<compile_context>
chip_gen: v5e
topology: v5e:2x2
jax: 0.10.0
libtpu: 0.0.40
codegen_flags: <defaults>
</compile_context>

<pallas_src>
import functools

import jax
import jax.numpy as jnp
from jax.experimental import pallas as pl
from jax.experimental.pallas import tpu as pltpu


# ----------------------------------------------------------------------------
# Pallas kernels
# ----------------------------------------------------------------------------
def _mm_act_kernel(a_ref, b_ref, o_ref, acc_ref, *, act):
    """Tiled bf16 matmul (f32 accumulation) with activation fused in epilogue."""
    @pl.when(pl.program_id(2) == 0)
    def _():
        acc_ref[...] = jnp.zeros_like(acc_ref)

    acc_ref[...] += jnp.dot(a_ref[...], b_ref[...],
                            preferred_element_type=jnp.float32)

    @pl.when(pl.program_id(2) == pl.num_programs(2) - 1)
    def _():
        y = acc_ref[...]
        if act == "leaky":
            y = jnp.where(y >= 0.0, y, 0.2 * y)
        o_ref[...] = y.astype(o_ref.dtype)


def _mm_stats_kernel(a_ref, b_ref, y_ref, s1_ref, s2_ref, acc_ref):
    """Tiled bf16 matmul that also emits per-M-tile column sum / sum-of-squares
    of the f32 accumulator (one-pass BatchNorm statistics)."""
    @pl.when(pl.program_id(2) == 0)
    def _():
        acc_ref[...] = jnp.zeros_like(acc_ref)

    acc_ref[...] += jnp.dot(a_ref[...], b_ref[...],
                            preferred_element_type=jnp.float32)

    @pl.when(pl.program_id(2) == pl.num_programs(2) - 1)
    def _():
        acc = acc_ref[...]
        y_ref[...] = acc
        s1_ref[...] = jnp.sum(acc, axis=0, keepdims=True)[None]
        s2_ref[...] = jnp.sum(acc * acc, axis=0, keepdims=True)[None]


def _bn_leaky_kernel(y_ref, s_ref, b_ref, o_ref):
    """y * scale + bias followed by LeakyReLU(0.2); math in f32, stores bf16."""
    v = y_ref[...] * s_ref[...] + b_ref[...]
    o_ref[...] = jnp.where(v >= 0.0, v, 0.2 * v).astype(o_ref.dtype)


def _reduce_sigmoid_kernel(a_ref, w_ref, o_ref):
    """o[m] = sigmoid(sum_k a[m,k] * w[0,k]) — single-block lane reduction."""
    a = a_ref[...].astype(jnp.float32)
    w = w_ref[...].astype(jnp.float32)
    s = jnp.sum(a * w, axis=1, keepdims=True)           # [M, 1]
    z = jnp.exp(-jnp.abs(s))                            # numerically stable sigmoid
    o_ref[...] = jnp.where(s >= 0.0, 1.0 / (1.0 + z), z / (1.0 + z))


# ----------------------------------------------------------------------------
# pallas_call wrappers (tiles match the true problem sizes — no 128 padding)
# ----------------------------------------------------------------------------
def _pick_tile(dim, candidates):
    for c in candidates:
        if dim >= c and dim % c == 0:
            return c
    return dim


def _tiles(M, N, K):
    tm = _pick_tile(M, (256, 128, 64, 32, 16, 8))
    tn = 128 if N % 128 == 0 else N                      # full-extent when N < 128
    tk = K if K <= 4096 else _pick_tile(K, (4096, 2048, 1024, 512, 256, 128))
    return tm, tn, tk


def pallas_conv_act(a, b, act, out_dtype=jnp.bfloat16):
    """[M,K] @ [K,N] (bf16 operands, f32 acc) with fused activation epilogue."""
    M, K = a.shape
    K2, N = b.shape
    assert K == K2
    tm, tn, tk = _tiles(M, N, K)
    grid = (M // tm, N // tn, pl.cdiv(K, tk))
    return pl.pallas_call(
        functools.partial(_mm_act_kernel, act=act),
        out_shape=jax.ShapeDtypeStruct((M, N), out_dtype),
        grid_spec=pltpu.PrefetchScalarGridSpec(
            num_scalar_prefetch=0,
            grid=grid,
            in_specs=[
                pl.BlockSpec((tm, tk), lambda i, j, k: (i, k)),
                pl.BlockSpec((tk, tn), lambda i, j, k: (k, j)),
            ],
            out_specs=pl.BlockSpec((tm, tn), lambda i, j, k: (i, j)),
            scratch_shapes=[pltpu.VMEM((tm, tn), jnp.float32)],
        ),
        compiler_params=pltpu.CompilerParams(
            dimension_semantics=("parallel", "parallel", "arbitrary")),
    )(a, b)


def pallas_conv_stats(a, b):
    """[M,K] @ [K,N] returning f32 y plus per-M-tile column sums / sums-of-squares."""
    M, K = a.shape
    K2, N = b.shape
    assert K == K2
    tm, tn, tk = _tiles(M, N, K)
    mt = M // tm
    grid = (mt, N // tn, pl.cdiv(K, tk))
    return pl.pallas_call(
        _mm_stats_kernel,
        out_shape=(
            jax.ShapeDtypeStruct((M, N), jnp.float32),
            jax.ShapeDtypeStruct((mt, 1, N), jnp.float32),
            jax.ShapeDtypeStruct((mt, 1, N), jnp.float32),
        ),
        grid_spec=pltpu.PrefetchScalarGridSpec(
            num_scalar_prefetch=0,
            grid=grid,
            in_specs=[
                pl.BlockSpec((tm, tk), lambda i, j, k: (i, k)),
                pl.BlockSpec((tk, tn), lambda i, j, k: (k, j)),
            ],
            out_specs=[
                pl.BlockSpec((tm, tn), lambda i, j, k: (i, j)),
                pl.BlockSpec((1, 1, tn), lambda i, j, k: (i, 0, j)),
                pl.BlockSpec((1, 1, tn), lambda i, j, k: (i, 0, j)),
            ],
            scratch_shapes=[pltpu.VMEM((tm, tn), jnp.float32)],
        ),
        compiler_params=pltpu.CompilerParams(
            dimension_semantics=("parallel", "parallel", "arbitrary")),
    )(a, b)


def pallas_bn_leaky(y, scale, bias, out_dtype=jnp.bfloat16):
    """Per-channel y * scale + bias + LeakyReLU(0.2); y: [M,N] f32, lane-dense N."""
    M, N = y.shape
    tm = _pick_tile(M, (128, 64, 32, 16, 8))
    return pl.pallas_call(
        _bn_leaky_kernel,
        out_shape=jax.ShapeDtypeStruct((M, N), out_dtype),
        grid=(M // tm,),
        in_specs=[
            pl.BlockSpec((tm, N), lambda i: (i, 0)),
            pl.BlockSpec((1, N), lambda i: (0, 0)),
            pl.BlockSpec((1, N), lambda i: (0, 0)),
        ],
        out_specs=pl.BlockSpec((tm, N), lambda i: (i, 0)),
        compiler_params=pltpu.CompilerParams(dimension_semantics=("parallel",)),
    )(y, scale.reshape(1, N), bias.reshape(1, N))


def pallas_dot_sigmoid(a, w_row):
    """[M,K] . [1,K] -> sigmoid([M,1]); final conv (tiny M/N, huge K)."""
    M, K = a.shape
    return pl.pallas_call(
        _reduce_sigmoid_kernel,
        out_shape=jax.ShapeDtypeStruct((M, 1), jnp.float32),
        grid=(1,),
        in_specs=[
            pl.BlockSpec((M, K), lambda i: (0, 0)),
            pl.BlockSpec((1, K), lambda i: (0, 0)),
        ],
        out_specs=pl.BlockSpec((M, 1), lambda i: (0, 0)),
    )(a, w_row)


# ----------------------------------------------------------------------------
# JAX glue: NHWC im2col + layer composition
# ----------------------------------------------------------------------------
def im2col_nhwc(x, ksize, stride, pad):
    """x: [N, H, W, C] -> patches [N*OH*OW, K*K*C], flattening order (kh, kw, c)."""
    N, H, W, C = x.shape
    OH = (H + 2 * pad - ksize) // stride + 1
    OW = (W + 2 * pad - ksize) // stride + 1
    xp = jnp.pad(x, ((0, 0), (pad, pad), (pad, pad), (0, 0)))
    cols = []
    for kh in range(ksize):
        for kw in range(ksize):
            cols.append(
                xp[:, kh:kh + stride * OH:stride, kw:kw + stride * OW:stride, :])
    patches = jnp.stack(cols, axis=3)                    # [N, OH, OW, K*K, C]
    patches = patches.reshape(N * OH * OW, ksize * ksize * C)
    return patches, OH, OW


def _weight_matrix(weight):
    """Torch [Cout, Cin, KH, KW] -> bf16 [KH*KW*Cin, Cout] (matches im2col order)."""
    Cout, Cin, KH, KW = weight.shape
    return jnp.transpose(weight, (2, 3, 1, 0)).reshape(
        KH * KW * Cin, Cout).astype(jnp.bfloat16)


def conv_block(x, weight, *, stride, pad, bn):
    """Conv2d(bias=False) [+ train-mode BatchNorm2d] + LeakyReLU(0.2).

    x: NHWC bf16.  weight: torch layout [Cout, Cin, K, K] f32.  Returns NHWC bf16.
    """
    Nb = x.shape[0]
    Cout, Cin, K, _ = weight.shape
    patches, OH, OW = im2col_nhwc(x, K, stride, pad)     # bf16 [M, K*K*Cin]
    w_mat = _weight_matrix(weight)                       # bf16 [K*K*Cin, Cout]

    if bn is None:
        out = pallas_conv_act(patches, w_mat, "leaky")   # activation fused in epilogue
    else:
        gamma, beta = bn
        M = patches.shape[0]
        y, s1, s2 = pallas_conv_stats(patches, w_mat)    # f32 y + partial stats
        mean = jnp.sum(s1.reshape(-1, Cout), axis=0) / M
        var = jnp.maximum(
            jnp.sum(s2.reshape(-1, Cout), axis=0) / M - mean * mean, 0.0)
        inv = gamma / jnp.sqrt(var + 1e-5)               # biased (training-mode) BN
        scale = inv.astype(jnp.float32)
        bias = (beta - mean * inv).astype(jnp.float32)
        out = pallas_bn_leaky(y, scale, bias)            # affine + LeakyReLU fused
    return out.reshape(Nb, OH, OW, Cout)


def final_block(x, weight):
    """Final 4x4 valid conv (Cout=1) + Sigmoid.  x: [N, 4, 4, 512] bf16."""
    Nb = x.shape[0]
    Cout, Cin, K, _ = weight.shape
    patches, OH, OW = im2col_nhwc(x, K, 1, 0)            # [Nb, K*K*Cin]
    w_row = _weight_matrix(weight).T                     # [1, K*K*Cin] bf16
    out = pallas_dot_sigmoid(patches, w_row)             # [Nb, 1] f32
    return out.reshape(Nb, Cout, OH, OW)                 # NCHW [N, 1, 1, 1]


def discriminator_forward(x_nchw, params):
    w1, w2, w3, w4, w5, g2, b2, g3, b3, g4, b4 = params
    # Single NCHW -> NHWC layout change + bf16 cast at the network input.
    h = jnp.transpose(x_nchw, (0, 2, 3, 1)).astype(jnp.bfloat16)
    h = conv_block(h, w1, stride=2, pad=1, bn=None)
    h = conv_block(h, w2, stride=2, pad=1, bn=(g2, b2))
    h = conv_block(h, w3, stride=2, pad=1, bn=(g3, b3))
    h = conv_block(h, w4, stride=2, pad=1, bn=(g4, b4))
    return final_block(h, w5)                            # [N, 1, 1, 1]


def init_params(key):
    nc, ndf = 3, 64
    ks = jax.random.split(key, 5)

    def w(k, cout, cin):
        return (0.02 * jax.random.normal(k, (cout, cin, 4, 4))).astype(jnp.float32)

    w1 = w(ks[0], ndf, nc)
    w2 = w(ks[1], ndf * 2, ndf)
    w3 = w(ks[2], ndf * 4, ndf * 2)
    w4 = w(ks[3], ndf * 8, ndf * 4)
    w5 = w(ks[4], 1, ndf * 8)
    ones = lambda c: jnp.ones((c,), jnp.float32)
    zeros = lambda c: jnp.zeros((c,), jnp.float32)
    return (w1, w2, w3, w4, w5,
            ones(ndf * 2), zeros(ndf * 2),
            ones(ndf * 4), zeros(ndf * 4),
            ones(ndf * 8), zeros(ndf * 8))


if __name__ == "__main__":
    key = jax.random.PRNGKey(0)
    k_x, k_p = jax.random.split(key)
    # Smallest valid input for this architecture (final 4x4 valid conv needs 64x64 input).
    x = jax.random.normal(k_x, (2, 3, 64, 64), dtype=jnp.float32)
    params = init_params(k_p)

    fwd = jax.jit(discriminator_forward)
    out = jax.block_until_ready(fwd(x, params))

    assert out.shape == (2, 1, 1, 1), out.shape
    assert bool(jnp.all(jnp.isfinite(out))), "non-finite output"
    assert bool(jnp.all((out >= 0.0) & (out <= 1.0))), "sigmoid output out of range"
    print("KERNEL_OK")
</pallas_src>

<mosaic_0001>
module attributes {stable_mosaic.version = 11 : i64} {
  func.func @_mm_act_kernel(%arg0: i32, %arg1: i32, %arg2: i32, %arg3: memref<256x48xbf16, #tpu.memory_space<vmem>>, %arg4: memref<48x64xbf16, #tpu.memory_space<vmem>>, %arg5: memref<256x64xbf16, #tpu.memory_space<vmem>>, %arg6: memref<256x64xf32, #tpu.memory_space<vmem>>) attributes {dimension_semantics = [#tpu.dimension_semantics<parallel>, #tpu.dimension_semantics<parallel>, #tpu.dimension_semantics<arbitrary>], iteration_bounds = array<i64: 8, 1, 1>, scalar_prefetch = 0 : i64, scratch_operands = 1 : i64, tpu.core_type = #tpu.core_type<tc>, window_params = [{transform_indices = @transform_0, window_bounds = array<i64: 256, 48>}, {transform_indices = @transform_1, window_bounds = array<i64: 48, 64>}, {transform_indices = @transform_2, window_bounds = array<i64: 256, 64>}]} {
    %c0_i32 = arith.constant 0 : i32
    %0 = arith.cmpi eq, %arg2, %c0_i32 : i32
    %1 = arith.extui %0 : i1 to i32
    %c0_i32_0 = arith.constant 0 : i32
    %2 = arith.cmpi ne, %1, %c0_i32_0 : i32
    scf.if %2 {
      %cst_10 = arith.constant 0.000000e+00 : f32
      %12 = vector.broadcast %cst_10 : f32 to vector<256x64xf32>
      %c0_11 = arith.constant 0 : index
      %c0_12 = arith.constant 0 : index
      %13 = vector.load %arg6[%c0_11, %c0_12] : memref<256x64xf32, #tpu.memory_space<vmem>>, vector<256x64xf32>
      tpu.vector_store %arg6[%c0_11, %c0_12], %12 {strides = array<i32>} : memref<256x64xf32, #tpu.memory_space<vmem>>, vector<256x64xf32>,
    } else {
    }
    %c0 = arith.constant 0 : index
    %c0_1 = arith.constant 0 : index
    %3 = vector.load %arg6[%c0, %c0_1] : memref<256x64xf32, #tpu.memory_space<vmem>>, vector<256x64xf32>
    %c0_2 = arith.constant 0 : index
    %c0_3 = arith.constant 0 : index
    %4 = vector.load %arg3[%c0_2, %c0_3] : memref<256x48xbf16, #tpu.memory_space<vmem>>, vector<256x48xbf16>
    %c0_4 = arith.constant 0 : index
    %c0_5 = arith.constant 0 : index
    %5 = vector.load %arg4[%c0_4, %c0_5] : memref<48x64xbf16, #tpu.memory_space<vmem>>, vector<48x64xbf16>
    %cst = arith.constant dense<0.000000e+00> : vector<256x64xf32>
    %6 = tpu.matmul %4, %5, %cst {dimension_numbers = #tpu.dot_dimension_numbers<[1], [0], [0], [1], [0, 0, 1, 1], [], []>} : vector<256x48xbf16>, vector<48x64xbf16>, vector<256x64xf32> -> vector<256x64xf32>
    %7 = arith.addf %3, %6 : vector<256x64xf32>
    %c0_6 = arith.constant 0 : index
    %c0_7 = arith.constant 0 : index
    %8 = vector.load %arg6[%c0_6, %c0_7] : memref<256x64xf32, #tpu.memory_space<vmem>>, vector<256x64xf32>
    tpu.vector_store %arg6[%c0_6, %c0_7], %7 {strides = array<i32>} : memref<256x64xf32, #tpu.memory_space<vmem>>, vector<256x64xf32>,
    %c0_i32_8 = arith.constant 0 : i32
    %9 = arith.cmpi eq, %arg2, %c0_i32_8 : i32
    %10 = arith.extui %9 : i1 to i32
    %c0_i32_9 = arith.constant 0 : i32
    %11 = arith.cmpi ne, %10, %c0_i32_9 : i32
    scf.if %11 {
      %c0_10 = arith.constant 0 : index
      %c0_11 = arith.constant 0 : index
      %12 = vector.load %arg6[%c0_10, %c0_11] : memref<256x64xf32, #tpu.memory_space<vmem>>, vector<256x64xf32>
      %cst_12 = arith.constant 0.000000e+00 : f32
      %13 = vector.broadcast %cst_12 : f32 to vector<256x64xf32>
      %14 = arith.cmpf oge, %12, %13 : vector<256x64xf32>
      %cst_13 = arith.constant 2.000000e-01 : f32
      %15 = vector.broadcast %cst_13 : f32 to vector<256x64xf32>
      %16 = arith.mulf %15, %12 : vector<256x64xf32>
      %17 = arith.select %14, %12, %16 : vector<256x64xi1>, vector<256x64xf32>
      %18 = arith.truncf %17 : vector<256x64xf32> to vector<256x64xbf16>
      %c0_14 = arith.constant 0 : index
      %c0_15 = arith.constant 0 : index
      %19 = vector.load %arg5[%c0_14, %c0_15] : memref<256x64xbf16, #tpu.memory_space<vmem>>, vector<256x64xbf16>
      tpu.vector_store %arg5[%c0_14, %c0_15], %18 {strides = array<i32>} : memref<256x64xbf16, #tpu.memory_space<vmem>>, vector<256x64xbf16>,
    } else {
    }
    return
  }
  func.func @transform_0(%arg0: i32, %arg1: i32, %arg2: i32) -> (i32, i32) {
    %c0_i32 = arith.constant 0 : i32
    return %arg0, %arg2 : i32, i32
  }
  func.func @transform_1(%arg0: i32, %arg1: i32, %arg2: i32) -> (i32, i32) {
    %c0_i32 = arith.constant 0 : i32
    return %arg2, %arg1 : i32, i32
  }
  func.func @transform_2(%arg0: i32, %arg1: i32, %arg2: i32) -> (i32, i32) {
    %c0_i32 = arith.constant 0 : i32
    return %arg0, %arg1 : i32, i32
  }
}

module attributes {stable_mosaic.version = 11 : i64} {
  func.func @_mm_stats_kernel(%arg0: i32, %arg1: i32, %arg2: i32, %arg3: memref<256x1024xbf16, #tpu.memory_space<vmem>>, %arg4: memref<1024x128xbf16, #tpu.memory_space<vmem>>, %arg5: memref<256x128xf32, #tpu.memory_space<vmem>>, %arg6: memref<1x1x128xf32, #tpu.memory_space<vmem>>, %arg7: memref<1x1x128xf32, #tpu.memory_space<vmem>>, %arg8: memref<256x128xf32, #tpu.memory_space<vmem>>) attributes {dimension_semantics = [#tpu.dimension_semantics<parallel>, #tpu.dimension_semantics<parallel>, #tpu.dimension_semantics<arbitrary>], iteration_bounds = array<i64: 2, 1, 1>, scalar_prefetch = 0 : i64, scratch_operands = 1 : i64, tpu.core_type = #tpu.core_type<tc>, window_params = [{transform_indices = @transform_0, window_bounds = array<i64: 256, 1024>}, {transform_indices = @transform_1, window_bounds = array<i64: 1024, 128>}, {transform_indices = @transform_2, window_bounds = array<i64: 256, 128>}, {transform_indices = @transform_3, window_bounds = array<i64: 1, 1, 128>}, {transform_indices = @transform_4, window_bounds = array<i64: 1, 1, 128>}]} {
    %c0_i32 = arith.constant 0 : i32
    %0 = arith.cmpi eq, %arg2, %c0_i32 : i32
    %1 = arith.extui %0 : i1 to i32
    %c0_i32_0 = arith.constant 0 : i32
    %2 = arith.cmpi ne, %1, %c0_i32_0 : i32
    scf.if %2 {
      %cst_10 = arith.constant 0.000000e+00 : f32
      %12 = vector.broadcast %cst_10 : f32 to vector<256x128xf32>
      %c0_11 = arith.constant 0 : index
      %c0_12 = arith.constant 0 : index
      %13 = vector.load %arg8[%c0_11, %c0_12] : memref<256x128xf32, #tpu.memory_space<vmem>>, vector<256x128xf32>
      tpu.vector_store %arg8[%c0_11, %c0_12], %12 {strides = array<i32>} : memref<256x128xf32, #tpu.memory_space<vmem>>, vector<256x128xf32>,
    } else {
    }
    %c0 = arith.constant 0 : index
    %c0_1 = arith.constant 0 : index
    %3 = vector.load %arg8[%c0, %c0_1] : memref<256x128xf32, #tpu.memory_space<vmem>>, vector<256x128xf32>
    %c0_2 = arith.constant 0 : index
    %c0_3 = arith.constant 0 : index
    %4 = vector.load %arg3[%c0_2, %c0_3] : memref<256x1024xbf16, #tpu.memory_space<vmem>>, vector<256x1024xbf16>
    %c0_4 = arith.constant 0 : index
    %c0_5 = arith.constant 0 : index
    %5 = vector.load %arg4[%c0_4, %c0_5] : memref<1024x128xbf16, #tpu.memory_space<vmem>>, vector<1024x128xbf16>
    %cst = arith.constant dense<0.000000e+00> : vector<256x128xf32>
    %6 = tpu.matmul %4, %5, %cst {dimension_numbers = #tpu.dot_dimension_numbers<[1], [0], [0], [1], [0, 0, 1, 1], [], []>} : vector<256x1024xbf16>, vector<1024x128xbf16>, vector<256x128xf32> -> vector<256x128xf32>
    %7 = arith.addf %3, %6 : vector<256x128xf32>
    %c0_6 = arith.constant 0 : index
    %c0_7 = arith.constant 0 : index
    %8 = vector.load %arg8[%c0_6, %c0_7] : memref<256x128xf32, #tpu.memory_space<vmem>>, vector<256x128xf32>
    tpu.vector_store %arg8[%c0_6, %c0_7], %7 {strides = array<i32>} : memref<256x128xf32, #tpu.memory_space<vmem>>, vector<256x128xf32>,
    %c0_i32_8 = arith.constant 0 : i32
    %9 = arith.cmpi eq, %arg2, %c0_i32_8 : i32
    %10 = arith.extui %9 : i1 to i32
    %c0_i32_9 = arith.constant 0 : i32
    %11 = arith.cmpi ne, %10, %c0_i32_9 : i32
    scf.if %11 {
      %c0_10 = arith.constant 0 : index
      %c0_11 = arith.constant 0 : index
      %12 = vector.load %arg8[%c0_10, %c0_11] : memref<256x128xf32, #tpu.memory_space<vmem>>, vector<256x128xf32>
      %c0_12 = arith.constant 0 : index
      %c0_13 = arith.constant 0 : index
      %13 = vector.load %arg5[%c0_12, %c0_13] : memref<256x128xf32, #tpu.memory_space<vmem>>, vector<256x128xf32>
      tpu.vector_store %arg5[%c0_12, %c0_13], %12 {strides = array<i32>} : memref<256x128xf32, #tpu.memory_space<vmem>>, vector<256x128xf32>,
      %cst_14 = arith.constant dense<0.000000e+00> : vector<128xf32>
      %14 = vector.multi_reduction <add>, %12, %cst_14 [0] : vector<256x128xf32> to vector<128xf32>
      %15 = vector.shape_cast %14 : vector<128xf32> to vector<1x128xf32>
      %16 = vector.shape_cast %15 : vector<1x128xf32> to vector<1x1x128xf32>
      %c0_15 = arith.constant 0 : index
      %c0_16 = arith.constant 0 : index
      %c0_17 = arith.constant 0 : index
      %17 = vector.load %arg6[%c0_15, %c0_16, %c0_17] : memref<1x1x128xf32, #tpu.memory_space<vmem>>, vector<1x1x128xf32>
      tpu.vector_store %arg6[%c0_15, %c0_16, %c0_17], %16 {strides = array<i32>} : memref<1x1x128xf32, #tpu.memory_space<vmem>>, vector<1x1x128xf32>,
      %18 = arith.mulf %12, %12 : vector<256x128xf32>
      %cst_18 = arith.constant dense<0.000000e+00> : vector<128xf32>
      %19 = vector.multi_reduction <add>, %18, %cst_18 [0] : vector<256x128xf32> to vector<128xf32>
      %20 = vector.shape_cast %19 : vector<128xf32> to vector<1x128xf32>
      %21 = vector.shape_cast %20 : vector<1x128xf32> to vector<1x1x128xf32>
      %c0_19 = arith.constant 0 : index
      %c0_20 = arith.constant 0 : index
      %c0_21 = arith.constant 0 : index
      %22 = vector.load %arg7[%c0_19, %c0_20, %c0_21] : memref<1x1x128xf32, #tpu.memory_space<vmem>>, vector<1x1x128xf32>
      tpu.vector_store %arg7[%c0_19, %c0_20, %c0_21], %21 {strides = array<i32>} : memref<1x1x128xf32, #tpu.memory_space<vmem>>, vector<1x1x128xf32>,
    } else {
    }
    return
  }
  func.func @transform_0(%arg0: i32, %arg1: i32, %arg2: i32) -> (i32, i32) {
    %c0_i32 = arith.constant 0 : i32
    return %arg0, %arg2 : i32, i32
  }
  func.func @transform_1(%arg0: i32, %arg1: i32, %arg2: i32) -> (i32, i32) {
    %c0_i32 = arith.constant 0 : i32
    return %arg2, %arg1 : i32, i32
  }
  func.func @transform_2(%arg0: i32, %arg1: i32, %arg2: i32) -> (i32, i32) {
    %c0_i32 = arith.constant 0 : i32
    return %arg0, %arg1 : i32, i32
  }
  func.func @transform_3(%arg0: i32, %arg1: i32, %arg2: i32) -> (i32, i32, i32) {
    %c0_i32 = arith.constant 0 : i32
    %c0_i32_0 = arith.constant 0 : i32
    return %arg0, %c0_i32, %arg1 : i32, i32, i32
  }
  func.func @transform_4(%arg0: i32, %arg1: i32, %arg2: i32) -> (i32, i32, i32) {
    %c0_i32 = arith.constant 0 : i32
    %c0_i32_0 = arith.constant 0 : i32
    return %arg0, %c0_i32, %arg1 : i32, i32, i32
  }
}

module attributes {stable_mosaic.version = 11 : i64} {
  func.func @_bn_leaky_kernel(%arg0: i32, %arg1: memref<128x128xf32, #tpu.memory_space<vmem>>, %arg2: memref<1x128xf32, #tpu.memory_space<vmem>>, %arg3: memref<1x128xf32, #tpu.memory_space<vmem>>, %arg4: memref<128x128xbf16, #tpu.memory_space<vmem>>) attributes {dimension_semantics = [#tpu.dimension_semantics<parallel>], iteration_bounds = array<i64: 4>, scalar_prefetch = 0 : i64, scratch_operands = 0 : i64, tpu.core_type = #tpu.core_type<tc>, window_params = [{transform_indices = @transform_0, window_bounds = array<i64: 128, 128>}, {pipeline_mode = #tpu.pipeline_mode<synchronous>, transform_indices = @transform_1, window_bounds = array<i64: 1, 128>}, {pipeline_mode = #tpu.pipeline_mode<synchronous>, transform_indices = @transform_2, window_bounds = array<i64: 1, 128>}, {transform_indices = @transform_3, window_bounds = array<i64: 128, 128>}]} {
    %c0 = arith.constant 0 : index
    %c0_0 = arith.constant 0 : index
    %0 = vector.load %arg1[%c0, %c0_0] : memref<128x128xf32, #tpu.memory_space<vmem>>, vector<128x128xf32>
    %c0_1 = arith.constant 0 : index
    %c0_2 = arith.constant 0 : index
    %1 = vector.load %arg2[%c0_1, %c0_2] : memref<1x128xf32, #tpu.memory_space<vmem>>, vector<1x128xf32>
    %2 = vector.broadcast %1 : vector<1x128xf32> to vector<128x128xf32>
    %3 = arith.mulf %0, %2 : vector<128x128xf32>
    %c0_3 = arith.constant 0 : index
    %c0_4 = arith.constant 0 : index
    %4 = vector.load %arg3[%c0_3, %c0_4] : memref<1x128xf32, #tpu.memory_space<vmem>>, vector<1x128xf32>
    %5 = vector.broadcast %4 : vector<1x128xf32> to vector<128x128xf32>
    %6 = arith.addf %3, %5 : vector<128x128xf32>
    %cst = arith.constant 0.000000e+00 : f32
    %7 = vector.broadcast %cst : f32 to vector<128x128xf32>
    %8 = arith.cmpf oge, %6, %7 : vector<128x128xf32>
    %cst_5 = arith.constant 2.000000e-01 : f32
    %9 = vector.broadcast %cst_5 : f32 to vector<128x128xf32>
    %10 = arith.mulf %9, %6 : vector<128x128xf32>
    %11 = arith.select %8, %6, %10 : vector<128x128xi1>, vector<128x128xf32>
    %12 = arith.truncf %11 : vector<128x128xf32> to vector<128x128xbf16>
    %c0_6 = arith.constant 0 : index
    %c0_7 = arith.constant 0 : index
    %13 = vector.load %arg4[%c0_6, %c0_7] : memref<128x128xbf16, #tpu.memory_space<vmem>>, vector<128x128xbf16>
    tpu.vector_store %arg4[%c0_6, %c0_7], %12 {strides = array<i32>} : memref<128x128xbf16, #tpu.memory_space<vmem>>, vector<128x128xbf16>,
    return
  }
  func.func @transform_0(%arg0: i32) -> (i32, i32) {
    %c0_i32 = arith.constant 0 : i32
    %c0_i32_0 = arith.constant 0 : i32
    return %arg0, %c0_i32 : i32, i32
  }
  func.func @transform_1(%arg0: i32) -> (i32, i32) {
    %c0_i32 = arith.constant 0 : i32
    %c0_i32_0 = arith.constant 0 : i32
    %c0_i32_1 = arith.constant 0 : i32
    return %c0_i32, %c0_i32_0 : i32, i32
  }
  func.func @transform_2(%arg0: i32) -> (i32, i32) {
    %c0_i32 = arith.constant 0 : i32
    %c0_i32_0 = arith.constant 0 : i32
    %c0_i32_1 = arith.constant 0 : i32
    return %c0_i32, %c0_i32_0 : i32, i32
  }
  func.func @transform_3(%arg0: i32) -> (i32, i32) {
    %c0_i32 = arith.constant 0 : i32
    %c0_i32_0 = arith.constant 0 : i32
    return %arg0, %c0_i32 : i32, i32
  }
}

module attributes {stable_mosaic.version = 11 : i64} {
  func.func @_mm_stats_kernel(%arg0: i32, %arg1: i32, %arg2: i32, %arg3: memref<128x2048xbf16, #tpu.memory_space<vmem>>, %arg4: memref<2048x128xbf16, #tpu.memory_space<vmem>>, %arg5: memref<128x128xf32, #tpu.memory_space<vmem>>, %arg6: memref<1x1x128xf32, #tpu.memory_space<vmem>>, %arg7: memref<1x1x128xf32, #tpu.memory_space<vmem>>, %arg8: memref<128x128xf32, #tpu.memory_space<vmem>>) attributes {dimension_semantics = [#tpu.dimension_semantics<parallel>, #tpu.dimension_semantics<parallel>, #tpu.dimension_semantics<arbitrary>], iteration_bounds = array<i64: 1, 2, 1>, scalar_prefetch = 0 : i64, scratch_operands = 1 : i64, tpu.core_type = #tpu.core_type<tc>, window_params = [{transform_indices = @transform_0, window_bounds = array<i64: 128, 2048>}, {transform_indices = @transform_1, window_bounds = array<i64: 2048, 128>}, {transform_indices = @transform_2, window_bounds = array<i64: 128, 128>}, {transform_indices = @transform_3, window_bounds = array<i64: 1, 1, 128>}, {transform_indices = @transform_4, window_bounds = array<i64: 1, 1, 128>}]} {
    %c0_i32 = arith.constant 0 : i32
    %0 = arith.cmpi eq, %arg2, %c0_i32 : i32
    %1 = arith.extui %0 : i1 to i32
    %c0_i32_0 = arith.constant 0 : i32
    %2 = arith.cmpi ne, %1, %c0_i32_0 : i32
    scf.if %2 {
      %cst_10 = arith.constant 0.000000e+00 : f32
      %12 = vector.broadcast %cst_10 : f32 to vector<128x128xf32>
      %c0_11 = arith.constant 0 : index
      %c0_12 = arith.constant 0 : index
      %13 = vector.load %arg8[%c0_11, %c0_12] : memref<128x128xf32, #tpu.memory_space<vmem>>, vector<128x128xf32>
      tpu.vector_store %arg8[%c0_11, %c0_12], %12 {strides = array<i32>} : memref<128x128xf32, #tpu.memory_space<vmem>>, vector<128x128xf32>,
    } else {
    }
    %c0 = arith.constant 0 : index
    %c0_1 = arith.constant 0 : index
    %3 = vector.load %arg8[%c0, %c0_1] : memref<128x128xf32, #tpu.memory_space<vmem>>, vector<128x128xf32>
    %c0_2 = arith.constant 0 : index
    %c0_3 = arith.constant 0 : index
    %4 = vector.load %arg3[%c0_2, %c0_3] : memref<128x2048xbf16, #tpu.memory_space<vmem>>, vector<128x2048xbf16>
    %c0_4 = arith.constant 0 : index
    %c0_5 = arith.constant 0 : index
    %5 = vector.load %arg4[%c0_4, %c0_5] : memref<2048x128xbf16, #tpu.memory_space<vmem>>, vector<2048x128xbf16>
    %cst = arith.constant dense<0.000000e+00> : vector<128x128xf32>
    %6 = tpu.matmul %4, %5, %cst {dimension_numbers = #tpu.dot_dimension_numbers<[1], [0], [0], [1], [0, 0, 1, 1], [], []>} : vector<128x2048xbf16>, vector<2048x128xbf16>, vector<128x128xf32> -> vector<128x128xf32>
    %7 = arith.addf %3, %6 : vector<128x128xf32>
    %c0_6 = arith.constant 0 : index
    %c0_7 = arith.constant 0 : index
    %8 = vector.load %arg8[%c0_6, %c0_7] : memref<128x128xf32, #tpu.memory_space<vmem>>, vector<128x128xf32>
    tpu.vector_store %arg8[%c0_6, %c0_7], %7 {strides = array<i32>} : memref<128x128xf32, #tpu.memory_space<vmem>>, vector<128x128xf32>,
    %c0_i32_8 = arith.constant 0 : i32
    %9 = arith.cmpi eq, %arg2, %c0_i32_8 : i32
    %10 = arith.extui %9 : i1 to i32
    %c0_i32_9 = arith.constant 0 : i32
    %11 = arith.cmpi ne, %10, %c0_i32_9 : i32
    scf.if %11 {
      %c0_10 = arith.constant 0 : index
      %c0_11 = arith.constant 0 : index
      %12 = vector.load %arg8[%c0_10, %c0_11] : memref<128x128xf32, #tpu.memory_space<vmem>>, vector<128x128xf32>
      %c0_12 = arith.constant 0 : index
      %c0_13 = arith.constant 0 : index
      %13 = vector.load %arg5[%c0_12, %c0_13] : memref<128x128xf32, #tpu.memory_space<vmem>>, vector<128x128xf32>
      tpu.vector_store %arg5[%c0_12, %c0_13], %12 {strides = array<i32>} : memref<128x128xf32, #tpu.memory_space<vmem>>, vector<128x128xf32>,
      %cst_14 = arith.constant dense<0.000000e+00> : vector<128xf32>
      %14 = vector.multi_reduction <add>, %12, %cst_14 [0] : vector<128x128xf32> to vector<128xf32>
      %15 = vector.shape_cast %14 : vector<128xf32> to vector<1x128xf32>
      %16 = vector.shape_cast %15 : vector<1x128xf32> to vector<1x1x128xf32>
      %c0_15 = arith.constant 0 : index
      %c0_16 = arith.constant 0 : index
      %c0_17 = arith.constant 0 : index
      %17 = vector.load %arg6[%c0_15, %c0_16, %c0_17] : memref<1x1x128xf32, #tpu.memory_space<vmem>>, vector<1x1x128xf32>
      tpu.vector_store %arg6[%c0_15, %c0_16, %c0_17], %16 {strides = array<i32>} : memref<1x1x128xf32, #tpu.memory_space<vmem>>, vector<1x1x128xf32>,
      %18 = arith.mulf %12, %12 : vector<128x128xf32>
      %cst_18 = arith.constant dense<0.000000e+00> : vector<128xf32>
      %19 = vector.multi_reduction <add>, %18, %cst_18 [0] : vector<128x128xf32> to vector<128xf32>
      %20 = vector.shape_cast %19 : vector<128xf32> to vector<1x128xf32>
      %21 = vector.shape_cast %20 : vector<1x128xf32> to vector<1x1x128xf32>
      %c0_19 = arith.constant 0 : index
      %c0_20 = arith.constant 0 : index
      %c0_21 = arith.constant 0 : index
      %22 = vector.load %arg7[%c0_19, %c0_20, %c0_21] : memref<1x1x128xf32, #tpu.memory_space<vmem>>, vector<1x1x128xf32>
      tpu.vector_store %arg7[%c0_19, %c0_20, %c0_21], %21 {strides = array<i32>} : memref<1x1x128xf32, #tpu.memory_space<vmem>>, vector<1x1x128xf32>,
    } else {
    }
    return
  }
  func.func @transform_0(%arg0: i32, %arg1: i32, %arg2: i32) -> (i32, i32) {
    %c0_i32 = arith.constant 0 : i32
    return %arg0, %arg2 : i32, i32
  }
  func.func @transform_1(%arg0: i32, %arg1: i32, %arg2: i32) -> (i32, i32) {
    %c0_i32 = arith.constant 0 : i32
    return %arg2, %arg1 : i32, i32
  }
  func.func @transform_2(%arg0: i32, %arg1: i32, %arg2: i32) -> (i32, i32) {
    %c0_i32 = arith.constant 0 : i32
    return %arg0, %arg1 : i32, i32
  }
  func.func @transform_3(%arg0: i32, %arg1: i32, %arg2: i32) -> (i32, i32, i32) {
    %c0_i32 = arith.constant 0 : i32
    %c0_i32_0 = arith.constant 0 : i32
    return %arg0, %c0_i32, %arg1 : i32, i32, i32
  }
  func.func @transform_4(%arg0: i32, %arg1: i32, %arg2: i32) -> (i32, i32, i32) {
    %c0_i32 = arith.constant 0 : i32
    %c0_i32_0 = arith.constant 0 : i32
    return %arg0, %c0_i32, %arg1 : i32, i32, i32
  }
}

module attributes {stable_mosaic.version = 11 : i64} {
  func.func @_bn_leaky_kernel(%arg0: i32, %arg1: memref<128x256xf32, #tpu.memory_space<vmem>>, %arg2: memref<1x256xf32, #tpu.memory_space<vmem>>, %arg3: memref<1x256xf32, #tpu.memory_space<vmem>>, %arg4: memref<128x256xbf16, #tpu.memory_space<vmem>>) attributes {dimension_semantics = [#tpu.dimension_semantics<parallel>], iteration_bounds = array<i64: 1>, scalar_prefetch = 0 : i64, scratch_operands = 0 : i64, tpu.core_type = #tpu.core_type<tc>, window_params = [{transform_indices = @transform_0, window_bounds = array<i64: 128, 256>}, {pipeline_mode = #tpu.pipeline_mode<synchronous>, transform_indices = @transform_1, window_bounds = array<i64: 1, 256>}, {pipeline_mode = #tpu.pipeline_mode<synchronous>, transform_indices = @transform_2, window_bounds = array<i64: 1, 256>}, {transform_indices = @transform_3, window_bounds = array<i64: 128, 256>}]} {
    %c0 = arith.constant 0 : index
    %c0_0 = arith.constant 0 : index
    %0 = vector.load %arg1[%c0, %c0_0] : memref<128x256xf32, #tpu.memory_space<vmem>>, vector<128x256xf32>
    %c0_1 = arith.constant 0 : index
    %c0_2 = arith.constant 0 : index
    %1 = vector.load %arg2[%c0_1, %c0_2] : memref<1x256xf32, #tpu.memory_space<vmem>>, vector<1x256xf32>
    %2 = vector.broadcast %1 : vector<1x256xf32> to vector<128x256xf32>
    %3 = arith.mulf %0, %2 : vector<128x256xf32>
    %c0_3 = arith.constant 0 : index
    %c0_4 = arith.constant 0 : index
    %4 = vector.load %arg3[%c0_3, %c0_4] : memref<1x256xf32, #tpu.memory_space<vmem>>, vector<1x256xf32>
    %5 = vector.broadcast %4 : vector<1x256xf32> to vector<128x256xf32>
    %6 = arith.addf %3, %5 : vector<128x256xf32>
    %cst = arith.constant 0.000000e+00 : f32
    %7 = vector.broadcast %cst : f32 to vector<128x256xf32>
    %8 = arith.cmpf oge, %6, %7 : vector<128x256xf32>
    %cst_5 = arith.constant 2.000000e-01 : f32
    %9 = vector.broadcast %cst_5 : f32 to vector<128x256xf32>
    %10 = arith.mulf %9, %6 : vector<128x256xf32>
    %11 = arith.select %8, %6, %10 : vector<128x256xi1>, vector<128x256xf32>
    %12 = arith.truncf %11 : vector<128x256xf32> to vector<128x256xbf16>
    %c0_6 = arith.constant 0 : index
    %c0_7 = arith.constant 0 : index
    %13 = vector.load %arg4[%c0_6, %c0_7] : memref<128x256xbf16, #tpu.memory_space<vmem>>, vector<128x256xbf16>
    tpu.vector_store %arg4[%c0_6, %c0_7], %12 {strides = array<i32>} : memref<128x256xbf16, #tpu.memory_space<vmem>>, vector<128x256xbf16>,
    return
  }
  func.func @transform_0(%arg0: i32) -> (i32, i32) {
    %c0_i32 = arith.constant 0 : i32
    %c0_i32_0 = arith.constant 0 : i32
    return %arg0, %c0_i32 : i32, i32
  }
  func.func @transform_1(%arg0: i32) -> (i32, i32) {
    %c0_i32 = arith.constant 0 : i32
    %c0_i32_0 = arith.constant 0 : i32
    %c0_i32_1 = arith.constant 0 : i32
    return %c0_i32, %c0_i32_0 : i32, i32
  }
  func.func @transform_2(%arg0: i32) -> (i32, i32) {
    %c0_i32 = arith.constant 0 : i32
    %c0_i32_0 = arith.constant 0 : i32
    %c0_i32_1 = arith.constant 0 : i32
    return %c0_i32, %c0_i32_0 : i32, i32
  }
  func.func @transform_3(%arg0: i32) -> (i32, i32) {
    %c0_i32 = arith.constant 0 : i32
    %c0_i32_0 = arith.constant 0 : i32
    return %arg0, %c0_i32 : i32, i32
  }
}

module attributes {stable_mosaic.version = 11 : i64} {
  func.func @_mm_stats_kernel(%arg0: i32, %arg1: i32, %arg2: i32, %arg3: memref<32x4096xbf16, #tpu.memory_space<vmem>>, %arg4: memref<4096x128xbf16, #tpu.memory_space<vmem>>, %arg5: memref<32x128xf32, #tpu.memory_space<vmem>>, %arg6: memref<1x1x128xf32, #tpu.memory_space<vmem>>, %arg7: memref<1x1x128xf32, #tpu.memory_space<vmem>>, %arg8: memref<32x128xf32, #tpu.memory_space<vmem>>) attributes {dimension_semantics = [#tpu.dimension_semantics<parallel>, #tpu.dimension_semantics<parallel>, #tpu.dimension_semantics<arbitrary>], iteration_bounds = array<i64: 1, 4, 1>, scalar_prefetch = 0 : i64, scratch_operands = 1 : i64, tpu.core_type = #tpu.core_type<tc>, window_params = [{transform_indices = @transform_0, window_bounds = array<i64: 32, 4096>}, {transform_indices = @transform_1, window_bounds = array<i64: 4096, 128>}, {transform_indices = @transform_2, window_bounds = array<i64: 32, 128>}, {transform_indices = @transform_3, window_bounds = array<i64: 1, 1, 128>}, {transform_indices = @transform_4, window_bounds = array<i64: 1, 1, 128>}]} {
    %c0_i32 = arith.constant 0 : i32
    %0 = arith.cmpi eq, %arg2, %c0_i32 : i32
    %1 = arith.extui %0 : i1 to i32
    %c0_i32_0 = arith.constant 0 : i32
    %2 = arith.cmpi ne, %1, %c0_i32_0 : i32
    scf.if %2 {
      %cst_10 = arith.constant 0.000000e+00 : f32
      %12 = vector.broadcast %cst_10 : f32 to vector<32x128xf32>
      %c0_11 = arith.constant 0 : index
      %c0_12 = arith.constant 0 : index
      %13 = vector.load %arg8[%c0_11, %c0_12] : memref<32x128xf32, #tpu.memory_space<vmem>>, vector<32x128xf32>
      tpu.vector_store %arg8[%c0_11, %c0_12], %12 {strides = array<i32>} : memref<32x128xf32, #tpu.memory_space<vmem>>, vector<32x128xf32>,
    } else {
    }
    %c0 = arith.constant 0 : index
    %c0_1 = arith.constant 0 : index
    %3 = vector.load %arg8[%c0, %c0_1] : memref<32x128xf32, #tpu.memory_space<vmem>>, vector<32x128xf32>
    %c0_2 = arith.constant 0 : index
    %c0_3 = arith.constant 0 : index
    %4 = vector.load %arg3[%c0_2, %c0_3] : memref<32x4096xbf16, #tpu.memory_space<vmem>>, vector<32x4096xbf16>
    %c0_4 = arith.constant 0 : index
    %c0_5 = arith.constant 0 : index
    %5 = vector.load %arg4[%c0_4, %c0_5] : memref<4096x128xbf16, #tpu.memory_space<vmem>>, vector<4096x128xbf16>
    %cst = arith.constant dense<0.000000e+00> : vector<32x128xf32>
    %6 = tpu.matmul %4, %5, %cst {dimension_numbers = #tpu.dot_dimension_numbers<[1], [0], [0], [1], [0, 0, 1, 1], [], []>} : vector<32x4096xbf16>, vector<4096x128xbf16>, vector<32x128xf32> -> vector<32x128xf32>
    %7 = arith.addf %3, %6 : vector<32x128xf32>
    %c0_6 = arith.constant 0 : index
    %c0_7 = arith.constant 0 : index
    %8 = vector.load %arg8[%c0_6, %c0_7] : memref<32x128xf32, #tpu.memory_space<vmem>>, vector<32x128xf32>
    tpu.vector_store %arg8[%c0_6, %c0_7], %7 {strides = array<i32>} : memref<32x128xf32, #tpu.memory_space<vmem>>, vector<32x128xf32>,
    %c0_i32_8 = arith.constant 0 : i32
    %9 = arith.cmpi eq, %arg2, %c0_i32_8 : i32
    %10 = arith.extui %9 : i1 to i32
    %c0_i32_9 = arith.constant 0 : i32
    %11 = arith.cmpi ne, %10, %c0_i32_9 : i32
    scf.if %11 {
      %c0_10 = arith.constant 0 : index
      %c0_11 = arith.constant 0 : index
      %12 = vector.load %arg8[%c0_10, %c0_11] : memref<32x128xf32, #tpu.memory_space<vmem>>, vector<32x128xf32>
      %c0_12 = arith.constant 0 : index
      %c0_13 = arith.constant 0 : index
      %13 = vector.load %arg5[%c0_12, %c0_13] : memref<32x128xf32, #tpu.memory_space<vmem>>, vector<32x128xf32>
      tpu.vector_store %arg5[%c0_12, %c0_13], %12 {strides = array<i32>} : memref<32x128xf32, #tpu.memory_space<vmem>>, vector<32x128xf32>,
      %cst_14 = arith.constant dense<0.000000e+00> : vector<128xf32>
      %14 = vector.multi_reduction <add>, %12, %cst_14 [0] : vector<32x128xf32> to vector<128xf32>
      %15 = vector.shape_cast %14 : vector<128xf32> to vector<1x128xf32>
      %16 = vector.shape_cast %15 : vector<1x128xf32> to vector<1x1x128xf32>
      %c0_15 = arith.constant 0 : index
      %c0_16 = arith.constant 0 : index
      %c0_17 = arith.constant 0 : index
      %17 = vector.load %arg6[%c0_15, %c0_16, %c0_17] : memref<1x1x128xf32, #tpu.memory_space<vmem>>, vector<1x1x128xf32>
      tpu.vector_store %arg6[%c0_15, %c0_16, %c0_17], %16 {strides = array<i32>} : memref<1x1x128xf32, #tpu.memory_space<vmem>>, vector<1x1x128xf32>,
      %18 = arith.mulf %12, %12 : vector<32x128xf32>
      %cst_18 = arith.constant dense<0.000000e+00> : vector<128xf32>
      %19 = vector.multi_reduction <add>, %18, %cst_18 [0] : vector<32x128xf32> to vector<128xf32>
      %20 = vector.shape_cast %19 : vector<128xf32> to vector<1x128xf32>
      %21 = vector.shape_cast %20 : vector<1x128xf32> to vector<1x1x128xf32>
      %c0_19 = arith.constant 0 : index
      %c0_20 = arith.constant 0 : index
      %c0_21 = arith.constant 0 : index
      %22 = vector.load %arg7[%c0_19, %c0_20, %c0_21] : memref<1x1x128xf32, #tpu.memory_space<vmem>>, vector<1x1x128xf32>
      tpu.vector_store %arg7[%c0_19, %c0_20, %c0_21], %21 {strides = array<i32>} : memref<1x1x128xf32, #tpu.memory_space<vmem>>, vector<1x1x128xf32>,
    } else {
    }
    return
  }
  func.func @transform_0(%arg0: i32, %arg1: i32, %arg2: i32) -> (i32, i32) {
    %c0_i32 = arith.constant 0 : i32
    return %arg0, %arg2 : i32, i32
  }
  func.func @transform_1(%arg0: i32, %arg1: i32, %arg2: i32) -> (i32, i32) {
    %c0_i32 = arith.constant 0 : i32
    return %arg2, %arg1 : i32, i32
  }
  func.func @transform_2(%arg0: i32, %arg1: i32, %arg2: i32) -> (i32, i32) {
    %c0_i32 = arith.constant 0 : i32
    return %arg0, %arg1 : i32, i32
  }
  func.func @transform_3(%arg0: i32, %arg1: i32, %arg2: i32) -> (i32, i32, i32) {
    %c0_i32 = arith.constant 0 : i32
    %c0_i32_0 = arith.constant 0 : i32
    return %arg0, %c0_i32, %arg1 : i32, i32, i32
  }
  func.func @transform_4(%arg0: i32, %arg1: i32, %arg2: i32) -> (i32, i32, i32) {
    %c0_i32 = arith.constant 0 : i32
    %c0_i32_0 = arith.constant 0 : i32
    return %arg0, %c0_i32, %arg1 : i32, i32, i32
  }
}

module attributes {stable_mosaic.version = 11 : i64} {
  func.func @_bn_leaky_kernel(%arg0: i32, %arg1: memref<32x512xf32, #tpu.memory_space<vmem>>, %arg2: memref<1x512xf32, #tpu.memory_space<vmem>>, %arg3: memref<1x512xf32, #tpu.memory_space<vmem>>, %arg4: memref<32x512xbf16, #tpu.memory_space<vmem>>) attributes {dimension_semantics = [#tpu.dimension_semantics<parallel>], iteration_bounds = array<i64: 1>, scalar_prefetch = 0 : i64, scratch_operands = 0 : i64, tpu.core_type = #tpu.core_type<tc>, window_params = [{transform_indices = @transform_0, window_bounds = array<i64: 32, 512>}, {pipeline_mode = #tpu.pipeline_mode<synchronous>, transform_indices = @transform_1, window_bounds = array<i64: 1, 512>}, {pipeline_mode = #tpu.pipeline_mode<synchronous>, transform_indices = @transform_2, window_bounds = array<i64: 1, 512>}, {transform_indices = @transform_3, window_bounds = array<i64: 32, 512>}]} {
    %c0 = arith.constant 0 : index
    %c0_0 = arith.constant 0 : index
    %0 = vector.load %arg1[%c0, %c0_0] : memref<32x512xf32, #tpu.memory_space<vmem>>, vector<32x512xf32>
    %c0_1 = arith.constant 0 : index
    %c0_2 = arith.constant 0 : index
    %1 = vector.load %arg2[%c0_1, %c0_2] : memref<1x512xf32, #tpu.memory_space<vmem>>, vector<1x512xf32>
    %2 = vector.broadcast %1 : vector<1x512xf32> to vector<32x512xf32>
    %3 = arith.mulf %0, %2 : vector<32x512xf32>
    %c0_3 = arith.constant 0 : index
    %c0_4 = arith.constant 0 : index
    %4 = vector.load %arg3[%c0_3, %c0_4] : memref<1x512xf32, #tpu.memory_space<vmem>>, vector<1x512xf32>
    %5 = vector.broadcast %4 : vector<1x512xf32> to vector<32x512xf32>
    %6 = arith.addf %3, %5 : vector<32x512xf32>
    %cst = arith.constant 0.000000e+00 : f32
    %7 = vector.broadcast %cst : f32 to vector<32x512xf32>
    %8 = arith.cmpf oge, %6, %7 : vector<32x512xf32>
    %cst_5 = arith.constant 2.000000e-01 : f32
    %9 = vector.broadcast %cst_5 : f32 to vector<32x512xf32>
    %10 = arith.mulf %9, %6 : vector<32x512xf32>
    %11 = arith.select %8, %6, %10 : vector<32x512xi1>, vector<32x512xf32>
    %12 = arith.truncf %11 : vector<32x512xf32> to vector<32x512xbf16>
    %c0_6 = arith.constant 0 : index
    %c0_7 = arith.constant 0 : index
    %13 = vector.load %arg4[%c0_6, %c0_7] : memref<32x512xbf16, #tpu.memory_space<vmem>>, vector<32x512xbf16>
    tpu.vector_store %arg4[%c0_6, %c0_7], %12 {strides = array<i32>} : memref<32x512xbf16, #tpu.memory_space<vmem>>, vector<32x512xbf16>,
    return
  }
  func.func @transform_0(%arg0: i32) -> (i32, i32) {
    %c0_i32 = arith.constant 0 : i32
    %c0_i32_0 = arith.constant 0 : i32
    return %arg0, %c0_i32 : i32, i32
  }
  func.func @transform_1(%arg0: i32) -> (i32, i32) {
    %c0_i32 = arith.constant 0 : i32
    %c0_i32_0 = arith.constant 0 : i32
    %c0_i32_1 = arith.constant 0 : i32
    return %c0_i32, %c0_i32_0 : i32, i32
  }
  func.func @transform_2(%arg0: i32) -> (i32, i32) {
    %c0_i32 = arith.constant 0 : i32
    %c0_i32_0 = arith.constant 0 : i32
    %c0_i32_1 = arith.constant 0 : i32
    return %c0_i32, %c0_i32_0 : i32, i32
  }
  func.func @transform_3(%arg0: i32) -> (i32, i32) {
    %c0_i32 = arith.constant 0 : i32
    %c0_i32_0 = arith.constant 0 : i32
    return %arg0, %c0_i32 : i32, i32
  }
}

module attributes {stable_mosaic.version = 11 : i64} {
  func.func @_reduce_sigmoid_kernel(%arg0: i32, %arg1: memref<2x8192xbf16, #tpu.memory_space<vmem>>, %arg2: memref<1x8192xbf16, #tpu.memory_space<vmem>>, %arg3: memref<2x1xf32, #tpu.memory_space<vmem>>) attributes {dimension_semantics = [#tpu.dimension_semantics<arbitrary>], iteration_bounds = array<i64: 1>, scalar_prefetch = 0 : i64, scratch_operands = 0 : i64, tpu.core_type = #tpu.core_type<tc>, window_params = [{pipeline_mode = #tpu.pipeline_mode<synchronous>, transform_indices = @transform_0, window_bounds = array<i64: 2, 8192>}, {pipeline_mode = #tpu.pipeline_mode<synchronous>, transform_indices = @transform_1, window_bounds = array<i64: 1, 8192>}, {pipeline_mode = #tpu.pipeline_mode<synchronous>, transform_indices = @transform_2, window_bounds = array<i64: 2, 1>}]} {
    %c0 = arith.constant 0 : index
    %c0_0 = arith.constant 0 : index
    %0 = vector.load %arg1[%c0, %c0_0] : memref<2x8192xbf16, #tpu.memory_space<vmem>>, vector<2x8192xbf16>
    %1 = arith.extf %0 : vector<2x8192xbf16> to vector<2x8192xf32>
    %c0_1 = arith.constant 0 : index
    %c0_2 = arith.constant 0 : index
    %2 = vector.load %arg2[%c0_1, %c0_2] : memref<1x8192xbf16, #tpu.memory_space<vmem>>, vector<1x8192xbf16>
    %3 = arith.extf %2 : vector<1x8192xbf16> to vector<1x8192xf32>
    %4 = vector.broadcast %3 : vector<1x8192xf32> to vector<2x8192xf32>
    %5 = arith.mulf %1, %4 : vector<2x8192xf32>
    %cst = arith.constant dense<0.000000e+00> : vector<2xf32>
    %6 = vector.multi_reduction <add>, %5, %cst [1] : vector<2x8192xf32> to vector<2xf32>
    %7 = vector.shape_cast %6 : vector<2xf32> to vector<2x1xf32>
    %8 = math.absf %7 : vector<2x1xf32>
    %cst_3 = arith.constant 0.000000e+00 : f32
    %9 = vector.broadcast %cst_3 : f32 to vector<2x1xf32>
    %10 = arith.subf %9, %8 : vector<2x1xf32>
    %11 = math.exp %10 : vector<2x1xf32>
    %cst_4 = arith.constant 0.000000e+00 : f32
    %12 = vector.broadcast %cst_4 : f32 to vector<2x1xf32>
    %13 = arith.cmpf oge, %7, %12 : vector<2x1xf32>
    %cst_5 = arith.constant 1.000000e+00 : f32
    %14 = vector.broadcast %cst_5 : f32 to vector<2x1xf32>
    %15 = arith.addf %14, %11 : vector<2x1xf32>
    %cst_6 = arith.constant 1.000000e+00 : f32
    %16 = vector.broadcast %cst_6 : f32 to vector<2x1xf32>
    %17 = arith.divf %16, %15 : vector<2x1xf32>
    %cst_7 = arith.constant 1.000000e+00 : f32
    %18 = vector.broadcast %cst_7 : f32 to vector<2x1xf32>
    %19 = arith.addf %18, %11 : vector<2x1xf32>
    %20 = arith.divf %11, %19 : vector<2x1xf32>
    %21 = arith.select %13, %17, %20 : vector<2x1xi1>, vector<2x1xf32>
    %c0_8 = arith.constant 0 : index
    %c0_9 = arith.constant 0 : index
    %22 = vector.load %arg3[%c0_8, %c0_9] : memref<2x1xf32, #tpu.memory_space<vmem>>, vector<2x1xf32>
    tpu.vector_store %arg3[%c0_8, %c0_9], %21 {strides = array<i32>} : memref<2x1xf32, #tpu.memory_space<vmem>>, vector<2x1xf32>,
    return
  }
  func.func @transform_0(%arg0: i32) -> (i32, i32) {
    %c0_i32 = arith.constant 0 : i32
    %c0_i32_0 = arith.constant 0 : i32
    %c0_i32_1 = arith.constant 0 : i32
    return %c0_i32, %c0_i32_0 : i32, i32
  }
  func.func @transform_1(%arg0: i32) -> (i32, i32) {
    %c0_i32 = arith.constant 0 : i32
    %c0_i32_0 = arith.constant 0 : i32
    %c0_i32_1 = arith.constant 0 : i32
    return %c0_i32, %c0_i32_0 : i32, i32
  }
  func.func @transform_2(%arg0: i32) -> (i32, i32) {
    %c0_i32 = arith.constant 0 : i32
    %c0_i32_0 = arith.constant 0 : i32
    %c0_i32_1 = arith.constant 0 : i32
    return %c0_i32, %c0_i32_0 : i32, i32
  }
}

</mosaic_0001>

<bundles_post_ra>
// kernel: discriminator_forward.8
= control target key start
LH: loop header
LB: loop body
LE: loop exit
PB: predicated region body
PF: predicated region fallthrough
CT: control target
= control target key end

     0   :  { %s1119_s9 = smov 0   ;;  %s1121_s10 = smov 0   ;;  %s1332_s0 = inlined_call_operand.vmem [shape: bf16[2048,48], index: 0, kind: input, shape index: {}]   ;;  %s1333_s1 = inlined_call_operand.vmem [shape: bf16[48,64], index: 1, kind: input, shape index: {}]   ;;  %s1334_s2 = inlined_call_operand.vmem [shape: bf16[2048,64], index: 2, kind: output, shape index: {}]  }
   0x1   :  { %s1123_s11 = smov 0  }
   0x2 LB: > { %s31_s12 = sadd.s32 1, %s1097_s10  ;;  %p927_p0 = scmp.ge.s32.totalorder %s1101_s11, 1  ;;  %s1101_s11 = sphi %s1123_s11, %s12_s11   ;;  %s1097_s10 = sphi %s1121_s10, %s1336_s10   ;;  %s1093_s9 = sphi %s1119_s9, %s1335_s9  }
   0x3   : > { %p33_p1 = scmp.ge.s32.totalorder %s31_s12, 8  ;;  %p155_p2 = scmp.lt.s32.totalorder %s1101_s11, 9 }
   0x5   : > { %s1338_s12 = smov (%p33_p1, %s31_s12), 0  ;;  %p156_p3 = pnand %p927_p0, %p155_p2 }
   0x6   : > { %s928_s15 = sshll.u32 (!%p156_p3), %s1093_s9, 5 }
   0x7   : > { %159 = sbr.rel (%p156_p3) target bundleno = 233 (0xe9), region = 28  ;;  %p192_p4 = scmp.lt.s32.totalorder (!%p156_p3), %s928_s15, 255 }
   0xc   : > { %v1044_v0 = vld [vmem:[%s1333_s1 + $0x10] sm:$0xff]  ;;  %v1043_v1 = vld [vmem:[%s1333_s1 + $0x8] sm:$0xff]  ;;  %s1340_s15 = smov (!%p192_p4, %s928_s15), 255  ;;  %v1042_v2 = vld [vmem:[%s1333_s1] sm:$0xff]  ;;  %vm424_vm0 = vcmask 392192   ;;  %vm223_vm1 = vcmask 523264  }
   0xd   : > { %478 = vmatpush.bf16.msra.mxu0 %v1044_v0  ;;  %1045 = vmatpush.bf16.msra.mxu1 %v1044_v0  ;;  %s929_s18 = sshll.u32 %s1340_s15, 2  ;;  %v1103_v11 = vmov 0.0   ;;  %vm790_vm4 = vcmask 519168  }
   0xe   : > { %1046 = vmatpush.bf16.msra.mxu2 %v1044_v0  ;;  %1047 = vmatpush.bf16.msra.mxu3 %v1044_v0  ;;  %s1154_s23 = scalar_lea.vmem %s1332_s0, %s929_s18  ;;  %224 = vst.msk [vmem:[#allocation2] sm:$0xff] %vm223_vm1, %v1103_v11  ;;  %s1230_s26 = scalar_lea.vmem %s1334_s2, %s929_s18 }
   0xf   : > { %v1026_v3 = vld [vmem:[%s1154_s23] sm:$0xff]  ;;  %v1027_v7 = vld [vmem:[%s1154_s23 + $0x8] sm:$0xff]  ;;  %225 = vst.msk [vmem:[#allocation2 + $0x8] sm:$0xff] %vm223_vm1, %v1103_v11  ;;  %v1028_v12 = vld [vmem:[%s1154_s23 + $0x10] sm:$0xff] }
  0x10   : > { %v1030_v4 = vld [vmem:[%s1154_s23 + $0x20] sm:$0xff]  ;;  %v1031_v8 = vld [vmem:[%s1154_s23 + $0x28] sm:$0xff]  ;;  %226 = vst.msk [vmem:[#allocation2 + $0x10] sm:$0xff] %vm223_vm1, %v1103_v11  ;;  %v1032_v13 = vld [vmem:[%s1154_s23 + $0x30] sm:$0xff] }
  0x11   : > { %479 = vmatpush.bf16.msra.mxu0 %v1043_v1  ;;  %1048 = vmatpush.bf16.msra.mxu1 %v1043_v1  ;;  %v1034_v5 = vld [vmem:[%s1154_s23 + $0x40] sm:$0xff]  ;;  %v1035_v9 = vld [vmem:[%s1154_s23 + $0x48] sm:$0xff]  ;;  %227 = vst.msk [vmem:[#allocation2 + $0x18] sm:$0xff] %vm223_vm1, %v1103_v11  ;;  %v1036_v14 = vld [vmem:[%s1154_s23 + $0x50] sm:$0xff] }
  0x12   : > { %1049 = vmatpush.bf16.msra.mxu2 %v1043_v1  ;;  %1050 = vmatpush.bf16.msra.mxu3 %v1043_v1  ;;  %v1038_v6 = vld [vmem:[%s1154_s23 + $0x60] sm:$0xff]  ;;  %v1039_v10 = vld [vmem:[%s1154_s23 + $0x68] sm:$0xff]  ;;  %228 = vst.msk [vmem:[#allocation2 + $0x20] sm:$0xff] %vm223_vm1, %v1103_v11  ;;  %v1040_v15 = vld [vmem:[%s1154_s23 + $0x70] sm:$0xff] }
  0x13   : > { %229 = vst.msk [vmem:[#allocation2 + $0x28] sm:$0xff] %vm223_vm1, %v1103_v11  ;;  %v1029_v16 = vld [vmem:[%s1154_s23 + $0x18] sm:$0xff] }
  0x14   : > { %230 = vst.msk [vmem:[#allocation2 + $0x30] sm:$0xff] %vm223_vm1, %v1103_v11  ;;  %v1033_v17 = vld [vmem:[%s1154_s23 + $0x38] sm:$0xff] }
  0x15   : > { %480 = vmatpush.bf16.msra.mxu0 %v1042_v2  ;;  %1051 = vmatpush.bf16.msra.mxu1 %v1042_v2  ;;  %231 = vst.msk [vmem:[#allocation2 + $0x38] sm:$0xff] %vm223_vm1, %v1103_v11  ;;  %v1037_v18 = vld [vmem:[%s1154_s23 + $0x58] sm:$0xff]  ;;  %v256_v20 = vld [vmem:[#allocation2] sm:$0xff] }
  0x16   : > { %1052 = vmatpush.bf16.msra.mxu2 %v1042_v2  ;;  %1053 = vmatpush.bf16.msra.mxu3 %v1042_v2  ;;  %232 = vst.msk [vmem:[#allocation2 + $0x40] sm:$0xff] %vm223_vm1, %v1103_v11  ;;  %v1041_v19 = vld [vmem:[%s1154_s23 + $0x78] sm:$0xff]  ;;  %v257_v28 = vld [vmem:[#allocation2 + $0x8] sm:$0xff] }
  0x17   : > { %233 = vst.msk [vmem:[#allocation2 + $0x48] sm:$0xff] %vm223_vm1, %v1103_v11  ;;  %v258_v47 = vld [vmem:[#allocation2 + $0x10] sm:$0xff] }
  0x18   : > { %1008 = vmatmul.msk.bf16.vlgmr.msra.gmra.mxu0 %vm424_vm0, %v1026_v3  ;;  %1012 = vmatmul.msk.bf16.vlgmr.msra.gmra.mxu1 %vm424_vm0, %v1030_v4  ;;  %234 = vst.msk [vmem:[#allocation2 + $0x50] sm:$0xff] %vm223_vm1, %v1103_v11 }
  0x19   : > { %1016 = vmatmul.msk.bf16.vlgmr.msra.gmra.mxu2 %vm424_vm0, %v1034_v5  ;;  %1020 = vmatmul.msk.bf16.vlgmr.msra.gmra.mxu3 %vm424_vm0, %v1038_v6  ;;  %235 = vst.msk [vmem:[#allocation2 + $0x58] sm:$0xff] %vm223_vm1, %v1103_v11 }
  0x1a   : > { %236 = vst.msk [vmem:[#allocation2 + $0x60] sm:$0xff] %vm223_vm1, %v1103_v11 }
  0x1b   : > { %237 = vst.msk [vmem:[#allocation2 + $0x68] sm:$0xff] %vm223_vm1, %v1103_v11 }
  0x1c   : > { %238 = vst.msk [vmem:[#allocation2 + $0x70] sm:$0xff] %vm223_vm1, %v1103_v11 }
  0x1d   : > { %239 = vst.msk [vmem:[#allocation2 + $0x78] sm:$0xff] %vm223_vm1, %v1103_v11  ;;  %v264_v21 = vld [vmem:[#allocation2 + $0x40] sm:$0xff] }
  0x1e   : > { %240 = vst.msk [vmem:[#allocation2 + $0x80] sm:$0xff] %vm223_vm1, %v1103_v11  ;;  %v265_v29 = vld [vmem:[#allocation2 + $0x48] sm:$0xff] }
  0x1f   : > { %241 = vst.msk [vmem:[#allocation2 + $0x88] sm:$0xff] %vm223_vm1, %v1103_v11  ;;  %v266_v48 = vld [vmem:[#allocation2 + $0x50] sm:$0xff] }
  0x20   : > { %242 = vst.msk [vmem:[#allocation2 + $0x90] sm:$0xff] %vm223_vm1, %v1103_v11 }
  0x21   : > { %243 = vst.msk [vmem:[#allocation2 + $0x98] sm:$0xff] %vm223_vm1, %v1103_v11 }
  0x22   : > { %244 = vst.msk [vmem:[#allocation2 + $0xa0] sm:$0xff] %vm223_vm1, %v1103_v11 }
  0x23   : > { %245 = vst.msk [vmem:[#allocation2 + $0xa8] sm:$0xff] %vm223_vm1, %v1103_v11 }
  0x24   : > { %246 = vst.msk [vmem:[#allocation2 + $0xb0] sm:$0xff] %vm223_vm1, %v1103_v11 }
  0x25   : > { %247 = vst.msk [vmem:[#allocation2 + $0xb8] sm:$0xff] %vm223_vm1, %v1103_v11  ;;  %v272_v26 = vld [vmem:[#allocation2 + $0x80] sm:$0xff] }
  0x26   : > { %248 = vst.msk [vmem:[#allocation2 + $0xc0] sm:$0xff] %vm223_vm1, %v1103_v11  ;;  %v273_v43 = vld [vmem:[#allocation2 + $0x88] sm:$0xff] }
  0x27   : > { %249 = vst.msk [vmem:[#allocation2 + $0xc8] sm:$0xff] %vm223_vm1, %v1103_v11  ;;  %v274_v5 = vld [vmem:[#allocation2 + $0x90] sm:$0xff] }
  0x28   : > { %1009 = vmatmul.msk.bf16.gmra.mxu0 %vm424_vm0, %v1027_v7  ;;  %1013 = vmatmul.msk.bf16.gmra.mxu1 %vm424_vm0, %v1031_v8  ;;  %250 = vst.msk [vmem:[#allocation2 + $0xd0] sm:$0xff] %vm223_vm1, %v1103_v11 }
  0x29   : > { %1017 = vmatmul.msk.bf16.gmra.mxu2 %vm424_vm0, %v1035_v9  ;;  %1021 = vmatmul.msk.bf16.gmra.mxu3 %vm424_vm0, %v1039_v10  ;;  %251 = vst.msk [vmem:[#allocation2 + $0xd8] sm:$0xff] %vm223_vm1, %v1103_v11  ;;  %v259_v9 = vld [vmem:[#allocation2 + $0x18] sm:$0xff] }
  0x2a   : > { %252 = vst.msk [vmem:[#allocation2 + $0xe0] sm:$0xff] %vm223_vm1, %v1103_v11 }
  0x2b   : > { %253 = vst.msk [vmem:[#allocation2 + $0xe8] sm:$0xff] %vm223_vm1, %v1103_v11 }
  0x2c   : > { %254 = vst.msk [vmem:[#allocation2 + $0xf0] sm:$0xff] %vm223_vm1, %v1103_v11 }
  0x2d   : > { %255 = vst.msk [vmem:[#allocation2 + $0xf8] sm:$0xff] %vm223_vm1, %v1103_v11  ;;  %v280_v27 = vld [vmem:[#allocation2 + $0xc0] sm:$0xff] }
  0x2e   : > { %v281_v44 = vld [vmem:[#allocation2 + $0xc8] sm:$0xff] }
  0x2f   : > { %v282_v6 = vld [vmem:[#allocation2 + $0xd0] sm:$0xff] }
  0x38   : > { %1010 = vmatmul.msk.bf16.gmra.mxu0 %vm424_vm0, %v1028_v12  ;;  %1014 = vmatmul.msk.bf16.gmra.mxu1 %vm424_vm0, %v1032_v13 }
  0x39   : > { %1018 = vmatmul.msk.bf16.gmra.mxu2 %vm424_vm0, %v1036_v14  ;;  %1022 = vmatmul.msk.bf16.gmra.mxu3 %vm424_vm0, %v1040_v15  ;;  %v267_v14 = vld [vmem:[#allocation2 + $0x58] sm:$0xff] }
  0x48   : > { %1011 = vmatmul.msk.bf16.gmra.mxu0 %vm424_vm0, %v1029_v16  ;;  %1015 = vmatmul.msk.bf16.gmra.mxu1 %vm424_vm0, %v1033_v17 }
  0x49   : > { %1019 = vmatmul.msk.bf16.gmra.mxu2 %vm424_vm0, %v1037_v18  ;;  %1023 = vmatmul.msk.bf16.gmra.mxu3 %vm424_vm0, %v1041_v19 }
  0x95   : > { %v482_v22 = vpop.f32.mrf.mxu0  ;;  %v502_v23 = vpop.f32.mrf.mxu1 }
  0x96   : > { %v562_v24 = vadd.f32 %v482_v22, %v256_v20  ;;  %v570_v25 = vadd.f32 %v502_v23, %v264_v21 }
  0x98   : > { %595 = vst.msk [vmem:[#allocation2] sm:$0xff] %vm223_vm1, %v562_v24 }
  0x99   : > { %603 = vst.msk [vmem:[#allocation2 + $0x40] sm:$0xff] %vm223_vm1, %v570_v25 }
  0x9c   : > { %v522_v30 = vpop.f32.mrf.mxu2  ;;  %v542_v31 = vpop.f32.mrf.mxu3 }
  0x9d   : > { %v578_v32 = vadd.f32 %v522_v30, %v272_v26  ;;  %v586_v33 = vadd.f32 %v542_v31, %v280_v27  ;;  %v484_v34 = vpop.f32.mrf.mxu0  ;;  %v504_v35 = vpop.f32.mrf.mxu1 }
  0x9e   : > { %v563_v36 = vadd.f32 %v484_v34, %v257_v28  ;;  %v571_v37 = vadd.f32 %v504_v35, %v265_v29  ;;  %v283_v34 = vld [vmem:[#allocation2 + $0xd8] sm:$0xff] }
  0x9f   : > { %v630_v38 = vld [vmem:[#allocation2] sm:$0xff]  ;;  %611 = vst.msk [vmem:[#allocation2 + $0x80] sm:$0xff] %vm223_vm1, %v578_v32 }
  0xa0   : > { %vm662_vm2 = vcmp.ge.f32.partialorder %v630_v38, 0.0  ;;  %v694_v39 = vmul.f32 0.2, %v630_v38  ;;  %v638_v40 = vld [vmem:[#allocation2 + $0x40] sm:$0xff]  ;;  %619 = vst.msk [vmem:[#allocation2 + $0xc0] sm:$0xff] %vm223_vm1, %v586_v33  ;;  %v275_v33 = vld [vmem:[#allocation2 + $0x98] sm:$0xff] }
  0xa1   : > { %vm670_vm3 = vcmp.ge.f32.partialorder %v638_v40, 0.0  ;;  %v702_v41 = vmul.f32 0.2, %v638_v40  ;;  %596 = vst.msk [vmem:[#allocation2 + $0x8] sm:$0xff] %vm223_vm1, %v563_v36 }
  0xa2   : > { %v726_v42 = vsel %vm662_vm2, %v630_v38, %v694_v39  ;;  %604 = vst.msk [vmem:[#allocation2 + $0x48] sm:$0xff] %vm223_vm1, %v571_v37  ;;  %v260_v37 = vld [vmem:[#allocation2 + $0x20] sm:$0xff] }
  0xa3   : > { %v758_v45 = vpack.c.bf16 %v726_v42, %v726_v42  ;;  %v734_v46 = vsel %vm670_vm3, %v638_v40, %v702_v41  ;;  %v268_v42 = vld [vmem:[#allocation2 + $0x60] sm:$0xff] }
  0xa4   : > { %v766_v49 = vpack.c.bf16 %v734_v46, %v734_v46  ;;  %v524_v50 = vpop.f32.mrf.mxu2  ;;  %v544_v51 = vpop.f32.mrf.mxu3 }
  0xa5   : > { %791 = vst.msk [vmem:[%s1230_s26] sm:$0xf] %vm790_vm4, %v758_v45  ;;  %v579_v52 = vadd.f32 %v524_v50, %v273_v43  ;;  %v587_v53 = vadd.f32 %v544_v51, %v281_v44  ;;  %v487_v54 = vpop.f32.mrf.mxu0  ;;  %v507_v55 = vpop.f32.mrf.mxu1 }
  0xa6   : > { %799 = vst.msk [vmem:[%s1230_s26 + $0x20] sm:$0xf] %vm790_vm4, %v766_v49  ;;  %v646_v56 = vld [vmem:[#allocation2 + $0x80] sm:$0xff]  ;;  %v564_v57 = vadd.f32 %v487_v54, %v258_v47  ;;  %v572_v58 = vadd.f32 %v507_v55, %v266_v48 }
  0xa7   : > { %vm678_vm5 = vcmp.ge.f32.partialorder %v646_v56, 0.0  ;;  %v710_v59 = vmul.f32 0.2, %v646_v56  ;;  %v654_v60 = vld [vmem:[#allocation2 + $0xc0] sm:$0xff]  ;;  %612 = vst.msk [vmem:[#allocation2 + $0x88] sm:$0xff] %vm223_vm1, %v579_v52 }
  0xa8   : > { %vm686_vm6 = vcmp.ge.f32.partialorder %v654_v60, 0.0  ;;  %v718_v61 = vmul.f32 0.2, %v654_v60  ;;  %v631_v62 = vld [vmem:[#allocation2 + $0x8] sm:$0xff]  ;;  %620 = vst.msk [vmem:[#allocation2 + $0xc8] sm:$0xff] %vm223_vm1, %v587_v53 }
  0xa9   : > { %v742_v63 = vsel %vm678_vm5, %v646_v56, %v710_v59  ;;  %vm663_vm7 = vcmp.ge.f32.partialorder %v631_v62, 0.0  ;;  %v695_v0 = vmul.f32 0.2, %v631_v62  ;;  %v639_v1 = vld [vmem:[#allocation2 + $0x48] sm:$0xff]  ;;  %597 = vst.msk [vmem:[#allocation2 + $0x10] sm:$0xff] %vm223_vm1, %v564_v57 }
  0xaa   : > { %v774_v2 = vpack.c.bf16 %v742_v63, %v742_v63  ;;  %v750_v3 = vsel %vm686_vm6, %v654_v60, %v718_v61  ;;  %vm671_vm8 = vcmp.ge.f32.partialorder %v639_v1, 0.0  ;;  %v703_v4 = vmul.f32 0.2, %v639_v1  ;;  %605 = vst.msk [vmem:[#allocation2 + $0x50] sm:$0xff] %vm223_vm1, %v572_v58  ;;  %v276_v58 = vld [vmem:[#allocation2 + $0xa0] sm:$0xff] }
  0xab   : > { %v782_v7 = vpack.c.bf16 %v750_v3, %v750_v3  ;;  %v727_v8 = vsel %vm663_vm7, %v631_v62, %v695_v0  ;;  %v284_v62 = vld [vmem:[#allocation2 + $0xe0] sm:$0xff]  ;;  %v261_v3 = vld [vmem:[#allocation2 + $0x28] sm:$0xff] }
  0xac   : > { %807 = vst.msk [vmem:[%s1230_s26 + $0x40] sm:$0xf] %vm790_vm4, %v774_v2  ;;  %v759_v10 = vpack.c.bf16 %v727_v8, %v727_v8  ;;  %v735_v11 = vsel %vm671_vm8, %v639_v1, %v703_v4  ;;  %v527_v12 = vpop.f32.mrf.mxu2  ;;  %v547_v13 = vpop.f32.mrf.mxu3  ;;  %v269_v8 = vld [vmem:[#allocation2 + $0x68] sm:$0xff] }
  0xad   : > { %815 = vst.msk [vmem:[%s1230_s26 + $0x60] sm:$0xf] %vm790_vm4, %v782_v7  ;;  %v767_v15 = vpack.c.bf16 %v735_v11, %v735_v11  ;;  %v580_v16 = vadd.f32 %v527_v12, %v274_v5  ;;  %v588_v17 = vadd.f32 %v547_v13, %v282_v6  ;;  %v489_v18 = vpop.f32.mrf.mxu0  ;;  %v509_v19 = vpop.f32.mrf.mxu1 }
  0xae   : > { %792 = vst.msk [vmem:[%s1230_s26 + $0x4] sm:$0xf] %vm790_vm4, %v759_v10  ;;  %v647_v20 = vld [vmem:[#allocation2 + $0x88] sm:$0xff]  ;;  %v565_v21 = vadd.f32 %v489_v18, %v259_v9  ;;  %v573_v24 = vadd.f32 %v509_v19, %v267_v14 }
  0xaf   : > { %800 = vst.msk [vmem:[%s1230_s26 + $0x24] sm:$0xf] %vm790_vm4, %v767_v15  ;;  %vm679_vm9 = vcmp.ge.f32.partialorder %v647_v20, 0.0  ;;  %v711_v22 = vmul.f32 0.2, %v647_v20  ;;  %v655_v23 = vld [vmem:[#allocation2 + $0xc8] sm:$0xff] }
  0xb0   : > { %vm687_vm10 = vcmp.ge.f32.partialorder %v655_v23, 0.0  ;;  %v719_v25 = vmul.f32 0.2, %v655_v23  ;;  %v632_v26 = vld [vmem:[#allocation2 + $0x10] sm:$0xff]  ;;  %613 = vst.msk [vmem:[#allocation2 + $0x90] sm:$0xff] %vm223_vm1, %v580_v16 }
  0xb1   : > { %v743_v27 = vsel %vm679_vm9, %v647_v20, %v711_v22  ;;  %vm664_vm11 = vcmp.ge.f32.partialorder %v632_v26, 0.0  ;;  %v696_v28 = vmul.f32 0.2, %v632_v26  ;;  %v640_v29 = vld [vmem:[#allocation2 + $0x50] sm:$0xff]  ;;  %621 = vst.msk [vmem:[#allocation2 + $0xd0] sm:$0xff] %vm223_vm1, %v588_v17  ;;  %v277_v22 = vld [vmem:[#allocation2 + $0xa8] sm:$0xff] }
  0xb2   : > { %v775_v30 = vpack.c.bf16 %v743_v27, %v743_v27  ;;  %v751_v31 = vsel %vm687_vm10, %v655_v23, %v719_v25  ;;  %vm672_vm12 = vcmp.ge.f32.partialorder %v640_v29, 0.0  ;;  %v704_v32 = vmul.f32 0.2, %v640_v29  ;;  %598 = vst.msk [vmem:[#allocation2 + $0x18] sm:$0xff] %vm223_vm1, %v565_v21 }
  0xb3   : > { %v783_v35 = vpack.c.bf16 %v751_v31, %v751_v31  ;;  %v728_v36 = vsel %vm664_vm11, %v632_v26, %v696_v28  ;;  %606 = vst.msk [vmem:[#allocation2 + $0x58] sm:$0xff] %vm223_vm1, %v573_v24  ;;  %v285_v26 = vld [vmem:[#allocation2 + $0xe8] sm:$0xff]  ;;  %v262_v31 = vld [vmem:[#allocation2 + $0x30] sm:$0xff] }
  0xb4   : > { %808 = vst.msk [vmem:[%s1230_s26 + $0x44] sm:$0xf] %vm790_vm4, %v775_v30  ;;  %v760_v38 = vpack.c.bf16 %v728_v36, %v728_v36  ;;  %v736_v39 = vsel %vm672_vm12, %v640_v29, %v704_v32  ;;  %v529_v40 = vpop.f32.mrf.mxu2  ;;  %v549_v41 = vpop.f32.mrf.mxu3  ;;  %v270_v36 = vld [vmem:[#allocation2 + $0x70] sm:$0xff] }
  0xb5   : > { %816 = vst.msk [vmem:[%s1230_s26 + $0x64] sm:$0xf] %vm790_vm4, %v783_v35  ;;  %v768_v43 = vpack.c.bf16 %v736_v39, %v736_v39  ;;  %v581_v44 = vadd.f32 %v529_v40, %v275_v33  ;;  %v589_v45 = vadd.f32 %v549_v41, %v283_v34  ;;  %v492_v46 = vpop.f32.mrf.mxu0  ;;  %v512_v47 = vpop.f32.mrf.mxu1 }
  0xb6   : > { %793 = vst.msk [vmem:[%s1230_s26 + $0x8] sm:$0xf] %vm790_vm4, %v760_v38  ;;  %v566_v48 = vadd.f32 %v492_v46, %v260_v37  ;;  %v574_v50 = vadd.f32 %v512_v47, %v268_v42 }
  0xb7   : > { %801 = vst.msk [vmem:[%s1230_s26 + $0x28] sm:$0xf] %vm790_vm4, %v768_v43  ;;  %v648_v49 = vld [vmem:[#allocation2 + $0x90] sm:$0xff] }
  0xb8   : > { %vm680_vm13 = vcmp.ge.f32.partialorder %v648_v49, 0.0  ;;  %v712_v51 = vmul.f32 0.2, %v648_v49  ;;  %v656_v52 = vld [vmem:[#allocation2 + $0xd0] sm:$0xff]  ;;  %614 = vst.msk [vmem:[#allocation2 + $0x98] sm:$0xff] %vm223_vm1, %v581_v44 }
  0xb9   : > { %vm688_vm14 = vcmp.ge.f32.partialorder %v656_v52, 0.0  ;;  %v720_v53 = vmul.f32 0.2, %v656_v52  ;;  %v633_v54 = vld [vmem:[#allocation2 + $0x18] sm:$0xff]  ;;  %622 = vst.msk [vmem:[#allocation2 + $0xd8] sm:$0xff] %vm223_vm1, %v589_v45 }
  0xba   : > { %v744_v55 = vsel %vm680_vm13, %v648_v49, %v712_v51  ;;  %vm665_vm15 = vcmp.ge.f32.partialorder %v633_v54, 0.0  ;;  %v697_v56 = vmul.f32 0.2, %v633_v54  ;;  %v641_v57 = vld [vmem:[#allocation2 + $0x58] sm:$0xff]  ;;  %599 = vst.msk [vmem:[#allocation2 + $0x20] sm:$0xff] %vm223_vm1, %v566_v48 }
  0xbb   : > { %v776_v59 = vpack.c.bf16 %v744_v55, %v744_v55  ;;  %v752_v60 = vsel %vm688_vm14, %v656_v52, %v720_v53  ;;  %vm673_vm0 = vcmp.ge.f32.partialorder %v641_v57, 0.0  ;;  %v705_v61 = vmul.f32 0.2, %v641_v57  ;;  %607 = vst.msk [vmem:[#allocation2 + $0x60] sm:$0xff] %vm223_vm1, %v574_v50  ;;  %v278_v50 = vld [vmem:[#allocation2 + $0xb0] sm:$0xff] }
  0xbc   : > { %v784_v63 = vpack.c.bf16 %v752_v60, %v752_v60  ;;  %v729_v0 = vsel %vm665_vm15, %v633_v54, %v697_v56  ;;  %v532_v1 = vpop.f32.mrf.mxu2  ;;  %v552_v2 = vpop.f32.mrf.mxu3  ;;  %v286_v55 = vld [vmem:[#allocation2 + $0xf0] sm:$0xff] }
  0xbd   : > { %809 = vst.msk [vmem:[%s1230_s26 + $0x48] sm:$0xf] %vm790_vm4, %v776_v59  ;;  %v761_v4 = vpack.c.bf16 %v729_v0, %v729_v0  ;;  %v737_v5 = vsel %vm673_vm0, %v641_v57, %v705_v61  ;;  %v582_v6 = vadd.f32 %v532_v1, %v276_v58  ;;  %v494_v7 = vpop.f32.mrf.mxu0  ;;  %v514_v9 = vpop.f32.mrf.mxu1  ;;  %v590_v11 = vadd.f32 %v552_v2, %v284_v62  ;;  %v263_v59 = vld [vmem:[#allocation2 + $0x38] sm:$0xff] }
  0xbe   : > { %817 = vst.msk [vmem:[%s1230_s26 + $0x68] sm:$0xf] %vm790_vm4, %v784_v63  ;;  %v769_v10 = vpack.c.bf16 %v737_v5, %v737_v5  ;;  %v567_v13 = vadd.f32 %v494_v7, %v261_v3  ;;  %v575_v16 = vadd.f32 %v514_v9, %v269_v8  ;;  %v271_v0 = vld [vmem:[#allocation2 + $0x78] sm:$0xff] }
  0xbf   : > { %794 = vst.msk [vmem:[%s1230_s26 + $0xc] sm:$0xf] %vm790_vm4, %v761_v4  ;;  %v649_v12 = vld [vmem:[#allocation2 + $0x98] sm:$0xff] }
  0xc0   : > { %802 = vst.msk [vmem:[%s1230_s26 + $0x2c] sm:$0xf] %vm790_vm4, %v769_v10  ;;  %vm681_vm2 = vcmp.ge.f32.partialorder %v649_v12, 0.0  ;;  %v713_v14 = vmul.f32 0.2, %v649_v12  ;;  %v657_v15 = vld [vmem:[#allocation2 + $0xd8] sm:$0xff] }
  0xc1   : > { %vm689_vm3 = vcmp.ge.f32.partialorder %v657_v15, 0.0  ;;  %v721_v17 = vmul.f32 0.2, %v657_v15  ;;  %v634_v18 = vld [vmem:[#allocation2 + $0x20] sm:$0xff]  ;;  %615 = vst.msk [vmem:[#allocation2 + $0xa0] sm:$0xff] %vm223_vm1, %v582_v6 }
  0xc2   : > { %v745_v19 = vsel %vm681_vm2, %v649_v12, %v713_v14  ;;  %vm666_vm5 = vcmp.ge.f32.partialorder %v634_v18, 0.0  ;;  %v698_v20 = vmul.f32 0.2, %v634_v18  ;;  %v642_v21 = vld [vmem:[#allocation2 + $0x60] sm:$0xff]  ;;  %623 = vst.msk [vmem:[#allocation2 + $0xe0] sm:$0xff] %vm223_vm1, %v590_v11  ;;  %v279_v14 = vld [vmem:[#allocation2 + $0xb8] sm:$0xff] }
  0xc3   : > { %v777_v23 = vpack.c.bf16 %v745_v19, %v745_v19  ;;  %v753_v24 = vsel %vm689_vm3, %v657_v15, %v721_v17  ;;  %vm674_vm6 = vcmp.ge.f32.partialorder %v642_v21, 0.0  ;;  %v706_v25 = vmul.f32 0.2, %v642_v21  ;;  %600 = vst.msk [vmem:[#allocation2 + $0x28] sm:$0xff] %vm223_vm1, %v567_v13  ;;  %v287_v19 = vld [vmem:[#allocation2 + $0xf8] sm:$0xff] }
  0xc4   : > { %v785_v27 = vpack.c.bf16 %v753_v24, %v753_v24  ;;  %v730_v28 = vsel %vm666_vm5, %v634_v18, %v698_v20  ;;  %608 = vst.msk [vmem:[#allocation2 + $0x68] sm:$0xff] %vm223_vm1, %v575_v16  ;;  %v534_v29 = vpop.f32.mrf.mxu2  ;;  %v554_v30 = vpop.f32.mrf.mxu3 }
  0xc5   : > { %810 = vst.msk [vmem:[%s1230_s26 + $0x4c] sm:$0xf] %vm790_vm4, %v777_v23  ;;  %v762_v32 = vpack.c.bf16 %v730_v28, %v730_v28  ;;  %v738_v33 = vsel %vm674_vm6, %v642_v21, %v706_v25  ;;  %v583_v34 = vadd.f32 %v534_v29, %v277_v22  ;;  %v497_v35 = vpop.f32.mrf.mxu0  ;;  %v517_v37 = vpop.f32.mrf.mxu1  ;;  %v591_v39 = vadd.f32 %v554_v30, %v285_v26 }
  0xc6   : > { %818 = vst.msk [vmem:[%s1230_s26 + $0x6c] sm:$0xf] %vm790_vm4, %v785_v27  ;;  %v770_v38 = vpack.c.bf16 %v738_v33, %v738_v33  ;;  %v568_v40 = vadd.f32 %v497_v35, %v262_v31  ;;  %v576_v42 = vadd.f32 %v517_v37, %v270_v36 }
  0xc7   : > { %795 = vst.msk [vmem:[%s1230_s26 + $0x10] sm:$0xf] %vm790_vm4, %v762_v32 }
  0xc8   : > { %803 = vst.msk [vmem:[%s1230_s26 + $0x30] sm:$0xf] %vm790_vm4, %v770_v38  ;;  %v650_v41 = vld [vmem:[#allocation2 + $0xa0] sm:$0xff] }
  0xc9   : > { %vm682_vm7 = vcmp.ge.f32.partialorder %v650_v41, 0.0  ;;  %v714_v43 = vmul.f32 0.2, %v650_v41  ;;  %v658_v44 = vld [vmem:[#allocation2 + $0xe0] sm:$0xff]  ;;  %616 = vst.msk [vmem:[#allocation2 + $0xa8] sm:$0xff] %vm223_vm1, %v583_v34 }
  0xca   : > { %vm690_vm8 = vcmp.ge.f32.partialorder %v658_v44, 0.0  ;;  %v722_v45 = vmul.f32 0.2, %v658_v44  ;;  %v635_v46 = vld [vmem:[#allocation2 + $0x28] sm:$0xff]  ;;  %624 = vst.msk [vmem:[#allocation2 + $0xe8] sm:$0xff] %vm223_vm1, %v591_v39 }
  0xcb   : > { %v746_v47 = vsel %vm682_vm7, %v650_v41, %v714_v43  ;;  %vm667_vm9 = vcmp.ge.f32.partialorder %v635_v46, 0.0  ;;  %v699_v48 = vmul.f32 0.2, %v635_v46  ;;  %v643_v49 = vld [vmem:[#allocation2 + $0x68] sm:$0xff]  ;;  %601 = vst.msk [vmem:[#allocation2 + $0x30] sm:$0xff] %vm223_vm1, %v568_v40 }
  0xcc   : > { %v778_v51 = vpack.c.bf16 %v746_v47, %v746_v47  ;;  %v754_v52 = vsel %vm690_vm8, %v658_v44, %v722_v45  ;;  %vm675_vm10 = vcmp.ge.f32.partialorder %v643_v49, 0.0  ;;  %v707_v53 = vmul.f32 0.2, %v643_v49  ;;  %609 = vst.msk [vmem:[#allocation2 + $0x70] sm:$0xff] %vm223_vm1, %v576_v42  ;;  %v537_v54 = vpop.f32.mrf.mxu2  ;;  %v557_v56 = vpop.f32.mrf.mxu3 }
  0xcd   : > { %v786_v57 = vpack.c.bf16 %v754_v52, %v754_v52  ;;  %v731_v58 = vsel %vm667_vm9, %v635_v46, %v699_v48  ;;  %v499_v60 = vpop.f32.mrf.mxu0  ;;  %v584_v63 = vadd.f32 %v537_v54, %v278_v50  ;;  %v519_v1 = vpop.f32.mrf.mxu1  ;;  %v592_v3 = vadd.f32 %v557_v56, %v286_v55 }
  0xce   : > { %811 = vst.msk [vmem:[%s1230_s26 + $0x50] sm:$0xf] %vm790_vm4, %v778_v51  ;;  %v763_v61 = vpack.c.bf16 %v731_v58, %v731_v58  ;;  %v739_v62 = vsel %vm675_vm10, %v643_v49, %v707_v53  ;;  %v569_v5 = vadd.f32 %v499_v60, %v263_v59  ;;  %v577_v8 = vadd.f32 %v519_v1, %v271_v0 }
  0xcf   : > { %819 = vst.msk [vmem:[%s1230_s26 + $0x70] sm:$0xf] %vm790_vm4, %v786_v57  ;;  %v771_v2 = vpack.c.bf16 %v739_v62, %v739_v62 }
  0xd0   : > { %796 = vst.msk [vmem:[%s1230_s26 + $0x14] sm:$0xf] %vm790_vm4, %v763_v61  ;;  %v651_v4 = vld [vmem:[#allocation2 + $0xa8] sm:$0xff] }
  0xd1   : > { %804 = vst.msk [vmem:[%s1230_s26 + $0x34] sm:$0xf] %vm790_vm4, %v771_v2  ;;  %vm683_vm11 = vcmp.ge.f32.partialorder %v651_v4, 0.0  ;;  %v715_v6 = vmul.f32 0.2, %v651_v4  ;;  %v659_v7 = vld [vmem:[#allocation2 + $0xe8] sm:$0xff] }
  0xd2   : > { %vm691_vm12 = vcmp.ge.f32.partialorder %v659_v7, 0.0  ;;  %v723_v9 = vmul.f32 0.2, %v659_v7  ;;  %v636_v10 = vld [vmem:[#allocation2 + $0x30] sm:$0xff]  ;;  %617 = vst.msk [vmem:[#allocation2 + $0xb0] sm:$0xff] %vm223_vm1, %v584_v63 }
  0xd3   : > { %v747_v11 = vsel %vm683_vm11, %v651_v4, %v715_v6  ;;  %vm668_vm13 = vcmp.ge.f32.partialorder %v636_v10, 0.0  ;;  %v700_v12 = vmul.f32 0.2, %v636_v10  ;;  %v644_v13 = vld [vmem:[#allocation2 + $0x70] sm:$0xff]  ;;  %625 = vst.msk [vmem:[#allocation2 + $0xf0] sm:$0xff] %vm223_vm1, %v592_v3 }
  0xd4   : > { %v779_v15 = vpack.c.bf16 %v747_v11, %v747_v11  ;;  %v755_v16 = vsel %vm691_vm12, %v659_v7, %v723_v9  ;;  %vm676_vm14 = vcmp.ge.f32.partialorder %v644_v13, 0.0  ;;  %v708_v17 = vmul.f32 0.2, %v644_v13  ;;  %602 = vst.msk [vmem:[#allocation2 + $0x38] sm:$0xff] %vm223_vm1, %v569_v5  ;;  %v539_v18 = vpop.f32.mrf.mxu2  ;;  %v559_v20 = vpop.f32.mrf.mxu3 }
  0xd5   : > { %v787_v21 = vpack.c.bf16 %v755_v16, %v755_v16  ;;  %v732_v22 = vsel %vm668_vm13, %v636_v10, %v700_v12  ;;  %610 = vst.msk [vmem:[#allocation2 + $0x78] sm:$0xff] %vm223_vm1, %v577_v8  ;;  %v585_v25 = vadd.f32 %v539_v18, %v279_v14  ;;  %v593_v27 = vadd.f32 %v559_v20, %v287_v19 }
  0xd6   : > { %812 = vst.msk [vmem:[%s1230_s26 + $0x54] sm:$0xf] %vm790_vm4, %v779_v15  ;;  %v764_v23 = vpack.c.bf16 %v732_v22, %v732_v22  ;;  %v740_v24 = vsel %vm676_vm14, %v644_v13, %v708_v17 }
  0xd7   : > { %820 = vst.msk [vmem:[%s1230_s26 + $0x74] sm:$0xf] %vm790_vm4, %v787_v21  ;;  %v772_v26 = vpack.c.bf16 %v740_v24, %v740_v24 }
  0xd8   : > { %797 = vst.msk [vmem:[%s1230_s26 + $0x18] sm:$0xf] %vm790_vm4, %v764_v23 }
  0xd9   : > { %805 = vst.msk [vmem:[%s1230_s26 + $0x38] sm:$0xf] %vm790_vm4, %v772_v26  ;;  %v652_v28 = vld [vmem:[#allocation2 + $0xb0] sm:$0xff] }
  0xda   : > { %vm684_vm15 = vcmp.ge.f32.partialorder %v652_v28, 0.0  ;;  %v716_v29 = vmul.f32 0.2, %v652_v28  ;;  %v660_v30 = vld [vmem:[#allocation2 + $0xf0] sm:$0xff]  ;;  %618 = vst.msk [vmem:[#allocation2 + $0xb8] sm:$0xff] %vm223_vm1, %v585_v25 }
  0xdb   : > { %vm692_vm0 = vcmp.ge.f32.partialorder %v660_v30, 0.0  ;;  %v724_v31 = vmul.f32 0.2, %v660_v30  ;;  %v637_v32 = vld [vmem:[#allocation2 + $0x38] sm:$0xff]  ;;  %626 = vst.msk [vmem:[#allocation2 + $0xf8] sm:$0xff] %vm223_vm1, %v593_v27 }
  0xdc   : > { %v748_v33 = vsel %vm684_vm15, %v652_v28, %v716_v29  ;;  %vm669_vm2 = vcmp.ge.f32.partialorder %v637_v32, 0.0  ;;  %v701_v34 = vmul.f32 0.2, %v637_v32  ;;  %v645_v35 = vld [vmem:[#allocation2 + $0x78] sm:$0xff] }
  0xdd   : > { %v780_v36 = vpack.c.bf16 %v748_v33, %v748_v33  ;;  %v756_v37 = vsel %vm692_vm0, %v660_v30, %v724_v31  ;;  %vm677_vm3 = vcmp.ge.f32.partialorder %v645_v35, 0.0  ;;  %v709_v38 = vmul.f32 0.2, %v645_v35 }
  0xde   : > { %v788_v39 = vpack.c.bf16 %v756_v37, %v756_v37  ;;  %v733_v40 = vsel %vm669_vm2, %v637_v32, %v701_v34 }
  0xdf   : > { %813 = vst.msk [vmem:[%s1230_s26 + $0x58] sm:$0xf] %vm790_vm4, %v780_v36  ;;  %v765_v41 = vpack.c.bf16 %v733_v40, %v733_v40  ;;  %v741_v42 = vsel %vm677_vm3, %v645_v35, %v709_v38 }
  0xe0   : > { %821 = vst.msk [vmem:[%s1230_s26 + $0x78] sm:$0xf] %vm790_vm4, %v788_v39  ;;  %v773_v43 = vpack.c.bf16 %v741_v42, %v741_v42 }
  0xe1   : > { %798 = vst.msk [vmem:[%s1230_s26 + $0x1c] sm:$0xf] %vm790_vm4, %v765_v41  ;;  %v653_v44 = vld [vmem:[#allocation2 + $0xb8] sm:$0xff] }
  0xe2   : > { %806 = vst.msk [vmem:[%s1230_s26 + $0x3c] sm:$0xf] %vm790_vm4, %v773_v43  ;;  %vm685_vm1 = vcmp.ge.f32.partialorder %v653_v44, 0.0  ;;  %v717_v45 = vmul.f32 0.2, %v653_v44  ;;  %v661_v46 = vld [vmem:[#allocation2 + $0xf8] sm:$0xff] }
  0xe3   : > { %vm693_vm5 = vcmp.ge.f32.partialorder %v661_v46, 0.0  ;;  %v725_v47 = vmul.f32 0.2, %v661_v46 }
  0xe4   : > { %v749_v48 = vsel %vm685_vm1, %v653_v44, %v717_v45 }
  0xe5   : > { %v781_v49 = vpack.c.bf16 %v749_v48, %v749_v48  ;;  %v757_v50 = vsel %vm693_vm5, %v661_v46, %v725_v47 }
  0xe6   : > { %v789_v51 = vpack.c.bf16 %v757_v50, %v757_v50 }
  0xe7   : > { %814 = vst.msk [vmem:[%s1230_s26 + $0x5c] sm:$0xf] %vm790_vm4, %v781_v49 }
  0xe8   : > { %822 = vst.msk [vmem:[%s1230_s26 + $0x7c] sm:$0xf] %vm790_vm4, %v789_v51 }
  0xe9 PF: > { %s12_s11 = sadd.s32 1, %s1101_s11   ;;  %s1335_s9 = smov %s1097_s10 }
  0xea   : > { %p9_p5 = scmp.ge.s32.totalorder %s12_s11, 10   ;;  %s1336_s10 = smov %s1338_s12 }
  0xec   :  { %11 = sbr.rel (!%p9_p5) target bundleno = 2 (0x2), region = 69 }

// kernel: discriminator_forward.9
= control target key start
LH: loop header
LB: loop body
LE: loop exit
PB: predicated region body
PF: predicated region fallthrough
CT: control target
= control target key end

     0   :  { %s3831_s15 = smov 0   ;;  %s3833_s16 = smov 0   ;;  %s4459_s0 = inlined_call_operand.vmem [shape: bf16[512,1024], index: 0, kind: input, shape index: {}]   ;;  %s4460_s1 = inlined_call_operand.vmem [shape: bf16[1024,128], index: 1, kind: input, shape index: {}]   ;;  %s4461_s2 = inlined_call_operand.vmem [shape: f32[512,128], index: 2, kind: output, shape index: {0}]   ;;  %s4462_s3 = inlined_call_operand.vmem [shape: f32[2,1,128], index: 3, kind: output, shape index: {1}]   ;;  %s4463_s4 = inlined_call_operand.vmem [shape: f32[2,1,128], index: 4, kind: output, shape index: {2}]  }
   0x1   :  { %s3835_s17 = smov 0  }
   0x2 LB: > { %s34_s18 = sadd.s32 1, %s3800_s16  ;;  %p2789_p0 = scmp.ge.s32.totalorder %s3804_s17, 1  ;;  %s3804_s17 = sphi %s3835_s17, %s15_s17   ;;  %s3800_s16 = sphi %s3833_s16, %s4465_s16   ;;  %s3796_s15 = sphi %s3831_s15, %s4464_s15  }
   0x3   : > { %p36_p1 = scmp.ge.s32.totalorder %s34_s18, 2  ;;  %p217_p2 = scmp.lt.s32.totalorder %s3804_s17, 3 }
   0x5   : > { %s4467_s18 = smov (%p36_p1, %s34_s18), 0  ;;  %p218_p3 = pnand %p2789_p0, %p217_p2 }
   0x6   : > { %s2790_s21 = sshll.u32 (!%p218_p3), %s3796_s15, 5  ;;  %p301_p5 = scmp.lt.s32.totalorder (!%p218_p3), %s3796_s15, 1 }
   0x7   : > { %221 = sbr.rel (%p218_p3) target bundleno = 703 (0x2bf), region = 28  ;;  %p273_p4 = scmp.lt.s32.totalorder (!%p218_p3), %s2790_s21, 63 }
   0xc   : > { %v3701_v0 = vld [vmem:[%s4460_s1 + $0x38] sm:$0xff]  ;;  %v3700_v4 = vld [vmem:[%s4460_s1 + $0x30] sm:$0xff]  ;;  %v3699_v8 = vld [vmem:[%s4460_s1 + $0x28] sm:$0xff]  ;;  %s4469_s21 = smov (!%p273_p4, %s2790_s21), 63  ;;  %s4471_s15 = smov (!%p301_p5, %s3796_s15), 1 }
   0xd   : > { %v3709_v1 = vld [vmem:[%s4460_s1 + $0x78] sm:$0xff]  ;;  %1661 = vmatpush.bf16.msra.mxu0 %v3701_v0  ;;  %v3708_v5 = vld [vmem:[%s4460_s1 + $0x70] sm:$0xff]  ;;  %v3707_v9 = vld [vmem:[%s4460_s1 + $0x68] sm:$0xff]  ;;  %s3565_s25 = sshll.u32 %s4469_s21, 5  ;;  %s2794_s28 = sshll.u32 %s4469_s21, 3 }
   0xe   : > { %v3717_v2 = vld [vmem:[%s4460_s1 + $0xb8] sm:$0xff]  ;;  %1750 = vmatpush.bf16.msra.mxu1 %v3709_v1  ;;  %v3716_v6 = vld [vmem:[%s4460_s1 + $0xb0] sm:$0xff]  ;;  %v3715_v10 = vld [vmem:[%s4460_s1 + $0xa8] sm:$0xff]  ;;  %s3936_s6 = scalar_lea.vmem %s4459_s0, %s3565_s25  ;;  %s4321_s5 = scalar_lea.vmem %s4461_s2, %s2794_s28 }
   0xf   : > { %v3725_v3 = vld [vmem:[%s4460_s1 + $0xf8] sm:$0xff]  ;;  %1839 = vmatpush.bf16.msra.mxu2 %v3717_v2  ;;  %v3724_v7 = vld [vmem:[%s4460_s1 + $0xf0] sm:$0xff]  ;;  %v3723_v11 = vld [vmem:[%s4460_s1 + $0xe8] sm:$0xff]  ;;  %s306_s7 = scalar_lea.vmem %s4462_s3, %s4471_s15  ;;  %s312_s10 = scalar_lea.vmem %s4463_s4, %s4471_s15 }
  0x10   : > { %1928 = vmatpush.bf16.msra.mxu3 %v3725_v3  ;;  %v3698_v12 = vld [vmem:[%s4460_s1 + $0x20] sm:$0xff]  ;;  %v3697_v16 = vld [vmem:[%s4460_s1 + $0x18] sm:$0xff]  ;;  %v3696_v20 = vld [vmem:[%s4460_s1 + $0x10] sm:$0xff] }
  0x11   : > { %1662 = vmatpush.bf16.msra.mxu0 %v3700_v4  ;;  %v3706_v13 = vld [vmem:[%s4460_s1 + $0x60] sm:$0xff]  ;;  %v3705_v17 = vld [vmem:[%s4460_s1 + $0x58] sm:$0xff]  ;;  %v3704_v21 = vld [vmem:[%s4460_s1 + $0x50] sm:$0xff] }
  0x12   : > { %1751 = vmatpush.bf16.msra.mxu1 %v3708_v5  ;;  %v3714_v14 = vld [vmem:[%s4460_s1 + $0xa0] sm:$0xff]  ;;  %v3713_v18 = vld [vmem:[%s4460_s1 + $0x98] sm:$0xff]  ;;  %v3712_v22 = vld [vmem:[%s4460_s1 + $0x90] sm:$0xff] }
  0x13   : > { %1840 = vmatpush.bf16.msra.mxu2 %v3716_v6  ;;  %v3722_v15 = vld [vmem:[%s4460_s1 + $0xe0] sm:$0xff]  ;;  %v3721_v19 = vld [vmem:[%s4460_s1 + $0xd8] sm:$0xff]  ;;  %v3720_v23 = vld [vmem:[%s4460_s1 + $0xd0] sm:$0xff] }
  0x14   : > { %1929 = vmatpush.bf16.msra.mxu3 %v3724_v7  ;;  %v3695_v24 = vld [vmem:[%s4460_s1 + $0x8] sm:$0xff]  ;;  %v3694_v28 = vld [vmem:[%s4460_s1] sm:$0xff]  ;;  %v3749_v40 = vld [vmem:[%s4460_s1 + $0x1b8] sm:$0xff] }
  0x15   : > { %1663 = vmatpush.bf16.msra.mxu0 %v3699_v8  ;;  %v3703_v25 = vld [vmem:[%s4460_s1 + $0x48] sm:$0xff]  ;;  %v3702_v29 = vld [vmem:[%s4460_s1 + $0x40] sm:$0xff]  ;;  %v3733_v41 = vld [vmem:[%s4460_s1 + $0x138] sm:$0xff] }
  0x16   : > { %1752 = vmatpush.bf16.msra.mxu1 %v3707_v9  ;;  %v3711_v26 = vld [vmem:[%s4460_s1 + $0x88] sm:$0xff]  ;;  %v3710_v30 = vld [vmem:[%s4460_s1 + $0x80] sm:$0xff]  ;;  %v3757_v46 = vld [vmem:[%s4460_s1 + $0x1f8] sm:$0xff] }
  0x17   : > { %1841 = vmatpush.bf16.msra.mxu2 %v3715_v10  ;;  %v3719_v27 = vld [vmem:[%s4460_s1 + $0xc8] sm:$0xff]  ;;  %v3718_v31 = vld [vmem:[%s4460_s1 + $0xc0] sm:$0xff]  ;;  %v3741_v47 = vld [vmem:[%s4460_s1 + $0x178] sm:$0xff] }
  0x18   : > { %1930 = vmatpush.bf16.msra.mxu3 %v3723_v11  ;;  %v2797_v32 = vld [vmem:[%s3936_s6] sm:$0xf]  ;;  %v3566_v34 = vld [vmem:[%s3936_s6 + $0x4] sm:$0xf]  ;;  %v2805_v36 = vld [vmem:[%s3936_s6 + $0x8] sm:$0xf] }
  0x19   : > { %1664 = vmatpush.bf16.msra.mxu0 %v3698_v12  ;;  %v3570_v33 = vld [vmem:[%s3936_s6 + $0x1c] sm:$0xf0]  ;;  %v2799_v35 = vld [vmem:[%s3936_s6 + $0x20] sm:$0xf0]  ;;  %v3571_v37 = vld [vmem:[%s3936_s6 + $0x24] sm:$0xf0] }
  0x1a   : > { %1753 = vmatpush.bf16.msra.mxu1 %v3706_v13  ;;  %v3567_v38 = vld [vmem:[%s3936_s6 + $0xc] sm:$0xf]  ;;  %v2798_v42 = vor.u32 %v3570_v33, %v2797_v32  ;;  %v2802_v43 = vor.u32 %v3566_v34, %v2799_v35  ;;  %v2806_v44 = vor.u32 %v3571_v37, %v2805_v36  ;;  %v3748_v48 = vld [vmem:[%s4460_s1 + $0x1b0] sm:$0xff]  ;;  %v2829_v52 = vld [vmem:[%s3936_s6 + $0x40] sm:$0xf] }
  0x1b   : > { %1842 = vmatpush.bf16.msra.mxu2 %v3714_v14  ;;  %v2807_v39 = vld [vmem:[%s3936_s6 + $0x28] sm:$0xf0]  ;;  %v3732_v49 = vld [vmem:[%s4460_s1 + $0x130] sm:$0xff]  ;;  %v3578_v53 = vld [vmem:[%s3936_s6 + $0x5c] sm:$0xf0] }
  0x1c   : > { %1931 = vmatpush.bf16.msra.mxu3 %v3722_v15  ;;  %v2810_v45 = vor.u32 %v3567_v38, %v2807_v39  ;;  %v3756_v50 = vld [vmem:[%s4460_s1 + $0x1f0] sm:$0xff]  ;;  %v3574_v54 = vld [vmem:[%s3936_s6 + $0x44] sm:$0xf]  ;;  %v2837_v56 = vld [vmem:[%s3936_s6 + $0x48] sm:$0xf]  ;;  %v2830_v60 = vor.u32 %v3578_v53, %v2829_v52 }
  0x1d   : > { %1665 = vmatpush.bf16.msra.mxu0 %v3697_v16  ;;  %v3740_v51 = vld [vmem:[%s4460_s1 + $0x170] sm:$0xff]  ;;  %v2831_v55 = vld [vmem:[%s3936_s6 + $0x60] sm:$0xf0]  ;;  %v3579_v57 = vld [vmem:[%s3936_s6 + $0x64] sm:$0xf0] }
  0x1e   : > { %1754 = vmatpush.bf16.msra.mxu1 %v3705_v17  ;;  %v3575_v58 = vld [vmem:[%s3936_s6 + $0x4c] sm:$0xf]  ;;  %v2834_v61 = vor.u32 %v3574_v54, %v2831_v55  ;;  %v2838_v62 = vor.u32 %v3579_v57, %v2837_v56  ;;  %v2861_v0 = vld [vmem:[%s3936_s6 + $0x80] sm:$0xf]  ;;  %v3582_v2 = vld [vmem:[%s3936_s6 + $0x84] sm:$0xf] }
  0x1f   : > { %1843 = vmatpush.bf16.msra.mxu2 %v3713_v18  ;;  %v2839_v59 = vld [vmem:[%s3936_s6 + $0x68] sm:$0xf0]  ;;  %v3586_v1 = vld [vmem:[%s3936_s6 + $0x9c] sm:$0xf0]  ;;  %v2863_v3 = vld [vmem:[%s3936_s6 + $0xa0] sm:$0xf0] }
  0x20   : > { %1932 = vmatpush.bf16.msra.mxu3 %v3721_v19  ;;  %v2842_v63 = vor.u32 %v3575_v58, %v2839_v59  ;;  %v2869_v4 = vld [vmem:[%s3936_s6 + $0x88] sm:$0xf]  ;;  %v3583_v6 = vld [vmem:[%s3936_s6 + $0x8c] sm:$0xf]  ;;  %v2862_v8 = vor.u32 %v3586_v1, %v2861_v0  ;;  %v2866_v9 = vor.u32 %v3582_v2, %v2863_v3  ;;  %v2893_v16 = vld [vmem:[%s3936_s6 + $0xc0] sm:$0xf] }
  0x21   : > { %1666 = vmatpush.bf16.msra.mxu0 %v3696_v20  ;;  %v3587_v5 = vld [vmem:[%s3936_s6 + $0xa4] sm:$0xf0]  ;;  %v2871_v7 = vld [vmem:[%s3936_s6 + $0xa8] sm:$0xf0]  ;;  %v3594_v17 = vld [vmem:[%s3936_s6 + $0xdc] sm:$0xf0] }
  0x22   : > { %1755 = vmatpush.bf16.msra.mxu1 %v3704_v21  ;;  %v2870_v10 = vor.u32 %v3587_v5, %v2869_v4  ;;  %v2874_v11 = vor.u32 %v3583_v6, %v2871_v7  ;;  %v3747_v12 = vld [vmem:[%s4460_s1 + $0x1a8] sm:$0xff]  ;;  %v3590_v18 = vld [vmem:[%s3936_s6 + $0xc4] sm:$0xf]  ;;  %v2989_v56 = vld [vmem:[%s3936_s6 + $0x180] sm:$0xf] }
  0x23   : > { %1844 = vmatpush.bf16.msra.mxu2 %v3712_v22  ;;  %v3731_v13 = vld [vmem:[%s4460_s1 + $0x128] sm:$0xff]  ;;  %v2895_v19 = vld [vmem:[%s3936_s6 + $0xe0] sm:$0xf0]  ;;  %v3618_v57 = vld [vmem:[%s3936_s6 + $0x19c] sm:$0xf0] }
  0x24   : > { %1933 = vmatpush.bf16.msra.mxu3 %v3720_v23  ;;  %v3755_v14 = vld [vmem:[%s4460_s1 + $0x1e8] sm:$0xff]  ;;  %v3614_v58 = vld [vmem:[%s3936_s6 + $0x184] sm:$0xf]  ;;  %v2990_v0 = vor.u32 %v3618_v57, %v2989_v56  ;;  %v3745_v4 = vld [vmem:[%s4460_s1 + $0x198] sm:$0xff] }
  0x25   : > { %1667 = vmatpush.bf16.msra.mxu0 %v3695_v24  ;;  %v3739_v15 = vld [vmem:[%s4460_s1 + $0x168] sm:$0xff]  ;;  %v2894_v24 = vor.u32 %v3594_v17, %v2893_v16  ;;  %v2991_v59 = vld [vmem:[%s3936_s6 + $0x1a0] sm:$0xf0]  ;;  %v3729_v5 = vld [vmem:[%s4460_s1 + $0x118] sm:$0xff] }
  0x26   : > { %1756 = vmatpush.bf16.msra.mxu1 %v3703_v25  ;;  %v2901_v20 = vld [vmem:[%s3936_s6 + $0xc8] sm:$0xf]  ;;  %v3591_v22 = vld [vmem:[%s3936_s6 + $0xcc] sm:$0xf]  ;;  %v2898_v25 = vor.u32 %v3590_v18, %v2895_v19  ;;  %v2994_v1 = vor.u32 %v3614_v58, %v2991_v59  ;;  %v3753_v6 = vld [vmem:[%s4460_s1 + $0x1d8] sm:$0xff] }
  0x27   : > { %1845 = vmatpush.bf16.msra.mxu2 %v3711_v26  ;;  %v3595_v21 = vld [vmem:[%s3936_s6 + $0xe4] sm:$0xf0]  ;;  %v2903_v23 = vld [vmem:[%s3936_s6 + $0xe8] sm:$0xf0]  ;;  %v3737_v7 = vld [vmem:[%s4460_s1 + $0x158] sm:$0xff] }
  0x28   : > { %1934 = vmatpush.bf16.msra.mxu3 %v3719_v27  ;;  %v2902_v26 = vor.u32 %v3595_v21, %v2901_v20  ;;  %v2906_v27 = vor.u32 %v3591_v22, %v2903_v23  ;;  %v2933_v32 = vld [vmem:[%s3936_s6 + $0x108] sm:$0xf]  ;;  %v3599_v34 = vld [vmem:[%s3936_s6 + $0x10c] sm:$0xf]  ;;  %v3053_v20 = vld [vmem:[%s3936_s6 + $0x200] sm:$0xf] }
  0x29   : > { %1668 = vmatpush.bf16.msra.mxu0 %v3694_v28  ;;  %v2925_v28 = vld [vmem:[%s3936_s6 + $0x100] sm:$0xf]  ;;  %v3603_v33 = vld [vmem:[%s3936_s6 + $0x124] sm:$0xf0]  ;;  %v2935_v35 = vld [vmem:[%s3936_s6 + $0x128] sm:$0xf0] }
  0x2a   : > { %1757 = vmatpush.bf16.msra.mxu1 %v3702_v29  ;;  %v3602_v29 = vld [vmem:[%s3936_s6 + $0x11c] sm:$0xf0]  ;;  %v2934_v38 = vor.u32 %v3603_v33, %v2933_v32  ;;  %v2938_v39 = vor.u32 %v3599_v34, %v2935_v35  ;;  %v3630_v22 = vld [vmem:[%s3936_s6 + $0x204] sm:$0xf]  ;;  %v3744_v35 = vld [vmem:[%s4460_s1 + $0x190] sm:$0xff] }
  0x2b   : > { %1846 = vmatpush.bf16.msra.mxu2 %v3710_v30  ;;  %v3598_v30 = vld [vmem:[%s3936_s6 + $0x104] sm:$0xf]  ;;  %v2926_v36 = vor.u32 %v3602_v29, %v2925_v28  ;;  %v3634_v21 = vld [vmem:[%s3936_s6 + $0x21c] sm:$0xf0] }
  0x2c   : > { %1935 = vmatpush.bf16.msra.mxu3 %v3718_v31  ;;  %1669 = vmatmul.bf16.vlgmr.msra.gmra.mxu0 %v2798_v42  ;;  %v2927_v31 = vld [vmem:[%s3936_s6 + $0x120] sm:$0xf0]  ;;  %v3054_v28 = vor.u32 %v3634_v21, %v3053_v20 }
  0x2d   : > { %2017 = vmatpush.bf16.msrb.mxu0 %v3733_v41  ;;  %1758 = vmatmul.bf16.vlgmr.msra.gmra.mxu1 %v2802_v43  ;;  %v2930_v37 = vor.u32 %v3598_v30, %v2927_v31  ;;  %v3730_v41 = vld [vmem:[%s4460_s1 + $0x120] sm:$0xff] }
  0x2e   : > { %1847 = vmatmul.bf16.vlgmr.msra.gmra.mxu2 %v2806_v44  ;;  %2106 = vmatpush.bf16.msrb.mxu1 %v3741_v47  ;;  %v3754_v42 = vld [vmem:[%s4460_s1 + $0x1e0] sm:$0xff] }
  0x2f   : > { %2195 = vmatpush.bf16.msrb.mxu2 %v3749_v40  ;;  %1936 = vmatmul.bf16.vlgmr.msra.gmra.mxu3 %v2810_v45  ;;  %v3746_v40 = vld [vmem:[%s4460_s1 + $0x1a0] sm:$0xff] }
  0x30   : > { %2284 = vmatpush.bf16.msrb.mxu3 %v3757_v46  ;;  %v3738_v43 = vld [vmem:[%s4460_s1 + $0x160] sm:$0xff] }
  0x31   : > { %2018 = vmatpush.bf16.msrb.mxu0 %v3732_v49  ;;  %v2957_v44 = vld [vmem:[%s3936_s6 + $0x140] sm:$0xf]  ;;  %v3606_v46 = vld [vmem:[%s3936_s6 + $0x144] sm:$0xf]  ;;  %v3611_v49 = vld [vmem:[%s3936_s6 + $0x164] sm:$0xf0] }
  0x32   : > { %2107 = vmatpush.bf16.msrb.mxu1 %v3740_v51  ;;  %v3610_v45 = vld [vmem:[%s3936_s6 + $0x15c] sm:$0xf0]  ;;  %v2959_v47 = vld [vmem:[%s3936_s6 + $0x160] sm:$0xf0]  ;;  %v2967_v51 = vld [vmem:[%s3936_s6 + $0x168] sm:$0xf0] }
  0x33   : > { %2196 = vmatpush.bf16.msrb.mxu2 %v3748_v48  ;;  %v2965_v48 = vld [vmem:[%s3936_s6 + $0x148] sm:$0xf]  ;;  %v2958_v52 = vor.u32 %v3610_v45, %v2957_v44  ;;  %v2962_v53 = vor.u32 %v3606_v46, %v2959_v47  ;;  %v3055_v23 = vld [vmem:[%s3936_s6 + $0x220] sm:$0xf0]  ;;  %v3736_v45 = vld [vmem:[%s4460_s1 + $0x150] sm:$0xff] }
  0x34   : > { %2285 = vmatpush.bf16.msrb.mxu3 %v3756_v50  ;;  %v3607_v50 = vld [vmem:[%s3936_s6 + $0x14c] sm:$0xf]  ;;  %v2966_v54 = vor.u32 %v3611_v49, %v2965_v48  ;;  %v3058_v29 = vor.u32 %v3630_v22, %v3055_v23  ;;  %v3085_v46 = vld [vmem:[%s3936_s6 + $0x240] sm:$0xf]  ;;  %v3638_v48 = vld [vmem:[%s3936_s6 + $0x244] sm:$0xf] }
  0x35   : > { %2019 = vmatpush.bf16.msrb.mxu0 %v3731_v13  ;;  %v2970_v55 = vor.u32 %v3607_v50, %v2967_v51  ;;  %v3627_v13 = vld [vmem:[%s3936_s6 + $0x1e4] sm:$0xf0]  ;;  %v3642_v47 = vld [vmem:[%s3936_s6 + $0x25c] sm:$0xf0]  ;;  %v3087_v49 = vld [vmem:[%s3936_s6 + $0x260] sm:$0xf0] }
  0x36   : > { %2108 = vmatpush.bf16.msrb.mxu1 %v3739_v15  ;;  %v3031_v15 = vld [vmem:[%s3936_s6 + $0x1e8] sm:$0xf0]  ;;  %v3093_v50 = vld [vmem:[%s3936_s6 + $0x248] sm:$0xf]  ;;  %v3086_v56 = vor.u32 %v3642_v47, %v3085_v46  ;;  %v3090_v57 = vor.u32 %v3638_v48, %v3087_v49 }
  0x37   : > { %2197 = vmatpush.bf16.msrb.mxu2 %v3747_v12  ;;  %v3029_v12 = vld [vmem:[%s3936_s6 + $0x1c8] sm:$0xf]  ;;  %v3159_v46 = vld [vmem:[%s3936_s6 + $0x2e8] sm:$0xf0] }
  0x38   : > { %2286 = vmatpush.bf16.msrb.mxu3 %v3755_v14  ;;  %v3623_v14 = vld [vmem:[%s3936_s6 + $0x1cc] sm:$0xf]  ;;  %v3030_v18 = vor.u32 %v3627_v13, %v3029_v12  ;;  %v3643_v51 = vld [vmem:[%s3936_s6 + $0x264] sm:$0xf0] }
  0x39   : > { %2020 = vmatpush.bf16.msrb.mxu0 %v3730_v41  ;;  %v3034_v19 = vor.u32 %v3623_v14, %v3031_v15  ;;  %v3125_v12 = vld [vmem:[%s3936_s6 + $0x288] sm:$0xf]  ;;  %v3647_v14 = vld [vmem:[%s3936_s6 + $0x28c] sm:$0xf] }
  0x3a   : > { %2109 = vmatpush.bf16.msrb.mxu1 %v3738_v43  ;;  %v3651_v13 = vld [vmem:[%s3936_s6 + $0x2a4] sm:$0xf0]  ;;  %v3127_v15 = vld [vmem:[%s3936_s6 + $0x2a8] sm:$0xf0] }
  0x3b   : > { %2198 = vmatpush.bf16.msrb.mxu2 %v3746_v40  ;;  %v3126_v23 = vor.u32 %v3651_v13, %v3125_v12 }
  0x3c   : > { %1674 = vmatmul.bf16.gmra.mxu0 %v2830_v60  ;;  %2287 = vmatpush.bf16.msrb.mxu3 %v3754_v42  ;;  %v2997_v60 = vld [vmem:[%s3936_s6 + $0x188] sm:$0xf] }
  0x3d   : > { %1763 = vmatmul.bf16.gmra.mxu1 %v2834_v61  ;;  %v3619_v61 = vld [vmem:[%s3936_s6 + $0x1a4] sm:$0xf0]  ;;  %2021 = vmatpush.bf16.msrb.mxu0 %v3729_v5 }
  0x3e   : > { %1852 = vmatmul.bf16.gmra.mxu2 %v2838_v62  ;;  %v3615_v62 = vld [vmem:[%s3936_s6 + $0x18c] sm:$0xf]  ;;  %v2998_v2 = vor.u32 %v3619_v61, %v2997_v60  ;;  %2110 = vmatpush.bf16.msrb.mxu1 %v3737_v7  ;;  %v3094_v61 = vor.u32 %v3643_v51, %v3093_v50 }
  0x3f   : > { %1941 = vmatmul.bf16.gmra.mxu3 %v2842_v63  ;;  %v2999_v63 = vld [vmem:[%s3936_s6 + $0x1a8] sm:$0xf0]  ;;  %2199 = vmatpush.bf16.msrb.mxu2 %v3745_v4 }
  0x40   : > { %v3002_v3 = vor.u32 %v3615_v62, %v2999_v63  ;;  %2288 = vmatpush.bf16.msrb.mxu3 %v3753_v6 }
  0x42   : > { %2111 = vmatpush.bf16.msrb.mxu1 %v3736_v45  ;;  %v3655_v45 = vld [vmem:[%s3936_s6 + $0x2cc] sm:$0xf] }
  0x43   : > { %2200 = vmatpush.bf16.msrb.mxu2 %v3744_v35 }
  0x4c   : > { %1679 = vmatmul.bf16.gmra.mxu0 %v2862_v8  ;;  %v3021_v8 = vld [vmem:[%s3936_s6 + $0x1c0] sm:$0xf] }
  0x4d   : > { %1768 = vmatmul.bf16.gmra.mxu1 %v2866_v9  ;;  %v3626_v9 = vld [vmem:[%s3936_s6 + $0x1dc] sm:$0xf0] }
  0x4e   : > { %1857 = vmatmul.bf16.gmra.mxu2 %v2870_v10  ;;  %v3622_v10 = vld [vmem:[%s3936_s6 + $0x1c4] sm:$0xf]  ;;  %v3022_v16 = vor.u32 %v3626_v9, %v3021_v8  ;;  %v3117_v8 = vld [vmem:[%s3936_s6 + $0x280] sm:$0xf] }
  0x4f   : > { %1946 = vmatmul.bf16.gmra.mxu3 %v2874_v11  ;;  %v3023_v11 = vld [vmem:[%s3936_s6 + $0x1e0] sm:$0xf0]  ;;  %v3650_v9 = vld [vmem:[%s3936_s6 + $0x29c] sm:$0xf0] }
  0x50   : > { %v3026_v17 = vor.u32 %v3622_v10, %v3023_v11  ;;  %v3646_v10 = vld [vmem:[%s3936_s6 + $0x284] sm:$0xf] }
  0x51   : > { %v3119_v11 = vld [vmem:[%s3936_s6 + $0x2a0] sm:$0xf0] }
  0x5c   : > { %1684 = vmatmul.bf16.gmra.mxu0 %v2894_v24  ;;  %v3061_v24 = vld [vmem:[%s3936_s6 + $0x208] sm:$0xf] }
  0x5d   : > { %1773 = vmatmul.bf16.gmra.mxu1 %v2898_v25  ;;  %v3635_v25 = vld [vmem:[%s3936_s6 + $0x224] sm:$0xf0] }
  0x5e   : > { %1862 = vmatmul.bf16.gmra.mxu2 %v2902_v26  ;;  %v3631_v26 = vld [vmem:[%s3936_s6 + $0x20c] sm:$0xf]  ;;  %v3062_v32 = vor.u32 %v3635_v25, %v3061_v24  ;;  %v3130_v24 = vor.u32 %v3647_v14, %v3127_v15 }
  0x5f   : > { %1951 = vmatmul.bf16.gmra.mxu3 %v2906_v27  ;;  %v3063_v27 = vld [vmem:[%s3936_s6 + $0x228] sm:$0xf0] }
  0x60   : > { %v3066_v33 = vor.u32 %v3631_v26, %v3063_v27  ;;  %v3743_v27 = vld [vmem:[%s4460_s1 + $0x188] sm:$0xff] }
  0x61   : > { %2201 = vmatpush.bf16.msrb.mxu2 %v3743_v27 }
  0x6c   : > { %1689 = vmatmul.bf16.gmra.mxu0 %v2926_v36  ;;  %v3728_v36 = vld [vmem:[%s4460_s1 + $0x110] sm:$0xff] }
  0x6d   : > { %1778 = vmatmul.bf16.gmra.mxu1 %v2930_v37  ;;  %v3752_v37 = vld [vmem:[%s4460_s1 + $0x1d0] sm:$0xff]  ;;  %2022 = vmatpush.bf16.msrb.mxu0 %v3728_v36 }
  0x6e   : > { %1867 = vmatmul.bf16.gmra.mxu2 %v2934_v38  ;;  %2289 = vmatpush.bf16.msrb.mxu3 %v3752_v37  ;;  %v3735_v37 = vld [vmem:[%s4460_s1 + $0x148] sm:$0xff] }
  0x6f   : > { %1956 = vmatmul.bf16.gmra.mxu3 %v2938_v39  ;;  %2112 = vmatpush.bf16.msrb.mxu1 %v3735_v37  ;;  %v3670_v37 = vld [vmem:[%s3936_s6 + $0x344] sm:$0xf] }
  0x7c   : > { %1694 = vmatmul.bf16.gmra.mxu0 %v2958_v52  ;;  %v3639_v52 = vld [vmem:[%s3936_s6 + $0x24c] sm:$0xf] }
  0x7d   : > { %1783 = vmatmul.bf16.gmra.mxu1 %v2962_v53  ;;  %v3095_v53 = vld [vmem:[%s3936_s6 + $0x268] sm:$0xf0] }
  0x7e   : > { %1872 = vmatmul.bf16.gmra.mxu2 %v2966_v54  ;;  %v3098_v62 = vor.u32 %v3639_v52, %v3095_v53 }
  0x7f   : > { %1961 = vmatmul.bf16.gmra.mxu3 %v2970_v55 }
  0x8c   : > { %1699 = vmatmul.bf16.gmra.mxu0 %v2990_v0 }
  0x8d   : > { %1788 = vmatmul.bf16.gmra.mxu1 %v2994_v1 }
  0x8e   : > { %1877 = vmatmul.bf16.gmra.mxu2 %v2998_v2 }
  0x8f   : > { %1966 = vmatmul.bf16.gmra.mxu3 %v3002_v3 }
  0x9c   : > { %1704 = vmatmul.bf16.gmra.mxu0 %v3022_v16 }
  0x9d   : > { %1793 = vmatmul.bf16.gmra.mxu1 %v3026_v17 }
  0x9e   : > { %1882 = vmatmul.bf16.gmra.mxu2 %v3030_v18  ;;  %v3118_v18 = vor.u32 %v3650_v9, %v3117_v8  ;;  %v3667_v8 = vld [vmem:[%s3936_s6 + $0x324] sm:$0xf0]  ;;  %v3663_v9 = vld [vmem:[%s3936_s6 + $0x30c] sm:$0xf] }
  0x9f   : > { %1971 = vmatmul.bf16.gmra.mxu3 %v3034_v19  ;;  %v3122_v19 = vor.u32 %v3646_v10, %v3119_v11  ;;  %v3191_v10 = vld [vmem:[%s3936_s6 + $0x328] sm:$0xf0] }
  0xa9   : > { %v1670_v30 = vpop.f32.mrf.mxu0 }
  0xaa   : > { %v1759_v31 = vpop.f32.mrf.mxu1 }
  0xab   : > { %v1760_v34 = vadd.f32 %v1759_v31, %v1670_v30 }
  0xac   : > { %1709 = vmatmul.bf16.gmra.mxu0 %v3054_v28  ;;  %v3727_v28 = vld [vmem:[%s4460_s1 + $0x108] sm:$0xff] }
  0xad   : > { %1798 = vmatmul.bf16.gmra.mxu1 %v3058_v29  ;;  %v3751_v29 = vld [vmem:[%s4460_s1 + $0x1c8] sm:$0xff]  ;;  %2023 = vmatpush.bf16.msrb.mxu0 %v3727_v28 }
  0xae   : > { %1887 = vmatmul.bf16.gmra.mxu2 %v3062_v32  ;;  %2290 = vmatpush.bf16.msrb.mxu3 %v3751_v29 }
  0xaf   : > { %1976 = vmatmul.bf16.gmra.mxu3 %v3066_v33 }
  0xb1   : > { %v1848_v38 = vpop.f32.mrf.mxu2  ;;  %v1672_v41 = vpop.f32.mrf.mxu0 }
  0xb2   : > { %v1937_v39 = vpop.f32.mrf.mxu3  ;;  %v1849_v40 = vadd.f32 %v1848_v38, %v1760_v34  ;;  %v1761_v42 = vpop.f32.mrf.mxu1  ;;  %v3149_v38 = vld [vmem:[%s3936_s6 + $0x2c0] sm:$0xf] }
  0xb3   : > { %v1762_v43 = vadd.f32 %v1761_v42, %v1672_v41  ;;  %v3151_v41 = vld [vmem:[%s3936_s6 + $0x2e0] sm:$0xf0]  ;;  %v3157_v42 = vld [vmem:[%s3936_s6 + $0x2c8] sm:$0xf] }
  0xb4   : > { %v4097_v44 = vadd.f32 %v1937_v39, %v1849_v40  ;;  %v3658_v39 = vld [vmem:[%s3936_s6 + $0x2dc] sm:$0xf0]  ;;  %v3654_v40 = vld [vmem:[%s3936_s6 + $0x2c4] sm:$0xf] }
  0xb5   : > { %v3150_v49 = vor.u32 %v3658_v39, %v3149_v38  ;;  %v3154_v50 = vor.u32 %v3654_v40, %v3151_v41  ;;  %v3215_v38 = vld [vmem:[%s3936_s6 + $0x360] sm:$0xf0]  ;;  %v3221_v39 = vld [vmem:[%s3936_s6 + $0x348] sm:$0xf]  ;;  %v3671_v41 = vld [vmem:[%s3936_s6 + $0x34c] sm:$0xf] }
  0xb6   : > { %v3675_v40 = vld [vmem:[%s3936_s6 + $0x364] sm:$0xf0] }
  0xb9   : > { %v1850_v54 = vpop.f32.mrf.mxu2  ;;  %v1675_v59 = vpop.f32.mrf.mxu0 }
  0xba   : > { %v1939_v55 = vpop.f32.mrf.mxu3  ;;  %v1851_v58 = vadd.f32 %v1850_v54, %v1762_v43  ;;  %v1764_v60 = vpop.f32.mrf.mxu1  ;;  %v3659_v43 = vld [vmem:[%s3936_s6 + $0x2e4] sm:$0xf0] }
  0xbb   : > { %v1765_v63 = vadd.f32 %v1764_v60, %v1675_v59  ;;  %v3158_v54 = vor.u32 %v3659_v43, %v3157_v42  ;;  %v3223_v42 = vld [vmem:[%s3936_s6 + $0x368] sm:$0xf0] }
  0xbc   : > { %v4110_v0 = vadd.f32 %v1939_v55, %v1851_v58  ;;  %1714 = vmatmul.bf16.gmra.mxu0 %v3086_v56  ;;  %v3162_v55 = vor.u32 %v3655_v45, %v3159_v46 }
  0xbd   : > { %1803 = vmatmul.bf16.gmra.mxu1 %v3090_v57 }
  0xbe   : > { %1892 = vmatmul.bf16.gmra.mxu2 %v3094_v61 }
  0xbf   : > { %1981 = vmatmul.bf16.gmra.mxu3 %v3098_v62 }
  0xc1   : > { %v1853_v1 = vpop.f32.mrf.mxu2  ;;  %v1677_v4 = vpop.f32.mrf.mxu0 }
  0xc2   : > { %v1942_v2 = vpop.f32.mrf.mxu3  ;;  %v1854_v3 = vadd.f32 %v1853_v1, %v1765_v63  ;;  %v1766_v5 = vpop.f32.mrf.mxu1 }
  0xc3   : > { %v1767_v6 = vadd.f32 %v1766_v5, %v1677_v4  ;;  %v3662_v4 = vld [vmem:[%s3936_s6 + $0x304] sm:$0xf] }
  0xc4   : > { %v4112_v7 = vadd.f32 %v1942_v2, %v1854_v3  ;;  %v3181_v2 = vld [vmem:[%s3936_s6 + $0x300] sm:$0xf]  ;;  %v3183_v5 = vld [vmem:[%s3936_s6 + $0x320] sm:$0xf0] }
  0xc5   : > { %v3666_v3 = vld [vmem:[%s3936_s6 + $0x31c] sm:$0xf0]  ;;  %v3186_v14 = vor.u32 %v3662_v4, %v3183_v5  ;;  %v3247_v4 = vld [vmem:[%s3936_s6 + $0x3a0] sm:$0xf0]  ;;  %v3253_v5 = vld [vmem:[%s3936_s6 + $0x388] sm:$0xf] }
  0xc6   : > { %v3182_v13 = vor.u32 %v3666_v3, %v3181_v2  ;;  %v3682_v2 = vld [vmem:[%s3936_s6 + $0x39c] sm:$0xf0]  ;;  %v3678_v3 = vld [vmem:[%s3936_s6 + $0x384] sm:$0xf] }
  0xc9   : > { %v1855_v16 = vpop.f32.mrf.mxu2  ;;  %v1680_v21 = vpop.f32.mrf.mxu0 }
  0xca   : > { %v1944_v17 = vpop.f32.mrf.mxu3  ;;  %v1856_v20 = vadd.f32 %v1855_v16, %v1767_v6  ;;  %v1769_v22 = vpop.f32.mrf.mxu1  ;;  %v3189_v6 = vld [vmem:[%s3936_s6 + $0x308] sm:$0xf] }
  0xcb   : > { %v1770_v25 = vadd.f32 %v1769_v22, %v1680_v21  ;;  %v3742_v22 = vld [vmem:[%s4460_s1 + $0x180] sm:$0xff] }
  0xcc   : > { %v4122_v26 = vadd.f32 %v1944_v17, %v1856_v20  ;;  %1719 = vmatmul.bf16.gmra.mxu0 %v3118_v18  ;;  %v3190_v18 = vor.u32 %v3667_v8, %v3189_v6  ;;  %2202 = vmatpush.bf16.msrb.mxu2 %v3742_v22  ;;  %v3683_v6 = vld [vmem:[%s3936_s6 + $0x3a4] sm:$0xf0]  ;;  %v3679_v8 = vld [vmem:[%s3936_s6 + $0x38c] sm:$0xf] }
  0xcd   : > { %1808 = vmatmul.bf16.gmra.mxu1 %v3122_v19  ;;  %v3194_v19 = vor.u32 %v3663_v9, %v3191_v10  ;;  %v3255_v9 = vld [vmem:[%s3936_s6 + $0x3a8] sm:$0xf0] }
  0xce   : > { %1897 = vmatmul.bf16.gmra.mxu2 %v3126_v23  ;;  %v3726_v23 = vld [vmem:[%s4460_s1 + $0x100] sm:$0xff] }
  0xcf   : > { %1986 = vmatmul.bf16.gmra.mxu3 %v3130_v24  ;;  %v3750_v24 = vld [vmem:[%s4460_s1 + $0x1c0] sm:$0xff]  ;;  %2024 = vmatpush.bf16.msrb.mxu0 %v3726_v23 }
  0xd0   : > { %2291 = vmatpush.bf16.msrb.mxu3 %v3750_v24 }
  0xd1   : > { %v1858_v30 = vpop.f32.mrf.mxu2  ;;  %v1682_v33 = vpop.f32.mrf.mxu0 }
  0xd2   : > { %v1947_v31 = vpop.f32.mrf.mxu3  ;;  %v1859_v32 = vadd.f32 %v1858_v30, %v1770_v25  ;;  %v1771_v34 = vpop.f32.mrf.mxu1 }
  0xd3   : > { %v1772_v35 = vadd.f32 %v1771_v34, %v1682_v33  ;;  %v3734_v33 = vld [vmem:[%s4460_s1 + $0x140] sm:$0xff] }
  0xd4   : > { %v4133_v36 = vadd.f32 %v1947_v31, %v1859_v32  ;;  %v3213_v34 = vld [vmem:[%s3936_s6 + $0x340] sm:$0xf]  ;;  %2113 = vmatpush.bf16.msrb.mxu1 %v3734_v33  ;;  %v3686_v33 = vld [vmem:[%s3936_s6 + $0x3c4] sm:$0xf] }
  0xd9   : > { %v1860_v47 = vpop.f32.mrf.mxu2  ;;  %v1685_v52 = vpop.f32.mrf.mxu0 }
  0xda   : > { %v1949_v48 = vpop.f32.mrf.mxu3  ;;  %v1861_v51 = vadd.f32 %v1860_v47, %v1772_v35  ;;  %v1774_v53 = vpop.f32.mrf.mxu1  ;;  %v3674_v35 = vld [vmem:[%s3936_s6 + $0x35c] sm:$0xf0]  ;;  %v3218_v47 = vor.u32 %v3670_v37, %v3215_v38  ;;  %v3691_v37 = vld [vmem:[%s3936_s6 + $0x3e4] sm:$0xf0]  ;;  %v3687_v38 = vld [vmem:[%s3936_s6 + $0x3cc] sm:$0xf] }
  0xdb   : > { %v1775_v56 = vadd.f32 %v1774_v53, %v1685_v52  ;;  %v3214_v46 = vor.u32 %v3674_v35, %v3213_v34  ;;  %v3226_v52 = vor.u32 %v3671_v41, %v3223_v42  ;;  %v3279_v34 = vld [vmem:[%s3936_s6 + $0x3e0] sm:$0xf0]  ;;  %v3285_v35 = vld [vmem:[%s3936_s6 + $0x3c8] sm:$0xf] }
  0xdc   : > { %v4146_v57 = vadd.f32 %v1949_v48, %v1861_v51  ;;  %1724 = vmatmul.bf16.gmra.mxu0 %v3150_v49  ;;  %v3222_v51 = vor.u32 %v3675_v40, %v3221_v39  ;;  %v3287_v39 = vld [vmem:[%s3936_s6 + $0x3e8] sm:$0xf0] }
  0xdd   : > { %1813 = vmatmul.bf16.gmra.mxu1 %v3154_v50 }
  0xde   : > { %1902 = vmatmul.bf16.gmra.mxu2 %v3158_v54 }
  0xdf   : > { %1991 = vmatmul.bf16.gmra.mxu3 %v3162_v55 }
  0xe1   : > { %v1863_v58 = vpop.f32.mrf.mxu2  ;;  %v1687_v61 = vpop.f32.mrf.mxu0 }
  0xe2   : > { %v1952_v59 = vpop.f32.mrf.mxu3  ;;  %v1864_v60 = vadd.f32 %v1863_v58, %v1775_v56  ;;  %v1776_v62 = vpop.f32.mrf.mxu1 }
  0xe3   : > { %v1777_v63 = vadd.f32 %v1776_v62, %v1687_v61 }
  0xe4   : > { %v4148_v1 = vadd.f32 %v1952_v59, %v1864_v60 }
  0xe9   : > { %v1865_v11 = vpop.f32.mrf.mxu2  ;;  %v1690_v16 = vpop.f32.mrf.mxu0 }
  0xea   : > { %v1954_v12 = vpop.f32.mrf.mxu3  ;;  %v1866_v15 = vadd.f32 %v1865_v11, %v1777_v63  ;;  %v1779_v17 = vpop.f32.mrf.mxu1  ;;  %v3245_v63 = vld [vmem:[%s3936_s6 + $0x380] sm:$0xf] }
  0xeb   : > { %v1780_v20 = vadd.f32 %v1779_v17, %v1690_v16  ;;  %v3254_v17 = vor.u32 %v3683_v6, %v3253_v5  ;;  %v3573_v5 = vld [vmem:[%s3936_s6 + $0x34] sm:$0xf0]  ;;  %v3569_v6 = vld [vmem:[%s3936_s6 + $0x1c] sm:$0xf] }
  0xec   : > { %v4158_v21 = vadd.f32 %v1954_v12, %v1866_v15  ;;  %1729 = vmatmul.bf16.gmra.mxu0 %v3182_v13  ;;  %v3246_v12 = vor.u32 %v3682_v2, %v3245_v63  ;;  %v3250_v13 = vor.u32 %v3678_v3, %v3247_v4  ;;  %v3572_v63 = vld [vmem:[%s3936_s6 + $0x2c] sm:$0xf0]  ;;  %v3568_v2 = vld [vmem:[%s3936_s6 + $0x14] sm:$0xf]  ;;  %v2821_v4 = vld [vmem:[%s3936_s6 + $0x18] sm:$0xf] }
  0xed   : > { %1818 = vmatmul.bf16.gmra.mxu1 %v3186_v14  ;;  %v2815_v3 = vld [vmem:[%s3936_s6 + $0x30] sm:$0xf0] }
  0xee   : > { %1907 = vmatmul.bf16.gmra.mxu2 %v3190_v18  ;;  %v3258_v18 = vor.u32 %v3679_v8, %v3255_v9  ;;  %v2823_v8 = vld [vmem:[%s3936_s6 + $0x38] sm:$0xf0] }
  0xef   : > { %1996 = vmatmul.bf16.gmra.mxu3 %v3194_v19 }
  0xf1   : > { %v1868_v25 = vpop.f32.mrf.mxu2  ;;  %v1692_v29 = vpop.f32.mrf.mxu0 }
  0xf2   : > { %v1957_v27 = vpop.f32.mrf.mxu3  ;;  %v1869_v28 = vadd.f32 %v1868_v25, %v1780_v20  ;;  %v1781_v30 = vpop.f32.mrf.mxu1 }
  0xf3   : > { %v1782_v31 = vadd.f32 %v1781_v30, %v1692_v29  ;;  %v3277_v30 = vld [vmem:[%s3936_s6 + $0x3c0] sm:$0xf] }
  0xf4   : > { %v4169_v32 = vadd.f32 %v1957_v27, %v1869_v28 }
  0xf9   : > { %v1870_v43 = vpop.f32.mrf.mxu2  ;;  %v1695_v49 = vpop.f32.mrf.mxu0 }
  0xfa   : > { %v1959_v45 = vpop.f32.mrf.mxu3  ;;  %v1871_v48 = vadd.f32 %v1870_v43, %v1782_v31  ;;  %v1784_v50 = vpop.f32.mrf.mxu1  ;;  %v3690_v31 = vld [vmem:[%s3936_s6 + $0x3dc] sm:$0xf0]  ;;  %v3282_v43 = vor.u32 %v3686_v33, %v3279_v34  ;;  %v3580_v33 = vld [vmem:[%s3936_s6 + $0x6c] sm:$0xf0]  ;;  %v3576_v34 = vld [vmem:[%s3936_s6 + $0x54] sm:$0xf] }
  0xfb   : > { %v1785_v53 = vadd.f32 %v1784_v50, %v1695_v49  ;;  %v3278_v42 = vor.u32 %v3690_v31, %v3277_v30  ;;  %v3290_v49 = vor.u32 %v3687_v38, %v3287_v39  ;;  %v2845_v31 = vld [vmem:[%s3936_s6 + $0x50] sm:$0xf]  ;;  %v3581_v38 = vld [vmem:[%s3936_s6 + $0x74] sm:$0xf0]  ;;  %v3577_v39 = vld [vmem:[%s3936_s6 + $0x5c] sm:$0xf] }
  0xfc   : > { %v4182_v54 = vadd.f32 %v1959_v45, %v1871_v48  ;;  %1734 = vmatmul.bf16.gmra.mxu0 %v3214_v46  ;;  %v3286_v48 = vor.u32 %v3691_v37, %v3285_v35  ;;  %v2847_v35 = vld [vmem:[%s3936_s6 + $0x70] sm:$0xf0]  ;;  %v2853_v37 = vld [vmem:[%s3936_s6 + $0x58] sm:$0xf] }
  0xfd   : > { %1823 = vmatmul.bf16.gmra.mxu1 %v3218_v47 }
  0xfe   : > { %1912 = vmatmul.bf16.gmra.mxu2 %v3222_v51 }
  0xff   : > { %2001 = vmatmul.bf16.gmra.mxu3 %v3226_v52 }
 0x101   : > { %v1873_v55 = vpop.f32.mrf.mxu2  ;;  %v1697_v59 = vpop.f32.mrf.mxu0 }
 0x102   : > { %v1962_v56 = vpop.f32.mrf.mxu3  ;;  %v1874_v58 = vadd.f32 %v1873_v55, %v1785_v53  ;;  %v1786_v60 = vpop.f32.mrf.mxu1 }
 0x103   : > { %v1787_v61 = vadd.f32 %v1786_v60, %v1697_v59 }
 0x104   : > { %v4184_v62 = vadd.f32 %v1962_v56, %v1874_v58 }
 0x109   : > { %v1875_v10 = vpop.f32.mrf.mxu2  ;;  %v1700_v15 = vpop.f32.mrf.mxu0 }
 0x10a   : > { %v1964_v11 = vpop.f32.mrf.mxu3  ;;  %v1876_v14 = vadd.f32 %v1875_v10, %v1787_v61  ;;  %v1789_v16 = vpop.f32.mrf.mxu1  ;;  %v2813_v61 = vld [vmem:[%s3936_s6 + $0x10] sm:$0xf] }
 0x10b   : > { %v1790_v19 = vadd.f32 %v1789_v16, %v1700_v15  ;;  %v2822_v16 = vor.u32 %v3573_v5, %v2821_v4  ;;  %v3588_v4 = vld [vmem:[%s3936_s6 + $0xac] sm:$0xf0]  ;;  %v3584_v5 = vld [vmem:[%s3936_s6 + $0x94] sm:$0xf] }
 0x10c   : > { %v4194_v20 = vadd.f32 %v1964_v11, %v1876_v14  ;;  %1739 = vmatmul.bf16.gmra.mxu0 %v3246_v12  ;;  %v2814_v11 = vor.u32 %v3572_v63, %v2813_v61  ;;  %v2818_v12 = vor.u32 %v3568_v2, %v2815_v3  ;;  %v2877_v3 = vld [vmem:[%s3936_s6 + $0x90] sm:$0xf] }
 0x10d   : > { %1828 = vmatmul.bf16.gmra.mxu1 %v3250_v13 }
 0x10e   : > { %1917 = vmatmul.bf16.gmra.mxu2 %v3254_v17  ;;  %v2826_v17 = vor.u32 %v3569_v6, %v2823_v8  ;;  %v2879_v6 = vld [vmem:[%s3936_s6 + $0xb0] sm:$0xf0]  ;;  %v2885_v8 = vld [vmem:[%s3936_s6 + $0x98] sm:$0xf] }
 0x10f   : > { %2006 = vmatmul.bf16.gmra.mxu3 %v3258_v18 }
 0x111   : > { %v1878_v22 = vpop.f32.mrf.mxu2  ;;  %v1702_v25 = vpop.f32.mrf.mxu0 }
 0x112   : > { %v1967_v23 = vpop.f32.mrf.mxu3  ;;  %v1879_v24 = vadd.f32 %v1878_v22, %v1790_v19  ;;  %v1791_v27 = vpop.f32.mrf.mxu1 }
 0x113   : > { %v1792_v28 = vadd.f32 %v1791_v27, %v1702_v25 }
 0x114   : > { %v4196_v29 = vadd.f32 %v1967_v23, %v1879_v24 }
 0x119   : > { %v1880_v40 = vpop.f32.mrf.mxu2  ;;  %v1705_v46 = vpop.f32.mrf.mxu0 }
 0x11a   : > { %v1969_v41 = vpop.f32.mrf.mxu3  ;;  %v1881_v45 = vadd.f32 %v1880_v40, %v1792_v28  ;;  %v1794_v47 = vpop.f32.mrf.mxu1  ;;  %v2855_v40 = vld [vmem:[%s3936_s6 + $0x78] sm:$0xf0] }
 0x11b   : > { %v1795_v50 = vadd.f32 %v1794_v47, %v1705_v46 }
 0x11c   : > { %v4206_v51 = vadd.f32 %v1969_v41, %v1881_v45  ;;  %1744 = vmatmul.bf16.gmra.mxu0 %v3278_v42  ;;  %v2850_v45 = vor.u32 %v3576_v34, %v2847_v35 }
 0x11d   : > { %1833 = vmatmul.bf16.gmra.mxu1 %v3282_v43  ;;  %v2846_v43 = vor.u32 %v3580_v33, %v2845_v31 }
 0x11e   : > { %1922 = vmatmul.bf16.gmra.mxu2 %v3286_v48 }
 0x11f   : > { %2011 = vmatmul.bf16.gmra.mxu3 %v3290_v49  ;;  %v2854_v49 = vor.u32 %v3581_v38, %v2853_v37  ;;  %v2909_v38 = vld [vmem:[%s3936_s6 + $0xd0] sm:$0xf] }
 0x121   : > { %v1883_v52 = vpop.f32.mrf.mxu2  ;;  %v1707_v56 = vpop.f32.mrf.mxu0 }
 0x122   : > { %v1972_v53 = vpop.f32.mrf.mxu3  ;;  %v1884_v55 = vadd.f32 %v1883_v52, %v1795_v50  ;;  %v1796_v58 = vpop.f32.mrf.mxu1  ;;  %v2858_v50 = vor.u32 %v3577_v39, %v2855_v40  ;;  %v3596_v39 = vld [vmem:[%s3936_s6 + $0xec] sm:$0xf0]  ;;  %v3592_v40 = vld [vmem:[%s3936_s6 + $0xd4] sm:$0xf] }
 0x123   : > { %v1797_v59 = vadd.f32 %v1796_v58, %v1707_v56 }
 0x124   : > { %v4208_v60 = vadd.f32 %v1972_v53, %v1884_v55 }
 0x129   : > { %v1885_v9 = vpop.f32.mrf.mxu2  ;;  %v1710_v14 = vpop.f32.mrf.mxu0 }
 0x12a   : > { %v1974_v10 = vpop.f32.mrf.mxu3  ;;  %v1886_v13 = vadd.f32 %v1885_v9, %v1797_v59  ;;  %v1799_v15 = vpop.f32.mrf.mxu1  ;;  %v3589_v9 = vld [vmem:[%s3936_s6 + $0xb4] sm:$0xf0] }
 0x12b   : > { %v1800_v18 = vadd.f32 %v1799_v15, %v1710_v14  ;;  %v2878_v14 = vor.u32 %v3588_v4, %v2877_v3  ;;  %v2882_v15 = vor.u32 %v3584_v5, %v2879_v6 }
 0x12c   : > { %v4218_v19 = vadd.f32 %v1974_v10, %v1886_v13  ;;  %2025 = vmatmul.bf16.vlgmr.msrb.gmra.mxu0 %v2814_v11  ;;  %v3585_v10 = vld [vmem:[%s3936_s6 + $0x9c] sm:$0xf] }
 0x12d   : > { %2114 = vmatmul.bf16.vlgmr.msrb.gmra.mxu1 %v2818_v12  ;;  %v2887_v11 = vld [vmem:[%s3936_s6 + $0xb8] sm:$0xf0] }
 0x12e   : > { %2203 = vmatmul.bf16.vlgmr.msrb.gmra.mxu2 %v2822_v16 }
 0x12f   : > { %2292 = vmatmul.bf16.vlgmr.msrb.gmra.mxu3 %v2826_v17 }
 0x131   : > { %v1888_v22 = vpop.f32.mrf.mxu2  ;;  %v1712_v25 = vpop.f32.mrf.mxu0 }
 0x132   : > { %v1977_v23 = vpop.f32.mrf.mxu3  ;;  %v1889_v24 = vadd.f32 %v1888_v22, %v1800_v18  ;;  %v1801_v27 = vpop.f32.mrf.mxu1  ;;  %v2886_v22 = vor.u32 %v3589_v9, %v2885_v8 }
 0x133   : > { %v1802_v28 = vadd.f32 %v1801_v27, %v1712_v25 }
 0x134   : > { %v4220_v30 = vadd.f32 %v1977_v23, %v1889_v24  ;;  %v2890_v23 = vor.u32 %v3585_v10, %v2887_v11  ;;  %v2941_v11 = vld [vmem:[%s3936_s6 + $0x110] sm:$0xf] }
 0x139   : > { %v1890_v41 = vpop.f32.mrf.mxu2  ;;  %v1715_v47 = vpop.f32.mrf.mxu0 }
 0x13a   : > { %v1979_v42 = vpop.f32.mrf.mxu3  ;;  %v1891_v46 = vadd.f32 %v1890_v41, %v1802_v28  ;;  %v1804_v48 = vpop.f32.mrf.mxu1  ;;  %v2911_v41 = vld [vmem:[%s3936_s6 + $0xf0] sm:$0xf0] }
 0x13b   : > { %v1805_v52 = vadd.f32 %v1804_v48, %v1715_v47 }
 0x13c   : > { %v4230_v53 = vadd.f32 %v1979_v42, %v1891_v46  ;;  %2030 = vmatmul.bf16.gmra.mxu0 %v2846_v43  ;;  %v2917_v42 = vld [vmem:[%s3936_s6 + $0xd8] sm:$0xf]  ;;  %v2919_v46 = vld [vmem:[%s3936_s6 + $0xf8] sm:$0xf0] }
 0x13d   : > { %2119 = vmatmul.bf16.gmra.mxu1 %v2850_v45  ;;  %v3597_v43 = vld [vmem:[%s3936_s6 + $0xf4] sm:$0xf0]  ;;  %v3593_v45 = vld [vmem:[%s3936_s6 + $0xdc] sm:$0xf] }
 0x13e   : > { %2208 = vmatmul.bf16.gmra.mxu2 %v2854_v49  ;;  %v2910_v49 = vor.u32 %v3596_v39, %v2909_v38 }
 0x13f   : > { %2297 = vmatmul.bf16.gmra.mxu3 %v2858_v50  ;;  %v2914_v50 = vor.u32 %v3592_v40, %v2911_v41 }
 0x141   : > { %v1893_v55 = vpop.f32.mrf.mxu2  ;;  %v1717_v59 = vpop.f32.mrf.mxu0 }
 0x142   : > { %v1982_v56 = vpop.f32.mrf.mxu3  ;;  %v1894_v58 = vadd.f32 %v1893_v55, %v1805_v52  ;;  %v1806_v61 = vpop.f32.mrf.mxu1 }
 0x143   : > { %v1807_v63 = vadd.f32 %v1806_v61, %v1717_v59  ;;  %v2922_v59 = vor.u32 %v3593_v45, %v2919_v46 }
 0x144   : > { %v4232_v2 = vadd.f32 %v1982_v56, %v1894_v58  ;;  %v2918_v58 = vor.u32 %v3597_v43, %v2917_v42 }
 0x149   : > { %v1895_v12 = vpop.f32.mrf.mxu2  ;;  %v1720_v17 = vpop.f32.mrf.mxu0 }
 0x14a   : > { %v1984_v13 = vpop.f32.mrf.mxu3  ;;  %v1896_v16 = vadd.f32 %v1895_v12, %v1807_v63  ;;  %v1809_v18 = vpop.f32.mrf.mxu1  ;;  %v3604_v12 = vld [vmem:[%s3936_s6 + $0x12c] sm:$0xf0] }
 0x14b   : > { %v1810_v24 = vadd.f32 %v1809_v18, %v1720_v17  ;;  %v3601_v17 = vld [vmem:[%s3936_s6 + $0x11c] sm:$0xf] }
 0x14c   : > { %v4242_v25 = vadd.f32 %v1984_v13, %v1896_v16  ;;  %2035 = vmatmul.bf16.gmra.mxu0 %v2878_v14  ;;  %v3600_v13 = vld [vmem:[%s3936_s6 + $0x114] sm:$0xf]  ;;  %v3605_v16 = vld [vmem:[%s3936_s6 + $0x134] sm:$0xf0]  ;;  %v2951_v18 = vld [vmem:[%s3936_s6 + $0x138] sm:$0xf0] }
 0x14d   : > { %2124 = vmatmul.bf16.gmra.mxu1 %v2882_v15  ;;  %v2943_v14 = vld [vmem:[%s3936_s6 + $0x130] sm:$0xf0]  ;;  %v2949_v15 = vld [vmem:[%s3936_s6 + $0x118] sm:$0xf] }
 0x14e   : > { %2213 = vmatmul.bf16.gmra.mxu2 %v2886_v22 }
 0x14f   : > { %2302 = vmatmul.bf16.gmra.mxu3 %v2890_v23 }
 0x151   : > { %v1898_v27 = vpop.f32.mrf.mxu2  ;;  %v1722_v33 = vpop.f32.mrf.mxu0 }
 0x152   : > { %v1987_v28 = vpop.f32.mrf.mxu3  ;;  %v1899_v31 = vadd.f32 %v1898_v27, %v1810_v24  ;;  %v1811_v34 = vpop.f32.mrf.mxu1  ;;  %v2942_v24 = vor.u32 %v3604_v12, %v2941_v11  ;;  %v2946_v27 = vor.u32 %v3600_v13, %v2943_v14 }
 0x153   : > { %v1812_v35 = vadd.f32 %v1811_v34, %v1722_v33  ;;  %v2950_v34 = vor.u32 %v3605_v16, %v2949_v15 }
 0x154   : > { %v4244_v37 = vadd.f32 %v1987_v28, %v1899_v31 }
 0x159   : > { %v1900_v47 = vpop.f32.mrf.mxu2  ;;  %v1725_v55 = vpop.f32.mrf.mxu0 }
 0x15a   : > { %v1989_v48 = vpop.f32.mrf.mxu3  ;;  %v1901_v52 = vadd.f32 %v1900_v47, %v1812_v35  ;;  %v1814_v56 = vpop.f32.mrf.mxu1  ;;  %v2954_v35 = vor.u32 %v3601_v17, %v2951_v18 }
 0x15b   : > { %v1815_v61 = vadd.f32 %v1814_v56, %v1725_v55  ;;  %v2981_v55 = vld [vmem:[%s3936_s6 + $0x158] sm:$0xf] }
 0x15c   : > { %v4254_v63 = vadd.f32 %v1989_v48, %v1901_v52  ;;  %2040 = vmatmul.bf16.gmra.mxu0 %v2910_v49  ;;  %v2973_v48 = vld [vmem:[%s3936_s6 + $0x150] sm:$0xf]  ;;  %v2975_v52 = vld [vmem:[%s3936_s6 + $0x170] sm:$0xf0]  ;;  %v3613_v56 = vld [vmem:[%s3936_s6 + $0x174] sm:$0xf0] }
 0x15d   : > { %2129 = vmatmul.bf16.gmra.mxu1 %v2914_v50  ;;  %v3612_v49 = vld [vmem:[%s3936_s6 + $0x16c] sm:$0xf0]  ;;  %v3608_v50 = vld [vmem:[%s3936_s6 + $0x154] sm:$0xf]  ;;  %v2982_v11 = vor.u32 %v3613_v56, %v2981_v55 }
 0x15e   : > { %2218 = vmatmul.bf16.gmra.mxu2 %v2918_v58  ;;  %v3609_v58 = vld [vmem:[%s3936_s6 + $0x15c] sm:$0xf] }
 0x15f   : > { %2307 = vmatmul.bf16.gmra.mxu3 %v2922_v59  ;;  %v2983_v59 = vld [vmem:[%s3936_s6 + $0x178] sm:$0xf0] }
 0x160   : > { %v2986_v12 = vor.u32 %v3609_v58, %v2983_v59 }
 0x161   : > { %v1903_v3 = vpop.f32.mrf.mxu2  ;;  %v1727_v6 = vpop.f32.mrf.mxu0 }
 0x162   : > { %v1992_v4 = vpop.f32.mrf.mxu3  ;;  %v1904_v5 = vadd.f32 %v1903_v3, %v1815_v61  ;;  %v1816_v8 = vpop.f32.mrf.mxu1 }
 0x163   : > { %v1817_v9 = vadd.f32 %v1816_v8, %v1727_v6 }
 0x164   : > { %v4256_v10 = vadd.f32 %v1992_v4, %v1904_v5  ;;  %v2974_v4 = vor.u32 %v3612_v49, %v2973_v48  ;;  %v2978_v5 = vor.u32 %v3608_v50, %v2975_v52 }
 0x169   : > { %v1905_v22 = vpop.f32.mrf.mxu2  ;;  %v1730_v31 = vpop.f32.mrf.mxu0 }
 0x16a   : > { %v1994_v23 = vpop.f32.mrf.mxu3  ;;  %v1906_v28 = vadd.f32 %v1905_v22, %v1817_v9  ;;  %v1819_v33 = vpop.f32.mrf.mxu1 }
 0x16b   : > { %v1820_v38 = vadd.f32 %v1819_v33, %v1730_v31  ;;  %v3616_v31 = vld [vmem:[%s3936_s6 + $0x194] sm:$0xf] }
 0x16c   : > { %v4266_v39 = vadd.f32 %v1994_v23, %v1906_v28  ;;  %2045 = vmatmul.bf16.gmra.mxu0 %v2942_v24  ;;  %v3620_v28 = vld [vmem:[%s3936_s6 + $0x1ac] sm:$0xf0]  ;;  %v3007_v33 = vld [vmem:[%s3936_s6 + $0x1b0] sm:$0xf0] }
 0x16d   : > { %2134 = vmatmul.bf16.gmra.mxu1 %v2946_v27  ;;  %v3005_v27 = vld [vmem:[%s3936_s6 + $0x190] sm:$0xf] }
 0x16e   : > { %2223 = vmatmul.bf16.gmra.mxu2 %v2950_v34  ;;  %v3013_v34 = vld [vmem:[%s3936_s6 + $0x198] sm:$0xf] }
 0x16f   : > { %2312 = vmatmul.bf16.gmra.mxu3 %v2954_v35  ;;  %v3621_v35 = vld [vmem:[%s3936_s6 + $0x1b4] sm:$0xf0] }
 0x170   : > { %v3014_v50 = vor.u32 %v3621_v35, %v3013_v34 }
 0x171   : > { %v1908_v40 = vpop.f32.mrf.mxu2  ;;  %v1732_v43 = vpop.f32.mrf.mxu0 }
 0x172   : > { %v1997_v41 = vpop.f32.mrf.mxu3  ;;  %v1909_v42 = vadd.f32 %v1908_v40, %v1820_v38  ;;  %v1821_v45 = vpop.f32.mrf.mxu1  ;;  %v3617_v38 = vld [vmem:[%s3936_s6 + $0x19c] sm:$0xf] }
 0x173   : > { %v1822_v46 = vadd.f32 %v1821_v45, %v1732_v43  ;;  %v3015_v40 = vld [vmem:[%s3936_s6 + $0x1b8] sm:$0xf0]  ;;  %v3006_v43 = vor.u32 %v3620_v28, %v3005_v27  ;;  %v3010_v45 = vor.u32 %v3616_v31, %v3007_v33 }
 0x174   : > { %v4268_v47 = vadd.f32 %v1997_v41, %v1909_v42  ;;  %v3018_v52 = vor.u32 %v3617_v38, %v3015_v40 }
 0x179   : > { %v1910_v61 = vpop.f32.mrf.mxu2  ;;  %v1735_v8 = vpop.f32.mrf.mxu0 }
 0x17a   : > { %v1999_v3 = vpop.f32.mrf.mxu3  ;;  %v1911_v6 = vadd.f32 %v1910_v61, %v1822_v46  ;;  %v1824_v9 = vpop.f32.mrf.mxu1 }
 0x17b   : > { %v1825_v13 = vadd.f32 %v1824_v9, %v1735_v8  ;;  %v3037_v8 = vld [vmem:[%s3936_s6 + $0x1d0] sm:$0xf] }
 0x17c   : > { %v4278_v14 = vadd.f32 %v1999_v3, %v1911_v6  ;;  %2050 = vmatmul.bf16.gmra.mxu0 %v2974_v4  ;;  %v3628_v9 = vld [vmem:[%s3936_s6 + $0x1ec] sm:$0xf0] }
 0x17d   : > { %2139 = vmatmul.bf16.gmra.mxu1 %v2978_v5 }
 0x17e   : > { %2228 = vmatmul.bf16.gmra.mxu2 %v2982_v11  ;;  %v3624_v11 = vld [vmem:[%s3936_s6 + $0x1d4] sm:$0xf] }
 0x17f   : > { %2317 = vmatmul.bf16.gmra.mxu3 %v2986_v12  ;;  %v3039_v12 = vld [vmem:[%s3936_s6 + $0x1f0] sm:$0xf0] }
 0x180   : > { %v3042_v27 = vor.u32 %v3624_v11, %v3039_v12 }
 0x181   : > { %v1913_v15 = vpop.f32.mrf.mxu2  ;;  %v1737_v18 = vpop.f32.mrf.mxu0 }
 0x182   : > { %v2002_v16 = vpop.f32.mrf.mxu3  ;;  %v1914_v17 = vadd.f32 %v1913_v15, %v1825_v13  ;;  %v1826_v22 = vpop.f32.mrf.mxu1  ;;  %v3045_v13 = vld [vmem:[%s3936_s6 + $0x1d8] sm:$0xf] }
 0x183   : > { %v1827_v23 = vadd.f32 %v1826_v22, %v1737_v18  ;;  %v3629_v15 = vld [vmem:[%s3936_s6 + $0x1f4] sm:$0xf0] }
 0x184   : > { %v4280_v24 = vadd.f32 %v2002_v16, %v1914_v17  ;;  %v3625_v16 = vld [vmem:[%s3936_s6 + $0x1dc] sm:$0xf]  ;;  %v3046_v34 = vor.u32 %v3629_v15, %v3045_v13 }
 0x185   : > { %v3047_v17 = vld [vmem:[%s3936_s6 + $0x1f8] sm:$0xf0] }
 0x186   : > { %v3050_v35 = vor.u32 %v3625_v16, %v3047_v17 }
 0x189   : > { %v1915_v41 = vpop.f32.mrf.mxu2  ;;  %v1740_v48 = vpop.f32.mrf.mxu0 }
 0x18a   : > { %v2004_v42 = vpop.f32.mrf.mxu3  ;;  %v1916_v46 = vadd.f32 %v1915_v41, %v1827_v23  ;;  %v1829_v49 = vpop.f32.mrf.mxu1  ;;  %v3038_v23 = vor.u32 %v3628_v9, %v3037_v8 }
 0x18b   : > { %v1830_v55 = vadd.f32 %v1829_v49, %v1740_v48 }
 0x18c   : > { %v4290_v56 = vadd.f32 %v2004_v42, %v1916_v46  ;;  %2055 = vmatmul.bf16.gmra.mxu0 %v3006_v43 }
 0x18d   : > { %2144 = vmatmul.bf16.gmra.mxu1 %v3010_v45 }
 0x18e   : > { %2233 = vmatmul.bf16.gmra.mxu2 %v3014_v50  ;;  %v3069_v50 = vld [vmem:[%s3936_s6 + $0x210] sm:$0xf] }
 0x18f   : > { %2322 = vmatmul.bf16.gmra.mxu3 %v3018_v52  ;;  %v3636_v52 = vld [vmem:[%s3936_s6 + $0x22c] sm:$0xf0] }
 0x190   : > { %v3070_v9 = vor.u32 %v3636_v52, %v3069_v50  ;;  %v3111_v50 = vld [vmem:[%s3936_s6 + $0x278] sm:$0xf0] }
 0x191   : > { %v1918_v58 = vpop.f32.mrf.mxu2  ;;  %v1742_v3 = vpop.f32.mrf.mxu0 }
 0x192   : > { %v2007_v59 = vpop.f32.mrf.mxu3  ;;  %v1919_v61 = vadd.f32 %v1918_v58, %v1830_v55  ;;  %v1831_v4 = vpop.f32.mrf.mxu1  ;;  %v3632_v55 = vld [vmem:[%s3936_s6 + $0x214] sm:$0xf] }
 0x193   : > { %v1832_v5 = vadd.f32 %v1831_v4, %v1742_v3  ;;  %v3071_v58 = vld [vmem:[%s3936_s6 + $0x230] sm:$0xf0]  ;;  %v3633_v3 = vld [vmem:[%s3936_s6 + $0x21c] sm:$0xf] }
 0x194   : > { %v4292_v6 = vadd.f32 %v2007_v59, %v1919_v61  ;;  %v3077_v59 = vld [vmem:[%s3936_s6 + $0x218] sm:$0xf]  ;;  %v3079_v4 = vld [vmem:[%s3936_s6 + $0x238] sm:$0xf0]  ;;  %v3074_v11 = vor.u32 %v3632_v55, %v3071_v58 }
 0x195   : > { %v3637_v61 = vld [vmem:[%s3936_s6 + $0x234] sm:$0xf0]  ;;  %v3082_v17 = vor.u32 %v3633_v3, %v3079_v4 }
 0x196   : > { %v3078_v16 = vor.u32 %v3637_v61, %v3077_v59 }
 0x199   : > { %v1920_v18 = vpop.f32.mrf.mxu2  ;;  %v1745_v31 = vpop.f32.mrf.mxu0 }
 0x19a   : > { %v2009_v22 = vpop.f32.mrf.mxu3  ;;  %v1921_v28 = vadd.f32 %v1920_v18, %v1832_v5  ;;  %v1834_v33 = vpop.f32.mrf.mxu1 }
 0x19b   : > { %v1835_v38 = vadd.f32 %v1834_v33, %v1745_v31 }
 0x19c   : > { %v4302_v40 = vadd.f32 %v2009_v22, %v1921_v28  ;;  %2060 = vmatmul.bf16.gmra.mxu0 %v3038_v23 }
 0x19d   : > { %2149 = vmatmul.bf16.gmra.mxu1 %v3042_v27 }
 0x19e   : > { %2238 = vmatmul.bf16.gmra.mxu2 %v3046_v34 }
 0x19f   : > { %2327 = vmatmul.bf16.gmra.mxu3 %v3050_v35 }
 0x1a1   : > { %v1923_v41 = vpop.f32.mrf.mxu2  ;;  %v1747_v45 = vpop.f32.mrf.mxu0 }
 0x1a2   : > { %v2012_v42 = vpop.f32.mrf.mxu3  ;;  %v1924_v43 = vadd.f32 %v1923_v41, %v1835_v38  ;;  %v1836_v46 = vpop.f32.mrf.mxu1  ;;  %v3101_v38 = vld [vmem:[%s3936_s6 + $0x250] sm:$0xf] }
 0x1a3   : > { %v1837_v48 = vadd.f32 %v1836_v46, %v1747_v45  ;;  %v3644_v41 = vld [vmem:[%s3936_s6 + $0x26c] sm:$0xf0]  ;;  %v3109_v45 = vld [vmem:[%s3936_s6 + $0x258] sm:$0xf] }
 0x1a4   : > { %v4304_v49 = vadd.f32 %v2012_v42, %v1924_v43  ;;  %v3640_v42 = vld [vmem:[%s3936_s6 + $0x254] sm:$0xf]  ;;  %v3645_v46 = vld [vmem:[%s3936_s6 + $0x274] sm:$0xf0]  ;;  %v3102_v59 = vor.u32 %v3644_v41, %v3101_v38 }
 0x1a5   : > { %v3103_v43 = vld [vmem:[%s3936_s6 + $0x270] sm:$0xf0] }
 0x1a6   : > { %v3106_v61 = vor.u32 %v3640_v42, %v3103_v43  ;;  %v3135_v42 = vld [vmem:[%s3936_s6 + $0x2b0] sm:$0xf0]  ;;  %v3141_v43 = vld [vmem:[%s3936_s6 + $0x298] sm:$0xf] }
 0x1a9   : > { %v1925_v5 = vpop.f32.mrf.mxu2  ;;  %v2026_v13 = vpop.f32.mrf.mxu0 }
 0x1aa   : > { %v2014_v8 = vpop.f32.mrf.mxu3  ;;  %v1926_v12 = vadd.f32 %v1925_v5, %v1837_v48  ;;  %v2115_v15 = vpop.f32.mrf.mxu1  ;;  %v2027_v22 = vadd.f32 %v2026_v13, %v4097_v44  ;;  %v3641_v48 = vld [vmem:[%s3936_s6 + $0x25c] sm:$0xf] }
 0x1ac   : > { %v4314_v18 = vadd.f32 %v2014_v8, %v1926_v12  ;;  %2065 = vmatmul.bf16.gmra.mxu0 %v3070_v9  ;;  %v2116_v23 = vadd.f32 %v2115_v15, %v2027_v22  ;;  %v3110_v8 = vor.u32 %v3645_v46, %v3109_v45  ;;  %v3653_v45 = vld [vmem:[%s3936_s6 + $0x2b4] sm:$0xf0]  ;;  %v3649_v46 = vld [vmem:[%s3936_s6 + $0x29c] sm:$0xf] }
 0x1ad   : > { %2154 = vmatmul.bf16.gmra.mxu1 %v3074_v11 }
 0x1ae   : > { %2243 = vmatmul.bf16.gmra.mxu2 %v3078_v16 }
 0x1af   : > { %2332 = vmatmul.bf16.gmra.mxu3 %v3082_v17 }
 0x1b1   : > { %v2204_v27 = vpop.f32.mrf.mxu2  ;;  %v2028_v33 = vpop.f32.mrf.mxu0 }
 0x1b2   : > { %v2293_v28 = vpop.f32.mrf.mxu3  ;;  %v2205_v31 = vadd.f32 %v2204_v27, %v2116_v23  ;;  %v2117_v34 = vpop.f32.mrf.mxu1  ;;  %v2029_v35 = vadd.f32 %v2028_v33, %v4110_v0  ;;  %v3114_v0 = vor.u32 %v3641_v48, %v3111_v50  ;;  %v3143_v48 = vld [vmem:[%s3936_s6 + $0x2b8] sm:$0xf0] }
 0x1b4   : > { %v2294_v44 = vadd.f32 %v2293_v28, %v2205_v31  ;;  %v2118_v52 = vadd.f32 %v2117_v34, %v2029_v35  ;;  %v3133_v34 = vld [vmem:[%s3936_s6 + $0x290] sm:$0xf]  ;;  %v3648_v35 = vld [vmem:[%s3936_s6 + $0x294] sm:$0xf] }
 0x1b6   : > { %2472 = vst [vmem:[%s4321_s5] sm:$0xff] %v2294_v44  ;;  %v2542_v12 = vmul.f32 %v2294_v44, %v2294_v44 }
 0x1b9   : > { %v2206_v55 = vpop.f32.mrf.mxu2  ;;  %v2031_v4 = vpop.f32.mrf.mxu0 }
 0x1ba   : > { %v2295_v58 = vpop.f32.mrf.mxu3  ;;  %v2207_v3 = vadd.f32 %v2206_v55, %v2118_v52  ;;  %v2120_v5 = vpop.f32.mrf.mxu1  ;;  %v2032_v11 = vadd.f32 %v2031_v4, %v4112_v7 }
 0x1bc   : > { %v2296_v9 = vadd.f32 %v2295_v58, %v2207_v3  ;;  %2070 = vmatmul.bf16.gmra.mxu0 %v3102_v59  ;;  %v2121_v17 = vadd.f32 %v2120_v5, %v2032_v11  ;;  %v3142_v5 = vor.u32 %v3653_v45, %v3141_v43  ;;  %v3175_v43 = vld [vmem:[%s3936_s6 + $0x2f8] sm:$0xf0] }
 0x1bd   : > { %2159 = vmatmul.bf16.gmra.mxu1 %v3106_v61  ;;  %v3138_v61 = vor.u32 %v3648_v35, %v3135_v42  ;;  %v3167_v35 = vld [vmem:[%s3936_s6 + $0x2f0] sm:$0xf0]  ;;  %v3657_v42 = vld [vmem:[%s3936_s6 + $0x2dc] sm:$0xf] }
 0x1be   : > { %2473 = vst [vmem:[%s4321_s5 + $0x8] sm:$0xff] %v2296_v9  ;;  %v2504_v13 = vadd.f32 %v2296_v9, %v2294_v44  ;;  %v2543_v15 = vmul.f32 %v2296_v9, %v2296_v9  ;;  %2248 = vmatmul.bf16.gmra.mxu2 %v3110_v8  ;;  %v3652_v44 = vld [vmem:[%s3936_s6 + $0x2ac] sm:$0xf0]  ;;  %v3146_v8 = vor.u32 %v3649_v46, %v3143_v48 }
 0x1bf   : > { %2337 = vmatmul.bf16.gmra.mxu3 %v3114_v0  ;;  %v3134_v59 = vor.u32 %v3652_v44, %v3133_v34 }
 0x1c0   : > { %v2574_v16 = vadd.f32 %v2543_v15, %v2542_v12 }
 0x1c1   : > { %v2209_v22 = vpop.f32.mrf.mxu2  ;;  %v2033_v27 = vpop.f32.mrf.mxu0 }
 0x1c2   : > { %v2298_v7 = vpop.f32.mrf.mxu3  ;;  %v2210_v23 = vadd.f32 %v2209_v22, %v2121_v17  ;;  %v2122_v28 = vpop.f32.mrf.mxu1  ;;  %v2034_v33 = vadd.f32 %v2033_v27, %v4122_v26 }
 0x1c4   : > { %v2299_v31 = vadd.f32 %v2298_v7, %v2210_v23  ;;  %v2123_v52 = vadd.f32 %v2122_v28, %v2034_v33  ;;  %v3165_v28 = vld [vmem:[%s3936_s6 + $0x2d0] sm:$0xf]  ;;  %v3656_v33 = vld [vmem:[%s3936_s6 + $0x2d4] sm:$0xf] }
 0x1c6   : > { %2474 = vst [vmem:[%s4321_s5 + $0x10] sm:$0xff] %v2299_v31  ;;  %v2505_v38 = vadd.f32 %v2504_v13, %v2299_v31  ;;  %v2544_v41 = vmul.f32 %v2299_v31, %v2299_v31  ;;  %v3660_v31 = vld [vmem:[%s3936_s6 + $0x2ec] sm:$0xf0] }
 0x1c8   : > { %v2575_v50 = vadd.f32 %v2574_v16, %v2544_v41  ;;  %v3661_v41 = vld [vmem:[%s3936_s6 + $0x2f4] sm:$0xf0] }
 0x1c9   : > { %v2211_v55 = vpop.f32.mrf.mxu2  ;;  %v2036_v26 = vpop.f32.mrf.mxu0 }
 0x1ca   : > { %v2300_v58 = vpop.f32.mrf.mxu3  ;;  %v2212_v3 = vadd.f32 %v2211_v55, %v2123_v52  ;;  %v2125_v4 = vpop.f32.mrf.mxu1  ;;  %v2037_v9 = vadd.f32 %v2036_v26, %v4133_v36  ;;  %v3166_v52 = vor.u32 %v3660_v31, %v3165_v28  ;;  %v3170_v55 = vor.u32 %v3656_v33, %v3167_v35  ;;  %v3199_v28 = vld [vmem:[%s3936_s6 + $0x330] sm:$0xf0]  ;;  %v3205_v31 = vld [vmem:[%s3936_s6 + $0x318] sm:$0xf] }
 0x1cb   : > { %v3669_v33 = vld [vmem:[%s3936_s6 + $0x334] sm:$0xf0] }
 0x1cc   : > { %v2301_v0 = vadd.f32 %v2300_v58, %v2212_v3  ;;  %2075 = vmatmul.bf16.gmra.mxu0 %v3134_v59  ;;  %v2126_v15 = vadd.f32 %v2125_v4, %v2037_v9  ;;  %v3178_v3 = vor.u32 %v3657_v42, %v3175_v43 }
 0x1cd   : > { %2164 = vmatmul.bf16.gmra.mxu1 %v3138_v61 }
 0x1ce   : > { %2475 = vst [vmem:[%s4321_s5 + $0x18] sm:$0xff] %v2301_v0  ;;  %v2506_v11 = vadd.f32 %v2505_v38, %v2301_v0  ;;  %v2545_v12 = vmul.f32 %v2301_v0, %v2301_v0  ;;  %2253 = vmatmul.bf16.gmra.mxu2 %v3142_v5  ;;  %v3173_v38 = vld [vmem:[%s3936_s6 + $0x2d8] sm:$0xf] }
 0x1cf   : > { %2342 = vmatmul.bf16.gmra.mxu3 %v3146_v8  ;;  %v3174_v61 = vor.u32 %v3661_v41, %v3173_v38 }
 0x1d0   : > { %v2576_v13 = vadd.f32 %v2575_v50, %v2545_v12 }
 0x1d1   : > { %v2214_v16 = vpop.f32.mrf.mxu2  ;;  %v2038_v22 = vpop.f32.mrf.mxu0 }
 0x1d2   : > { %v2303_v17 = vpop.f32.mrf.mxu3  ;;  %v2215_v36 = vadd.f32 %v2214_v16, %v2126_v15  ;;  %v2127_v7 = vpop.f32.mrf.mxu1  ;;  %v2039_v27 = vadd.f32 %v2038_v22, %v4146_v57  ;;  %v3668_v22 = vld [vmem:[%s3936_s6 + $0x32c] sm:$0xf0] }
 0x1d4   : > { %v2304_v23 = vadd.f32 %v2303_v17, %v2215_v36  ;;  %v2128_v46 = vadd.f32 %v2127_v7, %v2039_v27  ;;  %v3197_v36 = vld [vmem:[%s3936_s6 + $0x310] sm:$0xf]  ;;  %v3664_v7 = vld [vmem:[%s3936_s6 + $0x314] sm:$0xf] }
 0x1d5   : > { %v3198_v43 = vor.u32 %v3668_v22, %v3197_v36  ;;  %v3677_v36 = vld [vmem:[%s3936_s6 + $0x374] sm:$0xf0]  ;;  %v3673_v22 = vld [vmem:[%s3936_s6 + $0x35c] sm:$0xf] }
 0x1d6   : > { %2476 = vst [vmem:[%s4321_s5 + $0x20] sm:$0xff] %v2304_v23  ;;  %v2507_v34 = vadd.f32 %v2506_v11, %v2304_v23  ;;  %v2546_v44 = vmul.f32 %v2304_v23, %v2304_v23 }
 0x1d8   : > { %v2577_v45 = vadd.f32 %v2576_v13, %v2546_v44  ;;  %v3207_v44 = vld [vmem:[%s3936_s6 + $0x338] sm:$0xf0] }
 0x1d9   : > { %v2216_v48 = vpop.f32.mrf.mxu2  ;;  %v2041_v57 = vpop.f32.mrf.mxu0 }
 0x1da   : > { %v2305_v50 = vpop.f32.mrf.mxu3  ;;  %v2217_v58 = vadd.f32 %v2216_v48, %v2128_v46  ;;  %v2130_v59 = vpop.f32.mrf.mxu1  ;;  %v2042_v4 = vadd.f32 %v2041_v57, %v4148_v1 }
 0x1dc   : > { %v2306_v26 = vadd.f32 %v2305_v50, %v2217_v58  ;;  %2080 = vmatmul.bf16.gmra.mxu0 %v3166_v52  ;;  %v2131_v9 = vadd.f32 %v2130_v59, %v2042_v4  ;;  %v3206_v50 = vor.u32 %v3669_v33, %v3205_v31 }
 0x1dd   : > { %2169 = vmatmul.bf16.gmra.mxu1 %v3170_v55 }
 0x1de   : > { %2477 = vst [vmem:[%s4321_s5 + $0x28] sm:$0xff] %v2306_v26  ;;  %v2508_v5 = vadd.f32 %v2507_v34, %v2306_v26  ;;  %v2547_v8 = vmul.f32 %v2306_v26, %v2306_v26  ;;  %2258 = vmatmul.bf16.gmra.mxu2 %v3174_v61  ;;  %v3665_v34 = vld [vmem:[%s3936_s6 + $0x31c] sm:$0xf] }
 0x1df   : > { %2347 = vmatmul.bf16.gmra.mxu3 %v3178_v3  ;;  %v3210_v52 = vor.u32 %v3665_v34, %v3207_v44 }
 0x1e0   : > { %v2578_v0 = vadd.f32 %v2577_v45, %v2547_v8  ;;  %v3202_v45 = vor.u32 %v3664_v7, %v3199_v28  ;;  %v3239_v7 = vld [vmem:[%s3936_s6 + $0x378] sm:$0xf0] }
 0x1e1   : > { %v2219_v11 = vpop.f32.mrf.mxu2  ;;  %v2043_v13 = vpop.f32.mrf.mxu0 }
 0x1e2   : > { %v2308_v12 = vpop.f32.mrf.mxu3  ;;  %v2220_v1 = vadd.f32 %v2219_v11, %v2131_v9  ;;  %v2132_v15 = vpop.f32.mrf.mxu1  ;;  %v2044_v17 = vadd.f32 %v2043_v13, %v4158_v21  ;;  %v3229_v11 = vld [vmem:[%s3936_s6 + $0x350] sm:$0xf] }
 0x1e4   : > { %v2309_v16 = vadd.f32 %v2308_v12, %v2220_v1  ;;  %v2133_v38 = vadd.f32 %v2132_v15, %v2044_v17  ;;  %v3676_v12 = vld [vmem:[%s3936_s6 + $0x36c] sm:$0xf0]  ;;  %v3672_v1 = vld [vmem:[%s3936_s6 + $0x354] sm:$0xf]  ;;  %v3237_v17 = vld [vmem:[%s3936_s6 + $0x358] sm:$0xf] }
 0x1e5   : > { %v3230_v33 = vor.u32 %v3676_v12, %v3229_v11  ;;  %v3271_v11 = vld [vmem:[%s3936_s6 + $0x3b8] sm:$0xf0] }
 0x1e6   : > { %2478 = vst [vmem:[%s4321_s5 + $0x30] sm:$0xff] %v2309_v16  ;;  %v2509_v23 = vadd.f32 %v2508_v5, %v2309_v16  ;;  %v2548_v27 = vmul.f32 %v2309_v16, %v2309_v16  ;;  %v3231_v16 = vld [vmem:[%s3936_s6 + $0x370] sm:$0xf0] }
 0x1e7   : > { %v3234_v34 = vor.u32 %v3672_v1, %v3231_v16 }
 0x1e8   : > { %v2579_v35 = vadd.f32 %v2578_v0, %v2548_v27 }
 0x1e9   : > { %v2221_v41 = vpop.f32.mrf.mxu2  ;;  %v2046_v21 = vpop.f32.mrf.mxu0 }
 0x1ea   : > { %v2310_v42 = vpop.f32.mrf.mxu3  ;;  %v2222_v46 = vadd.f32 %v2221_v41, %v2133_v38  ;;  %v2135_v48 = vpop.f32.mrf.mxu1  ;;  %v2047_v58 = vadd.f32 %v2046_v21, %v4169_v32  ;;  %v3238_v38 = vor.u32 %v3677_v36, %v3237_v17  ;;  %v3242_v41 = vor.u32 %v3673_v22, %v3239_v7 }
 0x1ec   : > { %v2311_v55 = vadd.f32 %v2310_v42, %v2222_v46  ;;  %2085 = vmatmul.bf16.gmra.mxu0 %v3198_v43  ;;  %v2136_v3 = vadd.f32 %v2135_v48, %v2047_v58 }
 0x1ed   : > { %2174 = vmatmul.bf16.gmra.mxu1 %v3202_v45 }
 0x1ee   : > { %2479 = vst [vmem:[%s4321_s5 + $0x38] sm:$0xff] %v2311_v55  ;;  %v2510_v57 = vadd.f32 %v2509_v23, %v2311_v55  ;;  %v2549_v59 = vmul.f32 %v2311_v55, %v2311_v55  ;;  %2263 = vmatmul.bf16.gmra.mxu2 %v3206_v50 }
 0x1ef   : > { %2352 = vmatmul.bf16.gmra.mxu3 %v3210_v52 }
 0x1f0   : > { %v2580_v61 = vadd.f32 %v2579_v35, %v2549_v59 }
 0x1f1   : > { %v2224_v26 = vpop.f32.mrf.mxu2  ;;  %v2048_v5 = vpop.f32.mrf.mxu0 }
 0x1f2   : > { %v2313_v4 = vpop.f32.mrf.mxu3  ;;  %v2225_v32 = vadd.f32 %v2224_v26, %v2136_v3  ;;  %v2137_v8 = vpop.f32.mrf.mxu1  ;;  %v2049_v9 = vadd.f32 %v2048_v5, %v4182_v54  ;;  %v3684_v3 = vld [vmem:[%s3936_s6 + $0x3ac] sm:$0xf0]  ;;  %v3680_v26 = vld [vmem:[%s3936_s6 + $0x394] sm:$0xf] }
 0x1f3   : > { %v3263_v5 = vld [vmem:[%s3936_s6 + $0x3b0] sm:$0xf0] }
 0x1f4   : > { %v2314_v0 = vadd.f32 %v2313_v4, %v2225_v32  ;;  %v2138_v27 = vadd.f32 %v2137_v8, %v2049_v9  ;;  %v3269_v8 = vld [vmem:[%s3936_s6 + $0x398] sm:$0xf]  ;;  %v3681_v9 = vld [vmem:[%s3936_s6 + $0x39c] sm:$0xf]  ;;  %v3266_v17 = vor.u32 %v3680_v26, %v3263_v5 }
 0x1f6   : > { %2480 = vst [vmem:[%s4321_s5 + $0x40] sm:$0xff] %v2314_v0  ;;  %v2511_v13 = vadd.f32 %v2510_v57, %v2314_v0  ;;  %v2550_v15 = vmul.f32 %v2314_v0, %v2314_v0  ;;  %v3685_v0 = vld [vmem:[%s3936_s6 + $0x3b4] sm:$0xf0] }
 0x1f7   : > { %v3270_v7 = vor.u32 %v3685_v0, %v3269_v8 }
 0x1f8   : > { %v2581_v23 = vadd.f32 %v2580_v61, %v2550_v15  ;;  %v3261_v61 = vld [vmem:[%s3936_s6 + $0x390] sm:$0xf] }
 0x1f9   : > { %v2226_v28 = vpop.f32.mrf.mxu2  ;;  %v2051_v54 = vpop.f32.mrf.mxu0  ;;  %v3262_v16 = vor.u32 %v3684_v3, %v3261_v61 }
 0x1fa   : > { %v2315_v31 = vpop.f32.mrf.mxu3  ;;  %v2227_v44 = vadd.f32 %v2226_v28, %v2138_v27  ;;  %v2140_v35 = vpop.f32.mrf.mxu1  ;;  %v2052_v43 = vadd.f32 %v2051_v54, %v4184_v62 }
 0x1fc   : > { %v2316_v42 = vadd.f32 %v2315_v31, %v2227_v44  ;;  %2090 = vmatmul.bf16.gmra.mxu0 %v3230_v33  ;;  %v2141_v48 = vadd.f32 %v2140_v35, %v2052_v43 }
 0x1fd   : > { %2179 = vmatmul.bf16.gmra.mxu1 %v3234_v34 }
 0x1fe   : > { %2481 = vst [vmem:[%s4321_s5 + $0x48] sm:$0xff] %v2316_v42  ;;  %v2512_v45 = vadd.f32 %v2511_v13, %v2316_v42  ;;  %v2551_v46 = vmul.f32 %v2316_v42, %v2316_v42  ;;  %2268 = vmatmul.bf16.gmra.mxu2 %v3238_v38 }
 0x1ff   : > { %2357 = vmatmul.bf16.gmra.mxu3 %v3242_v41 }
 0x200   : > { %v2582_v21 = vadd.f32 %v2581_v23, %v2551_v46  ;;  %v3274_v23 = vor.u32 %v3681_v9, %v3271_v11  ;;  %v3692_v46 = vld [vmem:[%s3936_s6 + $0x3ec] sm:$0xf0] }
 0x201   : > { %v2229_v50 = vpop.f32.mrf.mxu2  ;;  %v2053_v55 = vpop.f32.mrf.mxu0 }
 0x202   : > { %v2318_v52 = vpop.f32.mrf.mxu3  ;;  %v2230_v62 = vadd.f32 %v2229_v50, %v2141_v48  ;;  %v2142_v58 = vpop.f32.mrf.mxu1  ;;  %v2054_v59 = vadd.f32 %v2053_v55, %v4194_v20  ;;  %v3693_v55 = vld [vmem:[%s3936_s6 + $0x3f4] sm:$0xf0] }
 0x204   : > { %v2319_v57 = vadd.f32 %v2318_v52, %v2230_v62  ;;  %v2143_v1 = vadd.f32 %v2142_v58, %v2054_v59  ;;  %v3295_v52 = vld [vmem:[%s3936_s6 + $0x3f0] sm:$0xf0]  ;;  %v3301_v62 = vld [vmem:[%s3936_s6 + $0x3d8] sm:$0xf]  ;;  %v3689_v58 = vld [vmem:[%s3936_s6 + $0x3dc] sm:$0xf] }
 0x205   : > { %v3302_v0 = vor.u32 %v3693_v55, %v3301_v62 }
 0x206   : > { %2482 = vst [vmem:[%s4321_s5 + $0x50] sm:$0xff] %v2319_v57  ;;  %v2513_v4 = vadd.f32 %v2512_v45, %v2319_v57  ;;  %v2552_v32 = vmul.f32 %v2319_v57, %v2319_v57  ;;  %v3293_v45 = vld [vmem:[%s3936_s6 + $0x3d0] sm:$0xf]  ;;  %v3303_v57 = vld [vmem:[%s3936_s6 + $0x3f8] sm:$0xf0] }
 0x207   : > { %v3306_v9 = vor.u32 %v3689_v58, %v3303_v57 }
 0x208   : > { %v2583_v12 = vadd.f32 %v2582_v21, %v2552_v32  ;;  %v3688_v21 = vld [vmem:[%s3936_s6 + $0x3d4] sm:$0xf] }
 0x209   : > { %v2231_v13 = vpop.f32.mrf.mxu2  ;;  %v2056_v20 = vpop.f32.mrf.mxu0  ;;  %v3298_v32 = vor.u32 %v3688_v21, %v3295_v52 }
 0x20a   : > { %v2320_v15 = vpop.f32.mrf.mxu3  ;;  %v2232_v36 = vadd.f32 %v2231_v13, %v2143_v1  ;;  %v2145_v22 = vpop.f32.mrf.mxu1  ;;  %v2057_v28 = vadd.f32 %v2056_v20, %v4196_v29 }
 0x20c   : > { %v2321_v27 = vadd.f32 %v2320_v15, %v2232_v36  ;;  %2095 = vmatmul.bf16.gmra.mxu0 %v3262_v16  ;;  %v2146_v44 = vadd.f32 %v2145_v22, %v2057_v28 }
 0x20d   : > { %2184 = vmatmul.bf16.gmra.mxu1 %v3266_v17 }
 0x20e   : > { %2483 = vst [vmem:[%s4321_s5 + $0x58] sm:$0xff] %v2321_v27  ;;  %v2514_v31 = vadd.f32 %v2513_v4, %v2321_v27  ;;  %v2553_v33 = vmul.f32 %v2321_v27, %v2321_v27  ;;  %2273 = vmatmul.bf16.gmra.mxu2 %v3270_v7  ;;  %v3294_v4 = vor.u32 %v3692_v46, %v3293_v45 }
 0x20f   : > { %2362 = vmatmul.bf16.gmra.mxu3 %v3274_v23 }
 0x210   : > { %v2584_v34 = vadd.f32 %v2583_v12, %v2553_v33 }
 0x211   : > { %v2234_v54 = vpop.f32.mrf.mxu2  ;;  %v2058_v38 = vpop.f32.mrf.mxu0 }
 0x212   : > { %v2323_v35 = vpop.f32.mrf.mxu3  ;;  %v2235_v29 = vadd.f32 %v2234_v54, %v2146_v44  ;;  %v2147_v41 = vpop.f32.mrf.mxu1  ;;  %v2059_v43 = vadd.f32 %v2058_v38, %v4206_v51 }
 0x214   : > { %v2324_v42 = vadd.f32 %v2323_v35, %v2235_v29  ;;  %v2148_v61 = vadd.f32 %v2147_v41, %v2059_v43 }
 0x216   : > { %2484 = vst [vmem:[%s4321_s5 + $0x60] sm:$0xff] %v2324_v42  ;;  %v2515_v48 = vadd.f32 %v2514_v31, %v2324_v42  ;;  %v2554_v50 = vmul.f32 %v2324_v42, %v2324_v42 }
 0x218   : > { %v2585_v59 = vadd.f32 %v2584_v34, %v2554_v50 }
 0x219   : > { %v2236_v3 = vpop.f32.mrf.mxu2  ;;  %v2061_v51 = vpop.f32.mrf.mxu0 }
 0x21a   : > { %v2325_v26 = vpop.f32.mrf.mxu3  ;;  %v2237_v5 = vadd.f32 %v2236_v3, %v2148_v61  ;;  %v2150_v8 = vpop.f32.mrf.mxu1  ;;  %v2062_v12 = vadd.f32 %v2061_v51, %v4208_v60 }
 0x21c   : > { %v2326_v11 = vadd.f32 %v2325_v26, %v2237_v5  ;;  %2100 = vmatmul.bf16.gmra.mxu0 %v3294_v4  ;;  %v2151_v16 = vadd.f32 %v2150_v8, %v2062_v12 }
 0x21d   : > { %2189 = vmatmul.bf16.gmra.mxu1 %v3298_v32 }
 0x21e   : > { %2485 = vst [vmem:[%s4321_s5 + $0x68] sm:$0xff] %v2326_v11  ;;  %v2516_v1 = vadd.f32 %v2515_v48, %v2326_v11  ;;  %v2555_v13 = vmul.f32 %v2326_v11, %v2326_v11  ;;  %2278 = vmatmul.bf16.gmra.mxu2 %v3302_v0 }
 0x21f   : > { %2367 = vmatmul.bf16.gmra.mxu3 %v3306_v9 }
 0x220   : > { %v2586_v15 = vadd.f32 %v2585_v59, %v2555_v13 }
 0x221   : > { %v2239_v17 = vpop.f32.mrf.mxu2  ;;  %v2063_v22 = vpop.f32.mrf.mxu0 }
 0x222   : > { %v2328_v36 = vpop.f32.mrf.mxu3  ;;  %v2240_v20 = vadd.f32 %v2239_v17, %v2151_v16  ;;  %v2152_v7 = vpop.f32.mrf.mxu1  ;;  %v2064_v27 = vadd.f32 %v2063_v22, %v4218_v19 }
 0x224   : > { %v2329_v23 = vadd.f32 %v2328_v36, %v2240_v20  ;;  %v2153_v33 = vadd.f32 %v2152_v7, %v2064_v27 }
 0x226   : > { %2486 = vst [vmem:[%s4321_s5 + $0x70] sm:$0xff] %v2329_v23  ;;  %v2517_v60 = vadd.f32 %v2516_v1, %v2329_v23  ;;  %v2556_v28 = vmul.f32 %v2329_v23, %v2329_v23 }
 0x228   : > { %v2587_v31 = vadd.f32 %v2586_v15, %v2556_v28 }
 0x229   : > { %v2241_v34 = vpop.f32.mrf.mxu2  ;;  %v2066_v35 = vpop.f32.mrf.mxu0 }
 0x22a   : > { %v2330_v44 = vpop.f32.mrf.mxu3  ;;  %v2242_v54 = vadd.f32 %v2241_v34, %v2153_v33  ;;  %v2155_v29 = vpop.f32.mrf.mxu1  ;;  %v2067_v41 = vadd.f32 %v2066_v35, %v4220_v30 }
 0x22c   : > { %v2331_v38 = vadd.f32 %v2330_v44, %v2242_v54  ;;  %v2156_v46 = vadd.f32 %v2155_v29, %v2067_v41 }
 0x22e   : > { %2487 = vst [vmem:[%s4321_s5 + $0x78] sm:$0xff] %v2331_v38  ;;  %v2518_v42 = vadd.f32 %v2517_v60, %v2331_v38  ;;  %v2557_v43 = vmul.f32 %v2331_v38, %v2331_v38 }
 0x230   : > { %v2588_v45 = vadd.f32 %v2587_v31, %v2557_v43 }
 0x231   : > { %v2244_v19 = vpop.f32.mrf.mxu2  ;;  %v2068_v50 = vpop.f32.mrf.mxu0 }
 0x232   : > { %v2333_v21 = vpop.f32.mrf.mxu3  ;;  %v2245_v48 = vadd.f32 %v2244_v19, %v2156_v46  ;;  %v2157_v52 = vpop.f32.mrf.mxu1  ;;  %v2069_v55 = vadd.f32 %v2068_v50, %v4230_v53 }
 0x234   : > { %v2334_v62 = vadd.f32 %v2333_v21, %v2245_v48  ;;  %v2158_v61 = vadd.f32 %v2157_v52, %v2069_v55 }
 0x236   : > { %2488 = vst [vmem:[%s4321_s5 + $0x80] sm:$0xff] %v2334_v62  ;;  %v2519_v58 = vadd.f32 %v2518_v42, %v2334_v62  ;;  %v2558_v57 = vmul.f32 %v2334_v62, %v2334_v62 }
 0x238   : > { %v2589_v59 = vadd.f32 %v2588_v45, %v2558_v57 }
 0x239   : > { %v2246_v30 = vpop.f32.mrf.mxu2  ;;  %v2071_v4 = vpop.f32.mrf.mxu0 }
 0x23a   : > { %v2335_v3 = vpop.f32.mrf.mxu3  ;;  %v2247_v26 = vadd.f32 %v2246_v30, %v2158_v61  ;;  %v2160_v32 = vpop.f32.mrf.mxu1  ;;  %v2072_v51 = vadd.f32 %v2071_v4, %v4232_v2 }
 0x23c   : > { %v2336_v5 = vadd.f32 %v2335_v3, %v2247_v26  ;;  %v2161_v11 = vadd.f32 %v2160_v32, %v2072_v51 }
 0x23e   : > { %2489 = vst [vmem:[%s4321_s5 + $0x88] sm:$0xff] %v2336_v5  ;;  %v2520_v8 = vadd.f32 %v2519_v58, %v2336_v5  ;;  %v2559_v0 = vmul.f32 %v2336_v5, %v2336_v5 }
 0x240   : > { %v2590_v9 = vadd.f32 %v2589_v59, %v2559_v0 }
 0x241   : > { %v2249_v53 = vpop.f32.mrf.mxu2  ;;  %v2073_v13 = vpop.f32.mrf.mxu0 }
 0x242   : > { %v2338_v12 = vpop.f32.mrf.mxu3  ;;  %v2250_v1 = vadd.f32 %v2249_v53, %v2161_v11  ;;  %v2162_v15 = vpop.f32.mrf.mxu1  ;;  %v2074_v17 = vadd.f32 %v2073_v13, %v4242_v25 }
 0x244   : > { %v2339_v16 = vadd.f32 %v2338_v12, %v2250_v1  ;;  %v2163_v7 = vadd.f32 %v2162_v15, %v2074_v17 }
 0x246   : > { %2490 = vst [vmem:[%s4321_s5 + $0x90] sm:$0xff] %v2339_v16  ;;  %v2521_v36 = vadd.f32 %v2520_v8, %v2339_v16  ;;  %v2560_v20 = vmul.f32 %v2339_v16, %v2339_v16 }
 0x248   : > { %v2591_v22 = vadd.f32 %v2590_v9, %v2560_v20 }
 0x249   : > { %v2251_v2 = vpop.f32.mrf.mxu2  ;;  %v2076_v60 = vpop.f32.mrf.mxu0 }
 0x24a   : > { %v2340_v23 = vpop.f32.mrf.mxu3  ;;  %v2252_v27 = vadd.f32 %v2251_v2, %v2163_v7  ;;  %v2165_v28 = vpop.f32.mrf.mxu1  ;;  %v2077_v33 = vadd.f32 %v2076_v60, %v4244_v37 }
 0x24c   : > { %v2341_v31 = vadd.f32 %v2340_v23, %v2252_v27  ;;  %v2166_v35 = vadd.f32 %v2165_v28, %v2077_v33 }
 0x24e   : > { %2491 = vst [vmem:[%s4321_s5 + $0x98] sm:$0xff] %v2341_v31  ;;  %v2522_v34 = vadd.f32 %v2521_v36, %v2341_v31  ;;  %v2561_v44 = vmul.f32 %v2341_v31, %v2341_v31 }
 0x250   : > { %v2592_v54 = vadd.f32 %v2591_v22, %v2561_v44 }
 0x251   : > { %v2254_v25 = vpop.f32.mrf.mxu2  ;;  %v2078_v41 = vpop.f32.mrf.mxu0 }
 0x252   : > { %v2343_v29 = vpop.f32.mrf.mxu3  ;;  %v2255_v38 = vadd.f32 %v2254_v25, %v2166_v35  ;;  %v2167_v42 = vpop.f32.mrf.mxu1  ;;  %v2079_v45 = vadd.f32 %v2078_v41, %v4254_v63 }
 0x254   : > { %v2344_v43 = vadd.f32 %v2343_v29, %v2255_v38  ;;  %v2168_v48 = vadd.f32 %v2167_v42, %v2079_v45 }
 0x256   : > { %2492 = vst [vmem:[%s4321_s5 + $0xa0] sm:$0xff] %v2344_v43  ;;  %v2523_v46 = vadd.f32 %v2522_v34, %v2344_v43  ;;  %v2562_v19 = vmul.f32 %v2344_v43, %v2344_v43 }
 0x258   : > { %v2593_v21 = vadd.f32 %v2592_v54, %v2562_v19 }
 0x259   : > { %v2256_v37 = vpop.f32.mrf.mxu2  ;;  %v2081_v62 = vpop.f32.mrf.mxu0 }
 0x25a   : > { %v2345_v50 = vpop.f32.mrf.mxu3  ;;  %v2257_v52 = vadd.f32 %v2256_v37, %v2168_v48  ;;  %v2170_v55 = vpop.f32.mrf.mxu1  ;;  %v2082_v57 = vadd.f32 %v2081_v62, %v4256_v10 }
 0x25c   : > { %v2346_v58 = vadd.f32 %v2345_v50, %v2257_v52  ;;  %v2171_v3 = vadd.f32 %v2170_v55, %v2082_v57 }
 0x25e   : > { %2493 = vst [vmem:[%s4321_s5 + $0xa8] sm:$0xff] %v2346_v58  ;;  %v2524_v59 = vadd.f32 %v2523_v46, %v2346_v58  ;;  %v2563_v61 = vmul.f32 %v2346_v58, %v2346_v58 }
 0x260   : > { %v2594_v30 = vadd.f32 %v2593_v21, %v2563_v61 }
 0x261   : > { %v2259_v63 = vpop.f32.mrf.mxu2  ;;  %v2083_v32 = vpop.f32.mrf.mxu0 }
 0x262   : > { %v2348_v26 = vpop.f32.mrf.mxu3  ;;  %v2260_v4 = vadd.f32 %v2259_v63, %v2171_v3  ;;  %v2172_v5 = vpop.f32.mrf.mxu1  ;;  %v2084_v8 = vadd.f32 %v2083_v32, %v4266_v39 }
 0x264   : > { %v2349_v51 = vadd.f32 %v2348_v26, %v2260_v4  ;;  %v2173_v53 = vadd.f32 %v2172_v5, %v2084_v8 }
 0x266   : > { %2494 = vst [vmem:[%s4321_s5 + $0xb0] sm:$0xff] %v2349_v51  ;;  %v2525_v0 = vadd.f32 %v2524_v59, %v2349_v51  ;;  %v2564_v9 = vmul.f32 %v2349_v51, %v2349_v51 }
 0x268   : > { %v2595_v11 = vadd.f32 %v2594_v30, %v2564_v9 }
 0x269   : > { %v2261_v10 = vpop.f32.mrf.mxu2  ;;  %v2086_v13 = vpop.f32.mrf.mxu0 }
 0x26a   : > { %v2350_v12 = vpop.f32.mrf.mxu3  ;;  %v2262_v1 = vadd.f32 %v2261_v10, %v2173_v53  ;;  %v2175_v15 = vpop.f32.mrf.mxu1  ;;  %v2087_v17 = vadd.f32 %v2086_v13, %v4268_v47 }
 0x26c   : > { %v2351_v16 = vadd.f32 %v2350_v12, %v2262_v1  ;;  %v2176_v7 = vadd.f32 %v2175_v15, %v2087_v17 }
 0x26e   : > { %2495 = vst [vmem:[%s4321_s5 + $0xb8] sm:$0xff] %v2351_v16  ;;  %v2526_v36 = vadd.f32 %v2525_v0, %v2351_v16  ;;  %v2565_v20 = vmul.f32 %v2351_v16, %v2351_v16 }
 0x270   : > { %v2596_v22 = vadd.f32 %v2595_v11, %v2565_v20 }
 0x271   : > { %v2264_v39 = vpop.f32.mrf.mxu2  ;;  %v2088_v27 = vpop.f32.mrf.mxu0 }
 0x272   : > { %v2353_v2 = vpop.f32.mrf.mxu3  ;;  %v2265_v23 = vadd.f32 %v2264_v39, %v2176_v7  ;;  %v2177_v60 = vpop.f32.mrf.mxu1  ;;  %v2089_v31 = vadd.f32 %v2088_v27, %v4278_v14 }
 0x274   : > { %v2354_v28 = vadd.f32 %v2353_v2, %v2265_v23  ;;  %v2178_v54 = vadd.f32 %v2177_v60, %v2089_v31 }
 0x276   : > { %2496 = vst [vmem:[%s4321_s5 + $0xc0] sm:$0xff] %v2354_v28  ;;  %v2527_v33 = vadd.f32 %v2526_v36, %v2354_v28  ;;  %v2566_v34 = vmul.f32 %v2354_v28, %v2354_v28 }
 0x278   : > { %v2597_v44 = vadd.f32 %v2596_v22, %v2566_v34 }
 0x279   : > { %v2266_v47 = vpop.f32.mrf.mxu2  ;;  %v2091_v29 = vpop.f32.mrf.mxu0 }
 0x27a   : > { %v2355_v35 = vpop.f32.mrf.mxu3  ;;  %v2267_v25 = vadd.f32 %v2266_v47, %v2178_v54  ;;  %v2180_v38 = vpop.f32.mrf.mxu1  ;;  %v2092_v42 = vadd.f32 %v2091_v29, %v4280_v24 }
 0x27c   : > { %v2356_v41 = vadd.f32 %v2355_v35, %v2267_v25  ;;  %v2181_v19 = vadd.f32 %v2180_v38, %v2092_v42 }
 0x27e   : > { %2497 = vst [vmem:[%s4321_s5 + $0xc8] sm:$0xff] %v2356_v41  ;;  %v2528_v43 = vadd.f32 %v2527_v33, %v2356_v41  ;;  %v2567_v45 = vmul.f32 %v2356_v41, %v2356_v41 }
 0x280   : > { %v2598_v46 = vadd.f32 %v2597_v44, %v2567_v45 }
 0x281   : > { %v2269_v14 = vpop.f32.mrf.mxu2  ;;  %v2093_v37 = vpop.f32.mrf.mxu0 }
 0x282   : > { %v2358_v21 = vpop.f32.mrf.mxu3  ;;  %v2270_v48 = vadd.f32 %v2269_v14, %v2181_v19  ;;  %v2182_v50 = vpop.f32.mrf.mxu1  ;;  %v2094_v62 = vadd.f32 %v2093_v37, %v4290_v56 }
 0x284   : > { %v2359_v52 = vadd.f32 %v2358_v21, %v2270_v48  ;;  %v2183_v59 = vadd.f32 %v2182_v50, %v2094_v62 }
 0x286   : > { %2498 = vst [vmem:[%s4321_s5 + $0xd0] sm:$0xff] %v2359_v52  ;;  %v2529_v55 = vadd.f32 %v2528_v43, %v2359_v52  ;;  %v2568_v58 = vmul.f32 %v2359_v52, %v2359_v52 }
 0x288   : > { %v2599_v57 = vadd.f32 %v2598_v46, %v2568_v58 }
 0x289   : > { %v2271_v24 = vpop.f32.mrf.mxu2  ;;  %v2096_v3 = vpop.f32.mrf.mxu0 }
 0x28a   : > { %v2360_v61 = vpop.f32.mrf.mxu3  ;;  %v2272_v30 = vadd.f32 %v2271_v24, %v2183_v59  ;;  %v2185_v63 = vpop.f32.mrf.mxu1  ;;  %v2097_v4 = vadd.f32 %v2096_v3, %v4292_v6 }
 0x28c   : > { %v2361_v26 = vadd.f32 %v2360_v61, %v2272_v30  ;;  %v2186_v8 = vadd.f32 %v2185_v63, %v2097_v4 }
 0x28e   : > { %2499 = vst [vmem:[%s4321_s5 + $0xd8] sm:$0xff] %v2361_v26  ;;  %v2530_v32 = vadd.f32 %v2529_v55, %v2361_v26  ;;  %v2569_v5 = vmul.f32 %v2361_v26, %v2361_v26 }
 0x290   : > { %v2600_v51 = vadd.f32 %v2599_v57, %v2569_v5 }
 0x291   : > { %v2274_v56 = vpop.f32.mrf.mxu2  ;;  %v2098_v11 = vpop.f32.mrf.mxu0 }
 0x292   : > { %v2363_v0 = vpop.f32.mrf.mxu3  ;;  %v2275_v9 = vadd.f32 %v2274_v56, %v2186_v8  ;;  %v2187_v53 = vpop.f32.mrf.mxu1  ;;  %v2099_v12 = vadd.f32 %v2098_v11, %v4302_v40 }
 0x294   : > { %v2364_v10 = vadd.f32 %v2363_v0, %v2275_v9  ;;  %v2188_v16 = vadd.f32 %v2187_v53, %v2099_v12 }
 0x296   : > { %2500 = vst [vmem:[%s4321_s5 + $0xe0] sm:$0xff] %v2364_v10  ;;  %v2531_v1 = vadd.f32 %v2530_v32, %v2364_v10  ;;  %v2570_v13 = vmul.f32 %v2364_v10, %v2364_v10 }
 0x298   : > { %v2601_v15 = vadd.f32 %v2600_v51, %v2570_v13 }
 0x299   : > { %v2276_v6 = vpop.f32.mrf.mxu2  ;;  %v2101_v20 = vpop.f32.mrf.mxu0 }
 0x29a   : > { %v2365_v17 = vpop.f32.mrf.mxu3  ;;  %v2277_v36 = vadd.f32 %v2276_v6, %v2188_v16  ;;  %v2102_v7 = vadd.f32 %v2101_v20, %v4304_v49  ;;  %v2190_v39 = vpop.f32.mrf.mxu1 }
 0x29c   : > { %v2366_v22 = vadd.f32 %v2365_v17, %v2277_v36  ;;  %v2191_v60 = vadd.f32 %v2190_v39, %v2102_v7 }
 0x29e   : > { %2501 = vst [vmem:[%s4321_s5 + $0xe8] sm:$0xff] %v2366_v22  ;;  %v2532_v2 = vadd.f32 %v2531_v1, %v2366_v22  ;;  %v2571_v23 = vmul.f32 %v2366_v22, %v2366_v22 }
 0x2a0   : > { %v2602_v27 = vadd.f32 %v2601_v15, %v2571_v23 }
 0x2a1   : > { %v2279_v40 = vpop.f32.mrf.mxu2  ;;  %v2103_v33 = vpop.f32.mrf.mxu0 }
 0x2a2   : > { %v2368_v28 = vpop.f32.mrf.mxu3  ;;  %v2280_v31 = vadd.f32 %v2279_v40, %v2191_v60  ;;  %v2104_v44 = vadd.f32 %v2103_v33, %v4314_v18  ;;  %v2192_v35 = vpop.f32.mrf.mxu1 }
 0x2a4   : > { %v2369_v34 = vadd.f32 %v2368_v28, %v2280_v31  ;;  %v2193_v25 = vadd.f32 %v2192_v35, %v2104_v44 }
 0x2a6   : > { %2502 = vst [vmem:[%s4321_s5 + $0xf0] sm:$0xff] %v2369_v34  ;;  %v2533_v54 = vadd.f32 %v2532_v2, %v2369_v34  ;;  %v2572_v47 = vmul.f32 %v2369_v34, %v2369_v34 }
 0x2a8   : > { %v2603_v49 = vadd.f32 %v2602_v27, %v2572_v47 }
 0x2a9   : > { %v2281_v29 = vpop.f32.mrf.mxu2 }
 0x2aa   : > { %v2282_v38 = vadd.f32 %v2281_v29, %v2193_v25  ;;  %v2370_v41 = vpop.f32.mrf.mxu3 }
 0x2ac   : > { %v2371_v42 = vadd.f32 %v2370_v41, %v2282_v38 }
 0x2ae   : > { %2503 = vst [vmem:[%s4321_s5 + $0xf8] sm:$0xff] %v2371_v42  ;;  %v2534_v43 = vadd.f32 %v2533_v54, %v2371_v42  ;;  %v2573_v45 = vmul.f32 %v2371_v42, %v2371_v42 }
 0x2b0   : > { %v2535_v46 = vrot.slane %v2534_v43, 4  ;;  %v2604_v19 = vadd.f32 %v2603_v49, %v2573_v45 }
 0x2b2   : > { %v2536_v14 = vadd.f32 %v2535_v46, %v2534_v43  ;;  %v2605_v18 = vrot.slane %v2604_v19, 4 }
 0x2b4   : > { %v2537_v21 = vrot.slane %v2536_v14, 2  ;;  %v2606_v48 = vadd.f32 %v2605_v18, %v2604_v19 }
 0x2b6   : > { %v2538_v37 = vadd.f32 %v2537_v21, %v2536_v14  ;;  %v2607_v50 = vrot.slane %v2606_v48, 2 }
 0x2b8   : > { %v2539_v52 = vrot.slane %v2538_v37, 1  ;;  %v2608_v62 = vadd.f32 %v2607_v50, %v2606_v48 }
 0x2ba   : > { %v2540_v55 = vadd.f32 %v2539_v52, %v2538_v37  ;;  %v2609_v58 = vrot.slane %v2608_v62, 1 }
 0x2bc   : > { %2541 = vst [vmem:[%s306_s7] sm:$0x1] %v2540_v55  ;;  %v2610_v57 = vadd.f32 %v2609_v58, %v2608_v62 }
 0x2be   : > { %2611 = vst [vmem:[%s312_s10] sm:$0x1] %v2610_v57 }
 0x2bf PF: > { %s15_s17 = sadd.s32 1, %s3804_s17   ;;  %s4464_s15 = smov %s3800_s16 }
 0x2c0   : > { %p12_p6 = scmp.ge.s32.totalorder %s15_s17, 4   ;;  %s4465_s16 = smov %s4467_s18 }
 0x2c2   :  { %14 = sbr.rel (!%p12_p6) target bundleno = 2 (0x2), region = 93 }

// kernel: discriminator_forward.10
= control target key start
LH: loop header
LB: loop body
LE: loop exit
PB: predicated region body
PF: predicated region fallthrough
CT: control target
= control target key end

     0   :  { %s462_s12 = smov 0   ;;  %s554_s0 = inlined_call_operand.vmem [shape: f32[512,128], index: 0, kind: input, shape index: {}]   ;;  %s555_s1 = inlined_call_operand.vmem [shape: f32[1,128], index: 1, kind: input, shape index: {}]   ;;  %s556_s2 = inlined_call_operand.vmem [shape: f32[1,128], index: 2, kind: input, shape index: {}]   ;;  %s557_s3 = inlined_call_operand.vmem [shape: bf16[512,128], index: 3, kind: output, shape index: {}]  }
   0x1 LB: > { %s366_s13 = sadd.s32 4294967295, %s440_s12   ;;  %p370_p0 = scmp.ge.s32.totalorder %s440_s12, 1  ;;  %s440_s12 = sphi %s462_s12, %s13_s12  }
   0x2   : > { %p138_p1 = scmp.lt.s32.totalorder %s440_s12, 5 }
   0x4   : > { %p139_p2 = pnand %p370_p0, %p138_p1 }
   0x5   : > { %s371_s14 = sshll.u32 (!%p139_p2), %s366_s13, 4 }
   0x6   : > { %142 = sbr.rel (%p139_p2) target bundleno = 43 (0x2b), region = 32  ;;  %p163_p3 = scmp.lt.s32.totalorder (!%p139_p2), %s371_s14, 63 }
   0xb   : > { %s559_s14 = smov (!%p163_p3, %s371_s14), 63  ;;  %v475_v0 = vld [vmem:[%s555_s1] ss:$0 sm:$0xff] }
   0xc   : > { %s372_s17 = sshll.u32 %s559_s14, 3  ;;  %v486_v1 = vld [vmem:[%s556_s2] ss:$0 sm:$0xff]  ;;  %s374_s23 = sshll.u32 %s559_s14, 2 }
   0xd   : > { %s481_s20 = scalar_lea.vmem %s554_s0, %s372_s17  ;;  %s514_s26 = scalar_lea.vmem %s557_s3, %s374_s23 }
   0xe   : > { %v174_v2 = vld [vmem:[%s481_s20] sm:$0xff]  ;;  %v175_v3 = vld [vmem:[%s481_s20 + $0x8] sm:$0xff]  ;;  %v176_v4 = vld [vmem:[%s481_s20 + $0x10] sm:$0xff] }
   0xf   : > { %v194_v5 = vmul.f32 %v475_v0, %v174_v2  ;;  %v195_v6 = vmul.f32 %v475_v0, %v175_v3  ;;  %v177_v7 = vld [vmem:[%s481_s20 + $0x18] sm:$0xff]  ;;  %v196_v8 = vmul.f32 %v475_v0, %v176_v4  ;;  %v178_v9 = vld [vmem:[%s481_s20 + $0x20] sm:$0xff]  ;;  %v179_v10 = vld [vmem:[%s481_s20 + $0x28] sm:$0xff] }
  0x10   : > { %v197_v11 = vmul.f32 %v475_v0, %v177_v7  ;;  %v198_v12 = vmul.f32 %v475_v0, %v178_v9  ;;  %v199_v13 = vmul.f32 %v475_v0, %v179_v10  ;;  %v180_v14 = vld [vmem:[%s481_s20 + $0x30] sm:$0xff]  ;;  %v181_v15 = vld [vmem:[%s481_s20 + $0x38] sm:$0xff]  ;;  %v182_v30 = vld [vmem:[%s481_s20 + $0x40] sm:$0xff] }
  0x11   : > { %v214_v16 = vadd.f32 %v486_v1, %v194_v5  ;;  %v215_v17 = vadd.f32 %v486_v1, %v195_v6  ;;  %v216_v18 = vadd.f32 %v486_v1, %v196_v8  ;;  %v200_v19 = vmul.f32 %v475_v0, %v180_v14  ;;  %v183_v31 = vld [vmem:[%s481_s20 + $0x48] sm:$0xff]  ;;  %v184_v32 = vld [vmem:[%s481_s20 + $0x50] sm:$0xff]  ;;  %v185_v44 = vld [vmem:[%s481_s20 + $0x58] sm:$0xff] }
  0x12   : > { %v217_v20 = vadd.f32 %v486_v1, %v197_v11  ;;  %v218_v21 = vadd.f32 %v486_v1, %v198_v12  ;;  %v219_v22 = vadd.f32 %v486_v1, %v199_v13  ;;  %v201_v23 = vmul.f32 %v475_v0, %v181_v15  ;;  %v186_v46 = vld [vmem:[%s481_s20 + $0x60] sm:$0xff]  ;;  %v187_v56 = vld [vmem:[%s481_s20 + $0x68] sm:$0xff]  ;;  %v188_v60 = vld [vmem:[%s481_s20 + $0x70] sm:$0xff] }
  0x13   : > { %vm230_vm0 = vcmp.ge.f32.partialorder %v214_v16, 0.0  ;;  %vm231_vm1 = vcmp.ge.f32.partialorder %v215_v17, 0.0  ;;  %v246_v24 = vmul.f32 0.2, %v214_v16  ;;  %v247_v25 = vmul.f32 0.2, %v215_v17 }
  0x14   : > { %vm232_vm2 = vcmp.ge.f32.partialorder %v216_v18, 0.0  ;;  %vm233_vm3 = vcmp.ge.f32.partialorder %v217_v20, 0.0  ;;  %v248_v26 = vmul.f32 0.2, %v216_v18  ;;  %v249_v27 = vmul.f32 0.2, %v217_v20 }
  0x15   : > { %v262_v28 = vsel %vm230_vm0, %v214_v16, %v246_v24  ;;  %v263_v29 = vsel %vm231_vm1, %v215_v17, %v247_v25  ;;  %vm234_vm4 = vcmp.ge.f32.partialorder %v218_v21, 0.0  ;;  %vm235_vm5 = vcmp.ge.f32.partialorder %v219_v22, 0.0  ;;  %v189_v6 = vld [vmem:[%s481_s20 + $0x78] sm:$0xff] }
  0x16   : > { %v380_v33 = vpack.c.bf16 %v263_v29, %v262_v28  ;;  %v264_v34 = vsel %vm232_vm2, %v216_v18, %v248_v26  ;;  %v265_v35 = vsel %vm233_vm3, %v217_v20, %v249_v27  ;;  %v250_v36 = vmul.f32 0.2, %v218_v21 }
  0x17   : > { %v385_v37 = vpack.c.bf16 %v265_v35, %v264_v34  ;;  %v251_v38 = vmul.f32 0.2, %v219_v22  ;;  %v220_v39 = vadd.f32 %v486_v1, %v200_v19  ;;  %v221_v40 = vadd.f32 %v486_v1, %v201_v23 }
  0x18   : > { %381 = vst [vmem:[%s514_s26] sm:$0xff] %v380_v33   ;;  %v266_v41 = vsel %vm234_vm4, %v218_v21, %v250_v36  ;;  %v202_v42 = vmul.f32 %v475_v0, %v182_v30  ;;  %v203_v43 = vmul.f32 %v475_v0, %v183_v31  ;;  %v204_v45 = vmul.f32 %v475_v0, %v184_v32 }
  0x19   : > { %417 = vst [vmem:[%s514_s26 + $0x8] sm:$0xff] %v385_v37   ;;  %v267_v47 = vsel %vm235_vm5, %v219_v22, %v251_v38  ;;  %vm236_vm6 = vcmp.ge.f32.partialorder %v220_v39, 0.0  ;;  %vm237_vm7 = vcmp.ge.f32.partialorder %v221_v40, 0.0  ;;  %v252_v48 = vmul.f32 0.2, %v220_v39 }
  0x1a   : > { %v390_v49 = vpack.c.bf16 %v267_v47, %v266_v41  ;;  %v253_v50 = vmul.f32 0.2, %v221_v40  ;;  %v222_v51 = vadd.f32 %v486_v1, %v202_v42  ;;  %v223_v52 = vadd.f32 %v486_v1, %v203_v43 }
  0x1b   : > { %v268_v53 = vsel %vm236_vm6, %v220_v39, %v252_v48  ;;  %v205_v54 = vmul.f32 %v475_v0, %v185_v44  ;;  %v224_v55 = vadd.f32 %v486_v1, %v204_v45  ;;  %v206_v57 = vmul.f32 %v475_v0, %v186_v46 }
  0x1c   : > { %418 = vst [vmem:[%s514_s26 + $0x10] sm:$0xff] %v390_v49   ;;  %v269_v58 = vsel %vm237_vm7, %v221_v40, %v253_v50  ;;  %vm238_vm8 = vcmp.ge.f32.partialorder %v222_v51, 0.0  ;;  %vm239_vm9 = vcmp.ge.f32.partialorder %v223_v52, 0.0  ;;  %v254_v59 = vmul.f32 0.2, %v222_v51 }
  0x1d   : > { %v395_v61 = vpack.c.bf16 %v269_v58, %v268_v53  ;;  %v255_v62 = vmul.f32 0.2, %v223_v52  ;;  %v225_v63 = vadd.f32 %v486_v1, %v205_v54  ;;  %vm240_vm10 = vcmp.ge.f32.partialorder %v224_v55, 0.0 }
  0x1e   : > { %v270_v2 = vsel %vm238_vm8, %v222_v51, %v254_v59  ;;  %v256_v3 = vmul.f32 0.2, %v224_v55  ;;  %v207_v4 = vmul.f32 %v475_v0, %v187_v56  ;;  %v226_v5 = vadd.f32 %v486_v1, %v206_v57 }
  0x1f   : > { %419 = vst [vmem:[%s514_s26 + $0x18] sm:$0xff] %v395_v61   ;;  %v271_v7 = vsel %vm239_vm9, %v223_v52, %v255_v62  ;;  %vm241_vm11 = vcmp.ge.f32.partialorder %v225_v63, 0.0  ;;  %v257_v8 = vmul.f32 0.2, %v225_v63  ;;  %v208_v9 = vmul.f32 %v475_v0, %v188_v60 }
  0x20   : > { %v400_v10 = vpack.c.bf16 %v271_v7, %v270_v2  ;;  %v272_v11 = vsel %vm240_vm10, %v224_v55, %v256_v3  ;;  %v227_v12 = vadd.f32 %v486_v1, %v207_v4  ;;  %vm242_vm12 = vcmp.ge.f32.partialorder %v226_v5, 0.0 }
  0x21   : > { %v273_v13 = vsel %vm241_vm11, %v225_v63, %v257_v8  ;;  %v258_v14 = vmul.f32 0.2, %v226_v5  ;;  %v209_v15 = vmul.f32 %v475_v0, %v189_v6  ;;  %v228_v16 = vadd.f32 %v486_v1, %v208_v9 }
  0x22   : > { %420 = vst [vmem:[%s514_s26 + $0x20] sm:$0xff] %v400_v10   ;;  %v405_v17 = vpack.c.bf16 %v273_v13, %v272_v11  ;;  %vm243_vm13 = vcmp.ge.f32.partialorder %v227_v12, 0.0  ;;  %v259_v18 = vmul.f32 0.2, %v227_v12 }
  0x23   : > { %v274_v19 = vsel %vm242_vm12, %v226_v5, %v258_v14  ;;  %v229_v20 = vadd.f32 %v486_v1, %v209_v15  ;;  %vm244_vm14 = vcmp.ge.f32.partialorder %v228_v16, 0.0  ;;  %v260_v21 = vmul.f32 0.2, %v228_v16 }
  0x24   : > { %421 = vst [vmem:[%s514_s26 + $0x28] sm:$0xff] %v405_v17   ;;  %v275_v22 = vsel %vm243_vm13, %v227_v12, %v259_v18 }
  0x25   : > { %v410_v23 = vpack.c.bf16 %v275_v22, %v274_v19  ;;  %vm245_vm15 = vcmp.ge.f32.partialorder %v229_v20, 0.0  ;;  %v261_v24 = vmul.f32 0.2, %v229_v20  ;;  %v276_v25 = vsel %vm244_vm14, %v228_v16, %v260_v21 }
  0x27   : > { %422 = vst [vmem:[%s514_s26 + $0x30] sm:$0xff] %v410_v23   ;;  %v277_v0 = vsel %vm245_vm15, %v229_v20, %v261_v24 }
  0x28   : > { %v415_v26 = vpack.c.bf16 %v277_v0, %v276_v25 }
  0x2a   : > { %423 = vst [vmem:[%s514_s26 + $0x38] sm:$0xff] %v415_v26  }
  0x2b PF: > { %s13_s12 = sadd.s32 1, %s440_s12  }
  0x2c   : > { %p10_p4 = scmp.ge.s32.totalorder %s13_s12, 6  }
  0x2e   :  { %12 = sbr.rel (!%p10_p4) target bundleno = 1 (0x1), region = 62 }

// kernel: discriminator_forward.11
= control target key start
LH: loop header
LB: loop body
LE: loop exit
PB: predicated region body
PF: predicated region fallthrough
CT: control target
= control target key end

     0   :  { %s6837_s15 = smov 0   ;;  %s6839_s16 = smov 0   ;;  %s8513_s0 = inlined_call_operand.vmem [shape: bf16[128,2048], index: 0, kind: input, shape index: {}]   ;;  %s8514_s1 = inlined_call_operand.vmem [shape: bf16[2048,256], index: 1, kind: input, shape index: {}]   ;;  %s8515_s2 = inlined_call_operand.vmem [shape: f32[128,256], index: 2, kind: output, shape index: {0}]   ;;  %s8516_s3 = inlined_call_operand.vmem [shape: f32[1,1,256], index: 3, kind: output, shape index: {1}]   ;;  %s8517_s4 = inlined_call_operand.vmem [shape: f32[1,1,256], index: 4, kind: output, shape index: {2}]  }
   0x1   :  { %s6841_s17 = smov 0   ;;  %s6843_s18 = smov 0  }
   0x2   :  { %s6845_s19 = smov 0  }
   0x3 LB: > { %s30_s20 = sadd.s32 1, %s6806_s18  ;;  %s5438_s21 = sadd.s32 4294967295, %s6810_s19   ;;  %s6810_s19 = sphi %s6845_s19, %s15_s19   ;;  %s6806_s18 = sphi %s6843_s18, %s8522_s18   ;;  %s6802_s17 = sphi %s6841_s17, %s8521_s17   ;;  %s6798_s16 = sphi %s6839_s16, %s8520_s16   ;;  %s6794_s15 = sphi %s6837_s15, %s8519_s15  }
   0x4   : > { %p32_p0 = scmp.ge.s32.totalorder %s30_s20, 2  ;;  %p78_p1 = scmp.ne.s32.totalorder %s6798_s16, %s6794_s15 }
   0x5   : > { %p79_p2 = scmp.eq.s32.totalorder %s6810_s19, 0  ;;  %p110_p4 = scmp.eq.s32.totalorder %s5438_s21, 1 }
   0x6   : > { %s8524_s20 = smov (%p32_p0, %s30_s20), 0  ;;  %s71_s23 = sadd.s32 1, %s6798_s16 }
   0x7   : > { %p80_p3 = por %p79_p2, %p78_p1  ;;  %s67_s22 = ssub.s32 %s6806_s18, %s8524_s20 }
   0x8   : > { %p69_p5 = scmp.eq.s32.totalorder %s67_s22, 0  ;;  %p6872_p6 = por %p110_p4, %p78_p1 }
   0x9   : > { %p5442_p7 = scmp.ge.s32.totalorder %s6810_s19, 2 }
   0xa   : > { %s6877_s25 = scalar_select %p69_p5, %s6798_s16, %s71_s23  }
   0xb   : > { %203 = sbr.rel (%p5442_p7) target bundleno = 276 (0x114), region = 20 }
  0x10   : > { %206 = sbr.rel (!%p80_p3) target bundleno = 276 (0x114), region = 24  ;;  %s208_s26 = sand.u32 (%p80_p3), 1, %s6798_s16  }
  0x11   : > { %s5444_s27 = sshll.u32 (%p80_p3), %s6806_s18, 2  ;;  %s5443_s28 = sshll.u32 (%p80_p3), %s208_s26, 10 }
  0x12   : > { %s6885_s5 = scalar_lea.vmem (%p80_p3), %s8514_s1, %s5444_s27  ;;  %s6889_s6 = scalar_lea.vmem (%p80_p3), [#allocation3], %s5443_s28 }
  0x13   : > { %v232_v0 = vld [vmem:[%s6885_s5] sm:$0xf] (%p80_p3)  ;;  %v234_v1 = vld [vmem:[%s6885_s5 + $0x8] sm:$0xf] (%p80_p3)  ;;  %v236_v2 = vld [vmem:[%s6885_s5 + $0x10] sm:$0xf] (%p80_p3) }
  0x14   : > { %233 = vst [vmem:[%s6889_s6] sm:$0xf] (%p80_p3), %v232_v0  ;;  %v238_v3 = vld [vmem:[%s6885_s5 + $0x18] sm:$0xf] (%p80_p3)  ;;  %v240_v4 = vld [vmem:[%s6885_s5 + $0x20] sm:$0xf] (%p80_p3) }
  0x15   : > { %235 = vst [vmem:[%s6889_s6 + $0x4] sm:$0xf] %v234_v1  ;;  %v242_v5 = vld [vmem:[%s6885_s5 + $0x28] sm:$0xf]  ;;  %v244_v6 = vld [vmem:[%s6885_s5 + $0x30] sm:$0xf] }
  0x16   : > { %237 = vst [vmem:[%s6889_s6 + $0x8] sm:$0xf] %v236_v2  ;;  %v246_v7 = vld [vmem:[%s6885_s5 + $0x38] sm:$0xf]  ;;  %v248_v8 = vld [vmem:[%s6885_s5 + $0x40] sm:$0xf] }
  0x17   : > { %239 = vst [vmem:[%s6889_s6 + $0xc] sm:$0xf] %v238_v3  ;;  %v250_v9 = vld [vmem:[%s6885_s5 + $0x48] sm:$0xf]  ;;  %v252_v10 = vld [vmem:[%s6885_s5 + $0x50] sm:$0xf] }
  0x18   : > { %241 = vst [vmem:[%s6889_s6 + $0x10] sm:$0xf] %v240_v4  ;;  %v254_v11 = vld [vmem:[%s6885_s5 + $0x58] sm:$0xf]  ;;  %v256_v12 = vld [vmem:[%s6885_s5 + $0x60] sm:$0xf] }
  0x19   : > { %243 = vst [vmem:[%s6889_s6 + $0x14] sm:$0xf] %v242_v5  ;;  %v258_v13 = vld [vmem:[%s6885_s5 + $0x68] sm:$0xf]  ;;  %v260_v14 = vld [vmem:[%s6885_s5 + $0x70] sm:$0xf] }
  0x1a   : > { %245 = vst [vmem:[%s6889_s6 + $0x18] sm:$0xf] %v244_v6  ;;  %v262_v15 = vld [vmem:[%s6885_s5 + $0x78] sm:$0xf]  ;;  %v264_v16 = vld [vmem:[%s6885_s5 + $0x80] sm:$0xf] }
  0x1b   : > { %247 = vst [vmem:[%s6889_s6 + $0x1c] sm:$0xf] %v246_v7  ;;  %v266_v17 = vld [vmem:[%s6885_s5 + $0x88] sm:$0xf]  ;;  %v268_v18 = vld [vmem:[%s6885_s5 + $0x90] sm:$0xf] }
  0x1c   : > { %249 = vst [vmem:[%s6889_s6 + $0x20] sm:$0xf] %v248_v8  ;;  %v270_v19 = vld [vmem:[%s6885_s5 + $0x98] sm:$0xf]  ;;  %v272_v20 = vld [vmem:[%s6885_s5 + $0xa0] sm:$0xf] }
  0x1d   : > { %251 = vst [vmem:[%s6889_s6 + $0x24] sm:$0xf] %v250_v9  ;;  %v274_v21 = vld [vmem:[%s6885_s5 + $0xa8] sm:$0xf]  ;;  %v276_v22 = vld [vmem:[%s6885_s5 + $0xb0] sm:$0xf] }
  0x1e   : > { %253 = vst [vmem:[%s6889_s6 + $0x28] sm:$0xf] %v252_v10  ;;  %v278_v23 = vld [vmem:[%s6885_s5 + $0xb8] sm:$0xf]  ;;  %v280_v24 = vld [vmem:[%s6885_s5 + $0xc0] sm:$0xf] }
  0x1f   : > { %255 = vst [vmem:[%s6889_s6 + $0x2c] sm:$0xf] %v254_v11  ;;  %v282_v25 = vld [vmem:[%s6885_s5 + $0xc8] sm:$0xf]  ;;  %v284_v26 = vld [vmem:[%s6885_s5 + $0xd0] sm:$0xf] }
  0x20   : > { %257 = vst [vmem:[%s6889_s6 + $0x30] sm:$0xf] %v256_v12  ;;  %v286_v27 = vld [vmem:[%s6885_s5 + $0xd8] sm:$0xf]  ;;  %v288_v28 = vld [vmem:[%s6885_s5 + $0xe0] sm:$0xf] }
  0x21   : > { %259 = vst [vmem:[%s6889_s6 + $0x34] sm:$0xf] %v258_v13  ;;  %v290_v29 = vld [vmem:[%s6885_s5 + $0xe8] sm:$0xf]  ;;  %v292_v30 = vld [vmem:[%s6885_s5 + $0xf0] sm:$0xf] }
  0x22   : > { %261 = vst [vmem:[%s6889_s6 + $0x38] sm:$0xf] %v260_v14  ;;  %v294_v31 = vld [vmem:[%s6885_s5 + $0xf8] sm:$0xf]  ;;  %v296_v32 = vld [vmem:[%s6885_s5 + $0x100] sm:$0xf] }
  0x23   : > { %263 = vst [vmem:[%s6889_s6 + $0x3c] sm:$0xf] %v262_v15  ;;  %v298_v33 = vld [vmem:[%s6885_s5 + $0x108] sm:$0xf]  ;;  %v300_v34 = vld [vmem:[%s6885_s5 + $0x110] sm:$0xf] }
  0x24   : > { %265 = vst [vmem:[%s6889_s6 + $0x40] sm:$0xf] %v264_v16  ;;  %v302_v35 = vld [vmem:[%s6885_s5 + $0x118] sm:$0xf]  ;;  %v304_v36 = vld [vmem:[%s6885_s5 + $0x120] sm:$0xf] }
  0x25   : > { %267 = vst [vmem:[%s6889_s6 + $0x44] sm:$0xf] %v266_v17  ;;  %v306_v37 = vld [vmem:[%s6885_s5 + $0x128] sm:$0xf]  ;;  %v308_v38 = vld [vmem:[%s6885_s5 + $0x130] sm:$0xf] }
  0x26   : > { %269 = vst [vmem:[%s6889_s6 + $0x48] sm:$0xf] %v268_v18  ;;  %v310_v39 = vld [vmem:[%s6885_s5 + $0x138] sm:$0xf]  ;;  %v312_v40 = vld [vmem:[%s6885_s5 + $0x140] sm:$0xf] }
  0x27   : > { %271 = vst [vmem:[%s6889_s6 + $0x4c] sm:$0xf] %v270_v19  ;;  %v314_v41 = vld [vmem:[%s6885_s5 + $0x148] sm:$0xf]  ;;  %v316_v42 = vld [vmem:[%s6885_s5 + $0x150] sm:$0xf] }
  0x28   : > { %273 = vst [vmem:[%s6889_s6 + $0x50] sm:$0xf] %v272_v20  ;;  %v318_v43 = vld [vmem:[%s6885_s5 + $0x158] sm:$0xf]  ;;  %v320_v44 = vld [vmem:[%s6885_s5 + $0x160] sm:$0xf] }
  0x29   : > { %275 = vst [vmem:[%s6889_s6 + $0x54] sm:$0xf] %v274_v21  ;;  %v322_v45 = vld [vmem:[%s6885_s5 + $0x168] sm:$0xf]  ;;  %v324_v46 = vld [vmem:[%s6885_s5 + $0x170] sm:$0xf] }
  0x2a   : > { %277 = vst [vmem:[%s6889_s6 + $0x58] sm:$0xf] %v276_v22  ;;  %v326_v47 = vld [vmem:[%s6885_s5 + $0x178] sm:$0xf]  ;;  %v328_v48 = vld [vmem:[%s6885_s5 + $0x180] sm:$0xf] }
  0x2b   : > { %279 = vst [vmem:[%s6889_s6 + $0x5c] sm:$0xf] %v278_v23  ;;  %v330_v49 = vld [vmem:[%s6885_s5 + $0x188] sm:$0xf]  ;;  %v332_v50 = vld [vmem:[%s6885_s5 + $0x190] sm:$0xf] }
  0x2c   : > { %281 = vst [vmem:[%s6889_s6 + $0x60] sm:$0xf] %v280_v24  ;;  %v334_v51 = vld [vmem:[%s6885_s5 + $0x198] sm:$0xf]  ;;  %v336_v52 = vld [vmem:[%s6885_s5 + $0x1a0] sm:$0xf] }
  0x2d   : > { %283 = vst [vmem:[%s6889_s6 + $0x64] sm:$0xf] %v282_v25  ;;  %v338_v53 = vld [vmem:[%s6885_s5 + $0x1a8] sm:$0xf]  ;;  %v340_v54 = vld [vmem:[%s6885_s5 + $0x1b0] sm:$0xf] }
  0x2e   : > { %285 = vst [vmem:[%s6889_s6 + $0x68] sm:$0xf] %v284_v26  ;;  %v342_v55 = vld [vmem:[%s6885_s5 + $0x1b8] sm:$0xf]  ;;  %v344_v56 = vld [vmem:[%s6885_s5 + $0x1c0] sm:$0xf] }
  0x2f   : > { %287 = vst [vmem:[%s6889_s6 + $0x6c] sm:$0xf] %v286_v27  ;;  %v346_v57 = vld [vmem:[%s6885_s5 + $0x1c8] sm:$0xf]  ;;  %v348_v58 = vld [vmem:[%s6885_s5 + $0x1d0] sm:$0xf] }
  0x30   : > { %289 = vst [vmem:[%s6889_s6 + $0x70] sm:$0xf] %v288_v28  ;;  %v350_v59 = vld [vmem:[%s6885_s5 + $0x1d8] sm:$0xf]  ;;  %v352_v60 = vld [vmem:[%s6885_s5 + $0x1e0] sm:$0xf] }
  0x31   : > { %291 = vst [vmem:[%s6889_s6 + $0x74] sm:$0xf] %v290_v29  ;;  %v354_v61 = vld [vmem:[%s6885_s5 + $0x1e8] sm:$0xf]  ;;  %v356_v62 = vld [vmem:[%s6885_s5 + $0x1f0] sm:$0xf] }
  0x32   : > { %293 = vst [vmem:[%s6889_s6 + $0x78] sm:$0xf] %v292_v30  ;;  %v358_v63 = vld [vmem:[%s6885_s5 + $0x1f8] sm:$0xf]  ;;  %v360_v0 = vld [vmem:[%s6885_s5 + $0x200] sm:$0xf] }
  0x33   : > { %295 = vst [vmem:[%s6889_s6 + $0x7c] sm:$0xf] %v294_v31  ;;  %v362_v1 = vld [vmem:[%s6885_s5 + $0x208] sm:$0xf]  ;;  %v364_v2 = vld [vmem:[%s6885_s5 + $0x210] sm:$0xf] }
  0x34   : > { %297 = vst [vmem:[%s6889_s6 + $0x80] sm:$0xf] %v296_v32  ;;  %v366_v3 = vld [vmem:[%s6885_s5 + $0x218] sm:$0xf]  ;;  %v368_v4 = vld [vmem:[%s6885_s5 + $0x220] sm:$0xf] }
  0x35   : > { %299 = vst [vmem:[%s6889_s6 + $0x84] sm:$0xf] %v298_v33  ;;  %v370_v5 = vld [vmem:[%s6885_s5 + $0x228] sm:$0xf]  ;;  %v372_v6 = vld [vmem:[%s6885_s5 + $0x230] sm:$0xf] }
  0x36   : > { %301 = vst [vmem:[%s6889_s6 + $0x88] sm:$0xf] %v300_v34  ;;  %v374_v7 = vld [vmem:[%s6885_s5 + $0x238] sm:$0xf]  ;;  %v376_v8 = vld [vmem:[%s6885_s5 + $0x240] sm:$0xf] }
  0x37   : > { %303 = vst [vmem:[%s6889_s6 + $0x8c] sm:$0xf] %v302_v35  ;;  %v378_v9 = vld [vmem:[%s6885_s5 + $0x248] sm:$0xf]  ;;  %v380_v10 = vld [vmem:[%s6885_s5 + $0x250] sm:$0xf] }
  0x38   : > { %305 = vst [vmem:[%s6889_s6 + $0x90] sm:$0xf] %v304_v36  ;;  %v382_v11 = vld [vmem:[%s6885_s5 + $0x258] sm:$0xf]  ;;  %v384_v12 = vld [vmem:[%s6885_s5 + $0x260] sm:$0xf] }
  0x39   : > { %307 = vst [vmem:[%s6889_s6 + $0x94] sm:$0xf] %v306_v37  ;;  %v386_v13 = vld [vmem:[%s6885_s5 + $0x268] sm:$0xf]  ;;  %v388_v14 = vld [vmem:[%s6885_s5 + $0x270] sm:$0xf] }
  0x3a   : > { %309 = vst [vmem:[%s6889_s6 + $0x98] sm:$0xf] %v308_v38  ;;  %v390_v15 = vld [vmem:[%s6885_s5 + $0x278] sm:$0xf]  ;;  %v392_v16 = vld [vmem:[%s6885_s5 + $0x280] sm:$0xf] }
  0x3b   : > { %311 = vst [vmem:[%s6889_s6 + $0x9c] sm:$0xf] %v310_v39  ;;  %v394_v17 = vld [vmem:[%s6885_s5 + $0x288] sm:$0xf]  ;;  %v396_v18 = vld [vmem:[%s6885_s5 + $0x290] sm:$0xf] }
  0x3c   : > { %313 = vst [vmem:[%s6889_s6 + $0xa0] sm:$0xf] %v312_v40  ;;  %v398_v19 = vld [vmem:[%s6885_s5 + $0x298] sm:$0xf]  ;;  %v400_v20 = vld [vmem:[%s6885_s5 + $0x2a0] sm:$0xf] }
  0x3d   : > { %315 = vst [vmem:[%s6889_s6 + $0xa4] sm:$0xf] %v314_v41  ;;  %v402_v21 = vld [vmem:[%s6885_s5 + $0x2a8] sm:$0xf]  ;;  %v404_v22 = vld [vmem:[%s6885_s5 + $0x2b0] sm:$0xf] }
  0x3e   : > { %317 = vst [vmem:[%s6889_s6 + $0xa8] sm:$0xf] %v316_v42  ;;  %v406_v23 = vld [vmem:[%s6885_s5 + $0x2b8] sm:$0xf]  ;;  %v408_v24 = vld [vmem:[%s6885_s5 + $0x2c0] sm:$0xf] }
  0x3f   : > { %319 = vst [vmem:[%s6889_s6 + $0xac] sm:$0xf] %v318_v43  ;;  %v410_v25 = vld [vmem:[%s6885_s5 + $0x2c8] sm:$0xf]  ;;  %v412_v26 = vld [vmem:[%s6885_s5 + $0x2d0] sm:$0xf] }
  0x40   : > { %321 = vst [vmem:[%s6889_s6 + $0xb0] sm:$0xf] %v320_v44  ;;  %v414_v27 = vld [vmem:[%s6885_s5 + $0x2d8] sm:$0xf]  ;;  %v416_v28 = vld [vmem:[%s6885_s5 + $0x2e0] sm:$0xf] }
  0x41   : > { %323 = vst [vmem:[%s6889_s6 + $0xb4] sm:$0xf] %v322_v45  ;;  %v418_v29 = vld [vmem:[%s6885_s5 + $0x2e8] sm:$0xf]  ;;  %v420_v30 = vld [vmem:[%s6885_s5 + $0x2f0] sm:$0xf] }
  0x42   : > { %325 = vst [vmem:[%s6889_s6 + $0xb8] sm:$0xf] %v324_v46  ;;  %v422_v31 = vld [vmem:[%s6885_s5 + $0x2f8] sm:$0xf]  ;;  %v424_v32 = vld [vmem:[%s6885_s5 + $0x300] sm:$0xf] }
  0x43   : > { %327 = vst [vmem:[%s6889_s6 + $0xbc] sm:$0xf] %v326_v47  ;;  %v426_v33 = vld [vmem:[%s6885_s5 + $0x308] sm:$0xf]  ;;  %v428_v34 = vld [vmem:[%s6885_s5 + $0x310] sm:$0xf] }
  0x44   : > { %329 = vst [vmem:[%s6889_s6 + $0xc0] sm:$0xf] %v328_v48  ;;  %v430_v35 = vld [vmem:[%s6885_s5 + $0x318] sm:$0xf]  ;;  %v432_v36 = vld [vmem:[%s6885_s5 + $0x320] sm:$0xf] }
  0x45   : > { %331 = vst [vmem:[%s6889_s6 + $0xc4] sm:$0xf] %v330_v49  ;;  %v434_v37 = vld [vmem:[%s6885_s5 + $0x328] sm:$0xf]  ;;  %v436_v38 = vld [vmem:[%s6885_s5 + $0x330] sm:$0xf] }
  0x46   : > { %333 = vst [vmem:[%s6889_s6 + $0xc8] sm:$0xf] %v332_v50  ;;  %v438_v39 = vld [vmem:[%s6885_s5 + $0x338] sm:$0xf]  ;;  %v440_v40 = vld [vmem:[%s6885_s5 + $0x340] sm:$0xf] }
  0x47   : > { %335 = vst [vmem:[%s6889_s6 + $0xcc] sm:$0xf] %v334_v51  ;;  %v442_v41 = vld [vmem:[%s6885_s5 + $0x348] sm:$0xf]  ;;  %v444_v42 = vld [vmem:[%s6885_s5 + $0x350] sm:$0xf] }
  0x48   : > { %337 = vst [vmem:[%s6889_s6 + $0xd0] sm:$0xf] %v336_v52  ;;  %v446_v43 = vld [vmem:[%s6885_s5 + $0x358] sm:$0xf]  ;;  %v448_v44 = vld [vmem:[%s6885_s5 + $0x360] sm:$0xf] }
  0x49   : > { %339 = vst [vmem:[%s6889_s6 + $0xd4] sm:$0xf] %v338_v53  ;;  %v450_v45 = vld [vmem:[%s6885_s5 + $0x368] sm:$0xf]  ;;  %v452_v46 = vld [vmem:[%s6885_s5 + $0x370] sm:$0xf] }
  0x4a   : > { %341 = vst [vmem:[%s6889_s6 + $0xd8] sm:$0xf] %v340_v54  ;;  %v454_v47 = vld [vmem:[%s6885_s5 + $0x378] sm:$0xf]  ;;  %v456_v48 = vld [vmem:[%s6885_s5 + $0x380] sm:$0xf] }
  0x4b   : > { %343 = vst [vmem:[%s6889_s6 + $0xdc] sm:$0xf] %v342_v55  ;;  %v458_v49 = vld [vmem:[%s6885_s5 + $0x388] sm:$0xf]  ;;  %v460_v50 = vld [vmem:[%s6885_s5 + $0x390] sm:$0xf] }
  0x4c   : > { %345 = vst [vmem:[%s6889_s6 + $0xe0] sm:$0xf] %v344_v56  ;;  %v462_v51 = vld [vmem:[%s6885_s5 + $0x398] sm:$0xf]  ;;  %v464_v52 = vld [vmem:[%s6885_s5 + $0x3a0] sm:$0xf] }
  0x4d   : > { %347 = vst [vmem:[%s6889_s6 + $0xe4] sm:$0xf] %v346_v57  ;;  %v466_v53 = vld [vmem:[%s6885_s5 + $0x3a8] sm:$0xf]  ;;  %v468_v54 = vld [vmem:[%s6885_s5 + $0x3b0] sm:$0xf] }
  0x4e   : > { %349 = vst [vmem:[%s6889_s6 + $0xe8] sm:$0xf] %v348_v58  ;;  %v470_v55 = vld [vmem:[%s6885_s5 + $0x3b8] sm:$0xf]  ;;  %v472_v56 = vld [vmem:[%s6885_s5 + $0x3c0] sm:$0xf] }
  0x4f   : > { %351 = vst [vmem:[%s6889_s6 + $0xec] sm:$0xf] %v350_v59  ;;  %v474_v57 = vld [vmem:[%s6885_s5 + $0x3c8] sm:$0xf]  ;;  %v476_v58 = vld [vmem:[%s6885_s5 + $0x3d0] sm:$0xf] }
  0x50   : > { %353 = vst [vmem:[%s6889_s6 + $0xf0] sm:$0xf] %v352_v60  ;;  %v478_v59 = vld [vmem:[%s6885_s5 + $0x3d8] sm:$0xf]  ;;  %v480_v60 = vld [vmem:[%s6885_s5 + $0x3e0] sm:$0xf] }
  0x51   : > { %355 = vst [vmem:[%s6889_s6 + $0xf4] sm:$0xf] %v354_v61  ;;  %v482_v61 = vld [vmem:[%s6885_s5 + $0x3e8] sm:$0xf] }
  0x52   : > { %357 = vst [vmem:[%s6889_s6 + $0xf8] sm:$0xf] %v356_v62  ;;  %v484_v62 = vld [vmem:[%s6885_s5 + $0x3f0] sm:$0xf] }
  0x53   : > { %359 = vst [vmem:[%s6889_s6 + $0xfc] sm:$0xf] %v358_v63  ;;  %v486_v63 = vld [vmem:[%s6885_s5 + $0x3f8] sm:$0xf] }
  0x54   : > { %361 = vst [vmem:[%s6889_s6 + $0x100] sm:$0xf] %v360_v0  ;;  %v488_v0 = vld [vmem:[%s6885_s5 + $0x400] sm:$0xf] }
  0x55   : > { %363 = vst [vmem:[%s6889_s6 + $0x104] sm:$0xf] %v362_v1  ;;  %v490_v1 = vld [vmem:[%s6885_s5 + $0x408] sm:$0xf] }
  0x56   : > { %365 = vst [vmem:[%s6889_s6 + $0x108] sm:$0xf] %v364_v2  ;;  %v492_v2 = vld [vmem:[%s6885_s5 + $0x410] sm:$0xf] }
  0x57   : > { %367 = vst [vmem:[%s6889_s6 + $0x10c] sm:$0xf] %v366_v3  ;;  %v494_v3 = vld [vmem:[%s6885_s5 + $0x418] sm:$0xf] }
  0x58   : > { %369 = vst [vmem:[%s6889_s6 + $0x110] sm:$0xf] %v368_v4  ;;  %v496_v4 = vld [vmem:[%s6885_s5 + $0x420] sm:$0xf] }
  0x59   : > { %371 = vst [vmem:[%s6889_s6 + $0x114] sm:$0xf] %v370_v5  ;;  %v498_v5 = vld [vmem:[%s6885_s5 + $0x428] sm:$0xf] }
  0x5a   : > { %373 = vst [vmem:[%s6889_s6 + $0x118] sm:$0xf] %v372_v6  ;;  %v500_v6 = vld [vmem:[%s6885_s5 + $0x430] sm:$0xf] }
  0x5b   : > { %375 = vst [vmem:[%s6889_s6 + $0x11c] sm:$0xf] %v374_v7  ;;  %v502_v7 = vld [vmem:[%s6885_s5 + $0x438] sm:$0xf] }
  0x5c   : > { %377 = vst [vmem:[%s6889_s6 + $0x120] sm:$0xf] %v376_v8  ;;  %v504_v8 = vld [vmem:[%s6885_s5 + $0x440] sm:$0xf] }
  0x5d   : > { %379 = vst [vmem:[%s6889_s6 + $0x124] sm:$0xf] %v378_v9  ;;  %v506_v9 = vld [vmem:[%s6885_s5 + $0x448] sm:$0xf] }
  0x5e   : > { %381 = vst [vmem:[%s6889_s6 + $0x128] sm:$0xf] %v380_v10  ;;  %v508_v10 = vld [vmem:[%s6885_s5 + $0x450] sm:$0xf] }
  0x5f   : > { %383 = vst [vmem:[%s6889_s6 + $0x12c] sm:$0xf] %v382_v11  ;;  %v510_v11 = vld [vmem:[%s6885_s5 + $0x458] sm:$0xf] }
  0x60   : > { %385 = vst [vmem:[%s6889_s6 + $0x130] sm:$0xf] %v384_v12  ;;  %v512_v12 = vld [vmem:[%s6885_s5 + $0x460] sm:$0xf] }
  0x61   : > { %387 = vst [vmem:[%s6889_s6 + $0x134] sm:$0xf] %v386_v13  ;;  %v514_v13 = vld [vmem:[%s6885_s5 + $0x468] sm:$0xf] }
  0x62   : > { %389 = vst [vmem:[%s6889_s6 + $0x138] sm:$0xf] %v388_v14  ;;  %v516_v14 = vld [vmem:[%s6885_s5 + $0x470] sm:$0xf] }
  0x63   : > { %391 = vst [vmem:[%s6889_s6 + $0x13c] sm:$0xf] %v390_v15  ;;  %v518_v15 = vld [vmem:[%s6885_s5 + $0x478] sm:$0xf] }
  0x64   : > { %393 = vst [vmem:[%s6889_s6 + $0x140] sm:$0xf] %v392_v16  ;;  %v520_v16 = vld [vmem:[%s6885_s5 + $0x480] sm:$0xf] }
  0x65   : > { %395 = vst [vmem:[%s6889_s6 + $0x144] sm:$0xf] %v394_v17  ;;  %v522_v17 = vld [vmem:[%s6885_s5 + $0x488] sm:$0xf] }
  0x66   : > { %397 = vst [vmem:[%s6889_s6 + $0x148] sm:$0xf] %v396_v18  ;;  %v524_v18 = vld [vmem:[%s6885_s5 + $0x490] sm:$0xf] }
  0x67   : > { %399 = vst [vmem:[%s6889_s6 + $0x14c] sm:$0xf] %v398_v19  ;;  %v526_v19 = vld [vmem:[%s6885_s5 + $0x498] sm:$0xf] }
  0x68   : > { %401 = vst [vmem:[%s6889_s6 + $0x150] sm:$0xf] %v400_v20  ;;  %v528_v20 = vld [vmem:[%s6885_s5 + $0x4a0] sm:$0xf] }
  0x69   : > { %403 = vst [vmem:[%s6889_s6 + $0x154] sm:$0xf] %v402_v21  ;;  %v530_v21 = vld [vmem:[%s6885_s5 + $0x4a8] sm:$0xf] }
  0x6a   : > { %405 = vst [vmem:[%s6889_s6 + $0x158] sm:$0xf] %v404_v22  ;;  %v532_v22 = vld [vmem:[%s6885_s5 + $0x4b0] sm:$0xf] }
  0x6b   : > { %407 = vst [vmem:[%s6889_s6 + $0x15c] sm:$0xf] %v406_v23  ;;  %v534_v23 = vld [vmem:[%s6885_s5 + $0x4b8] sm:$0xf] }
  0x6c   : > { %409 = vst [vmem:[%s6889_s6 + $0x160] sm:$0xf] %v408_v24  ;;  %v536_v24 = vld [vmem:[%s6885_s5 + $0x4c0] sm:$0xf] }
  0x6d   : > { %411 = vst [vmem:[%s6889_s6 + $0x164] sm:$0xf] %v410_v25  ;;  %v538_v25 = vld [vmem:[%s6885_s5 + $0x4c8] sm:$0xf] }
  0x6e   : > { %413 = vst [vmem:[%s6889_s6 + $0x168] sm:$0xf] %v412_v26  ;;  %v540_v26 = vld [vmem:[%s6885_s5 + $0x4d0] sm:$0xf] }
  0x6f   : > { %415 = vst [vmem:[%s6889_s6 + $0x16c] sm:$0xf] %v414_v27  ;;  %v542_v27 = vld [vmem:[%s6885_s5 + $0x4d8] sm:$0xf] }
  0x70   : > { %417 = vst [vmem:[%s6889_s6 + $0x170] sm:$0xf] %v416_v28  ;;  %v544_v28 = vld [vmem:[%s6885_s5 + $0x4e0] sm:$0xf] }
  0x71   : > { %419 = vst [vmem:[%s6889_s6 + $0x174] sm:$0xf] %v418_v29  ;;  %v546_v29 = vld [vmem:[%s6885_s5 + $0x4e8] sm:$0xf] }
  0x72   : > { %421 = vst [vmem:[%s6889_s6 + $0x178] sm:$0xf] %v420_v30  ;;  %v548_v30 = vld [vmem:[%s6885_s5 + $0x4f0] sm:$0xf] }
  0x73   : > { %423 = vst [vmem:[%s6889_s6 + $0x17c] sm:$0xf] %v422_v31  ;;  %v550_v31 = vld [vmem:[%s6885_s5 + $0x4f8] sm:$0xf] }
  0x74   : > { %425 = vst [vmem:[%s6889_s6 + $0x180] sm:$0xf] %v424_v32  ;;  %v552_v32 = vld [vmem:[%s6885_s5 + $0x500] sm:$0xf] }
  0x75   : > { %427 = vst [vmem:[%s6889_s6 + $0x184] sm:$0xf] %v426_v33  ;;  %v554_v33 = vld [vmem:[%s6885_s5 + $0x508] sm:$0xf] }
  0x76   : > { %429 = vst [vmem:[%s6889_s6 + $0x188] sm:$0xf] %v428_v34  ;;  %v556_v34 = vld [vmem:[%s6885_s5 + $0x510] sm:$0xf] }
  0x77   : > { %431 = vst [vmem:[%s6889_s6 + $0x18c] sm:$0xf] %v430_v35  ;;  %v558_v35 = vld [vmem:[%s6885_s5 + $0x518] sm:$0xf] }
  0x78   : > { %433 = vst [vmem:[%s6889_s6 + $0x190] sm:$0xf] %v432_v36  ;;  %v560_v36 = vld [vmem:[%s6885_s5 + $0x520] sm:$0xf] }
  0x79   : > { %435 = vst [vmem:[%s6889_s6 + $0x194] sm:$0xf] %v434_v37  ;;  %v562_v37 = vld [vmem:[%s6885_s5 + $0x528] sm:$0xf] }
  0x7a   : > { %437 = vst [vmem:[%s6889_s6 + $0x198] sm:$0xf] %v436_v38  ;;  %v564_v38 = vld [vmem:[%s6885_s5 + $0x530] sm:$0xf] }
  0x7b   : > { %439 = vst [vmem:[%s6889_s6 + $0x19c] sm:$0xf] %v438_v39  ;;  %v566_v39 = vld [vmem:[%s6885_s5 + $0x538] sm:$0xf] }
  0x7c   : > { %441 = vst [vmem:[%s6889_s6 + $0x1a0] sm:$0xf] %v440_v40  ;;  %v568_v40 = vld [vmem:[%s6885_s5 + $0x540] sm:$0xf] }
  0x7d   : > { %443 = vst [vmem:[%s6889_s6 + $0x1a4] sm:$0xf] %v442_v41  ;;  %v570_v41 = vld [vmem:[%s6885_s5 + $0x548] sm:$0xf] }
  0x7e   : > { %445 = vst [vmem:[%s6889_s6 + $0x1a8] sm:$0xf] %v444_v42  ;;  %v572_v42 = vld [vmem:[%s6885_s5 + $0x550] sm:$0xf] }
  0x7f   : > { %447 = vst [vmem:[%s6889_s6 + $0x1ac] sm:$0xf] %v446_v43  ;;  %v574_v43 = vld [vmem:[%s6885_s5 + $0x558] sm:$0xf] }
  0x80   : > { %449 = vst [vmem:[%s6889_s6 + $0x1b0] sm:$0xf] %v448_v44  ;;  %v576_v44 = vld [vmem:[%s6885_s5 + $0x560] sm:$0xf] }
  0x81   : > { %451 = vst [vmem:[%s6889_s6 + $0x1b4] sm:$0xf] %v450_v45  ;;  %v578_v45 = vld [vmem:[%s6885_s5 + $0x568] sm:$0xf] }
  0x82   : > { %453 = vst [vmem:[%s6889_s6 + $0x1b8] sm:$0xf] %v452_v46  ;;  %v580_v46 = vld [vmem:[%s6885_s5 + $0x570] sm:$0xf] }
  0x83   : > { %455 = vst [vmem:[%s6889_s6 + $0x1bc] sm:$0xf] %v454_v47  ;;  %v582_v47 = vld [vmem:[%s6885_s5 + $0x578] sm:$0xf] }
  0x84   : > { %457 = vst [vmem:[%s6889_s6 + $0x1c0] sm:$0xf] %v456_v48  ;;  %v584_v48 = vld [vmem:[%s6885_s5 + $0x580] sm:$0xf] }
  0x85   : > { %459 = vst [vmem:[%s6889_s6 + $0x1c4] sm:$0xf] %v458_v49  ;;  %v586_v49 = vld [vmem:[%s6885_s5 + $0x588] sm:$0xf] }
  0x86   : > { %461 = vst [vmem:[%s6889_s6 + $0x1c8] sm:$0xf] %v460_v50  ;;  %v588_v50 = vld [vmem:[%s6885_s5 + $0x590] sm:$0xf] }
  0x87   : > { %463 = vst [vmem:[%s6889_s6 + $0x1cc] sm:$0xf] %v462_v51  ;;  %v590_v51 = vld [vmem:[%s6885_s5 + $0x598] sm:$0xf] }
  0x88   : > { %465 = vst [vmem:[%s6889_s6 + $0x1d0] sm:$0xf] %v464_v52  ;;  %v592_v52 = vld [vmem:[%s6885_s5 + $0x5a0] sm:$0xf] }
  0x89   : > { %467 = vst [vmem:[%s6889_s6 + $0x1d4] sm:$0xf] %v466_v53  ;;  %v594_v53 = vld [vmem:[%s6885_s5 + $0x5a8] sm:$0xf] }
  0x8a   : > { %469 = vst [vmem:[%s6889_s6 + $0x1d8] sm:$0xf] %v468_v54  ;;  %v596_v54 = vld [vmem:[%s6885_s5 + $0x5b0] sm:$0xf] }
  0x8b   : > { %471 = vst [vmem:[%s6889_s6 + $0x1dc] sm:$0xf] %v470_v55  ;;  %v598_v55 = vld [vmem:[%s6885_s5 + $0x5b8] sm:$0xf] }
  0x8c   : > { %473 = vst [vmem:[%s6889_s6 + $0x1e0] sm:$0xf] %v472_v56  ;;  %v600_v56 = vld [vmem:[%s6885_s5 + $0x5c0] sm:$0xf] }
  0x8d   : > { %475 = vst [vmem:[%s6889_s6 + $0x1e4] sm:$0xf] %v474_v57  ;;  %v602_v57 = vld [vmem:[%s6885_s5 + $0x5c8] sm:$0xf] }
  0x8e   : > { %477 = vst [vmem:[%s6889_s6 + $0x1e8] sm:$0xf] %v476_v58  ;;  %v604_v58 = vld [vmem:[%s6885_s5 + $0x5d0] sm:$0xf] }
  0x8f   : > { %479 = vst [vmem:[%s6889_s6 + $0x1ec] sm:$0xf] %v478_v59  ;;  %v606_v59 = vld [vmem:[%s6885_s5 + $0x5d8] sm:$0xf] }
  0x90   : > { %481 = vst [vmem:[%s6889_s6 + $0x1f0] sm:$0xf] %v480_v60  ;;  %v608_v60 = vld [vmem:[%s6885_s5 + $0x5e0] sm:$0xf] }
  0x91   : > { %483 = vst [vmem:[%s6889_s6 + $0x1f4] sm:$0xf] %v482_v61  ;;  %v610_v61 = vld [vmem:[%s6885_s5 + $0x5e8] sm:$0xf] }
  0x92   : > { %485 = vst [vmem:[%s6889_s6 + $0x1f8] sm:$0xf] %v484_v62  ;;  %v612_v62 = vld [vmem:[%s6885_s5 + $0x5f0] sm:$0xf] }
  0x93   : > { %487 = vst [vmem:[%s6889_s6 + $0x1fc] sm:$0xf] %v486_v63  ;;  %v614_v63 = vld [vmem:[%s6885_s5 + $0x5f8] sm:$0xf] }
  0x94   : > { %489 = vst [vmem:[%s6889_s6 + $0x200] sm:$0xf] %v488_v0  ;;  %v616_v0 = vld [vmem:[%s6885_s5 + $0x600] sm:$0xf] }
  0x95   : > { %491 = vst [vmem:[%s6889_s6 + $0x204] sm:$0xf] %v490_v1  ;;  %v618_v1 = vld [vmem:[%s6885_s5 + $0x608] sm:$0xf] }
  0x96   : > { %493 = vst [vmem:[%s6889_s6 + $0x208] sm:$0xf] %v492_v2  ;;  %v620_v2 = vld [vmem:[%s6885_s5 + $0x610] sm:$0xf] }
  0x97   : > { %495 = vst [vmem:[%s6889_s6 + $0x20c] sm:$0xf] %v494_v3  ;;  %v622_v3 = vld [vmem:[%s6885_s5 + $0x618] sm:$0xf] }
  0x98   : > { %497 = vst [vmem:[%s6889_s6 + $0x210] sm:$0xf] %v496_v4  ;;  %v624_v4 = vld [vmem:[%s6885_s5 + $0x620] sm:$0xf] }
  0x99   : > { %499 = vst [vmem:[%s6889_s6 + $0x214] sm:$0xf] %v498_v5  ;;  %v626_v5 = vld [vmem:[%s6885_s5 + $0x628] sm:$0xf] }
  0x9a   : > { %501 = vst [vmem:[%s6889_s6 + $0x218] sm:$0xf] %v500_v6  ;;  %v628_v6 = vld [vmem:[%s6885_s5 + $0x630] sm:$0xf] }
  0x9b   : > { %503 = vst [vmem:[%s6889_s6 + $0x21c] sm:$0xf] %v502_v7  ;;  %v630_v7 = vld [vmem:[%s6885_s5 + $0x638] sm:$0xf] }
  0x9c   : > { %505 = vst [vmem:[%s6889_s6 + $0x220] sm:$0xf] %v504_v8  ;;  %v632_v8 = vld [vmem:[%s6885_s5 + $0x640] sm:$0xf] }
  0x9d   : > { %507 = vst [vmem:[%s6889_s6 + $0x224] sm:$0xf] %v506_v9  ;;  %v634_v9 = vld [vmem:[%s6885_s5 + $0x648] sm:$0xf] }
  0x9e   : > { %509 = vst [vmem:[%s6889_s6 + $0x228] sm:$0xf] %v508_v10  ;;  %v636_v10 = vld [vmem:[%s6885_s5 + $0x650] sm:$0xf] }
  0x9f   : > { %511 = vst [vmem:[%s6889_s6 + $0x22c] sm:$0xf] %v510_v11  ;;  %v638_v11 = vld [vmem:[%s6885_s5 + $0x658] sm:$0xf] }
  0xa0   : > { %513 = vst [vmem:[%s6889_s6 + $0x230] sm:$0xf] %v512_v12  ;;  %v640_v12 = vld [vmem:[%s6885_s5 + $0x660] sm:$0xf] }
  0xa1   : > { %515 = vst [vmem:[%s6889_s6 + $0x234] sm:$0xf] %v514_v13  ;;  %v642_v13 = vld [vmem:[%s6885_s5 + $0x668] sm:$0xf] }
  0xa2   : > { %517 = vst [vmem:[%s6889_s6 + $0x238] sm:$0xf] %v516_v14  ;;  %v644_v14 = vld [vmem:[%s6885_s5 + $0x670] sm:$0xf] }
  0xa3   : > { %519 = vst [vmem:[%s6889_s6 + $0x23c] sm:$0xf] %v518_v15  ;;  %v646_v15 = vld [vmem:[%s6885_s5 + $0x678] sm:$0xf] }
  0xa4   : > { %521 = vst [vmem:[%s6889_s6 + $0x240] sm:$0xf] %v520_v16  ;;  %v648_v16 = vld [vmem:[%s6885_s5 + $0x680] sm:$0xf] }
  0xa5   : > { %523 = vst [vmem:[%s6889_s6 + $0x244] sm:$0xf] %v522_v17  ;;  %v650_v17 = vld [vmem:[%s6885_s5 + $0x688] sm:$0xf] }
  0xa6   : > { %525 = vst [vmem:[%s6889_s6 + $0x248] sm:$0xf] %v524_v18  ;;  %v652_v18 = vld [vmem:[%s6885_s5 + $0x690] sm:$0xf] }
  0xa7   : > { %527 = vst [vmem:[%s6889_s6 + $0x24c] sm:$0xf] %v526_v19  ;;  %v654_v19 = vld [vmem:[%s6885_s5 + $0x698] sm:$0xf] }
  0xa8   : > { %529 = vst [vmem:[%s6889_s6 + $0x250] sm:$0xf] %v528_v20  ;;  %v656_v20 = vld [vmem:[%s6885_s5 + $0x6a0] sm:$0xf] }
  0xa9   : > { %531 = vst [vmem:[%s6889_s6 + $0x254] sm:$0xf] %v530_v21  ;;  %v658_v21 = vld [vmem:[%s6885_s5 + $0x6a8] sm:$0xf] }
  0xaa   : > { %533 = vst [vmem:[%s6889_s6 + $0x258] sm:$0xf] %v532_v22  ;;  %v660_v22 = vld [vmem:[%s6885_s5 + $0x6b0] sm:$0xf] }
  0xab   : > { %535 = vst [vmem:[%s6889_s6 + $0x25c] sm:$0xf] %v534_v23  ;;  %v662_v23 = vld [vmem:[%s6885_s5 + $0x6b8] sm:$0xf] }
  0xac   : > { %537 = vst [vmem:[%s6889_s6 + $0x260] sm:$0xf] %v536_v24  ;;  %v664_v24 = vld [vmem:[%s6885_s5 + $0x6c0] sm:$0xf] }
  0xad   : > { %539 = vst [vmem:[%s6889_s6 + $0x264] sm:$0xf] %v538_v25  ;;  %v666_v25 = vld [vmem:[%s6885_s5 + $0x6c8] sm:$0xf] }
  0xae   : > { %541 = vst [vmem:[%s6889_s6 + $0x268] sm:$0xf] %v540_v26  ;;  %v668_v26 = vld [vmem:[%s6885_s5 + $0x6d0] sm:$0xf] }
  0xaf   : > { %543 = vst [vmem:[%s6889_s6 + $0x26c] sm:$0xf] %v542_v27  ;;  %v670_v27 = vld [vmem:[%s6885_s5 + $0x6d8] sm:$0xf] }
  0xb0   : > { %545 = vst [vmem:[%s6889_s6 + $0x270] sm:$0xf] %v544_v28  ;;  %v672_v28 = vld [vmem:[%s6885_s5 + $0x6e0] sm:$0xf] }
  0xb1   : > { %547 = vst [vmem:[%s6889_s6 + $0x274] sm:$0xf] %v546_v29  ;;  %v674_v29 = vld [vmem:[%s6885_s5 + $0x6e8] sm:$0xf] }
  0xb2   : > { %549 = vst [vmem:[%s6889_s6 + $0x278] sm:$0xf] %v548_v30  ;;  %v676_v30 = vld [vmem:[%s6885_s5 + $0x6f0] sm:$0xf] }
  0xb3   : > { %551 = vst [vmem:[%s6889_s6 + $0x27c] sm:$0xf] %v550_v31  ;;  %v678_v31 = vld [vmem:[%s6885_s5 + $0x6f8] sm:$0xf] }
  0xb4   : > { %553 = vst [vmem:[%s6889_s6 + $0x280] sm:$0xf] %v552_v32  ;;  %v680_v32 = vld [vmem:[%s6885_s5 + $0x700] sm:$0xf] }
  0xb5   : > { %555 = vst [vmem:[%s6889_s6 + $0x284] sm:$0xf] %v554_v33  ;;  %v682_v33 = vld [vmem:[%s6885_s5 + $0x708] sm:$0xf] }
  0xb6   : > { %557 = vst [vmem:[%s6889_s6 + $0x288] sm:$0xf] %v556_v34  ;;  %v684_v34 = vld [vmem:[%s6885_s5 + $0x710] sm:$0xf] }
  0xb7   : > { %559 = vst [vmem:[%s6889_s6 + $0x28c] sm:$0xf] %v558_v35  ;;  %v686_v35 = vld [vmem:[%s6885_s5 + $0x718] sm:$0xf] }
  0xb8   : > { %561 = vst [vmem:[%s6889_s6 + $0x290] sm:$0xf] %v560_v36  ;;  %v688_v36 = vld [vmem:[%s6885_s5 + $0x720] sm:$0xf] }
  0xb9   : > { %563 = vst [vmem:[%s6889_s6 + $0x294] sm:$0xf] %v562_v37  ;;  %v690_v37 = vld [vmem:[%s6885_s5 + $0x728] sm:$0xf] }
  0xba   : > { %565 = vst [vmem:[%s6889_s6 + $0x298] sm:$0xf] %v564_v38  ;;  %v692_v38 = vld [vmem:[%s6885_s5 + $0x730] sm:$0xf] }
  0xbb   : > { %567 = vst [vmem:[%s6889_s6 + $0x29c] sm:$0xf] %v566_v39  ;;  %v694_v39 = vld [vmem:[%s6885_s5 + $0x738] sm:$0xf] }
  0xbc   : > { %569 = vst [vmem:[%s6889_s6 + $0x2a0] sm:$0xf] %v568_v40  ;;  %v696_v40 = vld [vmem:[%s6885_s5 + $0x740] sm:$0xf] }
  0xbd   : > { %571 = vst [vmem:[%s6889_s6 + $0x2a4] sm:$0xf] %v570_v41  ;;  %v698_v41 = vld [vmem:[%s6885_s5 + $0x748] sm:$0xf] }
  0xbe   : > { %573 = vst [vmem:[%s6889_s6 + $0x2a8] sm:$0xf] %v572_v42  ;;  %v700_v42 = vld [vmem:[%s6885_s5 + $0x750] sm:$0xf] }
  0xbf   : > { %575 = vst [vmem:[%s6889_s6 + $0x2ac] sm:$0xf] %v574_v43  ;;  %v702_v43 = vld [vmem:[%s6885_s5 + $0x758] sm:$0xf] }
  0xc0   : > { %577 = vst [vmem:[%s6889_s6 + $0x2b0] sm:$0xf] %v576_v44  ;;  %v704_v44 = vld [vmem:[%s6885_s5 + $0x760] sm:$0xf] }
  0xc1   : > { %579 = vst [vmem:[%s6889_s6 + $0x2b4] sm:$0xf] %v578_v45  ;;  %v706_v45 = vld [vmem:[%s6885_s5 + $0x768] sm:$0xf] }
  0xc2   : > { %581 = vst [vmem:[%s6889_s6 + $0x2b8] sm:$0xf] %v580_v46  ;;  %v708_v46 = vld [vmem:[%s6885_s5 + $0x770] sm:$0xf] }
  0xc3   : > { %583 = vst [vmem:[%s6889_s6 + $0x2bc] sm:$0xf] %v582_v47  ;;  %v710_v47 = vld [vmem:[%s6885_s5 + $0x778] sm:$0xf] }
  0xc4   : > { %585 = vst [vmem:[%s6889_s6 + $0x2c0] sm:$0xf] %v584_v48  ;;  %v712_v48 = vld [vmem:[%s6885_s5 + $0x780] sm:$0xf] }
  0xc5   : > { %587 = vst [vmem:[%s6889_s6 + $0x2c4] sm:$0xf] %v586_v49  ;;  %v714_v49 = vld [vmem:[%s6885_s5 + $0x788] sm:$0xf] }
  0xc6   : > { %589 = vst [vmem:[%s6889_s6 + $0x2c8] sm:$0xf] %v588_v50  ;;  %v716_v50 = vld [vmem:[%s6885_s5 + $0x790] sm:$0xf] }
  0xc7   : > { %591 = vst [vmem:[%s6889_s6 + $0x2cc] sm:$0xf] %v590_v51  ;;  %v718_v51 = vld [vmem:[%s6885_s5 + $0x798] sm:$0xf] }
  0xc8   : > { %593 = vst [vmem:[%s6889_s6 + $0x2d0] sm:$0xf] %v592_v52  ;;  %v720_v52 = vld [vmem:[%s6885_s5 + $0x7a0] sm:$0xf] }
  0xc9   : > { %595 = vst [vmem:[%s6889_s6 + $0x2d4] sm:$0xf] %v594_v53  ;;  %v722_v53 = vld [vmem:[%s6885_s5 + $0x7a8] sm:$0xf] }
  0xca   : > { %597 = vst [vmem:[%s6889_s6 + $0x2d8] sm:$0xf] %v596_v54  ;;  %v724_v54 = vld [vmem:[%s6885_s5 + $0x7b0] sm:$0xf] }
  0xcb   : > { %599 = vst [vmem:[%s6889_s6 + $0x2dc] sm:$0xf] %v598_v55  ;;  %v726_v55 = vld [vmem:[%s6885_s5 + $0x7b8] sm:$0xf] }
  0xcc   : > { %601 = vst [vmem:[%s6889_s6 + $0x2e0] sm:$0xf] %v600_v56  ;;  %v728_v56 = vld [vmem:[%s6885_s5 + $0x7c0] sm:$0xf] }
  0xcd   : > { %603 = vst [vmem:[%s6889_s6 + $0x2e4] sm:$0xf] %v602_v57  ;;  %v730_v57 = vld [vmem:[%s6885_s5 + $0x7c8] sm:$0xf] }
  0xce   : > { %605 = vst [vmem:[%s6889_s6 + $0x2e8] sm:$0xf] %v604_v58  ;;  %v732_v58 = vld [vmem:[%s6885_s5 + $0x7d0] sm:$0xf] }
  0xcf   : > { %607 = vst [vmem:[%s6889_s6 + $0x2ec] sm:$0xf] %v606_v59  ;;  %v734_v59 = vld [vmem:[%s6885_s5 + $0x7d8] sm:$0xf] }
  0xd0   : > { %609 = vst [vmem:[%s6889_s6 + $0x2f0] sm:$0xf] %v608_v60  ;;  %v736_v60 = vld [vmem:[%s6885_s5 + $0x7e0] sm:$0xf] }
  0xd1   : > { %611 = vst [vmem:[%s6889_s6 + $0x2f4] sm:$0xf] %v610_v61  ;;  %v738_v61 = vld [vmem:[%s6885_s5 + $0x7e8] sm:$0xf] }
  0xd2   : > { %613 = vst [vmem:[%s6889_s6 + $0x2f8] sm:$0xf] %v612_v62  ;;  %v740_v62 = vld [vmem:[%s6885_s5 + $0x7f0] sm:$0xf] }
  0xd3   : > { %615 = vst [vmem:[%s6889_s6 + $0x2fc] sm:$0xf] %v614_v63  ;;  %v742_v63 = vld [vmem:[%s6885_s5 + $0x7f8] sm:$0xf] }
  0xd4   : > { %617 = vst [vmem:[%s6889_s6 + $0x300] sm:$0xf] %v616_v0 }
  0xd5   : > { %619 = vst [vmem:[%s6889_s6 + $0x304] sm:$0xf] %v618_v1 }
  0xd6   : > { %621 = vst [vmem:[%s6889_s6 + $0x308] sm:$0xf] %v620_v2 }
  0xd7   : > { %623 = vst [vmem:[%s6889_s6 + $0x30c] sm:$0xf] %v622_v3 }
  0xd8   : > { %625 = vst [vmem:[%s6889_s6 + $0x310] sm:$0xf] %v624_v4 }
  0xd9   : > { %627 = vst [vmem:[%s6889_s6 + $0x314] sm:$0xf] %v626_v5 }
  0xda   : > { %629 = vst [vmem:[%s6889_s6 + $0x318] sm:$0xf] %v628_v6 }
  0xdb   : > { %631 = vst [vmem:[%s6889_s6 + $0x31c] sm:$0xf] %v630_v7 }
  0xdc   : > { %633 = vst [vmem:[%s6889_s6 + $0x320] sm:$0xf] %v632_v8 }
  0xdd   : > { %635 = vst [vmem:[%s6889_s6 + $0x324] sm:$0xf] %v634_v9 }
  0xde   : > { %637 = vst [vmem:[%s6889_s6 + $0x328] sm:$0xf] %v636_v10 }
  0xdf   : > { %639 = vst [vmem:[%s6889_s6 + $0x32c] sm:$0xf] %v638_v11 }
  0xe0   : > { %641 = vst [vmem:[%s6889_s6 + $0x330] sm:$0xf] %v640_v12 }
  0xe1   : > { %643 = vst [vmem:[%s6889_s6 + $0x334] sm:$0xf] %v642_v13 }
  0xe2   : > { %645 = vst [vmem:[%s6889_s6 + $0x338] sm:$0xf] %v644_v14 }
  0xe3   : > { %647 = vst [vmem:[%s6889_s6 + $0x33c] sm:$0xf] %v646_v15 }
  0xe4   : > { %649 = vst [vmem:[%s6889_s6 + $0x340] sm:$0xf] %v648_v16 }
  0xe5   : > { %651 = vst [vmem:[%s6889_s6 + $0x344] sm:$0xf] %v650_v17 }
  0xe6   : > { %653 = vst [vmem:[%s6889_s6 + $0x348] sm:$0xf] %v652_v18 }
  0xe7   : > { %655 = vst [vmem:[%s6889_s6 + $0x34c] sm:$0xf] %v654_v19 }
  0xe8   : > { %657 = vst [vmem:[%s6889_s6 + $0x350] sm:$0xf] %v656_v20 }
  0xe9   : > { %659 = vst [vmem:[%s6889_s6 + $0x354] sm:$0xf] %v658_v21 }
  0xea   : > { %661 = vst [vmem:[%s6889_s6 + $0x358] sm:$0xf] %v660_v22 }
  0xeb   : > { %663 = vst [vmem:[%s6889_s6 + $0x35c] sm:$0xf] %v662_v23 }
  0xec   : > { %665 = vst [vmem:[%s6889_s6 + $0x360] sm:$0xf] %v664_v24 }
  0xed   : > { %667 = vst [vmem:[%s6889_s6 + $0x364] sm:$0xf] %v666_v25 }
  0xee   : > { %669 = vst [vmem:[%s6889_s6 + $0x368] sm:$0xf] %v668_v26 }
  0xef   : > { %671 = vst [vmem:[%s6889_s6 + $0x36c] sm:$0xf] %v670_v27 }
  0xf0   : > { %673 = vst [vmem:[%s6889_s6 + $0x370] sm:$0xf] %v672_v28 }
  0xf1   : > { %675 = vst [vmem:[%s6889_s6 + $0x374] sm:$0xf] %v674_v29 }
  0xf2   : > { %677 = vst [vmem:[%s6889_s6 + $0x378] sm:$0xf] %v676_v30 }
  0xf3   : > { %679 = vst [vmem:[%s6889_s6 + $0x37c] sm:$0xf] %v678_v31 }
  0xf4   : > { %681 = vst [vmem:[%s6889_s6 + $0x380] sm:$0xf] %v680_v32 }
  0xf5   : > { %683 = vst [vmem:[%s6889_s6 + $0x384] sm:$0xf] %v682_v33 }
  0xf6   : > { %685 = vst [vmem:[%s6889_s6 + $0x388] sm:$0xf] %v684_v34 }
  0xf7   : > { %687 = vst [vmem:[%s6889_s6 + $0x38c] sm:$0xf] %v686_v35 }
  0xf8   : > { %689 = vst [vmem:[%s6889_s6 + $0x390] sm:$0xf] %v688_v36 }
  0xf9   : > { %691 = vst [vmem:[%s6889_s6 + $0x394] sm:$0xf] %v690_v37 }
  0xfa   : > { %693 = vst [vmem:[%s6889_s6 + $0x398] sm:$0xf] %v692_v38 }
  0xfb   : > { %695 = vst [vmem:[%s6889_s6 + $0x39c] sm:$0xf] %v694_v39 }
  0xfc   : > { %697 = vst [vmem:[%s6889_s6 + $0x3a0] sm:$0xf] %v696_v40 }
  0xfd   : > { %699 = vst [vmem:[%s6889_s6 + $0x3a4] sm:$0xf] %v698_v41 }
  0xfe   : > { %701 = vst [vmem:[%s6889_s6 + $0x3a8] sm:$0xf] %v700_v42 }
  0xff   : > { %703 = vst [vmem:[%s6889_s6 + $0x3ac] sm:$0xf] %v702_v43 }
 0x100   : > { %705 = vst [vmem:[%s6889_s6 + $0x3b0] sm:$0xf] %v704_v44 }
 0x101   : > { %707 = vst [vmem:[%s6889_s6 + $0x3b4] sm:$0xf] %v706_v45 }
 0x102   : > { %709 = vst [vmem:[%s6889_s6 + $0x3b8] sm:$0xf] %v708_v46 }
 0x103   : > { %711 = vst [vmem:[%s6889_s6 + $0x3bc] sm:$0xf] %v710_v47 }
 0x104   : > { %713 = vst [vmem:[%s6889_s6 + $0x3c0] sm:$0xf] %v712_v48 }
 0x105   : > { %715 = vst [vmem:[%s6889_s6 + $0x3c4] sm:$0xf] %v714_v49 }
 0x106   : > { %717 = vst [vmem:[%s6889_s6 + $0x3c8] sm:$0xf] %v716_v50 }
 0x107   : > { %719 = vst [vmem:[%s6889_s6 + $0x3cc] sm:$0xf] %v718_v51 }
 0x108   : > { %721 = vst [vmem:[%s6889_s6 + $0x3d0] sm:$0xf] %v720_v52 }
 0x109   : > { %723 = vst [vmem:[%s6889_s6 + $0x3d4] sm:$0xf] %v722_v53 }
 0x10a   : > { %725 = vst [vmem:[%s6889_s6 + $0x3d8] sm:$0xf] %v724_v54 }
 0x10b   : > { %727 = vst [vmem:[%s6889_s6 + $0x3dc] sm:$0xf] %v726_v55 }
 0x10c   : > { %729 = vst [vmem:[%s6889_s6 + $0x3e0] sm:$0xf] %v728_v56 }
 0x10d   : > { %731 = vst [vmem:[%s6889_s6 + $0x3e4] sm:$0xf] %v730_v57 }
 0x10e   : > { %733 = vst [vmem:[%s6889_s6 + $0x3e8] sm:$0xf] %v732_v58 }
 0x10f   : > { %735 = vst [vmem:[%s6889_s6 + $0x3ec] sm:$0xf] %v734_v59 }
 0x110   : > { %737 = vst [vmem:[%s6889_s6 + $0x3f0] sm:$0xf] %v736_v60 }
 0x111   : > { %739 = vst [vmem:[%s6889_s6 + $0x3f4] sm:$0xf] %v738_v61 }
 0x112   : > { %741 = vst [vmem:[%s6889_s6 + $0x3f8] sm:$0xf] %v740_v62 }
 0x113   : > { %743 = vst [vmem:[%s6889_s6 + $0x3fc] sm:$0xf] %v742_v63 }
 0x114 PF: > { %p5445_p8 = scmp.ge.s32.totalorder %s6810_s19, 1  ;;  %p2328_p9 = scmp.lt.s32.totalorder %s6810_s19, 3 }
 0x116   : > { %p2329_p10 = pnand %p5445_p8, %p2328_p9 }
 0x117   : > { %s2335_s7 = sand.u32 (!%p2329_p10), 1, %s6794_s15   ;;  %p2399_p11 = scmp.lt.s32.totalorder (!%p2329_p10), %s6802_s17, 1 }
 0x118   : > { %2332 = sbr.rel (%p2329_p10) target bundleno = 976 (0x3d0), region = 76  ;;  %s5446_s8 = sshll.u32 (!%p2329_p10), %s2335_s7, 10 }
 0x119   : > { %s7406_s9 = scalar_lea.vmem (!%p2329_p10), [#allocation3], %s5446_s8  ;;  %s5447_s23 = sshll.u32 (!%p2329_p10), %s2335_s7, 7 }
 0x11a   : > { %s8436_s26 = scalar_lea.vmem (!%p2329_p10), [#allocation4], %s5447_s23 }
 0x11d   : > { %v6611_v0 = vld [vmem:[%s7406_s9 + $0x38] sm:$0xff]  ;;  %v6610_v4 = vld [vmem:[%s7406_s9 + $0x30] sm:$0xff]  ;;  %v6609_v8 = vld [vmem:[%s7406_s9 + $0x28] sm:$0xff]  ;;  %s2400_s15 = scalar_select %p2399_p11, %s6802_s17, 1 }
 0x11e   : > { %v6619_v1 = vld [vmem:[%s7406_s9 + $0x78] sm:$0xff]  ;;  %4239 = vmatpush.bf16.msra.mxu0 %v6611_v0  ;;  %v6618_v5 = vld [vmem:[%s7406_s9 + $0x70] sm:$0xff]  ;;  %v6617_v9 = vld [vmem:[%s7406_s9 + $0x68] sm:$0xff]  ;;  %s6473_s5 = sshll.u32 (%p6872_p6), %s6802_s17, 3 }
 0x11f   : > { %v6627_v2 = vld [vmem:[%s7406_s9 + $0xb8] sm:$0xff]  ;;  %4288 = vmatpush.bf16.msra.mxu1 %v6619_v1  ;;  %v6626_v6 = vld [vmem:[%s7406_s9 + $0xb0] sm:$0xff]  ;;  %v6625_v10 = vld [vmem:[%s7406_s9 + $0xa8] sm:$0xff]  ;;  %s2410_s30 = scalar_lea.vmem %s8517_s4, %s2400_s15  ;;  %s5175_s10 = scalar_lea.vmem (%p6872_p6), %s8515_s2, %s6473_s5 }
 0x120   : > { %v6635_v3 = vld [vmem:[%s7406_s9 + $0xf8] sm:$0xff]  ;;  %4337 = vmatpush.bf16.msra.mxu2 %v6627_v2  ;;  %v6634_v7 = vld [vmem:[%s7406_s9 + $0xf0] sm:$0xff]  ;;  %v6633_v11 = vld [vmem:[%s7406_s9 + $0xe8] sm:$0xff] }
 0x121   : > { %4386 = vmatpush.bf16.msra.mxu3 %v6635_v3  ;;  %v6608_v12 = vld [vmem:[%s7406_s9 + $0x20] sm:$0xff]  ;;  %v6607_v16 = vld [vmem:[%s7406_s9 + $0x18] sm:$0xff]  ;;  %v6606_v20 = vld [vmem:[%s7406_s9 + $0x10] sm:$0xff] }
 0x122   : > { %4240 = vmatpush.bf16.msra.mxu0 %v6610_v4  ;;  %v6616_v13 = vld [vmem:[%s7406_s9 + $0x60] sm:$0xff]  ;;  %v6615_v17 = vld [vmem:[%s7406_s9 + $0x58] sm:$0xff]  ;;  %v6614_v21 = vld [vmem:[%s7406_s9 + $0x50] sm:$0xff] }
 0x123   : > { %4289 = vmatpush.bf16.msra.mxu1 %v6618_v5  ;;  %v6624_v14 = vld [vmem:[%s7406_s9 + $0xa0] sm:$0xff]  ;;  %v6623_v18 = vld [vmem:[%s7406_s9 + $0x98] sm:$0xff]  ;;  %v6622_v22 = vld [vmem:[%s7406_s9 + $0x90] sm:$0xff] }
 0x124   : > { %4338 = vmatpush.bf16.msra.mxu2 %v6626_v6  ;;  %v6632_v15 = vld [vmem:[%s7406_s9 + $0xe0] sm:$0xff]  ;;  %v6631_v19 = vld [vmem:[%s7406_s9 + $0xd8] sm:$0xff]  ;;  %v6630_v23 = vld [vmem:[%s7406_s9 + $0xd0] sm:$0xff] }
 0x125   : > { %4387 = vmatpush.bf16.msra.mxu3 %v6634_v7  ;;  %v6605_v24 = vld [vmem:[%s7406_s9 + $0x8] sm:$0xff]  ;;  %v6604_v28 = vld [vmem:[%s7406_s9] sm:$0xff]  ;;  %v6659_v40 = vld [vmem:[%s7406_s9 + $0x1b8] sm:$0xff] }
 0x126   : > { %4241 = vmatpush.bf16.msra.mxu0 %v6609_v8  ;;  %v6613_v25 = vld [vmem:[%s7406_s9 + $0x48] sm:$0xff]  ;;  %v5450_v29 = vld [vmem:[%s8513_s0] sm:$0xf]  ;;  %v6476_v34 = vld [vmem:[%s8513_s0 + $0x4] sm:$0xf] }
 0x127   : > { %4290 = vmatpush.bf16.msra.mxu1 %v6617_v9  ;;  %v6621_v26 = vld [vmem:[%s7406_s9 + $0x88] sm:$0xff]  ;;  %v6484_v30 = vld [vmem:[%s8513_s0 + $0x3c] sm:$0xf0]  ;;  %v5452_v35 = vld [vmem:[%s8513_s0 + $0x40] sm:$0xf0] }
 0x128   : > { %4339 = vmatpush.bf16.msra.mxu2 %v6625_v10  ;;  %v6629_v27 = vld [vmem:[%s7406_s9 + $0xc8] sm:$0xff]  ;;  %v6612_v31 = vld [vmem:[%s7406_s9 + $0x40] sm:$0xff]  ;;  %v6643_v41 = vld [vmem:[%s7406_s9 + $0x138] sm:$0xff]  ;;  %v5451_v42 = vor.u32 %v6484_v30, %v5450_v29  ;;  %v5455_v43 = vor.u32 %v6476_v34, %v5452_v35 }
 0x129   : > { %4388 = vmatpush.bf16.msra.mxu3 %v6633_v11  ;;  %v6620_v32 = vld [vmem:[%s7406_s9 + $0x80] sm:$0xff]  ;;  %v5458_v36 = vld [vmem:[%s8513_s0 + $0x8] sm:$0xf]  ;;  %v6477_v38 = vld [vmem:[%s8513_s0 + $0xc] sm:$0xf] }
 0x12a   : > { %4242 = vmatpush.bf16.msra.mxu0 %v6608_v12  ;;  %v6628_v33 = vld [vmem:[%s7406_s9 + $0xc0] sm:$0xff]  ;;  %v6485_v37 = vld [vmem:[%s8513_s0 + $0x44] sm:$0xf0]  ;;  %v5460_v39 = vld [vmem:[%s8513_s0 + $0x48] sm:$0xf0] }
 0x12b   : > { %4291 = vmatpush.bf16.msra.mxu1 %v6616_v13  ;;  %v5459_v44 = vor.u32 %v6485_v37, %v5458_v36  ;;  %v5463_v45 = vor.u32 %v6477_v38, %v5460_v39  ;;  %v6667_v46 = vld [vmem:[%s7406_s9 + $0x1f8] sm:$0xff]  ;;  %v6658_v48 = vld [vmem:[%s7406_s9 + $0x1b0] sm:$0xff]  ;;  %v6657_v52 = vld [vmem:[%s7406_s9 + $0x1a8] sm:$0xff] }
 0x12c   : > { %4340 = vmatpush.bf16.msra.mxu2 %v6624_v14  ;;  %v6651_v47 = vld [vmem:[%s7406_s9 + $0x178] sm:$0xff]  ;;  %v6642_v49 = vld [vmem:[%s7406_s9 + $0x130] sm:$0xff]  ;;  %v6641_v53 = vld [vmem:[%s7406_s9 + $0x128] sm:$0xff] }
 0x12d   : > { %4389 = vmatpush.bf16.msra.mxu3 %v6632_v15  ;;  %v6666_v50 = vld [vmem:[%s7406_s9 + $0x1f0] sm:$0xff]  ;;  %v6665_v54 = vld [vmem:[%s7406_s9 + $0x1e8] sm:$0xff]  ;;  %v5514_v56 = vld [vmem:[%s8513_s0 + $0x80] sm:$0xf] }
 0x12e   : > { %4243 = vmatpush.bf16.msra.mxu0 %v6607_v16  ;;  %v6650_v51 = vld [vmem:[%s7406_s9 + $0x170] sm:$0xff]  ;;  %v6649_v55 = vld [vmem:[%s7406_s9 + $0x168] sm:$0xff]  ;;  %v6500_v57 = vld [vmem:[%s8513_s0 + $0xbc] sm:$0xf0] }
 0x12f   : > { %4292 = vmatpush.bf16.msra.mxu1 %v6615_v17  ;;  %v6492_v58 = vld [vmem:[%s8513_s0 + $0x84] sm:$0xf]  ;;  %v5522_v60 = vld [vmem:[%s8513_s0 + $0x88] sm:$0xf]  ;;  %v6493_v62 = vld [vmem:[%s8513_s0 + $0x8c] sm:$0xf]  ;;  %v5515_v0 = vor.u32 %v6500_v57, %v5514_v56 }
 0x130   : > { %4341 = vmatpush.bf16.msra.mxu2 %v6623_v18  ;;  %v5516_v59 = vld [vmem:[%s8513_s0 + $0xc0] sm:$0xf0]  ;;  %v6501_v61 = vld [vmem:[%s8513_s0 + $0xc4] sm:$0xf0]  ;;  %v5524_v63 = vld [vmem:[%s8513_s0 + $0xc8] sm:$0xf0] }
 0x131   : > { %4390 = vmatpush.bf16.msra.mxu3 %v6631_v19  ;;  %v5519_v1 = vor.u32 %v6492_v58, %v5516_v59  ;;  %v5523_v2 = vor.u32 %v6501_v61, %v5522_v60  ;;  %v5527_v3 = vor.u32 %v6493_v62, %v5524_v63  ;;  %v6656_v4 = vld [vmem:[%s7406_s9 + $0x1a0] sm:$0xff]  ;;  %v5586_v12 = vld [vmem:[%s8513_s0 + $0x108] sm:$0xf]  ;;  %v6509_v14 = vld [vmem:[%s8513_s0 + $0x10c] sm:$0xf] }
 0x132   : > { %4244 = vmatpush.bf16.msra.mxu0 %v6606_v20  ;;  %v6640_v5 = vld [vmem:[%s7406_s9 + $0x120] sm:$0xff]  ;;  %v6517_v13 = vld [vmem:[%s8513_s0 + $0x144] sm:$0xf0]  ;;  %v5588_v15 = vld [vmem:[%s8513_s0 + $0x148] sm:$0xf0] }
 0x133   : > { %4293 = vmatpush.bf16.msra.mxu1 %v6614_v21  ;;  %v6664_v6 = vld [vmem:[%s7406_s9 + $0x1e0] sm:$0xff]  ;;  %v5587_v18 = vor.u32 %v6517_v13, %v5586_v12  ;;  %v5591_v19 = vor.u32 %v6509_v14, %v5588_v15  ;;  %v6655_v20 = vld [vmem:[%s7406_s9 + $0x198] sm:$0xff]  ;;  %v6533_v29 = vld [vmem:[%s8513_s0 + $0x1c4] sm:$0xf0] }
 0x134   : > { %4342 = vmatpush.bf16.msra.mxu2 %v6622_v22  ;;  %v6648_v7 = vld [vmem:[%s7406_s9 + $0x160] sm:$0xff]  ;;  %v6639_v21 = vld [vmem:[%s7406_s9 + $0x118] sm:$0xff]  ;;  %v6525_v30 = vld [vmem:[%s8513_s0 + $0x18c] sm:$0xf] }
 0x135   : > { %4391 = vmatpush.bf16.msra.mxu3 %v6630_v23  ;;  %v5578_v8 = vld [vmem:[%s8513_s0 + $0x100] sm:$0xf]  ;;  %v6508_v10 = vld [vmem:[%s8513_s0 + $0x104] sm:$0xf]  ;;  %v6663_v22 = vld [vmem:[%s7406_s9 + $0x1d8] sm:$0xff] }
 0x136   : > { %4245 = vmatpush.bf16.msra.mxu0 %v6605_v24  ;;  %v6516_v9 = vld [vmem:[%s8513_s0 + $0x13c] sm:$0xf0]  ;;  %v5580_v11 = vld [vmem:[%s8513_s0 + $0x140] sm:$0xf0]  ;;  %v6647_v23 = vld [vmem:[%s7406_s9 + $0x158] sm:$0xff] }
 0x137   : > { %4294 = vmatpush.bf16.msra.mxu1 %v6613_v25  ;;  %v5579_v16 = vor.u32 %v6516_v9, %v5578_v8  ;;  %v5583_v17 = vor.u32 %v6508_v10, %v5580_v11  ;;  %v5642_v24 = vld [vmem:[%s8513_s0 + $0x180] sm:$0xf]  ;;  %v6654_v36 = vld [vmem:[%s7406_s9 + $0x190] sm:$0xff]  ;;  %v6556_v58 = vld [vmem:[%s8513_s0 + $0x284] sm:$0xf] }
 0x138   : > { %4343 = vmatpush.bf16.msra.mxu2 %v6621_v26  ;;  %v6532_v25 = vld [vmem:[%s8513_s0 + $0x1bc] sm:$0xf0]  ;;  %v6524_v26 = vld [vmem:[%s8513_s0 + $0x184] sm:$0xf]  ;;  %v6638_v37 = vld [vmem:[%s7406_s9 + $0x110] sm:$0xff] }
 0x139   : > { %4392 = vmatpush.bf16.msra.mxu3 %v6629_v27  ;;  %v5644_v27 = vld [vmem:[%s8513_s0 + $0x1c0] sm:$0xf0]  ;;  %v6662_v38 = vld [vmem:[%s7406_s9 + $0x1d0] sm:$0xff]  ;;  %v5770_v56 = vld [vmem:[%s8513_s0 + $0x280] sm:$0xf] }
 0x13a   : > { %4246 = vmatpush.bf16.msra.mxu0 %v6604_v28  ;;  %v5650_v28 = vld [vmem:[%s8513_s0 + $0x188] sm:$0xf]  ;;  %v6646_v39 = vld [vmem:[%s7406_s9 + $0x150] sm:$0xff]  ;;  %v6564_v57 = vld [vmem:[%s8513_s0 + $0x2bc] sm:$0xf0] }
 0x13b   : > { %4295 = vmatpush.bf16.msra.mxu1 %v6612_v31  ;;  %v5652_v31 = vld [vmem:[%s8513_s0 + $0x1c8] sm:$0xf0]  ;;  %v5651_v34 = vor.u32 %v6533_v29, %v5650_v28  ;;  %v5772_v59 = vld [vmem:[%s8513_s0 + $0x2c0] sm:$0xf0]  ;;  %v5778_v60 = vld [vmem:[%s8513_s0 + $0x288] sm:$0xf] }
 0x13c   : > { %4344 = vmatpush.bf16.msra.mxu2 %v6620_v32  ;;  %v5643_v32 = vor.u32 %v6532_v25, %v5642_v24  ;;  %v5655_v35 = vor.u32 %v6525_v30, %v5652_v31  ;;  %v6565_v61 = vld [vmem:[%s8513_s0 + $0x2c4] sm:$0xf0]  ;;  %v6557_v62 = vld [vmem:[%s8513_s0 + $0x28c] sm:$0xf]  ;;  %v5834_v8 = vld [vmem:[%s8513_s0 + $0x300] sm:$0xf] }
 0x13d   : > { %4393 = vmatpush.bf16.msra.mxu3 %v6628_v33  ;;  %4247 = vmatmul.bf16.vlgmr.msra.gmra.mxu0 %v5451_v42  ;;  %v5647_v33 = vor.u32 %v6524_v26, %v5644_v27  ;;  %v6540_v42 = vld [vmem:[%s8513_s0 + $0x204] sm:$0xf]  ;;  %v5780_v63 = vld [vmem:[%s8513_s0 + $0x2c8] sm:$0xf0]  ;;  %v6580_v9 = vld [vmem:[%s8513_s0 + $0x33c] sm:$0xf0] }
 0x13e   : > { %4435 = vmatpush.bf16.msrb.mxu0 %v6643_v41  ;;  %4296 = vmatmul.bf16.vlgmr.msra.gmra.mxu1 %v5455_v43  ;;  %v6548_v41 = vld [vmem:[%s8513_s0 + $0x23c] sm:$0xf0]  ;;  %v5708_v43 = vld [vmem:[%s8513_s0 + $0x240] sm:$0xf0]  ;;  %v5842_v12 = vld [vmem:[%s8513_s0 + $0x308] sm:$0xf] }
 0x13f   : > { %4345 = vmatmul.bf16.vlgmr.msra.gmra.mxu2 %v5459_v44  ;;  %4484 = vmatpush.bf16.msrb.mxu1 %v6651_v47  ;;  %v5714_v44 = vld [vmem:[%s8513_s0 + $0x208] sm:$0xf]  ;;  %v5716_v47 = vld [vmem:[%s8513_s0 + $0x248] sm:$0xf0]  ;;  %v6572_v10 = vld [vmem:[%s8513_s0 + $0x304] sm:$0xf] }
 0x140   : > { %4533 = vmatpush.bf16.msrb.mxu2 %v6659_v40  ;;  %4394 = vmatmul.bf16.vlgmr.msra.gmra.mxu3 %v5463_v45  ;;  %v5706_v40 = vld [vmem:[%s8513_s0 + $0x200] sm:$0xf]  ;;  %v6549_v45 = vld [vmem:[%s8513_s0 + $0x244] sm:$0xf0]  ;;  %v5836_v11 = vld [vmem:[%s8513_s0 + $0x340] sm:$0xf0] }
 0x141   : > { %4582 = vmatpush.bf16.msrb.mxu3 %v6667_v46  ;;  %v6541_v46 = vld [vmem:[%s8513_s0 + $0x20c] sm:$0xf]  ;;  %v6581_v13 = vld [vmem:[%s8513_s0 + $0x344] sm:$0xf0]  ;;  %v5898_v24 = vld [vmem:[%s8513_s0 + $0x380] sm:$0xf] }
 0x142   : > { %4436 = vmatpush.bf16.msrb.mxu0 %v6642_v49  ;;  %v5711_v49 = vor.u32 %v6540_v42, %v5708_v43  ;;  %v6573_v14 = vld [vmem:[%s8513_s0 + $0x30c] sm:$0xf]  ;;  %v6596_v25 = vld [vmem:[%s8513_s0 + $0x3bc] sm:$0xf0]  ;;  %v6588_v26 = vld [vmem:[%s8513_s0 + $0x384] sm:$0xf] }
 0x143   : > { %4485 = vmatpush.bf16.msrb.mxu1 %v6650_v51  ;;  %v5719_v51 = vor.u32 %v6541_v46, %v5716_v47  ;;  %v5844_v15 = vld [vmem:[%s8513_s0 + $0x348] sm:$0xf0]  ;;  %v5900_v27 = vld [vmem:[%s8513_s0 + $0x3c0] sm:$0xf0]  ;;  %v5906_v28 = vld [vmem:[%s8513_s0 + $0x388] sm:$0xf] }
 0x144   : > { %4534 = vmatpush.bf16.msrb.mxu2 %v6658_v48  ;;  %v5707_v48 = vor.u32 %v6548_v41, %v5706_v40  ;;  %v6597_v29 = vld [vmem:[%s8513_s0 + $0x3c4] sm:$0xf0]  ;;  %v6589_v30 = vld [vmem:[%s8513_s0 + $0x38c] sm:$0xf]  ;;  %v5466_v40 = vld [vmem:[%s8513_s0 + $0x10] sm:$0xf] }
 0x145   : > { %4583 = vmatpush.bf16.msrb.mxu3 %v6666_v50  ;;  %v5715_v50 = vor.u32 %v6549_v45, %v5714_v44  ;;  %v5908_v31 = vld [vmem:[%s8513_s0 + $0x3c8] sm:$0xf0]  ;;  %v6486_v41 = vld [vmem:[%s8513_s0 + $0x4c] sm:$0xf0]  ;;  %v6478_v42 = vld [vmem:[%s8513_s0 + $0x14] sm:$0xf] }
 0x146   : > { %4437 = vmatpush.bf16.msrb.mxu0 %v6641_v53  ;;  %v6637_v53 = vld [vmem:[%s7406_s9 + $0x108] sm:$0xff]  ;;  %v5468_v43 = vld [vmem:[%s8513_s0 + $0x50] sm:$0xf0]  ;;  %v5474_v44 = vld [vmem:[%s8513_s0 + $0x18] sm:$0xf] }
 0x147   : > { %4486 = vmatpush.bf16.msrb.mxu1 %v6649_v55  ;;  %v6645_v55 = vld [vmem:[%s7406_s9 + $0x148] sm:$0xff]  ;;  %v6487_v45 = vld [vmem:[%s8513_s0 + $0x54] sm:$0xf0]  ;;  %v6479_v46 = vld [vmem:[%s8513_s0 + $0x1c] sm:$0xf] }
 0x148   : > { %4535 = vmatpush.bf16.msrb.mxu2 %v6657_v52  ;;  %v6653_v52 = vld [vmem:[%s7406_s9 + $0x188] sm:$0xff]  ;;  %v5476_v47 = vld [vmem:[%s8513_s0 + $0x58] sm:$0xf0] }
 0x149   : > { %4584 = vmatpush.bf16.msrb.mxu3 %v6665_v54  ;;  %v6661_v54 = vld [vmem:[%s7406_s9 + $0x1c8] sm:$0xff] }
 0x14a   : > { %4438 = vmatpush.bf16.msrb.mxu0 %v6640_v5  ;;  %v6636_v5 = vld [vmem:[%s7406_s9 + $0x100] sm:$0xff] }
 0x14b   : > { %4487 = vmatpush.bf16.msrb.mxu1 %v6648_v7  ;;  %v6644_v7 = vld [vmem:[%s7406_s9 + $0x140] sm:$0xff] }
 0x14c   : > { %4536 = vmatpush.bf16.msrb.mxu2 %v6656_v4  ;;  %v6652_v4 = vld [vmem:[%s7406_s9 + $0x180] sm:$0xff] }
 0x14d   : > { %4252 = vmatmul.bf16.gmra.mxu0 %v5515_v0  ;;  %4585 = vmatpush.bf16.msrb.mxu3 %v6664_v6  ;;  %v5771_v0 = vor.u32 %v6564_v57, %v5770_v56  ;;  %v6660_v6 = vld [vmem:[%s7406_s9 + $0x1c0] sm:$0xff]  ;;  %v6673_v56 = vld [vmem:[%s7406_s9 + $0x228] sm:$0xff] }
 0x14e   : > { %4301 = vmatmul.bf16.gmra.mxu1 %v5519_v1  ;;  %4439 = vmatpush.bf16.msrb.mxu0 %v6639_v21  ;;  %v5775_v1 = vor.u32 %v6556_v58, %v5772_v59  ;;  %v6675_v21 = vld [vmem:[%s7406_s9 + $0x238] sm:$0xff]  ;;  %v6697_v57 = vld [vmem:[%s7406_s9 + $0x2e8] sm:$0xff] }
 0x14f   : > { %4350 = vmatmul.bf16.gmra.mxu2 %v5523_v2  ;;  %4488 = vmatpush.bf16.msrb.mxu1 %v6647_v23  ;;  %v5779_v2 = vor.u32 %v6565_v61, %v5778_v60  ;;  %v6683_v23 = vld [vmem:[%s7406_s9 + $0x278] sm:$0xff] }
 0x150   : > { %4399 = vmatmul.bf16.gmra.mxu3 %v5527_v3  ;;  %4537 = vmatpush.bf16.msrb.mxu2 %v6655_v20  ;;  %v5783_v3 = vor.u32 %v6557_v62, %v5780_v63  ;;  %v6691_v20 = vld [vmem:[%s7406_s9 + $0x2b8] sm:$0xff] }
 0x151   : > { %4586 = vmatpush.bf16.msrb.mxu3 %v6663_v22  ;;  %v6699_v22 = vld [vmem:[%s7406_s9 + $0x2f8] sm:$0xff] }
 0x152   : > { %4440 = vmatpush.bf16.msrb.mxu0 %v6638_v37  ;;  %v6674_v37 = vld [vmem:[%s7406_s9 + $0x230] sm:$0xff] }
 0x153   : > { %4489 = vmatpush.bf16.msrb.mxu1 %v6646_v39  ;;  %v6682_v39 = vld [vmem:[%s7406_s9 + $0x270] sm:$0xff] }
 0x154   : > { %4538 = vmatpush.bf16.msrb.mxu2 %v6654_v36  ;;  %v6690_v36 = vld [vmem:[%s7406_s9 + $0x2b0] sm:$0xff] }
 0x155   : > { %4587 = vmatpush.bf16.msrb.mxu3 %v6662_v38  ;;  %v6698_v38 = vld [vmem:[%s7406_s9 + $0x2f0] sm:$0xff] }
 0x156   : > { %4441 = vmatpush.bf16.msrb.mxu0 %v6637_v53  ;;  %v5479_v53 = vor.u32 %v6479_v46, %v5476_v47 }
 0x157   : > { %4490 = vmatpush.bf16.msrb.mxu1 %v6645_v55  ;;  %v6689_v55 = vld [vmem:[%s7406_s9 + $0x2a8] sm:$0xff] }
 0x158   : > { %4539 = vmatpush.bf16.msrb.mxu2 %v6653_v52  ;;  %v5475_v52 = vor.u32 %v6487_v45, %v5474_v44 }
 0x159   : > { %4588 = vmatpush.bf16.msrb.mxu3 %v6661_v54 }
 0x15a   : > { %4442 = vmatpush.bf16.msrb.mxu0 %v6636_v5  ;;  %v5532_v5 = vld [vmem:[%s8513_s0 + $0xd0] sm:$0xf0] }
 0x15b   : > { %4491 = vmatpush.bf16.msrb.mxu1 %v6644_v7  ;;  %v6503_v7 = vld [vmem:[%s8513_s0 + $0xd4] sm:$0xf0] }
 0x15c   : > { %4540 = vmatpush.bf16.msrb.mxu2 %v6652_v4  ;;  %v6494_v4 = vld [vmem:[%s8513_s0 + $0x94] sm:$0xf] }
 0x15d   : > { %4257 = vmatmul.bf16.gmra.mxu0 %v5579_v16  ;;  %4589 = vmatpush.bf16.msrb.mxu3 %v6660_v6  ;;  %v5835_v16 = vor.u32 %v6580_v9, %v5834_v8  ;;  %v5538_v6 = vld [vmem:[%s8513_s0 + $0x98] sm:$0xf]  ;;  %v6495_v8 = vld [vmem:[%s8513_s0 + $0x9c] sm:$0xf] }
 0x15e   : > { %4306 = vmatmul.bf16.gmra.mxu1 %v5583_v17  ;;  %v5839_v17 = vor.u32 %v6572_v10, %v5836_v11  ;;  %4631 = vmatpush.bf16.msra.mxu0 %v6675_v21  ;;  %v5540_v9 = vld [vmem:[%s8513_s0 + $0xd8] sm:$0xf0]  ;;  %v6688_v21 = vld [vmem:[%s7406_s9 + $0x2a0] sm:$0xff] }
 0x15f   : > { %4355 = vmatmul.bf16.gmra.mxu2 %v5587_v18  ;;  %v5843_v18 = vor.u32 %v6581_v13, %v5842_v12  ;;  %4680 = vmatpush.bf16.msra.mxu1 %v6683_v23  ;;  %v5535_v13 = vor.u32 %v6494_v4, %v5532_v5  ;;  %v6696_v23 = vld [vmem:[%s7406_s9 + $0x2e0] sm:$0xff]  ;;  %v6535_v4 = vld [vmem:[%s8513_s0 + $0x1d4] sm:$0xf0]  ;;  %v6527_v5 = vld [vmem:[%s8513_s0 + $0x19c] sm:$0xf] }
 0x160   : > { %4404 = vmatmul.bf16.gmra.mxu3 %v5591_v19  ;;  %v5847_v19 = vor.u32 %v6573_v14, %v5844_v15  ;;  %4729 = vmatpush.bf16.msra.mxu2 %v6691_v20 }
 0x161   : > { %4778 = vmatpush.bf16.msra.mxu3 %v6699_v22  ;;  %v6672_v22 = vld [vmem:[%s7406_s9 + $0x220] sm:$0xff] }
 0x162   : > { %4632 = vmatpush.bf16.msra.mxu0 %v6674_v37  ;;  %v6519_v37 = vld [vmem:[%s8513_s0 + $0x154] sm:$0xf0] }
 0x163   : > { %4681 = vmatpush.bf16.msra.mxu1 %v6682_v39  ;;  %v5604_v39 = vld [vmem:[%s8513_s0 + $0x158] sm:$0xf0] }
 0x164   : > { %4730 = vmatpush.bf16.msra.mxu2 %v6690_v36  ;;  %v5602_v36 = vld [vmem:[%s8513_s0 + $0x118] sm:$0xf] }
 0x165   : > { %4779 = vmatpush.bf16.msra.mxu3 %v6698_v38  ;;  %v6511_v38 = vld [vmem:[%s8513_s0 + $0x11c] sm:$0xf]  ;;  %v5603_v47 = vor.u32 %v6519_v37, %v5602_v36  ;;  %v6551_v36 = vld [vmem:[%s8513_s0 + $0x254] sm:$0xf0] }
 0x166   : > { %4633 = vmatpush.bf16.msra.mxu0 %v6673_v56  ;;  %v6543_v37 = vld [vmem:[%s8513_s0 + $0x21c] sm:$0xf] }
 0x168   : > { %4731 = vmatpush.bf16.msra.mxu2 %v6689_v55 }
 0x169   : > { %4780 = vmatpush.bf16.msra.mxu3 %v6697_v57 }
 0x16a   : > { %4634 = vmatpush.bf16.msra.mxu0 %v6672_v22 }
 0x16c   : > { %4732 = vmatpush.bf16.msra.mxu2 %v6688_v21  ;;  %v6694_v21 = vld [vmem:[%s7406_s9 + $0x2d0] sm:$0xff] }
 0x16d   : > { %4262 = vmatmul.bf16.gmra.mxu0 %v5643_v32  ;;  %v5899_v32 = vor.u32 %v6596_v25, %v5898_v24  ;;  %4781 = vmatpush.bf16.msra.mxu3 %v6696_v23 }
 0x16e   : > { %4311 = vmatmul.bf16.gmra.mxu1 %v5647_v33  ;;  %v5903_v33 = vor.u32 %v6588_v26, %v5900_v27 }
 0x16f   : > { %4360 = vmatmul.bf16.gmra.mxu2 %v5651_v34  ;;  %v5907_v34 = vor.u32 %v6597_v29, %v5906_v28 }
 0x170   : > { %4409 = vmatmul.bf16.gmra.mxu3 %v5655_v35  ;;  %v5911_v35 = vor.u32 %v6589_v30, %v5908_v31  ;;  %v6680_v31 = vld [vmem:[%s7406_s9 + $0x260] sm:$0xff] }
 0x17d   : > { %4267 = vmatmul.bf16.gmra.mxu0 %v5707_v48  ;;  %v5467_v48 = vor.u32 %v6486_v41, %v5466_v40 }
 0x17e   : > { %4316 = vmatmul.bf16.gmra.mxu1 %v5711_v49  ;;  %v5471_v49 = vor.u32 %v6478_v42, %v5468_v43 }
 0x17f   : > { %4365 = vmatmul.bf16.gmra.mxu2 %v5715_v50 }
 0x180   : > { %4414 = vmatmul.bf16.gmra.mxu3 %v5719_v51 }
 0x18d   : > { %4272 = vmatmul.bf16.gmra.mxu0 %v5771_v0 }
 0x18e   : > { %4321 = vmatmul.bf16.gmra.mxu1 %v5775_v1  ;;  %v6681_v1 = vld [vmem:[%s7406_s9 + $0x268] sm:$0xff] }
 0x18f   : > { %4370 = vmatmul.bf16.gmra.mxu2 %v5779_v2  ;;  %v5530_v2 = vld [vmem:[%s8513_s0 + $0x90] sm:$0xf]  ;;  %4682 = vmatpush.bf16.msra.mxu1 %v6681_v1  ;;  %v6526_v1 = vld [vmem:[%s8513_s0 + $0x194] sm:$0xf] }
 0x190   : > { %4419 = vmatmul.bf16.gmra.mxu3 %v5783_v3  ;;  %v6502_v3 = vld [vmem:[%s8513_s0 + $0xcc] sm:$0xf0] }
 0x191   : > { %v5531_v12 = vor.u32 %v6502_v3, %v5530_v2  ;;  %v5660_v2 = vld [vmem:[%s8513_s0 + $0x1d0] sm:$0xf0]  ;;  %v5666_v3 = vld [vmem:[%s8513_s0 + $0x198] sm:$0xf] }
 0x193   : > { %4683 = vmatpush.bf16.msra.mxu1 %v6680_v31  ;;  %v5722_v31 = vld [vmem:[%s8513_s0 + $0x210] sm:$0xf] }
 0x19d   : > { %4277 = vmatmul.bf16.gmra.mxu0 %v5835_v16 }
 0x19e   : > { %4326 = vmatmul.bf16.gmra.mxu1 %v5839_v17  ;;  %v5539_v17 = vor.u32 %v6503_v7, %v5538_v6  ;;  %v5668_v6 = vld [vmem:[%s8513_s0 + $0x1d8] sm:$0xf0] }
 0x19f   : > { %4375 = vmatmul.bf16.gmra.mxu2 %v5843_v18  ;;  %v5543_v18 = vor.u32 %v6495_v8, %v5540_v9 }
 0x1a0   : > { %4424 = vmatmul.bf16.gmra.mxu3 %v5847_v19 }
 0x1ad   : > { %4282 = vmatmul.bf16.gmra.mxu0 %v5899_v32  ;;  %v5594_v32 = vld [vmem:[%s8513_s0 + $0x110] sm:$0xf] }
 0x1ae   : > { %4331 = vmatmul.bf16.gmra.mxu1 %v5903_v33  ;;  %v6518_v33 = vld [vmem:[%s8513_s0 + $0x14c] sm:$0xf0] }
 0x1af   : > { %4380 = vmatmul.bf16.gmra.mxu2 %v5907_v34  ;;  %v6510_v34 = vld [vmem:[%s8513_s0 + $0x114] sm:$0xf]  ;;  %v5595_v42 = vor.u32 %v6518_v33, %v5594_v32  ;;  %v6550_v32 = vld [vmem:[%s8513_s0 + $0x24c] sm:$0xf0] }
 0x1b0   : > { %4429 = vmatmul.bf16.gmra.mxu3 %v5911_v35  ;;  %v5596_v35 = vld [vmem:[%s8513_s0 + $0x150] sm:$0xf0] }
 0x1b1   : > { %v5599_v43 = vor.u32 %v6510_v34, %v5596_v35  ;;  %v6542_v33 = vld [vmem:[%s8513_s0 + $0x214] sm:$0xf]  ;;  %v5730_v35 = vld [vmem:[%s8513_s0 + $0x218] sm:$0xf] }
 0x1b2   : > { %v5724_v34 = vld [vmem:[%s8513_s0 + $0x250] sm:$0xf0] }
 0x1ba   : > { %v4248_v50 = vpop.f32.mrf.mxu0 }
 0x1bb   : > { %v4297_v51 = vpop.f32.mrf.mxu1 }
 0x1bc   : > { %v4298_v54 = vadd.f32 %v4297_v51, %v4248_v50  ;;  %v6687_v51 = vld [vmem:[%s7406_s9 + $0x298] sm:$0xff] }
 0x1bd   : > { %4443 = vmatmul.bf16.vlgmr.msrb.gmra.mxu0 %v5467_v48  ;;  %v5607_v48 = vor.u32 %v6511_v38, %v5604_v39  ;;  %4733 = vmatpush.bf16.msra.mxu2 %v6687_v51  ;;  %v5732_v38 = vld [vmem:[%s8513_s0 + $0x258] sm:$0xf0]  ;;  %v6685_v51 = vld [vmem:[%s7406_s9 + $0x288] sm:$0xff] }
 0x1be   : > { %4492 = vmatmul.bf16.vlgmr.msrb.gmra.mxu1 %v5471_v49 }
 0x1bf   : > { %4541 = vmatmul.bf16.vlgmr.msrb.gmra.mxu2 %v5475_v52  ;;  %v6671_v52 = vld [vmem:[%s7406_s9 + $0x218] sm:$0xff] }
 0x1c0   : > { %4590 = vmatmul.bf16.vlgmr.msrb.gmra.mxu3 %v5479_v53  ;;  %v6695_v53 = vld [vmem:[%s7406_s9 + $0x2d8] sm:$0xff]  ;;  %4635 = vmatpush.bf16.msra.mxu0 %v6671_v52  ;;  %v6669_v52 = vld [vmem:[%s7406_s9 + $0x208] sm:$0xff] }
 0x1c1   : > { %4782 = vmatpush.bf16.msra.mxu3 %v6695_v53  ;;  %v6693_v53 = vld [vmem:[%s7406_s9 + $0x2c8] sm:$0xff] }
 0x1c2   : > { %v4346_v58 = vpop.f32.mrf.mxu2  ;;  %v4250_v61 = vpop.f32.mrf.mxu0 }
 0x1c3   : > { %v4395_v59 = vpop.f32.mrf.mxu3  ;;  %v4347_v60 = vadd.f32 %v4346_v58, %v4298_v54  ;;  %v4299_v62 = vpop.f32.mrf.mxu1 }
 0x1c4   : > { %v4300_v63 = vadd.f32 %v4299_v62, %v4250_v61  ;;  %v6679_v61 = vld [vmem:[%s7406_s9 + $0x258] sm:$0xff]  ;;  %v5658_v62 = vld [vmem:[%s8513_s0 + $0x190] sm:$0xf] }
 0x1c5   : > { %v7699_v0 = vadd.f32 %v4395_v59, %v4347_v60  ;;  %4684 = vmatpush.bf16.msra.mxu1 %v6679_v61  ;;  %4783 = vmatpush.bf16.msra.mxu3 %v6694_v21  ;;  %v6684_v21 = vld [vmem:[%s7406_s9 + $0x280] sm:$0xff] }
 0x1c9   : > { %4784 = vmatpush.bf16.msra.mxu3 %v6693_v53 }
 0x1ca   : > { %v4348_v10 = vpop.f32.mrf.mxu2  ;;  %v4253_v15 = vpop.f32.mrf.mxu0 }
 0x1cb   : > { %v4397_v11 = vpop.f32.mrf.mxu3  ;;  %v4349_v14 = vadd.f32 %v4348_v10, %v4300_v63  ;;  %v4302_v16 = vpop.f32.mrf.mxu1  ;;  %v6534_v63 = vld [vmem:[%s8513_s0 + $0x1cc] sm:$0xf0]  ;;  %v5663_v10 = vor.u32 %v6526_v1, %v5660_v2  ;;  %v6558_v2 = vld [vmem:[%s8513_s0 + $0x294] sm:$0xf] }
 0x1cc   : > { %v4303_v19 = vadd.f32 %v4302_v16, %v4253_v15  ;;  %v5659_v9 = vor.u32 %v6534_v63, %v5658_v62  ;;  %v5671_v15 = vor.u32 %v6527_v5, %v5668_v6  ;;  %v6677_v62 = vld [vmem:[%s7406_s9 + $0x248] sm:$0xff]  ;;  %v5786_v63 = vld [vmem:[%s8513_s0 + $0x290] sm:$0xf]  ;;  %v6567_v5 = vld [vmem:[%s8513_s0 + $0x2d4] sm:$0xf0] }
 0x1cd   : > { %v7726_v20 = vadd.f32 %v4397_v11, %v4349_v14  ;;  %4448 = vmatmul.bf16.gmra.mxu0 %v5531_v12  ;;  %v5667_v14 = vor.u32 %v6535_v4, %v5666_v3  ;;  %v6566_v1 = vld [vmem:[%s8513_s0 + $0x2cc] sm:$0xf0]  ;;  %v5788_v3 = vld [vmem:[%s8513_s0 + $0x2d0] sm:$0xf0]  ;;  %v5794_v4 = vld [vmem:[%s8513_s0 + $0x298] sm:$0xf] }
 0x1ce   : > { %4497 = vmatmul.bf16.gmra.mxu1 %v5535_v13  ;;  %v6559_v6 = vld [vmem:[%s8513_s0 + $0x29c] sm:$0xf] }
 0x1cf   : > { %4546 = vmatmul.bf16.gmra.mxu2 %v5539_v17 }
 0x1d0   : > { %4595 = vmatmul.bf16.gmra.mxu3 %v5543_v18  ;;  %v6686_v18 = vld [vmem:[%s7406_s9 + $0x290] sm:$0xff] }
 0x1d1   : > { %4734 = vmatpush.bf16.msra.mxu2 %v6686_v18 }
 0x1d2   : > { %v4351_v24 = vpop.f32.mrf.mxu2  ;;  %v4255_v27 = vpop.f32.mrf.mxu0 }
 0x1d3   : > { %v4400_v25 = vpop.f32.mrf.mxu3  ;;  %v4352_v26 = vadd.f32 %v4351_v24, %v4303_v19  ;;  %v4304_v28 = vpop.f32.mrf.mxu1  ;;  %v6670_v19 = vld [vmem:[%s7406_s9 + $0x210] sm:$0xff] }
 0x1d4   : > { %v4305_v29 = vadd.f32 %v4304_v28, %v4255_v27  ;;  %4636 = vmatpush.bf16.msra.mxu0 %v6670_v19 }
 0x1d5   : > { %v7731_v30 = vadd.f32 %v4400_v25, %v4352_v26  ;;  %4735 = vmatpush.bf16.msra.mxu2 %v6685_v51 }
 0x1d8   : > { %4637 = vmatpush.bf16.msra.mxu0 %v6669_v52 }
 0x1d9   : > { %4736 = vmatpush.bf16.msra.mxu2 %v6684_v21 }
 0x1da   : > { %v4353_v40 = vpop.f32.mrf.mxu2  ;;  %v4258_v45 = vpop.f32.mrf.mxu0 }
 0x1db   : > { %v4402_v41 = vpop.f32.mrf.mxu3  ;;  %v4354_v44 = vadd.f32 %v4353_v40, %v4305_v29  ;;  %v4307_v46 = vpop.f32.mrf.mxu1  ;;  %v6678_v29 = vld [vmem:[%s7406_s9 + $0x250] sm:$0xff] }
 0x1dc   : > { %v4308_v49 = vadd.f32 %v4307_v46, %v4258_v45  ;;  %4685 = vmatpush.bf16.msra.mxu1 %v6678_v29  ;;  %v5731_v46 = vor.u32 %v6551_v36, %v5730_v35  ;;  %v6582_v35 = vld [vmem:[%s8513_s0 + $0x34c] sm:$0xf0]  ;;  %v6574_v36 = vld [vmem:[%s8513_s0 + $0x314] sm:$0xf] }
 0x1dd   : > { %v7758_v50 = vadd.f32 %v4402_v41, %v4354_v44  ;;  %4453 = vmatmul.bf16.gmra.mxu0 %v5595_v42  ;;  %v5723_v41 = vor.u32 %v6550_v32, %v5722_v31  ;;  %v5727_v42 = vor.u32 %v6542_v33, %v5724_v34  ;;  %v6676_v33 = vld [vmem:[%s7406_s9 + $0x240] sm:$0xff]  ;;  %v5850_v34 = vld [vmem:[%s8513_s0 + $0x310] sm:$0xf] }
 0x1de   : > { %4502 = vmatmul.bf16.gmra.mxu1 %v5599_v43 }
 0x1df   : > { %4551 = vmatmul.bf16.gmra.mxu2 %v5603_v47  ;;  %v5735_v47 = vor.u32 %v6543_v37, %v5732_v38  ;;  %v5852_v37 = vld [vmem:[%s8513_s0 + $0x350] sm:$0xf0]  ;;  %v5858_v38 = vld [vmem:[%s8513_s0 + $0x318] sm:$0xf] }
 0x1e0   : > { %4600 = vmatmul.bf16.gmra.mxu3 %v5607_v48  ;;  %4686 = vmatpush.bf16.msra.mxu1 %v6677_v62 }
 0x1e2   : > { %v4356_v54 = vpop.f32.mrf.mxu2  ;;  %v4260_v57 = vpop.f32.mrf.mxu0 }
 0x1e3   : > { %v4405_v55 = vpop.f32.mrf.mxu3  ;;  %v4357_v56 = vadd.f32 %v4356_v54, %v4308_v49  ;;  %v4309_v58 = vpop.f32.mrf.mxu1 }
 0x1e4   : > { %v4310_v59 = vadd.f32 %v4309_v58, %v4260_v57  ;;  %4687 = vmatpush.bf16.msra.mxu1 %v6676_v33 }
 0x1e5   : > { %v7763_v60 = vadd.f32 %v4405_v55, %v4357_v56 }
 0x1ea   : > { %v4358_v7 = vpop.f32.mrf.mxu2  ;;  %v4263_v12 = vpop.f32.mrf.mxu0 }
 0x1eb   : > { %v4407_v8 = vpop.f32.mrf.mxu3  ;;  %v4359_v11 = vadd.f32 %v4358_v7, %v4310_v59  ;;  %v4312_v13 = vpop.f32.mrf.mxu1  ;;  %v5796_v7 = vld [vmem:[%s8513_s0 + $0x2d8] sm:$0xf0] }
 0x1ec   : > { %v4313_v16 = vadd.f32 %v4312_v13, %v4263_v12 }
 0x1ed   : > { %v7790_v17 = vadd.f32 %v4407_v8, %v4359_v11  ;;  %4458 = vmatmul.bf16.gmra.mxu0 %v5659_v9  ;;  %v5791_v11 = vor.u32 %v6558_v2, %v5788_v3 }
 0x1ee   : > { %4507 = vmatmul.bf16.gmra.mxu1 %v5663_v10  ;;  %v5787_v10 = vor.u32 %v6566_v1, %v5786_v63 }
 0x1ef   : > { %4556 = vmatmul.bf16.gmra.mxu2 %v5667_v14 }
 0x1f0   : > { %4605 = vmatmul.bf16.gmra.mxu3 %v5671_v15  ;;  %v5795_v15 = vor.u32 %v6567_v5, %v5794_v4  ;;  %v6715_v4 = vld [vmem:[%s7406_s9 + $0x378] sm:$0xff]  ;;  %v5914_v5 = vld [vmem:[%s8513_s0 + $0x390] sm:$0xf] }
 0x1f1   : > { %4876 = vmatpush.bf16.msrb.mxu1 %v6715_v4  ;;  %v6721_v4 = vld [vmem:[%s7406_s9 + $0x3a8] sm:$0xff] }
 0x1f2   : > { %v4361_v22 = vpop.f32.mrf.mxu2  ;;  %v4265_v25 = vpop.f32.mrf.mxu0 }
 0x1f3   : > { %v4410_v23 = vpop.f32.mrf.mxu3  ;;  %v4362_v24 = vadd.f32 %v4361_v22, %v4313_v16  ;;  %v4314_v26 = vpop.f32.mrf.mxu1  ;;  %v5799_v16 = vor.u32 %v6559_v6, %v5796_v7  ;;  %v6668_v22 = vld [vmem:[%s7406_s9 + $0x200] sm:$0xff]  ;;  %v6598_v6 = vld [vmem:[%s8513_s0 + $0x3cc] sm:$0xf0]  ;;  %v6590_v7 = vld [vmem:[%s8513_s0 + $0x394] sm:$0xf] }
 0x1f4   : > { %v4315_v27 = vadd.f32 %v4314_v26, %v4265_v25  ;;  %4638 = vmatpush.bf16.msra.mxu0 %v6668_v22 }
 0x1f5   : > { %v7795_v28 = vadd.f32 %v4410_v23, %v4362_v24  ;;  %v6692_v23 = vld [vmem:[%s7406_s9 + $0x2c0] sm:$0xff] }
 0x1f6   : > { %4785 = vmatpush.bf16.msra.mxu3 %v6692_v23 }
 0x1fa   : > { %v4363_v39 = vpop.f32.mrf.mxu2  ;;  %v4268_v44 = vpop.f32.mrf.mxu0 }
 0x1fb   : > { %v4412_v40 = vpop.f32.mrf.mxu3  ;;  %v4364_v43 = vadd.f32 %v4363_v39, %v4315_v27  ;;  %v4317_v45 = vpop.f32.mrf.mxu1  ;;  %v6583_v39 = vld [vmem:[%s8513_s0 + $0x354] sm:$0xf0] }
 0x1fc   : > { %v4318_v48 = vadd.f32 %v4317_v45, %v4268_v44  ;;  %v5851_v44 = vor.u32 %v6582_v35, %v5850_v34  ;;  %v5855_v45 = vor.u32 %v6574_v36, %v5852_v37  ;;  %v5859_v51 = vor.u32 %v6583_v39, %v5858_v38 }
 0x1fd   : > { %v7822_v49 = vadd.f32 %v4412_v40, %v4364_v43  ;;  %4463 = vmatmul.bf16.gmra.mxu0 %v5723_v41  ;;  %v6575_v40 = vld [vmem:[%s8513_s0 + $0x31c] sm:$0xf] }
 0x1fe   : > { %4512 = vmatmul.bf16.gmra.mxu1 %v5727_v42  ;;  %v5860_v41 = vld [vmem:[%s8513_s0 + $0x358] sm:$0xf0] }
 0x1ff   : > { %4561 = vmatmul.bf16.gmra.mxu2 %v5731_v46  ;;  %v5863_v52 = vor.u32 %v6575_v40, %v5860_v41  ;;  %v6714_v40 = vld [vmem:[%s7406_s9 + $0x370] sm:$0xff]  ;;  %v5482_v41 = vld [vmem:[%s8513_s0 + $0x20] sm:$0xf] }
 0x200   : > { %4610 = vmatmul.bf16.gmra.mxu3 %v5735_v47  ;;  %4877 = vmatpush.bf16.msrb.mxu1 %v6714_v40 }
 0x202   : > { %v4366_v54 = vpop.f32.mrf.mxu2  ;;  %v4270_v57 = vpop.f32.mrf.mxu0 }
 0x203   : > { %v4415_v55 = vpop.f32.mrf.mxu3  ;;  %v4367_v56 = vadd.f32 %v4366_v54, %v4318_v48  ;;  %v4319_v58 = vpop.f32.mrf.mxu1 }
 0x204   : > { %v4320_v59 = vadd.f32 %v4319_v58, %v4270_v57  ;;  %v6731_v57 = vld [vmem:[%s7406_s9 + $0x3f8] sm:$0xff] }
 0x205   : > { %v7827_v61 = vadd.f32 %v4415_v55, %v4367_v56  ;;  %v6723_v55 = vld [vmem:[%s7406_s9 + $0x3b8] sm:$0xff]  ;;  %4974 = vmatpush.bf16.msrb.mxu3 %v6731_v57 }
 0x206   : > { %v6707_v56 = vld [vmem:[%s7406_s9 + $0x338] sm:$0xff]  ;;  %4925 = vmatpush.bf16.msrb.mxu2 %v6723_v55 }
 0x207   : > { %4827 = vmatpush.bf16.msrb.mxu0 %v6707_v56 }
 0x20a   : > { %v4368_v8 = vpop.f32.mrf.mxu2  ;;  %v4273_v13 = vpop.f32.mrf.mxu0 }
 0x20b   : > { %v4417_v9 = vpop.f32.mrf.mxu3  ;;  %v4369_v12 = vadd.f32 %v4368_v8, %v4320_v59  ;;  %v4322_v14 = vpop.f32.mrf.mxu1  ;;  %v5916_v8 = vld [vmem:[%s8513_s0 + $0x3d0] sm:$0xf0] }
 0x20c   : > { %v4323_v18 = vadd.f32 %v4322_v14, %v4273_v13 }
 0x20d   : > { %v7854_v19 = vadd.f32 %v4417_v9, %v4369_v12  ;;  %4468 = vmatmul.bf16.gmra.mxu0 %v5787_v10  ;;  %v5922_v9 = vld [vmem:[%s8513_s0 + $0x398] sm:$0xf]  ;;  %v5924_v12 = vld [vmem:[%s8513_s0 + $0x3d8] sm:$0xf0] }
 0x20e   : > { %4517 = vmatmul.bf16.gmra.mxu1 %v5791_v11  ;;  %v6599_v10 = vld [vmem:[%s8513_s0 + $0x3d4] sm:$0xf0]  ;;  %v6591_v11 = vld [vmem:[%s8513_s0 + $0x39c] sm:$0xf] }
 0x20f   : > { %4566 = vmatmul.bf16.gmra.mxu2 %v5795_v15  ;;  %v5915_v15 = vor.u32 %v6598_v6, %v5914_v5  ;;  %v5923_v23 = vor.u32 %v6599_v10, %v5922_v9  ;;  %v6705_v5 = vld [vmem:[%s7406_s9 + $0x328] sm:$0xff] }
 0x210   : > { %4615 = vmatmul.bf16.gmra.mxu3 %v5799_v16  ;;  %v5919_v16 = vor.u32 %v6590_v7, %v5916_v8  ;;  %v6729_v6 = vld [vmem:[%s7406_s9 + $0x3e8] sm:$0xff] }
 0x212   : > { %v4371_v24 = vpop.f32.mrf.mxu2  ;;  %v4275_v27 = vpop.f32.mrf.mxu0 }
 0x213   : > { %v4420_v25 = vpop.f32.mrf.mxu3  ;;  %v4372_v26 = vadd.f32 %v4371_v24, %v4323_v18  ;;  %v4324_v29 = vpop.f32.mrf.mxu1  ;;  %v5927_v24 = vor.u32 %v6591_v11, %v5924_v12 }
 0x214   : > { %v4325_v31 = vadd.f32 %v4324_v29, %v4275_v27  ;;  %v6722_v27 = vld [vmem:[%s7406_s9 + $0x3b0] sm:$0xff] }
 0x215   : > { %v7859_v32 = vadd.f32 %v4420_v25, %v4372_v26  ;;  %v6706_v29 = vld [vmem:[%s7406_s9 + $0x330] sm:$0xff]  ;;  %4926 = vmatpush.bf16.msrb.mxu2 %v6722_v27 }
 0x216   : > { %4828 = vmatpush.bf16.msrb.mxu0 %v6706_v29 }
 0x219   : > { %4927 = vmatpush.bf16.msrb.mxu2 %v6721_v4 }
 0x21a   : > { %v4373_v42 = vpop.f32.mrf.mxu2  ;;  %v4278_v47 = vpop.f32.mrf.mxu0  ;;  %4829 = vmatpush.bf16.msrb.mxu0 %v6705_v5 }
 0x21b   : > { %v4422_v43 = vpop.f32.mrf.mxu3  ;;  %v4374_v46 = vadd.f32 %v4373_v42, %v4325_v31  ;;  %v4327_v48 = vpop.f32.mrf.mxu1  ;;  %v6730_v31 = vld [vmem:[%s7406_s9 + $0x3f0] sm:$0xff]  ;;  %v6488_v42 = vld [vmem:[%s8513_s0 + $0x5c] sm:$0xf0] }
 0x21c   : > { %v4328_v53 = vadd.f32 %v4327_v48, %v4278_v47  ;;  %4975 = vmatpush.bf16.msrb.mxu3 %v6730_v31  ;;  %v6481_v47 = vld [vmem:[%s8513_s0 + $0x2c] sm:$0xf] }
 0x21d   : > { %v7886_v54 = vadd.f32 %v4422_v43, %v4374_v46  ;;  %4473 = vmatmul.bf16.gmra.mxu0 %v5851_v44  ;;  %v6480_v43 = vld [vmem:[%s8513_s0 + $0x24] sm:$0xf]  ;;  %v6489_v46 = vld [vmem:[%s8513_s0 + $0x64] sm:$0xf0]  ;;  %v5492_v48 = vld [vmem:[%s8513_s0 + $0x68] sm:$0xf0] }
 0x21e   : > { %4522 = vmatmul.bf16.gmra.mxu1 %v5855_v45  ;;  %v5484_v44 = vld [vmem:[%s8513_s0 + $0x60] sm:$0xf0]  ;;  %v5490_v45 = vld [vmem:[%s8513_s0 + $0x28] sm:$0xf] }
 0x21f   : > { %4571 = vmatmul.bf16.gmra.mxu2 %v5859_v51  ;;  %v5487_v55 = vor.u32 %v6480_v43, %v5484_v44  ;;  %v6704_v43 = vld [vmem:[%s7406_s9 + $0x320] sm:$0xff] }
 0x220   : > { %4620 = vmatmul.bf16.gmra.mxu3 %v5863_v52  ;;  %v6728_v44 = vld [vmem:[%s7406_s9 + $0x3e0] sm:$0xff]  ;;  %4830 = vmatpush.bf16.msrb.mxu0 %v6704_v43 }
 0x221   : > { %4976 = vmatpush.bf16.msrb.mxu3 %v6729_v6 }
 0x222   : > { %v4376_v58 = vpop.f32.mrf.mxu2  ;;  %v4280_v63 = vpop.f32.mrf.mxu0 }
 0x223   : > { %v4425_v59 = vpop.f32.mrf.mxu3  ;;  %v4377_v62 = vadd.f32 %v4376_v58, %v4328_v53  ;;  %v4329_v1 = vpop.f32.mrf.mxu1  ;;  %v5483_v53 = vor.u32 %v6488_v42, %v5482_v41  ;;  %v6720_v42 = vld [vmem:[%s7406_s9 + $0x3a0] sm:$0xff] }
 0x224   : > { %v4330_v2 = vadd.f32 %v4329_v1, %v4280_v63  ;;  %4928 = vmatpush.bf16.msrb.mxu2 %v6720_v42 }
 0x225   : > { %v7891_v3 = vadd.f32 %v4425_v59, %v4377_v62  ;;  %v5491_v59 = vor.u32 %v6489_v46, %v5490_v45  ;;  %v5495_v62 = vor.u32 %v6481_v47, %v5492_v48  ;;  %4977 = vmatpush.bf16.msrb.mxu3 %v6728_v44 }
 0x22a   : > { %v4378_v13 = vpop.f32.mrf.mxu2  ;;  %v4283_v21 = vpop.f32.mrf.mxu0 }
 0x22b   : > { %v4427_v14 = vpop.f32.mrf.mxu3  ;;  %v4379_v18 = vadd.f32 %v4378_v13, %v4330_v2  ;;  %v4332_v22 = vpop.f32.mrf.mxu1  ;;  %v6713_v13 = vld [vmem:[%s7406_s9 + $0x368] sm:$0xff] }
 0x22c   : > { %v4333_v25 = vadd.f32 %v4332_v22, %v4283_v21  ;;  %v5554_v21 = vld [vmem:[%s8513_s0 + $0xa8] sm:$0xf]  ;;  %4878 = vmatpush.bf16.msrb.mxu1 %v6713_v13 }
 0x22d   : > { %v7918_v26 = vadd.f32 %v4427_v14, %v4379_v18  ;;  %4478 = vmatmul.bf16.gmra.mxu0 %v5915_v15  ;;  %v5546_v15 = vld [vmem:[%s8513_s0 + $0xa0] sm:$0xf]  ;;  %v6496_v18 = vld [vmem:[%s8513_s0 + $0xa4] sm:$0xf]  ;;  %v6505_v22 = vld [vmem:[%s8513_s0 + $0xe4] sm:$0xf0] }
 0x22e   : > { %4527 = vmatmul.bf16.gmra.mxu1 %v5919_v16  ;;  %v6504_v16 = vld [vmem:[%s8513_s0 + $0xdc] sm:$0xf0] }
 0x22f   : > { %4576 = vmatmul.bf16.gmra.mxu2 %v5923_v23  ;;  %v6497_v23 = vld [vmem:[%s8513_s0 + $0xac] sm:$0xf]  ;;  %v5547_v29 = vor.u32 %v6504_v16, %v5546_v15  ;;  %v6719_v16 = vld [vmem:[%s7406_s9 + $0x398] sm:$0xff] }
 0x230   : > { %4625 = vmatmul.bf16.gmra.mxu3 %v5927_v24  ;;  %v5556_v24 = vld [vmem:[%s8513_s0 + $0xe8] sm:$0xf0]  ;;  %4929 = vmatpush.bf16.msrb.mxu2 %v6719_v16 }
 0x232   : > { %v4381_v33 = vpop.f32.mrf.mxu2  ;;  %v4285_v36 = vpop.f32.mrf.mxu0 }
 0x233   : > { %v4430_v34 = vpop.f32.mrf.mxu3  ;;  %v4382_v35 = vadd.f32 %v4381_v33, %v4333_v25  ;;  %v4334_v37 = vpop.f32.mrf.mxu1 }
 0x234   : > { %v4335_v38 = vadd.f32 %v4334_v37, %v4285_v36  ;;  %v5555_v36 = vor.u32 %v6505_v22, %v5554_v21  ;;  %v5559_v37 = vor.u32 %v6497_v23, %v5556_v24 }
 0x235   : > { %v7923_v39 = vadd.f32 %v4430_v34, %v4382_v35 }
 0x23a   : > { %v4383_v51 = vpop.f32.mrf.mxu2  ;;  %v4444_v57 = vpop.f32.mrf.mxu0 }
 0x23b   : > { %v4432_v52 = vpop.f32.mrf.mxu3  ;;  %v4384_v56 = vadd.f32 %v4383_v51, %v4335_v38  ;;  %v4493_v58 = vpop.f32.mrf.mxu1  ;;  %v4445_v63 = vadd.f32 %v4444_v57, %v7699_v0  ;;  %v6520_v57 = vld [vmem:[%s8513_s0 + $0x15c] sm:$0xf0] }
 0x23d   : > { %v7951_v1 = vadd.f32 %v4432_v52, %v4384_v56  ;;  %v4494_v2 = vadd.f32 %v4493_v58, %v4445_v63  ;;  %4639 = vmatmul.bf16.vlgmr.msra.gmra.mxu0 %v5483_v53  ;;  %v6712_v53 = vld [vmem:[%s7406_s9 + $0x360] sm:$0xff]  ;;  %v6513_v63 = vld [vmem:[%s8513_s0 + $0x12c] sm:$0xf] }
 0x23e   : > { %4688 = vmatmul.bf16.vlgmr.msra.gmra.mxu1 %v5487_v55  ;;  %v5610_v56 = vld [vmem:[%s8513_s0 + $0x120] sm:$0xf]  ;;  %v6512_v58 = vld [vmem:[%s8513_s0 + $0x124] sm:$0xf] }
 0x23f   : > { %4737 = vmatmul.bf16.vlgmr.msra.gmra.mxu2 %v5491_v59  ;;  %v5618_v59 = vld [vmem:[%s8513_s0 + $0x128] sm:$0xf]  ;;  %4879 = vmatpush.bf16.msrb.mxu1 %v6712_v53  ;;  %v5611_v6 = vor.u32 %v6520_v57, %v5610_v56  ;;  %v6718_v57 = vld [vmem:[%s7406_s9 + $0x390] sm:$0xff] }
 0x240   : > { %4786 = vmatmul.bf16.vlgmr.msra.gmra.mxu3 %v5495_v62  ;;  %v6521_v62 = vld [vmem:[%s8513_s0 + $0x164] sm:$0xf0]  ;;  %4930 = vmatpush.bf16.msrb.mxu2 %v6718_v57 }
 0x242   : > { %v4542_v7 = vpop.f32.mrf.mxu2  ;;  %v4446_v10 = vpop.f32.mrf.mxu0 }
 0x243   : > { %v4591_v8 = vpop.f32.mrf.mxu3  ;;  %v4543_v9 = vadd.f32 %v4542_v7, %v4494_v2  ;;  %v4495_v11 = vpop.f32.mrf.mxu1  ;;  %v4447_v0 = vadd.f32 %v4446_v10, %v7726_v20  ;;  %v5548_v20 = vld [vmem:[%s8513_s0 + $0xe0] sm:$0xf0]  ;;  %v5620_v2 = vld [vmem:[%s8513_s0 + $0x168] sm:$0xf0] }
 0x244   : > { %v5551_v31 = vor.u32 %v6496_v18, %v5548_v20  ;;  %v6703_v18 = vld [vmem:[%s7406_s9 + $0x318] sm:$0xff] }
 0x245   : > { %v7957_v12 = vadd.f32 %v4591_v8, %v4543_v9  ;;  %v4496_v14 = vadd.f32 %v4495_v11, %v4447_v0  ;;  %v5619_v11 = vor.u32 %v6521_v62, %v5618_v59  ;;  %v5623_v0 = vor.u32 %v6513_v63, %v5620_v2  ;;  %v6727_v20 = vld [vmem:[%s7406_s9 + $0x3d8] sm:$0xff]  ;;  %4831 = vmatpush.bf16.msrb.mxu0 %v6703_v18 }
 0x246   : > { %4978 = vmatpush.bf16.msrb.mxu3 %v6727_v20 }
 0x24a   : > { %v4544_v25 = vpop.f32.mrf.mxu2  ;;  %v4449_v34 = vpop.f32.mrf.mxu0 }
 0x24b   : > { %v4593_v27 = vpop.f32.mrf.mxu3  ;;  %v4545_v33 = vadd.f32 %v4544_v25, %v4496_v14  ;;  %v4498_v35 = vpop.f32.mrf.mxu1  ;;  %v4450_v38 = vadd.f32 %v4449_v34, %v7731_v30  ;;  %v6536_v34 = vld [vmem:[%s8513_s0 + $0x1dc] sm:$0xf0] }
 0x24d   : > { %v7985_v40 = vadd.f32 %v4593_v27, %v4545_v33  ;;  %v4499_v41 = vadd.f32 %v4498_v35, %v4450_v38  ;;  %4644 = vmatmul.bf16.gmra.mxu0 %v5547_v29  ;;  %v6711_v29 = vld [vmem:[%s7406_s9 + $0x358] sm:$0xff]  ;;  %v5674_v33 = vld [vmem:[%s8513_s0 + $0x1a0] sm:$0xf]  ;;  %v6528_v35 = vld [vmem:[%s8513_s0 + $0x1a4] sm:$0xf] }
 0x24e   : > { %4693 = vmatmul.bf16.gmra.mxu1 %v5551_v31  ;;  %v6529_v38 = vld [vmem:[%s8513_s0 + $0x1ac] sm:$0xf]  ;;  %v5675_v44 = vor.u32 %v6536_v34, %v5674_v33 }
 0x24f   : > { %4742 = vmatmul.bf16.gmra.mxu2 %v5555_v36  ;;  %v5682_v36 = vld [vmem:[%s8513_s0 + $0x1a8] sm:$0xf]  ;;  %4880 = vmatpush.bf16.msrb.mxu1 %v6711_v29 }
 0x250   : > { %4791 = vmatmul.bf16.gmra.mxu3 %v5559_v37  ;;  %v6537_v37 = vld [vmem:[%s8513_s0 + $0x1e4] sm:$0xf0] }
 0x251   : > { %v6717_v34 = vld [vmem:[%s7406_s9 + $0x388] sm:$0xff] }
 0x252   : > { %v4547_v45 = vpop.f32.mrf.mxu2  ;;  %v4451_v48 = vpop.f32.mrf.mxu0  ;;  %4931 = vmatpush.bf16.msrb.mxu2 %v6717_v34 }
 0x253   : > { %v4596_v46 = vpop.f32.mrf.mxu3  ;;  %v4548_v47 = vadd.f32 %v4547_v45, %v4499_v41  ;;  %v4500_v51 = vpop.f32.mrf.mxu1  ;;  %v4452_v30 = vadd.f32 %v4451_v48, %v7758_v50  ;;  %v5612_v50 = vld [vmem:[%s8513_s0 + $0x160] sm:$0xf0]  ;;  %v5684_v41 = vld [vmem:[%s8513_s0 + $0x1e8] sm:$0xf0] }
 0x254   : > { %v5615_v7 = vor.u32 %v6512_v58, %v5612_v50  ;;  %v6702_v58 = vld [vmem:[%s7406_s9 + $0x310] sm:$0xff] }
 0x255   : > { %v7991_v52 = vadd.f32 %v4596_v46, %v4548_v47  ;;  %v4501_v55 = vadd.f32 %v4500_v51, %v4452_v30  ;;  %v5683_v51 = vor.u32 %v6537_v37, %v5682_v36  ;;  %v5687_v30 = vor.u32 %v6529_v38, %v5684_v41  ;;  %v6726_v50 = vld [vmem:[%s7406_s9 + $0x3d0] sm:$0xff]  ;;  %4832 = vmatpush.bf16.msrb.mxu0 %v6702_v58 }
 0x256   : > { %4979 = vmatpush.bf16.msrb.mxu3 %v6726_v50 }
 0x25a   : > { %v4549_v4 = vpop.f32.mrf.mxu2  ;;  %v4454_v9 = vpop.f32.mrf.mxu0 }
 0x25b   : > { %v4598_v5 = vpop.f32.mrf.mxu3  ;;  %v4550_v8 = vadd.f32 %v4549_v4, %v4501_v55  ;;  %v4503_v10 = vpop.f32.mrf.mxu1  ;;  %v4455_v13 = vadd.f32 %v4454_v9, %v7763_v60  ;;  %v6552_v9 = vld [vmem:[%s8513_s0 + $0x25c] sm:$0xf0] }
 0x25d   : > { %v8019_v14 = vadd.f32 %v4598_v5, %v4550_v8  ;;  %v4504_v15 = vadd.f32 %v4503_v10, %v4455_v13  ;;  %4649 = vmatmul.bf16.gmra.mxu0 %v5611_v6  ;;  %v6710_v6 = vld [vmem:[%s7406_s9 + $0x350] sm:$0xff]  ;;  %v5738_v8 = vld [vmem:[%s8513_s0 + $0x220] sm:$0xf]  ;;  %v6544_v10 = vld [vmem:[%s8513_s0 + $0x224] sm:$0xf] }
 0x25e   : > { %4698 = vmatmul.bf16.gmra.mxu1 %v5615_v7  ;;  %v6545_v13 = vld [vmem:[%s8513_s0 + $0x22c] sm:$0xf]  ;;  %v5739_v20 = vor.u32 %v6552_v9, %v5738_v8  ;;  %v6716_v9 = vld [vmem:[%s7406_s9 + $0x380] sm:$0xff] }
 0x25f   : > { %4747 = vmatmul.bf16.gmra.mxu2 %v5619_v11  ;;  %v5746_v11 = vld [vmem:[%s8513_s0 + $0x228] sm:$0xf]  ;;  %4881 = vmatpush.bf16.msrb.mxu1 %v6710_v6 }
 0x260   : > { %4796 = vmatmul.bf16.gmra.mxu3 %v5623_v0  ;;  %v6553_v0 = vld [vmem:[%s8513_s0 + $0x264] sm:$0xf0]  ;;  %4932 = vmatpush.bf16.msrb.mxu2 %v6716_v9 }
 0x262   : > { %v4552_v21 = vpop.f32.mrf.mxu2  ;;  %v4456_v24 = vpop.f32.mrf.mxu0 }
 0x263   : > { %v4601_v22 = vpop.f32.mrf.mxu3  ;;  %v4553_v23 = vadd.f32 %v4552_v21, %v4504_v15  ;;  %v4505_v25 = vpop.f32.mrf.mxu1  ;;  %v4457_v60 = vadd.f32 %v4456_v24, %v7790_v17  ;;  %v5676_v17 = vld [vmem:[%s8513_s0 + $0x1e0] sm:$0xf0]  ;;  %v5748_v15 = vld [vmem:[%s8513_s0 + $0x268] sm:$0xf0] }
 0x264   : > { %v5679_v45 = vor.u32 %v6528_v35, %v5676_v17  ;;  %v6701_v35 = vld [vmem:[%s7406_s9 + $0x308] sm:$0xff] }
 0x265   : > { %v8025_v27 = vadd.f32 %v4601_v22, %v4553_v23  ;;  %v4506_v31 = vadd.f32 %v4505_v25, %v4457_v60  ;;  %v5747_v25 = vor.u32 %v6553_v0, %v5746_v11  ;;  %v5751_v60 = vor.u32 %v6545_v13, %v5748_v15  ;;  %v6725_v17 = vld [vmem:[%s7406_s9 + $0x3c8] sm:$0xff]  ;;  %4833 = vmatpush.bf16.msrb.mxu0 %v6701_v35 }
 0x266   : > { %4980 = vmatpush.bf16.msrb.mxu3 %v6725_v17 }
 0x26a   : > { %v4554_v42 = vpop.f32.mrf.mxu2  ;;  %v4459_v47 = vpop.f32.mrf.mxu0 }
 0x26b   : > { %v4603_v43 = vpop.f32.mrf.mxu3  ;;  %v4555_v46 = vadd.f32 %v4554_v42, %v4506_v31  ;;  %v4508_v48 = vpop.f32.mrf.mxu1  ;;  %v4460_v53 = vadd.f32 %v4459_v47, %v7795_v28  ;;  %v6568_v47 = vld [vmem:[%s8513_s0 + $0x2dc] sm:$0xf0] }
 0x26d   : > { %v8053_v55 = vadd.f32 %v4603_v43, %v4555_v46  ;;  %v4509_v56 = vadd.f32 %v4508_v48, %v4460_v53  ;;  %4654 = vmatmul.bf16.gmra.mxu0 %v5675_v44  ;;  %v6709_v44 = vld [vmem:[%s7406_s9 + $0x348] sm:$0xff]  ;;  %v5802_v46 = vld [vmem:[%s8513_s0 + $0x2a0] sm:$0xf]  ;;  %v6560_v48 = vld [vmem:[%s8513_s0 + $0x2a4] sm:$0xf] }
 0x26e   : > { %4703 = vmatmul.bf16.gmra.mxu1 %v5679_v45  ;;  %v6561_v53 = vld [vmem:[%s8513_s0 + $0x2ac] sm:$0xf]  ;;  %v5803_v50 = vor.u32 %v6568_v47, %v5802_v46 }
 0x26f   : > { %4752 = vmatmul.bf16.gmra.mxu2 %v5683_v51  ;;  %v5810_v51 = vld [vmem:[%s8513_s0 + $0x2a8] sm:$0xf]  ;;  %4882 = vmatpush.bf16.msrb.mxu1 %v6709_v44 }
 0x270   : > { %4801 = vmatmul.bf16.gmra.mxu3 %v5687_v30  ;;  %v6569_v30 = vld [vmem:[%s8513_s0 + $0x2e4] sm:$0xf0] }
 0x272   : > { %v4557_v59 = vpop.f32.mrf.mxu2  ;;  %v4461_v2 = vpop.f32.mrf.mxu0 }
 0x273   : > { %v4606_v62 = vpop.f32.mrf.mxu3  ;;  %v4558_v63 = vadd.f32 %v4557_v59, %v4509_v56  ;;  %v4510_v4 = vpop.f32.mrf.mxu1  ;;  %v4462_v28 = vadd.f32 %v4461_v2, %v7822_v49  ;;  %v5740_v49 = vld [vmem:[%s8513_s0 + $0x260] sm:$0xf0]  ;;  %v5812_v56 = vld [vmem:[%s8513_s0 + $0x2e8] sm:$0xf0] }
 0x274   : > { %v5743_v21 = vor.u32 %v6544_v10, %v5740_v49  ;;  %v6700_v10 = vld [vmem:[%s7406_s9 + $0x300] sm:$0xff] }
 0x275   : > { %v8059_v5 = vadd.f32 %v4606_v62, %v4558_v63  ;;  %v4511_v7 = vadd.f32 %v4510_v4, %v4462_v28  ;;  %v5811_v4 = vor.u32 %v6569_v30, %v5810_v51  ;;  %v5815_v28 = vor.u32 %v6561_v53, %v5812_v56  ;;  %v6724_v49 = vld [vmem:[%s7406_s9 + $0x3c0] sm:$0xff]  ;;  %4834 = vmatpush.bf16.msrb.mxu0 %v6700_v10 }
 0x276   : > { %4981 = vmatpush.bf16.msrb.mxu3 %v6724_v49 }
 0x27a   : > { %v4559_v16 = vpop.f32.mrf.mxu2  ;;  %v4464_v23 = vpop.f32.mrf.mxu0 }
 0x27b   : > { %v4608_v18 = vpop.f32.mrf.mxu3  ;;  %v4560_v22 = vadd.f32 %v4559_v16, %v4511_v7  ;;  %v4513_v24 = vpop.f32.mrf.mxu1  ;;  %v4465_v29 = vadd.f32 %v4464_v23, %v7827_v61  ;;  %v6584_v23 = vld [vmem:[%s8513_s0 + $0x35c] sm:$0xf0] }
 0x27d   : > { %v8087_v31 = vadd.f32 %v4608_v18, %v4560_v22  ;;  %v4514_v33 = vadd.f32 %v4513_v24, %v4465_v29  ;;  %4659 = vmatmul.bf16.gmra.mxu0 %v5739_v20  ;;  %v6708_v20 = vld [vmem:[%s7406_s9 + $0x340] sm:$0xff]  ;;  %v6577_v29 = vld [vmem:[%s8513_s0 + $0x32c] sm:$0xf]  ;;  %s2403_s9 = scalar_lea.vmem %s8516_s3, %s2400_s15 }
 0x27e   : > { %4708 = vmatmul.bf16.gmra.mxu1 %v5743_v21  ;;  %v5866_v22 = vld [vmem:[%s8513_s0 + $0x320] sm:$0xf]  ;;  %v6576_v24 = vld [vmem:[%s8513_s0 + $0x324] sm:$0xf] }
 0x27f   : > { %4757 = vmatmul.bf16.gmra.mxu2 %v5747_v25  ;;  %v5874_v25 = vld [vmem:[%s8513_s0 + $0x328] sm:$0xf]  ;;  %4883 = vmatpush.bf16.msrb.mxu1 %v6708_v20  ;;  %v5867_v17 = vor.u32 %v6584_v23, %v5866_v22 }
 0x280   : > { %4806 = vmatmul.bf16.gmra.mxu3 %v5751_v60  ;;  %v6585_v60 = vld [vmem:[%s8513_s0 + $0x364] sm:$0xf0] }
 0x282   : > { %v4562_v36 = vpop.f32.mrf.mxu2  ;;  %v4466_v41 = vpop.f32.mrf.mxu0 }
 0x283   : > { %v4611_v37 = vpop.f32.mrf.mxu3  ;;  %v4563_v38 = vadd.f32 %v4562_v36, %v4514_v33  ;;  %v4515_v42 = vpop.f32.mrf.mxu1  ;;  %v4467_v61 = vadd.f32 %v4466_v41, %v7854_v19  ;;  %v5804_v19 = vld [vmem:[%s8513_s0 + $0x2e0] sm:$0xf0]  ;;  %v5876_v33 = vld [vmem:[%s8513_s0 + $0x368] sm:$0xf0] }
 0x284   : > { %v5807_v59 = vor.u32 %v6560_v48, %v5804_v19 }
 0x285   : > { %v8093_v43 = vadd.f32 %v4611_v37, %v4563_v38  ;;  %v4516_v45 = vadd.f32 %v4515_v42, %v4467_v61  ;;  %v5875_v42 = vor.u32 %v6585_v60, %v5874_v25  ;;  %v5879_v61 = vor.u32 %v6577_v29, %v5876_v33  ;;  %v6490_v60 = vld [vmem:[%s8513_s0 + $0x6c] sm:$0xf0]  ;;  %v6482_v29 = vld [vmem:[%s8513_s0 + $0x34] sm:$0xf] }
 0x286   : > { %v5500_v33 = vld [vmem:[%s8513_s0 + $0x70] sm:$0xf0] }
 0x28a   : > { %v4564_v57 = vpop.f32.mrf.mxu2  ;;  %v4469_v63 = vpop.f32.mrf.mxu0 }
 0x28b   : > { %v4613_v58 = vpop.f32.mrf.mxu3  ;;  %v4565_v62 = vadd.f32 %v4564_v57, %v4516_v45  ;;  %v4518_v2 = vpop.f32.mrf.mxu1  ;;  %v4470_v6 = vadd.f32 %v4469_v63, %v7859_v32  ;;  %v6593_v63 = vld [vmem:[%s8513_s0 + $0x3ac] sm:$0xf] }
 0x28d   : > { %v8121_v7 = vadd.f32 %v4613_v58, %v4565_v62  ;;  %v4519_v8 = vadd.f32 %v4518_v2, %v4470_v6  ;;  %4664 = vmatmul.bf16.gmra.mxu0 %v5803_v50  ;;  %v6600_v58 = vld [vmem:[%s8513_s0 + $0x3dc] sm:$0xf0]  ;;  %v6592_v50 = vld [vmem:[%s8513_s0 + $0x3a4] sm:$0xf]  ;;  %v6601_v62 = vld [vmem:[%s8513_s0 + $0x3e4] sm:$0xf0] }
 0x28e   : > { %4713 = vmatmul.bf16.gmra.mxu1 %v5807_v59  ;;  %v5932_v59 = vld [vmem:[%s8513_s0 + $0x3e0] sm:$0xf0]  ;;  %v5940_v2 = vld [vmem:[%s8513_s0 + $0x3e8] sm:$0xf0] }
 0x28f   : > { %4762 = vmatmul.bf16.gmra.mxu2 %v5811_v4 }
 0x290   : > { %4811 = vmatmul.bf16.gmra.mxu3 %v5815_v28 }
 0x292   : > { %v4567_v11 = vpop.f32.mrf.mxu2  ;;  %v4471_v15 = vpop.f32.mrf.mxu0 }
 0x293   : > { %v4616_v0 = vpop.f32.mrf.mxu3  ;;  %v4568_v13 = vadd.f32 %v4567_v11, %v4519_v8  ;;  %v4520_v16 = vpop.f32.mrf.mxu1  ;;  %v4472_v32 = vadd.f32 %v4471_v15, %v7886_v54  ;;  %v5868_v54 = vld [vmem:[%s8513_s0 + $0x360] sm:$0xf0]  ;;  %v5935_v8 = vor.u32 %v6592_v50, %v5932_v59 }
 0x294   : > { %v5871_v36 = vor.u32 %v6576_v24, %v5868_v54 }
 0x295   : > { %v8127_v18 = vadd.f32 %v4616_v0, %v4568_v13  ;;  %v4521_v21 = vadd.f32 %v4520_v16, %v4472_v32  ;;  %v5943_v0 = vor.u32 %v6593_v63, %v5940_v2  ;;  %v6498_v63 = vld [vmem:[%s8513_s0 + $0xb4] sm:$0xf] }
 0x296   : > { %v5564_v2 = vld [vmem:[%s8513_s0 + $0xf0] sm:$0xf0] }
 0x29a   : > { %v4569_v34 = vpop.f32.mrf.mxu2  ;;  %v4474_v38 = vpop.f32.mrf.mxu0 }
 0x29b   : > { %v4618_v35 = vpop.f32.mrf.mxu3  ;;  %v4570_v37 = vadd.f32 %v4569_v34, %v4521_v21  ;;  %v4523_v41 = vpop.f32.mrf.mxu1  ;;  %v4475_v44 = vadd.f32 %v4474_v38, %v7891_v3  ;;  %v5930_v3 = vld [vmem:[%s8513_s0 + $0x3a0] sm:$0xf]  ;;  %v6491_v34 = vld [vmem:[%s8513_s0 + $0x74] sm:$0xf0] }
 0x29c   : > { %v5931_v6 = vor.u32 %v6600_v58, %v5930_v3 }
 0x29d   : > { %v8155_v45 = vadd.f32 %v4618_v35, %v4570_v37  ;;  %v4524_v46 = vadd.f32 %v4523_v41, %v4475_v44  ;;  %4669 = vmatmul.bf16.gmra.mxu0 %v5867_v17  ;;  %v6483_v35 = vld [vmem:[%s8513_s0 + $0x3c] sm:$0xf]  ;;  %v5503_v41 = vor.u32 %v6482_v29, %v5500_v33 }
 0x29e   : > { %4718 = vmatmul.bf16.gmra.mxu1 %v5871_v36  ;;  %v5508_v17 = vld [vmem:[%s8513_s0 + $0x78] sm:$0xf0] }
 0x29f   : > { %4767 = vmatmul.bf16.gmra.mxu2 %v5875_v42 }
 0x2a0   : > { %4816 = vmatmul.bf16.gmra.mxu3 %v5879_v61 }
 0x2a2   : > { %v4572_v47 = vpop.f32.mrf.mxu2  ;;  %v4476_v51 = vpop.f32.mrf.mxu0 }
 0x2a3   : > { %v4621_v48 = vpop.f32.mrf.mxu3  ;;  %v4573_v19 = vadd.f32 %v4572_v47, %v4524_v46  ;;  %v4525_v30 = vpop.f32.mrf.mxu1  ;;  %v4477_v53 = vadd.f32 %v4476_v51, %v7918_v26  ;;  %v5938_v26 = vld [vmem:[%s8513_s0 + $0x3a8] sm:$0xf]  ;;  %v5511_v47 = vor.u32 %v6483_v35, %v5508_v17  ;;  %v6514_v35 = vld [vmem:[%s8513_s0 + $0x134] sm:$0xf] }
 0x2a4   : > { %v5939_v11 = vor.u32 %v6601_v62, %v5938_v26  ;;  %v6506_v62 = vld [vmem:[%s8513_s0 + $0xec] sm:$0xf0]  ;;  %v5628_v17 = vld [vmem:[%s8513_s0 + $0x170] sm:$0xf0] }
 0x2a5   : > { %v8158_v56 = vadd.f32 %v4621_v48, %v4573_v19  ;;  %v4526_v57 = vadd.f32 %v4525_v30, %v4477_v53 }
 0x2aa   : > { %v4574_v4 = vpop.f32.mrf.mxu2  ;;  %v4479_v10 = vpop.f32.mrf.mxu0 }
 0x2ab   : > { %v4623_v28 = vpop.f32.mrf.mxu3  ;;  %v4575_v9 = vadd.f32 %v4574_v4, %v4526_v57  ;;  %v4528_v49 = vpop.f32.mrf.mxu1  ;;  %v4480_v13 = vadd.f32 %v4479_v10, %v7923_v39  ;;  %v5498_v39 = vld [vmem:[%s8513_s0 + $0x30] sm:$0xf]  ;;  %v6507_v4 = vld [vmem:[%s8513_s0 + $0xf4] sm:$0xf0] }
 0x2ac   : > { %v5499_v38 = vor.u32 %v6490_v60, %v5498_v39 }
 0x2ad   : > { %v8185_v15 = vadd.f32 %v4623_v28, %v4575_v9  ;;  %v4529_v16 = vadd.f32 %v4528_v49, %v4480_v13  ;;  %4674 = vmatmul.bf16.gmra.mxu0 %v5931_v6  ;;  %v6499_v28 = vld [vmem:[%s8513_s0 + $0xbc] sm:$0xf]  ;;  %v5567_v49 = vor.u32 %v6498_v63, %v5564_v2 }
 0x2ae   : > { %4723 = vmatmul.bf16.gmra.mxu1 %v5935_v8  ;;  %v5572_v6 = vld [vmem:[%s8513_s0 + $0xf8] sm:$0xf0] }
 0x2af   : > { %4772 = vmatmul.bf16.gmra.mxu2 %v5939_v11 }
 0x2b0   : > { %4821 = vmatmul.bf16.gmra.mxu3 %v5943_v0 }
 0x2b2   : > { %v4577_v32 = vpop.f32.mrf.mxu2  ;;  %v4481_v22 = vpop.f32.mrf.mxu0 }
 0x2b3   : > { %v4626_v20 = vpop.f32.mrf.mxu3  ;;  %v4578_v21 = vadd.f32 %v4577_v32, %v4529_v16  ;;  %v4530_v23 = vpop.f32.mrf.mxu1  ;;  %v4482_v24 = vadd.f32 %v4481_v22, %v7951_v1  ;;  %v5506_v1 = vld [vmem:[%s8513_s0 + $0x38] sm:$0xf]  ;;  %v5575_v32 = vor.u32 %v6499_v28, %v5572_v6  ;;  %v6530_v28 = vld [vmem:[%s8513_s0 + $0x1b4] sm:$0xf] }
 0x2b4   : > { %v5507_v46 = vor.u32 %v6491_v34, %v5506_v1  ;;  %v6522_v34 = vld [vmem:[%s8513_s0 + $0x16c] sm:$0xf0]  ;;  %v5692_v6 = vld [vmem:[%s8513_s0 + $0x1f0] sm:$0xf0] }
 0x2b5   : > { %v8188_v54 = vadd.f32 %v4626_v20, %v4578_v21  ;;  %v4531_v25 = vadd.f32 %v4530_v23, %v4482_v24 }
 0x2ba   : > { %v4579_v36 = vpop.f32.mrf.mxu2  ;;  %v4640_v61 = vpop.f32.mrf.mxu0 }
 0x2bb   : > { %v4628_v37 = vpop.f32.mrf.mxu3  ;;  %v4580_v42 = vadd.f32 %v4579_v36, %v4531_v25  ;;  %v4689_v44 = vpop.f32.mrf.mxu1  ;;  %v4641_v48 = vadd.f32 %v4640_v61, %v7957_v12  ;;  %v5562_v12 = vld [vmem:[%s8513_s0 + $0xb0] sm:$0xf]  ;;  %v6523_v36 = vld [vmem:[%s8513_s0 + $0x174] sm:$0xf0] }
 0x2bc   : > { %v5563_v10 = vor.u32 %v6506_v62, %v5562_v12 }
 0x2bd   : > { %v8215_v19 = vadd.f32 %v4628_v37, %v4580_v42  ;;  %v4690_v51 = vadd.f32 %v4689_v44, %v4641_v48  ;;  %4835 = vmatmul.bf16.vlgmr.msrb.gmra.mxu0 %v5499_v38  ;;  %v6515_v37 = vld [vmem:[%s8513_s0 + $0x13c] sm:$0xf]  ;;  %v5631_v44 = vor.u32 %v6514_v35, %v5628_v17 }
 0x2be   : > { %4884 = vmatmul.bf16.vlgmr.msrb.gmra.mxu1 %v5503_v41  ;;  %v5636_v38 = vld [vmem:[%s8513_s0 + $0x178] sm:$0xf0] }
 0x2bf   : > { %4933 = vmatmul.bf16.vlgmr.msrb.gmra.mxu2 %v5507_v46 }
 0x2c0   : > { %4982 = vmatmul.bf16.vlgmr.msrb.gmra.mxu3 %v5511_v47 }
 0x2c2   : > { %v4738_v30 = vpop.f32.mrf.mxu2  ;;  %v4642_v3 = vpop.f32.mrf.mxu0 }
 0x2c3   : > { %v4787_v53 = vpop.f32.mrf.mxu3  ;;  %v4739_v57 = vadd.f32 %v4738_v30, %v4690_v51  ;;  %v4691_v58 = vpop.f32.mrf.mxu1  ;;  %v4643_v50 = vadd.f32 %v4642_v3, %v7985_v40  ;;  %v5570_v40 = vld [vmem:[%s8513_s0 + $0xb8] sm:$0xf]  ;;  %v5639_v30 = vor.u32 %v6515_v37, %v5636_v38  ;;  %v6546_v37 = vld [vmem:[%s8513_s0 + $0x234] sm:$0xf] }
 0x2c4   : > { %v5571_v16 = vor.u32 %v6507_v4, %v5570_v40  ;;  %v6538_v4 = vld [vmem:[%s8513_s0 + $0x1ec] sm:$0xf0]  ;;  %v5756_v38 = vld [vmem:[%s8513_s0 + $0x270] sm:$0xf0] }
 0x2c5   : > { %v8218_v59 = vadd.f32 %v4787_v53, %v4739_v57  ;;  %v4692_v26 = vadd.f32 %v4691_v58, %v4643_v50 }
 0x2ca   : > { %v4740_v8 = vpop.f32.mrf.mxu2  ;;  %v4645_v0 = vpop.f32.mrf.mxu0 }
 0x2cb   : > { %v4789_v9 = vpop.f32.mrf.mxu3  ;;  %v4741_v11 = vadd.f32 %v4740_v8, %v4692_v26  ;;  %v4694_v13 = vpop.f32.mrf.mxu1  ;;  %v4646_v20 = vadd.f32 %v4645_v0, %v7991_v52  ;;  %v5626_v52 = vld [vmem:[%s8513_s0 + $0x130] sm:$0xf]  ;;  %v6539_v8 = vld [vmem:[%s8513_s0 + $0x1f4] sm:$0xf0] }
 0x2cc   : > { %v5627_v61 = vor.u32 %v6522_v34, %v5626_v52 }
 0x2cd   : > { %v8245_v21 = vadd.f32 %v4789_v9, %v4741_v11  ;;  %v4695_v22 = vadd.f32 %v4694_v13, %v4646_v20  ;;  %4840 = vmatmul.bf16.gmra.mxu0 %v5563_v10  ;;  %v6531_v9 = vld [vmem:[%s8513_s0 + $0x1bc] sm:$0xf]  ;;  %v5695_v13 = vor.u32 %v6530_v28, %v5692_v6 }
 0x2ce   : > { %4889 = vmatmul.bf16.gmra.mxu1 %v5567_v49  ;;  %v5700_v10 = vld [vmem:[%s8513_s0 + $0x1f8] sm:$0xf0] }
 0x2cf   : > { %4938 = vmatmul.bf16.gmra.mxu2 %v5571_v16 }
 0x2d0   : > { %4987 = vmatmul.bf16.gmra.mxu3 %v5575_v32 }
 0x2d2   : > { %v4743_v23 = vpop.f32.mrf.mxu2  ;;  %v4647_v39 = vpop.f32.mrf.mxu0 }
 0x2d3   : > { %v4792_v24 = vpop.f32.mrf.mxu3  ;;  %v4744_v25 = vadd.f32 %v4743_v23, %v4695_v22  ;;  %v4696_v60 = vpop.f32.mrf.mxu1  ;;  %v4648_v29 = vadd.f32 %v4647_v39, %v8019_v14  ;;  %v5634_v14 = vld [vmem:[%s8513_s0 + $0x138] sm:$0xf]  ;;  %v5703_v23 = vor.u32 %v6531_v9, %v5700_v10  ;;  %v6562_v9 = vld [vmem:[%s8513_s0 + $0x2b4] sm:$0xf] }
 0x2d4   : > { %v5635_v51 = vor.u32 %v6523_v36, %v5634_v14  ;;  %v6554_v36 = vld [vmem:[%s8513_s0 + $0x26c] sm:$0xf0]  ;;  %v5820_v10 = vld [vmem:[%s8513_s0 + $0x2f0] sm:$0xf0] }
 0x2d5   : > { %v8248_v33 = vadd.f32 %v4792_v24, %v4744_v25  ;;  %v4697_v1 = vadd.f32 %v4696_v60, %v4648_v29 }
 0x2da   : > { %v4745_v41 = vpop.f32.mrf.mxu2  ;;  %v4650_v47 = vpop.f32.mrf.mxu0 }
 0x2db   : > { %v4794_v42 = vpop.f32.mrf.mxu3  ;;  %v4746_v46 = vadd.f32 %v4745_v41, %v4697_v1  ;;  %v4699_v48 = vpop.f32.mrf.mxu1  ;;  %v4651_v53 = vadd.f32 %v4650_v47, %v8025_v27  ;;  %v5690_v27 = vld [vmem:[%s8513_s0 + $0x1b0] sm:$0xf]  ;;  %v6555_v41 = vld [vmem:[%s8513_s0 + $0x274] sm:$0xf0] }
 0x2dc   : > { %v5691_v0 = vor.u32 %v6538_v4, %v5690_v27 }
 0x2dd   : > { %v8275_v57 = vadd.f32 %v4794_v42, %v4746_v46  ;;  %v4700_v3 = vadd.f32 %v4699_v48, %v4651_v53  ;;  %4845 = vmatmul.bf16.gmra.mxu0 %v5627_v61  ;;  %v6547_v42 = vld [vmem:[%s8513_s0 + $0x23c] sm:$0xf]  ;;  %v5759_v48 = vor.u32 %v6546_v37, %v5756_v38 }
 0x2de   : > { %4894 = vmatmul.bf16.gmra.mxu1 %v5631_v44  ;;  %v5764_v61 = vld [vmem:[%s8513_s0 + $0x278] sm:$0xf0] }
 0x2df   : > { %4943 = vmatmul.bf16.gmra.mxu2 %v5635_v51 }
 0x2e0   : > { %4992 = vmatmul.bf16.gmra.mxu3 %v5639_v30 }
 0x2e2   : > { %v4748_v58 = vpop.f32.mrf.mxu2  ;;  %v4652_v12 = vpop.f32.mrf.mxu0 }
 0x2e3   : > { %v4797_v50 = vpop.f32.mrf.mxu3  ;;  %v4749_v26 = vadd.f32 %v4748_v58, %v4700_v3  ;;  %v4701_v62 = vpop.f32.mrf.mxu1  ;;  %v4653_v63 = vadd.f32 %v4652_v12, %v8053_v55  ;;  %v5698_v55 = vld [vmem:[%s8513_s0 + $0x1b8] sm:$0xf]  ;;  %v5767_v58 = vor.u32 %v6547_v42, %v5764_v61  ;;  %v6578_v42 = vld [vmem:[%s8513_s0 + $0x334] sm:$0xf] }
 0x2e4   : > { %v5699_v22 = vor.u32 %v6539_v8, %v5698_v55  ;;  %v6570_v8 = vld [vmem:[%s8513_s0 + $0x2ec] sm:$0xf0]  ;;  %v5884_v61 = vld [vmem:[%s8513_s0 + $0x370] sm:$0xf0] }
 0x2e5   : > { %v8278_v2 = vadd.f32 %v4797_v50, %v4749_v26  ;;  %v4702_v40 = vadd.f32 %v4701_v62, %v4653_v63 }
 0x2ea   : > { %v4750_v49 = vpop.f32.mrf.mxu2  ;;  %v4655_v32 = vpop.f32.mrf.mxu0 }
 0x2eb   : > { %v4799_v11 = vpop.f32.mrf.mxu3  ;;  %v4751_v16 = vadd.f32 %v4750_v49, %v4702_v40  ;;  %v4704_v20 = vpop.f32.mrf.mxu1  ;;  %v4656_v24 = vadd.f32 %v4655_v32, %v8059_v5  ;;  %v5754_v5 = vld [vmem:[%s8513_s0 + $0x230] sm:$0xf]  ;;  %v6571_v49 = vld [vmem:[%s8513_s0 + $0x2f4] sm:$0xf0] }
 0x2ec   : > { %v5755_v47 = vor.u32 %v6554_v36, %v5754_v5 }
 0x2ed   : > { %v8305_v25 = vadd.f32 %v4799_v11, %v4751_v16  ;;  %v4705_v39 = vadd.f32 %v4704_v20, %v4656_v24  ;;  %4850 = vmatmul.bf16.gmra.mxu0 %v5691_v0  ;;  %v6563_v11 = vld [vmem:[%s8513_s0 + $0x2bc] sm:$0xf]  ;;  %v5823_v20 = vor.u32 %v6562_v9, %v5820_v10 }
 0x2ee   : > { %4899 = vmatmul.bf16.gmra.mxu1 %v5695_v13  ;;  %v5828_v0 = vld [vmem:[%s8513_s0 + $0x2f8] sm:$0xf0] }
 0x2ef   : > { %4948 = vmatmul.bf16.gmra.mxu2 %v5699_v22 }
 0x2f0   : > { %4997 = vmatmul.bf16.gmra.mxu3 %v5703_v23 }
 0x2f2   : > { %v4753_v60 = vpop.f32.mrf.mxu2  ;;  %v4657_v52 = vpop.f32.mrf.mxu0 }
 0x2f3   : > { %v4802_v29 = vpop.f32.mrf.mxu3  ;;  %v4754_v1 = vadd.f32 %v4753_v60, %v4705_v39  ;;  %v4706_v34 = vpop.f32.mrf.mxu1  ;;  %v4658_v35 = vadd.f32 %v4657_v52, %v8087_v31  ;;  %v5762_v31 = vld [vmem:[%s8513_s0 + $0x238] sm:$0xf]  ;;  %v5831_v60 = vor.u32 %v6563_v11, %v5828_v0  ;;  %v6594_v11 = vld [vmem:[%s8513_s0 + $0x3b4] sm:$0xf] }
 0x2f4   : > { %v5763_v3 = vor.u32 %v6555_v41, %v5762_v31  ;;  %v6586_v41 = vld [vmem:[%s8513_s0 + $0x36c] sm:$0xf0]  ;;  %v5948_v0 = vld [vmem:[%s8513_s0 + $0x3f0] sm:$0xf0] }
 0x2f5   : > { %v8308_v17 = vadd.f32 %v4802_v29, %v4754_v1  ;;  %v4707_v14 = vadd.f32 %v4706_v34, %v4658_v35 }
 0x2fa   : > { %v4755_v44 = vpop.f32.mrf.mxu2  ;;  %v4660_v30 = vpop.f32.mrf.mxu0 }
 0x2fb   : > { %v4804_v46 = vpop.f32.mrf.mxu3  ;;  %v4756_v51 = vadd.f32 %v4755_v44, %v4707_v14  ;;  %v4709_v53 = vpop.f32.mrf.mxu1  ;;  %v4661_v50 = vadd.f32 %v4660_v30, %v8093_v43  ;;  %v5818_v43 = vld [vmem:[%s8513_s0 + $0x2b0] sm:$0xf]  ;;  %v6587_v44 = vld [vmem:[%s8513_s0 + $0x374] sm:$0xf0] }
 0x2fc   : > { %v5819_v32 = vor.u32 %v6570_v8, %v5818_v43 }
 0x2fd   : > { %v8335_v26 = vadd.f32 %v4804_v46, %v4756_v51  ;;  %v4710_v12 = vadd.f32 %v4709_v53, %v4661_v50  ;;  %4855 = vmatmul.bf16.gmra.mxu0 %v5755_v47  ;;  %v6579_v46 = vld [vmem:[%s8513_s0 + $0x33c] sm:$0xf]  ;;  %v5887_v53 = vor.u32 %v6578_v42, %v5884_v61 }
 0x2fe   : > { %4904 = vmatmul.bf16.gmra.mxu1 %v5759_v48  ;;  %v5892_v47 = vld [vmem:[%s8513_s0 + $0x378] sm:$0xf0] }
 0x2ff   : > { %4953 = vmatmul.bf16.gmra.mxu2 %v5763_v3 }
 0x300   : > { %5002 = vmatmul.bf16.gmra.mxu3 %v5767_v58 }
 0x302   : > { %v4758_v62 = vpop.f32.mrf.mxu2  ;;  %v4662_v27 = vpop.f32.mrf.mxu0 }
 0x303   : > { %v4807_v63 = vpop.f32.mrf.mxu3  ;;  %v4759_v40 = vadd.f32 %v4758_v62, %v4710_v12  ;;  %v4711_v4 = vpop.f32.mrf.mxu1  ;;  %v4663_v28 = vadd.f32 %v4662_v27, %v8121_v7  ;;  %v5826_v7 = vld [vmem:[%s8513_s0 + $0x2b8] sm:$0xf]  ;;  %v5895_v62 = vor.u32 %v6579_v46, %v5892_v47 }
 0x304   : > { %v5827_v39 = vor.u32 %v6571_v49, %v5826_v7  ;;  %v6602_v49 = vld [vmem:[%s8513_s0 + $0x3ec] sm:$0xf0] }
 0x305   : > { %v8338_v6 = vadd.f32 %v4807_v63, %v4759_v40  ;;  %v4712_v55 = vadd.f32 %v4711_v4, %v4663_v28 }
 0x30a   : > { %v4760_v13 = vpop.f32.mrf.mxu2  ;;  %v4665_v23 = vpop.f32.mrf.mxu0 }
 0x30b   : > { %v4809_v16 = vpop.f32.mrf.mxu3  ;;  %v4761_v22 = vadd.f32 %v4760_v13, %v4712_v55  ;;  %v4714_v24 = vpop.f32.mrf.mxu1  ;;  %v4666_v29 = vadd.f32 %v4665_v23, %v8127_v18  ;;  %v5882_v18 = vld [vmem:[%s8513_s0 + $0x330] sm:$0xf]  ;;  %v6603_v13 = vld [vmem:[%s8513_s0 + $0x3f4] sm:$0xf0] }
 0x30c   : > { %v5883_v30 = vor.u32 %v6586_v41, %v5882_v18 }
 0x30d   : > { %v8365_v1 = vadd.f32 %v4809_v16, %v4761_v22  ;;  %v4715_v52 = vadd.f32 %v4714_v24, %v4666_v29  ;;  %4860 = vmatmul.bf16.gmra.mxu0 %v5819_v32  ;;  %v6595_v16 = vld [vmem:[%s8513_s0 + $0x3bc] sm:$0xf]  ;;  %v5951_v24 = vor.u32 %v6594_v11, %v5948_v0 }
 0x30e   : > { %4909 = vmatmul.bf16.gmra.mxu1 %v5823_v20  ;;  %v5956_v32 = vld [vmem:[%s8513_s0 + $0x3f8] sm:$0xf0] }
 0x30f   : > { %4958 = vmatmul.bf16.gmra.mxu2 %v5827_v39 }
 0x310   : > { %5007 = vmatmul.bf16.gmra.mxu3 %v5831_v60 }
 0x312   : > { %v4763_v34 = vpop.f32.mrf.mxu2  ;;  %v4667_v5 = vpop.f32.mrf.mxu0 }
 0x313   : > { %v4812_v35 = vpop.f32.mrf.mxu3  ;;  %v4764_v14 = vadd.f32 %v4763_v34, %v4715_v52  ;;  %v4716_v36 = vpop.f32.mrf.mxu1  ;;  %v4668_v37 = vadd.f32 %v4667_v5, %v8155_v45  ;;  %v5890_v45 = vld [vmem:[%s8513_s0 + $0x338] sm:$0xf]  ;;  %v5959_v34 = vor.u32 %v6595_v16, %v5956_v32 }
 0x314   : > { %v5891_v12 = vor.u32 %v6587_v44, %v5890_v45 }
 0x315   : > { %v8368_v38 = vadd.f32 %v4812_v35, %v4764_v14  ;;  %v4717_v31 = vadd.f32 %v4716_v36, %v4668_v37 }
 0x31a   : > { %v4765_v48 = vpop.f32.mrf.mxu2  ;;  %v4670_v58 = vpop.f32.mrf.mxu0 }
 0x31b   : > { %v4814_v51 = vpop.f32.mrf.mxu3  ;;  %v4766_v3 = vadd.f32 %v4765_v48, %v4717_v31  ;;  %v4719_v50 = vpop.f32.mrf.mxu1  ;;  %v4671_v63 = vadd.f32 %v4670_v58, %v8158_v56  ;;  %v5946_v56 = vld [vmem:[%s8513_s0 + $0x3b0] sm:$0xf] }
 0x31c   : > { %v5947_v23 = vor.u32 %v6602_v49, %v5946_v56 }
 0x31d   : > { %v8395_v40 = vadd.f32 %v4814_v51, %v4766_v3  ;;  %v4720_v27 = vadd.f32 %v4719_v50, %v4671_v63  ;;  %4865 = vmatmul.bf16.gmra.mxu0 %v5883_v30 }
 0x31e   : > { %4914 = vmatmul.bf16.gmra.mxu1 %v5887_v53 }
 0x31f   : > { %4963 = vmatmul.bf16.gmra.mxu2 %v5891_v12 }
 0x320   : > { %5012 = vmatmul.bf16.gmra.mxu3 %v5895_v62 }
 0x322   : > { %v4768_v4 = vpop.f32.mrf.mxu2  ;;  %v4672_v43 = vpop.f32.mrf.mxu0 }
 0x323   : > { %v4817_v28 = vpop.f32.mrf.mxu3  ;;  %v4769_v55 = vadd.f32 %v4768_v4, %v4720_v27  ;;  %v4721_v8 = vpop.f32.mrf.mxu1  ;;  %v4673_v9 = vadd.f32 %v4672_v43, %v8185_v15  ;;  %v5954_v15 = vld [vmem:[%s8513_s0 + $0x3b8] sm:$0xf] }
 0x324   : > { %v5955_v52 = vor.u32 %v6603_v13, %v5954_v15 }
 0x325   : > { %v8398_v10 = vadd.f32 %v4817_v28, %v4769_v55  ;;  %v4722_v7 = vadd.f32 %v4721_v8, %v4673_v9 }
 0x32a   : > { %v4770_v20 = vpop.f32.mrf.mxu2  ;;  %v4675_v60 = vpop.f32.mrf.mxu0 }
 0x32b   : > { %v4819_v22 = vpop.f32.mrf.mxu3  ;;  %v4771_v39 = vadd.f32 %v4770_v20, %v4722_v7  ;;  %v4724_v29 = vpop.f32.mrf.mxu1  ;;  %v4676_v35 = vadd.f32 %v4675_v60, %v8188_v54 }
 0x32d   : > { %v8425_v14 = vadd.f32 %v4819_v22, %v4771_v39  ;;  %v4725_v5 = vadd.f32 %v4724_v29, %v4676_v35  ;;  %4870 = vmatmul.bf16.gmra.mxu0 %v5947_v23 }
 0x32e   : > { %4919 = vmatmul.bf16.gmra.mxu1 %v5951_v24 }
 0x32f   : > { %4968 = vmatmul.bf16.gmra.mxu2 %v5955_v52 }
 0x330   : > { %5017 = vmatmul.bf16.gmra.mxu3 %v5959_v34 }
 0x332   : > { %v4773_v36 = vpop.f32.mrf.mxu2  ;;  %v4677_v18 = vpop.f32.mrf.mxu0 }
 0x333   : > { %v4822_v37 = vpop.f32.mrf.mxu3  ;;  %v4774_v31 = vadd.f32 %v4773_v36, %v4725_v5  ;;  %v4726_v41 = vpop.f32.mrf.mxu1  ;;  %v4678_v42 = vadd.f32 %v4677_v18, %v8215_v19 }
 0x335   : > { %v8428_v61 = vadd.f32 %v4822_v37, %v4774_v31  ;;  %v4727_v45 = vadd.f32 %v4726_v41, %v4678_v42 }
 0x33a   : > { %v4775_v44 = vpop.f32.mrf.mxu2  ;;  %v4836_v47 = vpop.f32.mrf.mxu0 }
 0x33b   : > { %v4824_v54 = vpop.f32.mrf.mxu3  ;;  %v4776_v46 = vadd.f32 %v4775_v44, %v4727_v45  ;;  %v4885_v48 = vpop.f32.mrf.mxu1  ;;  %v4837_v30 = vadd.f32 %v4836_v47, %v8218_v59 }
 0x33d   : > { %v8430_v51 = vadd.f32 %v4824_v54, %v4776_v46  ;;  %v4886_v53 = vadd.f32 %v4885_v48, %v4837_v30 }
 0x342   : > { %v4934_v3 = vpop.f32.mrf.mxu2  ;;  %v4838_v12 = vpop.f32.mrf.mxu0 }
 0x343   : > { %v4983_v58 = vpop.f32.mrf.mxu3  ;;  %v4935_v50 = vadd.f32 %v4934_v3, %v4886_v53  ;;  %v4887_v19 = vpop.f32.mrf.mxu1  ;;  %v4839_v63 = vadd.f32 %v4838_v12, %v8245_v21 }
 0x345   : > { %v4984_v62 = vadd.f32 %v4983_v58, %v4935_v50  ;;  %v4888_v27 = vadd.f32 %v4887_v19, %v4839_v63 }
 0x347   : > { %5074 = vst [vmem:[%s8436_s26] sm:$0xff] %v4984_v62  ;;  %v5112_v7 = vmul.f32 %v4984_v62, %v4984_v62 }
 0x34a   : > { %v4936_v4 = vpop.f32.mrf.mxu2  ;;  %v4841_v55 = vpop.f32.mrf.mxu0 }
 0x34b   : > { %v4985_v28 = vpop.f32.mrf.mxu3  ;;  %v4937_v59 = vadd.f32 %v4936_v4, %v4888_v27  ;;  %v4890_v43 = vpop.f32.mrf.mxu1  ;;  %v4842_v9 = vadd.f32 %v4841_v55, %v8248_v33 }
 0x34d   : > { %v4986_v8 = vadd.f32 %v4985_v28, %v4937_v59  ;;  %v4891_v11 = vadd.f32 %v4890_v43, %v4842_v9 }
 0x34f   : > { %5075 = vst [vmem:[%s8436_s26 + $0x8] sm:$0xff] %v4986_v8  ;;  %v5090_v56 = vadd.f32 %v4986_v8, %v4984_v62  ;;  %v5113_v49 = vmul.f32 %v4986_v8, %v4986_v8 }
 0x351   : > { %v5128_v21 = vadd.f32 %v5113_v49, %v5112_v7 }
 0x352   : > { %v4939_v0 = vpop.f32.mrf.mxu2  ;;  %v4843_v16 = vpop.f32.mrf.mxu0 }
 0x353   : > { %v4988_v15 = vpop.f32.mrf.mxu3  ;;  %v4940_v13 = vadd.f32 %v4939_v0, %v4891_v11  ;;  %v4892_v32 = vpop.f32.mrf.mxu1  ;;  %v4844_v22 = vadd.f32 %v4843_v16, %v8275_v57 }
 0x355   : > { %v4989_v20 = vadd.f32 %v4988_v15, %v4940_v13  ;;  %v4893_v33 = vadd.f32 %v4892_v32, %v4844_v22 }
 0x357   : > { %5076 = vst [vmem:[%s8436_s26 + $0x10] sm:$0xff] %v4989_v20  ;;  %v5091_v23 = vadd.f32 %v5090_v56, %v4989_v20  ;;  %v5114_v24 = vmul.f32 %v4989_v20, %v4989_v20 }
 0x359   : > { %v5129_v39 = vadd.f32 %v5128_v21, %v5114_v24 }
 0x35a   : > { %v4941_v60 = vpop.f32.mrf.mxu2  ;;  %v4846_v34 = vpop.f32.mrf.mxu0 }
 0x35b   : > { %v4990_v29 = vpop.f32.mrf.mxu3  ;;  %v4942_v52 = vadd.f32 %v4941_v60, %v4893_v33  ;;  %v4895_v35 = vpop.f32.mrf.mxu1  ;;  %v4847_v36 = vadd.f32 %v4846_v34, %v8278_v2 }
 0x35d   : > { %v4991_v5 = vadd.f32 %v4990_v29, %v4942_v52  ;;  %v4896_v41 = vadd.f32 %v4895_v35, %v4847_v36 }
 0x35f   : > { %5077 = vst [vmem:[%s8436_s26 + $0x18] sm:$0xff] %v4991_v5  ;;  %v5092_v37 = vadd.f32 %v5091_v23, %v4991_v5  ;;  %v5115_v31 = vmul.f32 %v4991_v5, %v4991_v5 }
 0x361   : > { %v5130_v18 = vadd.f32 %v5129_v39, %v5115_v31 }
 0x362   : > { %v4944_v57 = vpop.f32.mrf.mxu2  ;;  %v4848_v44 = vpop.f32.mrf.mxu0 }
 0x363   : > { %v4993_v42 = vpop.f32.mrf.mxu3  ;;  %v4945_v45 = vadd.f32 %v4944_v57, %v4896_v41  ;;  %v4897_v54 = vpop.f32.mrf.mxu1  ;;  %v4849_v47 = vadd.f32 %v4848_v44, %v8305_v25 }
 0x365   : > { %v4994_v46 = vadd.f32 %v4993_v42, %v4945_v45  ;;  %v4898_v3 = vadd.f32 %v4897_v54, %v4849_v47 }
 0x367   : > { %5078 = vst [vmem:[%s8436_s26 + $0x20] sm:$0xff] %v4994_v46  ;;  %v5093_v48 = vadd.f32 %v5092_v37, %v4994_v46  ;;  %v5116_v30 = vmul.f32 %v4994_v46, %v4994_v46 }
 0x369   : > { %v5131_v53 = vadd.f32 %v5130_v18, %v5116_v30 }
 0x36a   : > { %v4946_v2 = vpop.f32.mrf.mxu2  ;;  %v4851_v12 = vpop.f32.mrf.mxu0 }
 0x36b   : > { %v4995_v58 = vpop.f32.mrf.mxu3  ;;  %v4947_v50 = vadd.f32 %v4946_v2, %v4898_v3  ;;  %v4900_v19 = vpop.f32.mrf.mxu1  ;;  %v4852_v63 = vadd.f32 %v4851_v12, %v8308_v17 }
 0x36d   : > { %v4996_v62 = vadd.f32 %v4995_v58, %v4947_v50  ;;  %v4901_v59 = vadd.f32 %v4900_v19, %v4852_v63 }
 0x36f   : > { %5079 = vst [vmem:[%s8436_s26 + $0x28] sm:$0xff] %v4996_v62  ;;  %v5094_v27 = vadd.f32 %v5093_v48, %v4996_v62  ;;  %v5117_v4 = vmul.f32 %v4996_v62, %v4996_v62 }
 0x371   : > { %v5132_v28 = vadd.f32 %v5131_v53, %v5117_v4 }
 0x372   : > { %v4949_v25 = vpop.f32.mrf.mxu2  ;;  %v4853_v8 = vpop.f32.mrf.mxu0 }
 0x373   : > { %v4998_v55 = vpop.f32.mrf.mxu3  ;;  %v4950_v43 = vadd.f32 %v4949_v25, %v4901_v59  ;;  %v4902_v9 = vpop.f32.mrf.mxu1  ;;  %v4854_v56 = vadd.f32 %v4853_v8, %v8335_v26 }
 0x375   : > { %v4999_v7 = vadd.f32 %v4998_v55, %v4950_v43  ;;  %v4903_v0 = vadd.f32 %v4902_v9, %v4854_v56 }
 0x377   : > { %5080 = vst [vmem:[%s8436_s26 + $0x30] sm:$0xff] %v4999_v7  ;;  %v5095_v49 = vadd.f32 %v5094_v27, %v4999_v7  ;;  %v5118_v21 = vmul.f32 %v4999_v7, %v4999_v7 }
 0x379   : > { %v5133_v11 = vadd.f32 %v5132_v28, %v5118_v21 }
 0x37a   : > { %v4951_v17 = vpop.f32.mrf.mxu2  ;;  %v4856_v16 = vpop.f32.mrf.mxu0 }
 0x37b   : > { %v5000_v15 = vpop.f32.mrf.mxu3  ;;  %v4952_v13 = vadd.f32 %v4951_v17, %v4903_v0  ;;  %v4905_v32 = vpop.f32.mrf.mxu1  ;;  %v4857_v22 = vadd.f32 %v4856_v16, %v8338_v6 }
 0x37d   : > { %v5001_v20 = vadd.f32 %v5000_v15, %v4952_v13  ;;  %v4906_v33 = vadd.f32 %v4905_v32, %v4857_v22 }
 0x37f   : > { %5081 = vst [vmem:[%s8436_s26 + $0x38] sm:$0xff] %v5001_v20  ;;  %v5096_v23 = vadd.f32 %v5095_v49, %v5001_v20  ;;  %v5119_v24 = vmul.f32 %v5001_v20, %v5001_v20 }
 0x381   : > { %v5134_v39 = vadd.f32 %v5133_v11, %v5119_v24 }
 0x382   : > { %v4954_v26 = vpop.f32.mrf.mxu2  ;;  %v4858_v52 = vpop.f32.mrf.mxu0 }
 0x383   : > { %v5003_v60 = vpop.f32.mrf.mxu3  ;;  %v4955_v29 = vadd.f32 %v4954_v26, %v4906_v33  ;;  %v4907_v34 = vpop.f32.mrf.mxu1  ;;  %v4859_v5 = vadd.f32 %v4858_v52, %v8365_v1 }
 0x385   : > { %v5004_v35 = vadd.f32 %v5003_v60, %v4955_v29  ;;  %v4908_v18 = vadd.f32 %v4907_v34, %v4859_v5 }
 0x387   : > { %5082 = vst [vmem:[%s8436_s26 + $0x40] sm:$0xff] %v5004_v35  ;;  %v5097_v36 = vadd.f32 %v5096_v23, %v5004_v35  ;;  %v5120_v37 = vmul.f32 %v5004_v35, %v5004_v35 }
 0x389   : > { %v5135_v31 = vadd.f32 %v5134_v39, %v5120_v37 }
 0x38a   : > { %v4956_v6 = vpop.f32.mrf.mxu2  ;;  %v4861_v42 = vpop.f32.mrf.mxu0 }
 0x38b   : > { %v5005_v41 = vpop.f32.mrf.mxu3  ;;  %v4957_v57 = vadd.f32 %v4956_v6, %v4908_v18  ;;  %v4910_v45 = vpop.f32.mrf.mxu1  ;;  %v4862_v54 = vadd.f32 %v4861_v42, %v8368_v38 }
 0x38d   : > { %v5006_v44 = vadd.f32 %v5005_v41, %v4957_v57  ;;  %v4911_v30 = vadd.f32 %v4910_v45, %v4862_v54 }
 0x38f   : > { %5083 = vst [vmem:[%s8436_s26 + $0x48] sm:$0xff] %v5006_v44  ;;  %v5098_v46 = vadd.f32 %v5097_v36, %v5006_v44  ;;  %v5121_v47 = vmul.f32 %v5006_v44, %v5006_v44 }
 0x391   : > { %v5136_v48 = vadd.f32 %v5135_v31, %v5121_v47 }
 0x392   : > { %v4959_v1 = vpop.f32.mrf.mxu2  ;;  %v4863_v2 = vpop.f32.mrf.mxu0 }
 0x393   : > { %v5008_v53 = vpop.f32.mrf.mxu3  ;;  %v4960_v3 = vadd.f32 %v4959_v1, %v4911_v30  ;;  %v4912_v58 = vpop.f32.mrf.mxu1  ;;  %v4864_v12 = vadd.f32 %v4863_v2, %v8395_v40 }
 0x395   : > { %v5009_v50 = vadd.f32 %v5008_v53, %v4960_v3  ;;  %v4913_v27 = vadd.f32 %v4912_v58, %v4864_v12 }
 0x397   : > { %5084 = vst [vmem:[%s8436_s26 + $0x50] sm:$0xff] %v5009_v50  ;;  %v5099_v19 = vadd.f32 %v5098_v46, %v5009_v50  ;;  %v5122_v62 = vmul.f32 %v5009_v50, %v5009_v50 }
 0x399   : > { %v5137_v63 = vadd.f32 %v5136_v48, %v5122_v62 }
 0x39a   : > { %v4961_v38 = vpop.f32.mrf.mxu2  ;;  %v4866_v59 = vpop.f32.mrf.mxu0 }
 0x39b   : > { %v5010_v4 = vpop.f32.mrf.mxu3  ;;  %v4962_v28 = vadd.f32 %v4961_v38, %v4913_v27  ;;  %v4915_v25 = vpop.f32.mrf.mxu1  ;;  %v4867_v43 = vadd.f32 %v4866_v59, %v8398_v10  ;;  %v5234_v27 = vld [vmem:[%s8436_s26] sm:$0xff] (%p6872_p6)  ;;  %v5236_v38 = vld [vmem:[%s8436_s26 + $0x8] sm:$0xff] (%p6872_p6) }
 0x39c   : > { %5235 = vst [vmem:[%s5175_s10] sm:$0xff] (%p6872_p6), %v5234_v27  ;;  %v5242_v59 = vld [vmem:[%s8436_s26 + $0x20] sm:$0xff] (%p6872_p6) }
 0x39d   : > { %v5011_v55 = vadd.f32 %v5010_v4, %v4962_v28  ;;  %v4916_v56 = vadd.f32 %v4915_v25, %v4867_v43  ;;  %v5238_v4 = vld [vmem:[%s8436_s26 + $0x10] sm:$0xff] (%p6872_p6)  ;;  %v5240_v28 = vld [vmem:[%s8436_s26 + $0x18] sm:$0xff] (%p6872_p6)  ;;  %5237 = vst [vmem:[%s5175_s10 + $0x10] sm:$0xff] (%p6872_p6), %v5236_v38  ;;  %v5244_v25 = vld [vmem:[%s8436_s26 + $0x28] sm:$0xff] (%p6872_p6) }
 0x39e   : > { %5239 = vst [vmem:[%s5175_s10 + $0x20] sm:$0xff] (%p6872_p6), %v5238_v4  ;;  %v5248_v43 = vld [vmem:[%s8436_s26 + $0x38] sm:$0xff] (%p6872_p6) }
 0x39f   : > { %5085 = vst [vmem:[%s8436_s26 + $0x58] sm:$0xff] %v5011_v55  ;;  %v5100_v8 = vadd.f32 %v5099_v19, %v5011_v55  ;;  %v5123_v9 = vmul.f32 %v5011_v55, %v5011_v55  ;;  %v5246_v55 = vld [vmem:[%s8436_s26 + $0x30] sm:$0xff] (%p6872_p6) }
 0x3a0   : > { %5241 = vst [vmem:[%s5175_s10 + $0x30] sm:$0xff] (%p6872_p6), %v5240_v28 }
 0x3a1   : > { %v5138_v7 = vadd.f32 %v5137_v63, %v5123_v9  ;;  %5243 = vst [vmem:[%s5175_s10 + $0x40] sm:$0xff] (%p6872_p6), %v5242_v59  ;;  %v5252_v9 = vld [vmem:[%s8436_s26 + $0x48] sm:$0xff] (%p6872_p6) }
 0x3a2   : > { %v4964_v40 = vpop.f32.mrf.mxu2  ;;  %v4868_v11 = vpop.f32.mrf.mxu0  ;;  %5245 = vst [vmem:[%s5175_s10 + $0x50] sm:$0xff] (%p6872_p6), %v5244_v25 }
 0x3a3   : > { %v5013_v49 = vpop.f32.mrf.mxu3  ;;  %v4965_v21 = vadd.f32 %v4964_v40, %v4916_v56  ;;  %v4917_v0 = vpop.f32.mrf.mxu1  ;;  %v4869_v15 = vadd.f32 %v4868_v11, %v8425_v14  ;;  %5247 = vst [vmem:[%s5175_s10 + $0x60] sm:$0xff] (%p6872_p6), %v5246_v55 }
 0x3a4   : > { %5249 = vst [vmem:[%s5175_s10 + $0x70] sm:$0xff] (%p6872_p6), %v5248_v43 }
 0x3a5   : > { %v5014_v17 = vadd.f32 %v5013_v49, %v4965_v21  ;;  %v4918_v20 = vadd.f32 %v4917_v0, %v4869_v15  ;;  %5253 = vst [vmem:[%s5175_s10 + $0x90] sm:$0xff] (%p6872_p6), %v5252_v9 }
 0x3a6   : > { %v5256_v56 = vld [vmem:[%s8436_s26 + $0x58] sm:$0xff] (%p6872_p6) }
 0x3a7   : > { %5086 = vst [vmem:[%s8436_s26 + $0x60] sm:$0xff] %v5014_v17  ;;  %v5101_v13 = vadd.f32 %v5100_v8, %v5014_v17  ;;  %v5124_v16 = vmul.f32 %v5014_v17, %v5014_v17  ;;  %v5250_v8 = vld [vmem:[%s8436_s26 + $0x40] sm:$0xff] (%p6872_p6) }
 0x3a8   : > { %5251 = vst [vmem:[%s5175_s10 + $0x80] sm:$0xff] (%p6872_p6), %v5250_v8 }
 0x3a9   : > { %v5139_v32 = vadd.f32 %v5138_v7, %v5124_v16  ;;  %v5254_v7 = vld [vmem:[%s8436_s26 + $0x50] sm:$0xff] (%p6872_p6)  ;;  %5257 = vst [vmem:[%s5175_s10 + $0xb0] sm:$0xff] (%p6872_p6), %v5256_v56 }
 0x3aa   : > { %v4966_v10 = vpop.f32.mrf.mxu2  ;;  %v4871_v24 = vpop.f32.mrf.mxu0  ;;  %5255 = vst [vmem:[%s5175_s10 + $0xa0] sm:$0xff] (%p6872_p6), %v5254_v7 }
 0x3ab   : > { %v5015_v22 = vpop.f32.mrf.mxu3  ;;  %v4967_v23 = vadd.f32 %v4966_v10, %v4918_v20  ;;  %v4872_v33 = vadd.f32 %v4871_v24, %v8428_v61  ;;  %v4920_v26 = vpop.f32.mrf.mxu1 }
 0x3ad   : > { %v5016_v39 = vadd.f32 %v5015_v22, %v4967_v23  ;;  %v4921_v34 = vadd.f32 %v4920_v26, %v4872_v33 }
 0x3ae   : > { %v5258_v40 = vld [vmem:[%s8436_s26 + $0x60] sm:$0xff] (%p6872_p6) }
 0x3af   : > { %5087 = vst [vmem:[%s8436_s26 + $0x68] sm:$0xff] %v5016_v39  ;;  %v5102_v60 = vadd.f32 %v5101_v13, %v5016_v39  ;;  %v5125_v29 = vmul.f32 %v5016_v39, %v5016_v39 }
 0x3b0   : > { %5259 = vst [vmem:[%s5175_s10 + $0xc0] sm:$0xff] (%p6872_p6), %v5258_v40 }
 0x3b1   : > { %v5140_v52 = vadd.f32 %v5139_v32, %v5125_v29 }
 0x3b2   : > { %v4969_v14 = vpop.f32.mrf.mxu2  ;;  %v4873_v36 = vpop.f32.mrf.mxu0 }
 0x3b3   : > { %v5018_v35 = vpop.f32.mrf.mxu3  ;;  %v4970_v5 = vadd.f32 %v4969_v14, %v4921_v34  ;;  %v4874_v31 = vadd.f32 %v4873_v36, %v8430_v51  ;;  %v4922_v41 = vpop.f32.mrf.mxu1 }
 0x3b5   : > { %v5019_v37 = vadd.f32 %v5018_v35, %v4970_v5  ;;  %v4923_v57 = vadd.f32 %v4922_v41, %v4874_v31 }
 0x3b6   : > { %v5260_v49 = vld [vmem:[%s8436_s26 + $0x68] sm:$0xff] (%p6872_p6) }
 0x3b7   : > { %5088 = vst [vmem:[%s8436_s26 + $0x70] sm:$0xff] %v5019_v37  ;;  %v5103_v18 = vadd.f32 %v5102_v60, %v5019_v37  ;;  %v5126_v6 = vmul.f32 %v5019_v37, %v5019_v37 }
 0x3b8   : > { %5261 = vst [vmem:[%s5175_s10 + $0xd0] sm:$0xff] (%p6872_p6), %v5260_v49 }
 0x3b9   : > { %v5141_v61 = vadd.f32 %v5140_v52, %v5126_v6 }
 0x3ba   : > { %v4971_v42 = vpop.f32.mrf.mxu2 }
 0x3bb   : > { %v4972_v45 = vadd.f32 %v4971_v42, %v4923_v57  ;;  %v5020_v44 = vpop.f32.mrf.mxu3 }
 0x3bd   : > { %v5021_v54 = vadd.f32 %v5020_v44, %v4972_v45 }
 0x3be   : > { %v5262_v21 = vld [vmem:[%s8436_s26 + $0x70] sm:$0xff] (%p6872_p6) }
 0x3bf   : > { %5089 = vst [vmem:[%s8436_s26 + $0x78] sm:$0xff] %v5021_v54  ;;  %v5104_v46 = vadd.f32 %v5103_v18, %v5021_v54  ;;  %v5127_v47 = vmul.f32 %v5021_v54, %v5021_v54 }
 0x3c0   : > { %5263 = vst [vmem:[%s5175_s10 + $0xe0] sm:$0xff] (%p6872_p6), %v5262_v21 }
 0x3c1   : > { %v5105_v48 = vrot.slane %v5104_v46, 4  ;;  %v5142_v30 = vadd.f32 %v5141_v61, %v5127_v47 }
 0x3c3   : > { %v5106_v1 = vadd.f32 %v5105_v48, %v5104_v46  ;;  %v5143_v51 = vrot.slane %v5142_v30, 4 }
 0x3c5   : > { %v5107_v53 = vrot.slane %v5106_v1, 2  ;;  %v5144_v3 = vadd.f32 %v5143_v51, %v5142_v30 }
 0x3c6   : > { %v5264_v11 = vld [vmem:[%s8436_s26 + $0x78] sm:$0xff] (%p6872_p6) }
 0x3c7   : > { %v5108_v2 = vadd.f32 %v5107_v53, %v5106_v1  ;;  %v5145_v58 = vrot.slane %v5144_v3, 2  ;;  %5265 = vst [vmem:[%s5175_s10 + $0xf0] sm:$0xff] (%p6872_p6), %v5264_v11 }
 0x3c9   : > { %v5109_v50 = vrot.slane %v5108_v2, 1  ;;  %v5146_v12 = vadd.f32 %v5145_v58, %v5144_v3 }
 0x3cb   : > { %v5110_v19 = vadd.f32 %v5109_v50, %v5108_v2  ;;  %v5147_v62 = vrot.slane %v5146_v12, 1  ;;  %5170 = sbr.rel (!%p6872_p6) target bundleno = 976 (0x3d0), region = 92 }
 0x3cd   : > { %5111 = vst [vmem:[%s2403_s9] sm:$0x1] %v5110_v19  ;;  %v5148_v63 = vadd.f32 %v5147_v62, %v5146_v12 }
 0x3cf   : > { %5149 = vst [vmem:[%s2410_s30] sm:$0x1] %v5148_v63 }
 0x3d0 PF: > { %s15_s19 = sadd.s32 1, %s6810_s19   ;;  %s8519_s15 = smov %s6798_s16 }
 0x3d1   : > { %p12_p12 = scmp.ge.s32.totalorder %s15_s19, 4   ;;  %s8520_s16 = smov %s6877_s25 }
 0x3d2   : > { %s8521_s17 = smov %s6806_s18  ;;  %s8522_s18 = smov %s8524_s20 }
 0x3d3   :  { %14 = sbr.rel (!%p12_p12) target bundleno = 3 (0x3), region = 192 }

// kernel: discriminator_forward.12
= control target key start
LH: loop header
LB: loop body
LE: loop exit
PB: predicated region body
PF: predicated region fallthrough
CT: control target
= control target key end

     0   :  { %s497_s0 = inlined_call_operand.vmem [shape: f32[128,256], index: 0, kind: input, shape index: {}]   ;;  %s498_s1 = inlined_call_operand.vmem [shape: f32[1,256], index: 1, kind: input, shape index: {}]   ;;  %s499_s2 = inlined_call_operand.vmem [shape: f32[1,256], index: 2, kind: input, shape index: {}]   ;;  %s500_s3 = inlined_call_operand.vmem [shape: bf16[128,256], index: 3, kind: output, shape index: {}]  }
   0x1   :  { %v14_v0 = vld [vmem:[%s497_s0] sm:$0xff]  ;;  %v15_v1 = vld [vmem:[%s497_s0 + $0x8] sm:$0xff]  ;;  %v16_v6 = vld [vmem:[%s497_s0 + $0x10] sm:$0xff] }
   0x2   :  { %v46_v2 = vld [vmem:[%s498_s1] sm:$0x3]  ;;  %v17_v7 = vld [vmem:[%s497_s0 + $0x18] sm:$0xff]  ;;  %v19_v11 = vld [vmem:[%s497_s0 + $0x28] sm:$0xff] }
   0x3   :  { %v283_v3 = vperm.slane %v46_v2, 0  ;;  %v285_v4 = vperm.slane %v46_v2, 1  ;;  %v84_v5 = vld [vmem:[%s499_s2] sm:$0x3]  ;;  %v20_v12 = vld [vmem:[%s497_s0 + $0x30] sm:$0xff]  ;;  %v21_v17 = vld [vmem:[%s497_s0 + $0x38] sm:$0xff] }
   0x4   :  { %v296_v8 = vperm.slane %v84_v5, 0  ;;  %v298_v9 = vperm.slane %v84_v5, 1  ;;  %v18_v10 = vld [vmem:[%s497_s0 + $0x20] sm:$0xff]  ;;  %v23_v41 = vld [vmem:[%s497_s0 + $0x48] sm:$0xff]  ;;  %v24_v42 = vld [vmem:[%s497_s0 + $0x50] sm:$0xff] }
   0x5   :  { %v52_v13 = vmul.f32 %v283_v3, %v14_v0  ;;  %v53_v14 = vmul.f32 %v285_v4, %v15_v1  ;;  %v54_v15 = vmul.f32 %v283_v3, %v16_v6  ;;  %v55_v16 = vmul.f32 %v285_v4, %v17_v7  ;;  %v22_v36 = vld [vmem:[%s497_s0 + $0x40] sm:$0xff]  ;;  %v25_v43 = vld [vmem:[%s497_s0 + $0x58] sm:$0xff]  ;;  %v27_v55 = vld [vmem:[%s497_s0 + $0x68] sm:$0xff] }
   0x6   :  { %v56_v18 = vmul.f32 %v283_v3, %v18_v10  ;;  %v57_v19 = vmul.f32 %v285_v4, %v19_v11  ;;  %v58_v20 = vmul.f32 %v283_v3, %v20_v12  ;;  %v59_v21 = vmul.f32 %v285_v4, %v21_v17  ;;  %v26_v54 = vld [vmem:[%s497_s0 + $0x60] sm:$0xff]  ;;  %v28_v5 = vld [vmem:[%s497_s0 + $0x70] sm:$0xff]  ;;  %v29_v6 = vld [vmem:[%s497_s0 + $0x78] sm:$0xff] }
   0x7   :  { %v90_v22 = vadd.f32 %v296_v8, %v52_v13  ;;  %v91_v23 = vadd.f32 %v298_v9, %v53_v14  ;;  %v92_v24 = vadd.f32 %v296_v8, %v54_v15  ;;  %v93_v25 = vadd.f32 %v298_v9, %v55_v16 }
   0x8   :  { %v94_v26 = vadd.f32 %v296_v8, %v56_v18  ;;  %v95_v27 = vadd.f32 %v298_v9, %v57_v19  ;;  %v96_v28 = vadd.f32 %v296_v8, %v58_v20  ;;  %v97_v29 = vadd.f32 %v298_v9, %v59_v21  ;;  %v30_v18 = vld [vmem:[%s497_s0 + $0x80] sm:$0xff]  ;;  %v31_v19 = vld [vmem:[%s497_s0 + $0x88] sm:$0xff] }
   0x9   :  { %vm122_vm0 = vcmp.ge.f32.partialorder %v90_v22, 0.0  ;;  %vm123_vm1 = vcmp.ge.f32.partialorder %v91_v23, 0.0  ;;  %v154_v30 = vmul.f32 0.2, %v90_v22  ;;  %v155_v31 = vmul.f32 0.2, %v91_v23 }
   0xa   :  { %vm124_vm2 = vcmp.ge.f32.partialorder %v92_v24, 0.0  ;;  %vm125_vm3 = vcmp.ge.f32.partialorder %v93_v25, 0.0  ;;  %v156_v32 = vmul.f32 0.2, %v92_v24  ;;  %v157_v33 = vmul.f32 0.2, %v93_v25 }
   0xb   :  { %v186_v34 = vsel %vm122_vm0, %v90_v22, %v154_v30  ;;  %v187_v35 = vsel %vm123_vm1, %v91_v23, %v155_v31  ;;  %vm126_vm4 = vcmp.ge.f32.partialorder %v94_v26, 0.0  ;;  %vm127_vm5 = vcmp.ge.f32.partialorder %v95_v27, 0.0  ;;  %v32_v23 = vld [vmem:[%s497_s0 + $0x90] sm:$0xff] }
   0xc   :  { %v218_v37 = vpack.c.bf16 %v187_v35, %v186_v34  ;;  %v188_v38 = vsel %vm124_vm2, %v92_v24, %v156_v32  ;;  %v189_v39 = vsel %vm125_vm3, %v93_v25, %v157_v33  ;;  %v158_v40 = vmul.f32 0.2, %v94_v26  ;;  %v33_v24 = vld [vmem:[%s497_s0 + $0x98] sm:$0xff] }
   0xd   :  { %v219_v44 = vpack.c.bf16 %v189_v39, %v188_v38  ;;  %v159_v45 = vmul.f32 0.2, %v95_v27  ;;  %vm128_vm6 = vcmp.ge.f32.partialorder %v96_v28, 0.0  ;;  %vm129_vm7 = vcmp.ge.f32.partialorder %v97_v29, 0.0 }
   0xe   :  { %234 = vst [vmem:[%s500_s3] sm:$0xff] %v218_v37  ;;  %v190_v46 = vsel %vm126_vm4, %v94_v26, %v158_v40  ;;  %v160_v47 = vmul.f32 0.2, %v96_v28  ;;  %v161_v48 = vmul.f32 0.2, %v97_v29  ;;  %v60_v49 = vmul.f32 %v283_v3, %v22_v36  ;;  %v34_v36 = vld [vmem:[%s497_s0 + $0xa0] sm:$0xff]  ;;  %v35_v37 = vld [vmem:[%s497_s0 + $0xa8] sm:$0xff] }
   0xf   :  { %235 = vst [vmem:[%s500_s3 + $0x8] sm:$0xff] %v219_v44  ;;  %v191_v50 = vsel %vm127_vm5, %v95_v27, %v159_v45  ;;  %v61_v51 = vmul.f32 %v285_v4, %v23_v41  ;;  %v62_v52 = vmul.f32 %v283_v3, %v24_v42  ;;  %v63_v53 = vmul.f32 %v285_v4, %v25_v43 }
  0x10   :  { %v220_v56 = vpack.c.bf16 %v191_v50, %v190_v46  ;;  %v192_v57 = vsel %vm128_vm6, %v96_v28, %v160_v47  ;;  %v193_v58 = vsel %vm129_vm7, %v97_v29, %v161_v48  ;;  %v98_v59 = vadd.f32 %v296_v8, %v60_v49  ;;  %v36_v50 = vld [vmem:[%s497_s0 + $0xb0] sm:$0xff] }
  0x11   :  { %v221_v60 = vpack.c.bf16 %v193_v58, %v192_v57  ;;  %v99_v61 = vadd.f32 %v298_v9, %v61_v51  ;;  %v100_v62 = vadd.f32 %v296_v8, %v62_v52  ;;  %v101_v63 = vadd.f32 %v298_v9, %v63_v53  ;;  %v37_v51 = vld [vmem:[%s497_s0 + $0xb8] sm:$0xff] }
  0x12   :  { %236 = vst [vmem:[%s500_s3 + $0x10] sm:$0xff] %v220_v56  ;;  %vm130_vm8 = vcmp.ge.f32.partialorder %v98_v59, 0.0  ;;  %v162_v0 = vmul.f32 0.2, %v98_v59  ;;  %v64_v1 = vmul.f32 %v283_v3, %v26_v54  ;;  %v65_v2 = vmul.f32 %v285_v4, %v27_v55 }
  0x13   :  { %237 = vst [vmem:[%s500_s3 + $0x18] sm:$0xff] %v221_v60  ;;  %vm131_vm9 = vcmp.ge.f32.partialorder %v99_v61, 0.0  ;;  %v163_v7 = vmul.f32 0.2, %v99_v61  ;;  %vm132_vm10 = vcmp.ge.f32.partialorder %v100_v62, 0.0  ;;  %vm133_vm11 = vcmp.ge.f32.partialorder %v101_v63, 0.0 }
  0x14   :  { %v194_v10 = vsel %vm130_vm8, %v98_v59, %v162_v0  ;;  %v164_v11 = vmul.f32 0.2, %v100_v62  ;;  %v165_v12 = vmul.f32 0.2, %v101_v63  ;;  %v102_v13 = vadd.f32 %v296_v8, %v64_v1 }
  0x15   :  { %v195_v14 = vsel %vm131_vm9, %v99_v61, %v163_v7  ;;  %v103_v15 = vadd.f32 %v298_v9, %v65_v2  ;;  %v66_v16 = vmul.f32 %v283_v3, %v28_v5  ;;  %v67_v17 = vmul.f32 %v285_v4, %v29_v6  ;;  %v40_v5 = vld [vmem:[%s497_s0 + $0xd0] sm:$0xff]  ;;  %v41_v6 = vld [vmem:[%s497_s0 + $0xd8] sm:$0xff] }
  0x16   :  { %v222_v20 = vpack.c.bf16 %v195_v14, %v194_v10  ;;  %v196_v21 = vsel %vm132_vm10, %v100_v62, %v164_v11  ;;  %v197_v22 = vsel %vm133_vm11, %v101_v63, %v165_v12  ;;  %vm134_vm12 = vcmp.ge.f32.partialorder %v102_v13, 0.0  ;;  %v38_v62 = vld [vmem:[%s497_s0 + $0xc0] sm:$0xff]  ;;  %v39_v63 = vld [vmem:[%s497_s0 + $0xc8] sm:$0xff] }
  0x17   :  { %v223_v25 = vpack.c.bf16 %v197_v22, %v196_v21  ;;  %vm135_vm13 = vcmp.ge.f32.partialorder %v103_v15, 0.0  ;;  %v166_v26 = vmul.f32 0.2, %v102_v13  ;;  %v167_v27 = vmul.f32 0.2, %v103_v15  ;;  %v43_v21 = vld [vmem:[%s497_s0 + $0xe8] sm:$0xff] }
  0x18   :  { %238 = vst [vmem:[%s500_s3 + $0x20] sm:$0xff] %v222_v20  ;;  %v104_v28 = vadd.f32 %v296_v8, %v66_v16  ;;  %v105_v29 = vadd.f32 %v298_v9, %v67_v17  ;;  %v68_v30 = vmul.f32 %v283_v3, %v30_v18  ;;  %v69_v31 = vmul.f32 %v285_v4, %v31_v19  ;;  %v42_v20 = vld [vmem:[%s497_s0 + $0xe0] sm:$0xff] }
  0x19   :  { %239 = vst [vmem:[%s500_s3 + $0x28] sm:$0xff] %v223_v25  ;;  %v198_v32 = vsel %vm134_vm12, %v102_v13, %v166_v26  ;;  %v199_v33 = vsel %vm135_vm13, %v103_v15, %v167_v27  ;;  %v70_v34 = vmul.f32 %v283_v3, %v32_v23  ;;  %v71_v35 = vmul.f32 %v285_v4, %v33_v24 }
  0x1a   :  { %v224_v38 = vpack.c.bf16 %v199_v33, %v198_v32  ;;  %vm136_vm14 = vcmp.ge.f32.partialorder %v104_v28, 0.0  ;;  %vm137_vm15 = vcmp.ge.f32.partialorder %v105_v29, 0.0  ;;  %v168_v39 = vmul.f32 0.2, %v104_v28 }
  0x1b   :  { %v169_v40 = vmul.f32 0.2, %v105_v29  ;;  %v106_v41 = vadd.f32 %v296_v8, %v68_v30  ;;  %v107_v42 = vadd.f32 %v298_v9, %v69_v31  ;;  %v108_v43 = vadd.f32 %v296_v8, %v70_v34  ;;  %v44_v34 = vld [vmem:[%s497_s0 + $0xf0] sm:$0xff] }
  0x1c   :  { %240 = vst [vmem:[%s500_s3 + $0x30] sm:$0xff] %v224_v38  ;;  %v200_v44 = vsel %vm136_vm14, %v104_v28, %v168_v39  ;;  %v109_v45 = vadd.f32 %v298_v9, %v71_v35  ;;  %v72_v46 = vmul.f32 %v283_v3, %v34_v36  ;;  %v73_v47 = vmul.f32 %v285_v4, %v35_v37  ;;  %v45_v35 = vld [vmem:[%s497_s0 + $0xf8] sm:$0xff] }
  0x1d   :  { %v201_v48 = vsel %vm137_vm15, %v105_v29, %v169_v40  ;;  %vm138_vm0 = vcmp.ge.f32.partialorder %v106_v41, 0.0  ;;  %vm139_vm1 = vcmp.ge.f32.partialorder %v107_v42, 0.0  ;;  %v170_v49 = vmul.f32 0.2, %v106_v41 }
  0x1e   :  { %v225_v52 = vpack.c.bf16 %v201_v48, %v200_v44  ;;  %v171_v53 = vmul.f32 0.2, %v107_v42  ;;  %vm140_vm2 = vcmp.ge.f32.partialorder %v108_v43, 0.0  ;;  %vm141_vm3 = vcmp.ge.f32.partialorder %v109_v45, 0.0 }
  0x1f   :  { %v202_v54 = vsel %vm138_vm0, %v106_v41, %v170_v49  ;;  %v172_v55 = vmul.f32 0.2, %v108_v43  ;;  %v173_v56 = vmul.f32 0.2, %v109_v45  ;;  %v110_v57 = vadd.f32 %v296_v8, %v72_v46 }
  0x20   :  { %241 = vst [vmem:[%s500_s3 + $0x38] sm:$0xff] %v225_v52  ;;  %v203_v58 = vsel %vm139_vm1, %v107_v42, %v171_v53  ;;  %v111_v59 = vadd.f32 %v298_v9, %v73_v47  ;;  %v74_v60 = vmul.f32 %v283_v3, %v36_v50  ;;  %v75_v61 = vmul.f32 %v285_v4, %v37_v51 }
  0x21   :  { %v226_v0 = vpack.c.bf16 %v203_v58, %v202_v54  ;;  %v204_v1 = vsel %vm140_vm2, %v108_v43, %v172_v55  ;;  %v205_v2 = vsel %vm141_vm3, %v109_v45, %v173_v56  ;;  %vm142_vm4 = vcmp.ge.f32.partialorder %v110_v57, 0.0 }
  0x22   :  { %v227_v7 = vpack.c.bf16 %v205_v2, %v204_v1  ;;  %vm143_vm5 = vcmp.ge.f32.partialorder %v111_v59, 0.0  ;;  %v174_v10 = vmul.f32 0.2, %v110_v57  ;;  %v175_v11 = vmul.f32 0.2, %v111_v59 }
  0x23   :  { %242 = vst [vmem:[%s500_s3 + $0x40] sm:$0xff] %v226_v0  ;;  %v112_v12 = vadd.f32 %v296_v8, %v74_v60  ;;  %v113_v13 = vadd.f32 %v298_v9, %v75_v61  ;;  %v76_v14 = vmul.f32 %v283_v3, %v38_v62  ;;  %v77_v15 = vmul.f32 %v285_v4, %v39_v63 }
  0x24   :  { %243 = vst [vmem:[%s500_s3 + $0x48] sm:$0xff] %v227_v7  ;;  %v206_v16 = vsel %vm142_vm4, %v110_v57, %v174_v10  ;;  %v207_v17 = vsel %vm143_vm5, %v111_v59, %v175_v11  ;;  %v78_v18 = vmul.f32 %v283_v3, %v40_v5  ;;  %v79_v19 = vmul.f32 %v285_v4, %v41_v6 }
  0x25   :  { %v228_v22 = vpack.c.bf16 %v207_v17, %v206_v16  ;;  %vm144_vm6 = vcmp.ge.f32.partialorder %v112_v12, 0.0  ;;  %vm145_vm7 = vcmp.ge.f32.partialorder %v113_v13, 0.0  ;;  %v176_v23 = vmul.f32 0.2, %v112_v12 }
  0x26   :  { %v177_v24 = vmul.f32 0.2, %v113_v13  ;;  %v114_v25 = vadd.f32 %v296_v8, %v76_v14  ;;  %v115_v26 = vadd.f32 %v298_v9, %v77_v15  ;;  %v116_v27 = vadd.f32 %v296_v8, %v78_v18 }
  0x27   :  { %244 = vst [vmem:[%s500_s3 + $0x50] sm:$0xff] %v228_v22  ;;  %v208_v28 = vsel %vm144_vm6, %v112_v12, %v176_v23  ;;  %v117_v29 = vadd.f32 %v298_v9, %v79_v19  ;;  %v80_v30 = vmul.f32 %v283_v3, %v42_v20  ;;  %v81_v31 = vmul.f32 %v285_v4, %v43_v21 }
  0x28   :  { %v209_v32 = vsel %vm145_vm7, %v113_v13, %v177_v24  ;;  %vm146_vm8 = vcmp.ge.f32.partialorder %v114_v25, 0.0  ;;  %vm147_vm9 = vcmp.ge.f32.partialorder %v115_v26, 0.0  ;;  %v178_v33 = vmul.f32 0.2, %v114_v25 }
  0x29   :  { %v229_v36 = vpack.c.bf16 %v209_v32, %v208_v28  ;;  %v179_v37 = vmul.f32 0.2, %v115_v26  ;;  %vm148_vm10 = vcmp.ge.f32.partialorder %v116_v27, 0.0  ;;  %vm149_vm11 = vcmp.ge.f32.partialorder %v117_v29, 0.0 }
  0x2a   :  { %v210_v38 = vsel %vm146_vm8, %v114_v25, %v178_v33  ;;  %v180_v39 = vmul.f32 0.2, %v116_v27  ;;  %v181_v40 = vmul.f32 0.2, %v117_v29  ;;  %v118_v41 = vadd.f32 %v296_v8, %v80_v30 }
  0x2b   :  { %245 = vst [vmem:[%s500_s3 + $0x58] sm:$0xff] %v229_v36  ;;  %v211_v42 = vsel %vm147_vm9, %v115_v26, %v179_v37  ;;  %v119_v43 = vadd.f32 %v298_v9, %v81_v31  ;;  %v82_v44 = vmul.f32 %v283_v3, %v44_v34  ;;  %v83_v45 = vmul.f32 %v285_v4, %v45_v35 }
  0x2c   :  { %v230_v46 = vpack.c.bf16 %v211_v42, %v210_v38  ;;  %v212_v47 = vsel %vm148_vm10, %v116_v27, %v180_v39  ;;  %v213_v48 = vsel %vm149_vm11, %v117_v29, %v181_v40  ;;  %vm150_vm12 = vcmp.ge.f32.partialorder %v118_v41, 0.0 }
  0x2d   :  { %v231_v49 = vpack.c.bf16 %v213_v48, %v212_v47  ;;  %vm151_vm13 = vcmp.ge.f32.partialorder %v119_v43, 0.0  ;;  %v182_v50 = vmul.f32 0.2, %v118_v41  ;;  %v183_v51 = vmul.f32 0.2, %v119_v43 }
  0x2e   :  { %246 = vst [vmem:[%s500_s3 + $0x60] sm:$0xff] %v230_v46  ;;  %v120_v52 = vadd.f32 %v296_v8, %v82_v44  ;;  %v121_v53 = vadd.f32 %v298_v9, %v83_v45 }
  0x2f   :  { %247 = vst [vmem:[%s500_s3 + $0x68] sm:$0xff] %v231_v49  ;;  %v214_v3 = vsel %vm150_vm12, %v118_v41, %v182_v50  ;;  %v215_v4 = vsel %vm151_vm13, %v119_v43, %v183_v51 }
  0x30   :  { %v232_v54 = vpack.c.bf16 %v215_v4, %v214_v3  ;;  %vm152_vm14 = vcmp.ge.f32.partialorder %v120_v52, 0.0  ;;  %vm153_vm15 = vcmp.ge.f32.partialorder %v121_v53, 0.0  ;;  %v184_v55 = vmul.f32 0.2, %v120_v52 }
  0x31   :  { %v185_v56 = vmul.f32 0.2, %v121_v53 }
  0x32   :  { %248 = vst [vmem:[%s500_s3 + $0x70] sm:$0xff] %v232_v54  ;;  %v216_v57 = vsel %vm152_vm14, %v120_v52, %v184_v55 }
  0x33   :  { %v217_v58 = vsel %vm153_vm15, %v121_v53, %v185_v56 }
  0x34   :  { %v233_v8 = vpack.c.bf16 %v217_v58, %v216_v57 }
  0x36   :  { %249 = vst [vmem:[%s500_s3 + $0x78] sm:$0xff] %v233_v8 }

// kernel: discriminator_forward.14
= control target key start
LH: loop header
LB: loop body
LE: loop exit
PB: predicated region body
PF: predicated region fallthrough
CT: control target
= control target key end

     0   :  { %s297_s0 = inlined_call_operand.vmem [shape: f32[32,512], index: 0, kind: input, shape index: {}]   ;;  %s298_s1 = inlined_call_operand.vmem [shape: f32[1,512], index: 1, kind: input, shape index: {}]   ;;  %s299_s2 = inlined_call_operand.vmem [shape: f32[1,512], index: 2, kind: input, shape index: {}]   ;;  %s300_s3 = inlined_call_operand.vmem [shape: bf16[32,512], index: 3, kind: output, shape index: {}]  }
   0x1   :  { %v14_v0 = vld [vmem:[%s297_s0] sm:$0xff]  ;;  %v15_v1 = vld [vmem:[%s297_s0 + $0x8] sm:$0xff]  ;;  %v16_v6 = vld [vmem:[%s297_s0 + $0x10] sm:$0xff] }
   0x2   :  { %v30_v2 = vld [vmem:[%s298_s1] sm:$0xf]  ;;  %v17_v7 = vld [vmem:[%s297_s0 + $0x18] sm:$0xff]  ;;  %v19_v13 = vld [vmem:[%s297_s0 + $0x28] sm:$0xff] }
   0x3   :  { %v179_v3 = vperm.slane %v30_v2, 0  ;;  %v181_v4 = vperm.slane %v30_v2, 1  ;;  %v56_v5 = vld [vmem:[%s299_s2] sm:$0xf]  ;;  %v196_v10 = vperm.slane %v30_v2, 2  ;;  %v198_v11 = vperm.slane %v30_v2, 3 }
   0x4   :  { %v192_v8 = vperm.slane %v56_v5, 0  ;;  %v194_v9 = vperm.slane %v56_v5, 1  ;;  %v18_v12 = vld [vmem:[%s297_s0 + $0x20] sm:$0xff]  ;;  %v208_v16 = vperm.slane %v56_v5, 2  ;;  %v210_v17 = vperm.slane %v56_v5, 3  ;;  %v20_v18 = vld [vmem:[%s297_s0 + $0x30] sm:$0xff] }
   0x5   :  { %v40_v14 = vmul.f32 %v179_v3, %v14_v0  ;;  %v41_v15 = vmul.f32 %v181_v4, %v15_v1  ;;  %v21_v19 = vld [vmem:[%s297_s0 + $0x38] sm:$0xff]  ;;  %v42_v20 = vmul.f32 %v196_v10, %v16_v6  ;;  %v43_v21 = vmul.f32 %v198_v11, %v17_v7  ;;  %v22_v38 = vld [vmem:[%s297_s0 + $0x40] sm:$0xff]  ;;  %v23_v39 = vld [vmem:[%s297_s0 + $0x48] sm:$0xff] }
   0x6   :  { %v44_v22 = vmul.f32 %v179_v3, %v18_v12  ;;  %v45_v23 = vmul.f32 %v181_v4, %v19_v13  ;;  %v46_v26 = vmul.f32 %v196_v10, %v20_v18  ;;  %v47_v27 = vmul.f32 %v198_v11, %v21_v19  ;;  %v24_v40 = vld [vmem:[%s297_s0 + $0x50] sm:$0xff]  ;;  %v25_v52 = vld [vmem:[%s297_s0 + $0x58] sm:$0xff]  ;;  %v26_v54 = vld [vmem:[%s297_s0 + $0x60] sm:$0xff] }
   0x7   :  { %v66_v24 = vadd.f32 %v192_v8, %v40_v14  ;;  %v67_v25 = vadd.f32 %v194_v9, %v41_v15  ;;  %v68_v28 = vadd.f32 %v208_v16, %v42_v20  ;;  %v69_v29 = vadd.f32 %v210_v17, %v43_v21  ;;  %v27_v0 = vld [vmem:[%s297_s0 + $0x68] sm:$0xff]  ;;  %v28_v6 = vld [vmem:[%s297_s0 + $0x70] sm:$0xff]  ;;  %v29_v19 = vld [vmem:[%s297_s0 + $0x78] sm:$0xff] }
   0x8   :  { %v70_v30 = vadd.f32 %v192_v8, %v44_v22  ;;  %v71_v31 = vadd.f32 %v194_v9, %v45_v23  ;;  %v72_v47 = vadd.f32 %v208_v16, %v46_v26  ;;  %v73_v48 = vadd.f32 %v210_v17, %v47_v27 }
   0x9   :  { %vm82_vm0 = vcmp.ge.f32.partialorder %v66_v24, 0.0  ;;  %vm83_vm1 = vcmp.ge.f32.partialorder %v67_v25, 0.0  ;;  %v98_v32 = vmul.f32 0.2, %v66_v24  ;;  %v99_v33 = vmul.f32 0.2, %v67_v25 }
   0xa   :  { %vm84_vm2 = vcmp.ge.f32.partialorder %v68_v28, 0.0  ;;  %vm85_vm3 = vcmp.ge.f32.partialorder %v69_v29, 0.0  ;;  %v100_v34 = vmul.f32 0.2, %v68_v28  ;;  %v101_v35 = vmul.f32 0.2, %v69_v29 }
   0xb   :  { %v114_v36 = vsel %vm82_vm0, %v66_v24, %v98_v32  ;;  %v115_v37 = vsel %vm83_vm1, %v67_v25, %v99_v33  ;;  %vm86_vm4 = vcmp.ge.f32.partialorder %v70_v30, 0.0  ;;  %vm87_vm5 = vcmp.ge.f32.partialorder %v71_v31, 0.0 }
   0xc   :  { %v130_v41 = vpack.c.bf16 %v115_v37, %v114_v36  ;;  %v116_v42 = vsel %vm84_vm2, %v68_v28, %v100_v34  ;;  %v117_v43 = vsel %vm85_vm3, %v69_v29, %v101_v35  ;;  %v102_v44 = vmul.f32 0.2, %v70_v30 }
   0xd   :  { %v131_v45 = vpack.c.bf16 %v117_v43, %v116_v42  ;;  %v103_v46 = vmul.f32 0.2, %v71_v31  ;;  %v48_v50 = vmul.f32 %v179_v3, %v22_v38  ;;  %v49_v51 = vmul.f32 %v181_v4, %v23_v39 }
   0xe   :  { %138 = vst [vmem:[%s300_s3] sm:$0xff] %v130_v41  ;;  %v118_v49 = vsel %vm86_vm4, %v70_v30, %v102_v44  ;;  %v50_v53 = vmul.f32 %v196_v10, %v24_v40  ;;  %vm88_vm6 = vcmp.ge.f32.partialorder %v72_v47, 0.0  ;;  %vm89_vm7 = vcmp.ge.f32.partialorder %v73_v48, 0.0 }
   0xf   :  { %139 = vst [vmem:[%s300_s3 + $0x8] sm:$0xff] %v131_v45  ;;  %v119_v55 = vsel %vm87_vm5, %v71_v31, %v103_v46  ;;  %v104_v56 = vmul.f32 0.2, %v72_v47  ;;  %v105_v58 = vmul.f32 0.2, %v73_v48  ;;  %v74_v59 = vadd.f32 %v192_v8, %v48_v50 }
  0x10   :  { %v132_v57 = vpack.c.bf16 %v119_v55, %v118_v49  ;;  %v75_v60 = vadd.f32 %v194_v9, %v49_v51  ;;  %v51_v62 = vmul.f32 %v198_v11, %v25_v52  ;;  %v76_v63 = vadd.f32 %v208_v16, %v50_v53 }
  0x11   :  { %v120_v61 = vsel %vm88_vm6, %v72_v47, %v104_v56  ;;  %v52_v1 = vmul.f32 %v179_v3, %v26_v54  ;;  %v121_v2 = vsel %vm89_vm7, %v73_v48, %v105_v58  ;;  %vm90_vm8 = vcmp.ge.f32.partialorder %v74_v59, 0.0 }
  0x12   :  { %140 = vst [vmem:[%s300_s3 + $0x10] sm:$0xff] %v132_v57  ;;  %vm91_vm9 = vcmp.ge.f32.partialorder %v75_v60, 0.0  ;;  %v106_v5 = vmul.f32 0.2, %v74_v59  ;;  %v133_v7 = vpack.c.bf16 %v121_v2, %v120_v61  ;;  %v107_v12 = vmul.f32 0.2, %v75_v60 }
  0x13   :  { %v77_v13 = vadd.f32 %v210_v17, %v51_v62  ;;  %vm92_vm10 = vcmp.ge.f32.partialorder %v76_v63, 0.0  ;;  %v108_v15 = vmul.f32 0.2, %v76_v63  ;;  %v53_v3 = vmul.f32 %v181_v4, %v27_v0 }
  0x14   :  { %v122_v14 = vsel %vm90_vm8, %v74_v59, %v106_v5  ;;  %v78_v18 = vadd.f32 %v192_v8, %v52_v1  ;;  %141 = vst [vmem:[%s300_s3 + $0x18] sm:$0xff] %v133_v7  ;;  %v123_v20 = vsel %vm91_vm9, %v75_v60, %v107_v12  ;;  %v54_v22 = vmul.f32 %v196_v10, %v28_v6 }
  0x15   :  { %vm93_vm11 = vcmp.ge.f32.partialorder %v77_v13, 0.0  ;;  %v109_v21 = vmul.f32 0.2, %v77_v13  ;;  %v134_v23 = vpack.c.bf16 %v123_v20, %v122_v14  ;;  %v124_v24 = vsel %vm92_vm10, %v76_v63, %v108_v15 }
  0x16   :  { %v79_v25 = vadd.f32 %v194_v9, %v53_v3  ;;  %vm94_vm12 = vcmp.ge.f32.partialorder %v78_v18, 0.0  ;;  %v110_v8 = vmul.f32 0.2, %v78_v18  ;;  %v55_v26 = vmul.f32 %v198_v11, %v29_v19 }
  0x17   :  { %v125_v4 = vsel %vm93_vm11, %v77_v13, %v109_v21  ;;  %v80_v27 = vadd.f32 %v208_v16, %v54_v22  ;;  %142 = vst [vmem:[%s300_s3 + $0x20] sm:$0xff] %v134_v23 }
  0x18   :  { %v135_v28 = vpack.c.bf16 %v125_v4, %v124_v24  ;;  %vm95_vm13 = vcmp.ge.f32.partialorder %v79_v25, 0.0  ;;  %v111_v29 = vmul.f32 0.2, %v79_v25  ;;  %v126_v30 = vsel %vm94_vm12, %v78_v18, %v110_v8 }
  0x19   :  { %v81_v10 = vadd.f32 %v210_v17, %v55_v26  ;;  %vm96_vm14 = vcmp.ge.f32.partialorder %v80_v27, 0.0  ;;  %v112_v31 = vmul.f32 0.2, %v80_v27 }
  0x1a   :  { %143 = vst [vmem:[%s300_s3 + $0x28] sm:$0xff] %v135_v28  ;;  %v127_v9 = vsel %vm95_vm13, %v79_v25, %v111_v29 }
  0x1b   :  { %v136_v11 = vpack.c.bf16 %v127_v9, %v126_v30  ;;  %vm97_vm15 = vcmp.ge.f32.partialorder %v81_v10, 0.0  ;;  %v113_v16 = vmul.f32 0.2, %v81_v10  ;;  %v128_v32 = vsel %vm96_vm14, %v80_v27, %v112_v31 }
  0x1d   :  { %144 = vst [vmem:[%s300_s3 + $0x30] sm:$0xff] %v136_v11  ;;  %v129_v33 = vsel %vm97_vm15, %v81_v10, %v113_v16 }
  0x1e   :  { %v137_v34 = vpack.c.bf16 %v129_v33, %v128_v32 }
  0x20   :  { %145 = vst [vmem:[%s300_s3 + $0x38] sm:$0xff] %v137_v34 }

// kernel: discriminator_forward.13
= control target key start
LH: loop header
LB: loop body
LE: loop exit
PB: predicated region body
PF: predicated region fallthrough
CT: control target
= control target key end

     0   :  { %s9513_s15 = smov 0   ;;  %s9515_s16 = smov 0   ;;  %s11304_s0 = inlined_call_operand.vmem [shape: bf16[32,4096], index: 0, kind: input, shape index: {}]   ;;  %s11305_s1 = inlined_call_operand.vmem [shape: bf16[4096,512], index: 1, kind: input, shape index: {}]   ;;  %s11306_s2 = inlined_call_operand.vmem [shape: f32[32,512], index: 2, kind: output, shape index: {0}]   ;;  %s11307_s3 = inlined_call_operand.vmem [shape: f32[1,1,512], index: 3, kind: output, shape index: {1}]   ;;  %s11308_s4 = inlined_call_operand.vmem [shape: f32[1,1,512], index: 4, kind: output, shape index: {2}]  }
   0x1   :  { %s9517_s17 = smov 0   ;;  %s9519_s18 = smov 0  }
   0x2   :  { %s9521_s19 = smov 0  }
   0x3 LB: > { %s30_s20 = sadd.s32 1, %s9482_s18  ;;  %s7794_s21 = sadd.s32 4294967295, %s9486_s19   ;;  %s9486_s19 = sphi %s9521_s19, %s15_s19   ;;  %s9482_s18 = sphi %s9519_s18, %s11313_s18   ;;  %s9478_s17 = sphi %s9517_s17, %s11312_s17   ;;  %s9474_s16 = sphi %s9515_s16, %s11311_s16   ;;  %s9470_s15 = sphi %s9513_s15, %s11310_s15  }
   0x4   : > { %p32_p0 = scmp.ge.s32.totalorder %s30_s20, 4  ;;  %p78_p1 = scmp.ne.s32.totalorder %s9474_s16, %s9470_s15 }
   0x5   : > { %p79_p2 = scmp.eq.s32.totalorder %s9486_s19, 0  ;;  %p110_p4 = scmp.eq.s32.totalorder %s7794_s21, 3 }
   0x6   : > { %s11315_s20 = smov (%p32_p0, %s30_s20), 0  ;;  %s71_s23 = sadd.s32 1, %s9474_s16 }
   0x7   : > { %p80_p3 = por %p79_p2, %p78_p1  ;;  %s67_s22 = ssub.s32 %s9482_s18, %s11315_s20 }
   0x8   : > { %p69_p5 = scmp.eq.s32.totalorder %s67_s22, 0  ;;  %p9548_p6 = por %p110_p4, %p78_p1 }
   0x9   : > { %p7798_p7 = scmp.ge.s32.totalorder %s9486_s19, 4 }
   0xa   : > { %s9553_s25 = scalar_select %p69_p5, %s9474_s16, %s71_s23  }
   0xb   : > { %203 = sbr.rel (%p7798_p7) target bundleno = 532 (0x214), region = 20 }
  0x10   : > { %206 = sbr.rel (!%p80_p3) target bundleno = 532 (0x214), region = 24  ;;  %s208_s26 = sand.u32 (%p80_p3), 1, %s9474_s16  }
  0x11   : > { %s7800_s27 = sshll.u32 (%p80_p3), %s9482_s18, 2  ;;  %s7799_s28 = sshll.u32 (%p80_p3), %s208_s26, 11 }
  0x12   : > { %s9561_s5 = scalar_lea.vmem (%p80_p3), %s11305_s1, %s7800_s27  ;;  %s9565_s6 = scalar_lea.vmem (%p80_p3), [#allocation3], %s7799_s28 }
  0x13   : > { %v232_v0 = vld [vmem:[%s9561_s5] sm:$0xf] (%p80_p3)  ;;  %v234_v1 = vld [vmem:[%s9561_s5 + $0x10] sm:$0xf] (%p80_p3) }
  0x14   : > { %233 = vst [vmem:[%s9565_s6] sm:$0xf] (%p80_p3), %v232_v0  ;;  %v236_v2 = vld [vmem:[%s9561_s5 + $0x20] sm:$0xf] (%p80_p3)  ;;  %v238_v3 = vld [vmem:[%s9561_s5 + $0x30] sm:$0xf] (%p80_p3) }
  0x15   : > { %235 = vst [vmem:[%s9565_s6 + $0x4] sm:$0xf] %v234_v1  ;;  %v240_v4 = vld [vmem:[%s9561_s5 + $0x40] sm:$0xf]  ;;  %v242_v5 = vld [vmem:[%s9561_s5 + $0x50] sm:$0xf] }
  0x16   : > { %237 = vst [vmem:[%s9565_s6 + $0x8] sm:$0xf] %v236_v2  ;;  %v244_v6 = vld [vmem:[%s9561_s5 + $0x60] sm:$0xf]  ;;  %v246_v7 = vld [vmem:[%s9561_s5 + $0x70] sm:$0xf] }
  0x17   : > { %239 = vst [vmem:[%s9565_s6 + $0xc] sm:$0xf] %v238_v3  ;;  %v248_v8 = vld [vmem:[%s9561_s5 + $0x80] sm:$0xf]  ;;  %v250_v9 = vld [vmem:[%s9561_s5 + $0x90] sm:$0xf] }
  0x18   : > { %241 = vst [vmem:[%s9565_s6 + $0x10] sm:$0xf] %v240_v4  ;;  %v252_v10 = vld [vmem:[%s9561_s5 + $0xa0] sm:$0xf]  ;;  %v254_v11 = vld [vmem:[%s9561_s5 + $0xb0] sm:$0xf] }
  0x19   : > { %243 = vst [vmem:[%s9565_s6 + $0x14] sm:$0xf] %v242_v5  ;;  %v256_v12 = vld [vmem:[%s9561_s5 + $0xc0] sm:$0xf]  ;;  %v258_v13 = vld [vmem:[%s9561_s5 + $0xd0] sm:$0xf] }
  0x1a   : > { %245 = vst [vmem:[%s9565_s6 + $0x18] sm:$0xf] %v244_v6  ;;  %v260_v14 = vld [vmem:[%s9561_s5 + $0xe0] sm:$0xf]  ;;  %v262_v15 = vld [vmem:[%s9561_s5 + $0xf0] sm:$0xf] }
  0x1b   : > { %247 = vst [vmem:[%s9565_s6 + $0x1c] sm:$0xf] %v246_v7  ;;  %v264_v16 = vld [vmem:[%s9561_s5 + $0x100] sm:$0xf]  ;;  %v266_v17 = vld [vmem:[%s9561_s5 + $0x110] sm:$0xf] }
  0x1c   : > { %249 = vst [vmem:[%s9565_s6 + $0x20] sm:$0xf] %v248_v8  ;;  %v268_v18 = vld [vmem:[%s9561_s5 + $0x120] sm:$0xf]  ;;  %v270_v19 = vld [vmem:[%s9561_s5 + $0x130] sm:$0xf] }
  0x1d   : > { %251 = vst [vmem:[%s9565_s6 + $0x24] sm:$0xf] %v250_v9  ;;  %v272_v20 = vld [vmem:[%s9561_s5 + $0x140] sm:$0xf]  ;;  %v274_v21 = vld [vmem:[%s9561_s5 + $0x150] sm:$0xf] }
  0x1e   : > { %253 = vst [vmem:[%s9565_s6 + $0x28] sm:$0xf] %v252_v10  ;;  %v276_v22 = vld [vmem:[%s9561_s5 + $0x160] sm:$0xf]  ;;  %v278_v23 = vld [vmem:[%s9561_s5 + $0x170] sm:$0xf] }
  0x1f   : > { %255 = vst [vmem:[%s9565_s6 + $0x2c] sm:$0xf] %v254_v11  ;;  %v280_v24 = vld [vmem:[%s9561_s5 + $0x180] sm:$0xf]  ;;  %v282_v25 = vld [vmem:[%s9561_s5 + $0x190] sm:$0xf] }
  0x20   : > { %257 = vst [vmem:[%s9565_s6 + $0x30] sm:$0xf] %v256_v12  ;;  %v284_v26 = vld [vmem:[%s9561_s5 + $0x1a0] sm:$0xf]  ;;  %v286_v27 = vld [vmem:[%s9561_s5 + $0x1b0] sm:$0xf] }
  0x21   : > { %259 = vst [vmem:[%s9565_s6 + $0x34] sm:$0xf] %v258_v13  ;;  %v288_v28 = vld [vmem:[%s9561_s5 + $0x1c0] sm:$0xf]  ;;  %v290_v29 = vld [vmem:[%s9561_s5 + $0x1d0] sm:$0xf] }
  0x22   : > { %261 = vst [vmem:[%s9565_s6 + $0x38] sm:$0xf] %v260_v14  ;;  %v292_v30 = vld [vmem:[%s9561_s5 + $0x1e0] sm:$0xf]  ;;  %v294_v31 = vld [vmem:[%s9561_s5 + $0x1f0] sm:$0xf] }
  0x23   : > { %263 = vst [vmem:[%s9565_s6 + $0x3c] sm:$0xf] %v262_v15  ;;  %v296_v32 = vld [vmem:[%s9561_s5 + $0x200] sm:$0xf]  ;;  %v298_v33 = vld [vmem:[%s9561_s5 + $0x210] sm:$0xf] }
  0x24   : > { %265 = vst [vmem:[%s9565_s6 + $0x40] sm:$0xf] %v264_v16  ;;  %v300_v34 = vld [vmem:[%s9561_s5 + $0x220] sm:$0xf]  ;;  %v302_v35 = vld [vmem:[%s9561_s5 + $0x230] sm:$0xf] }
  0x25   : > { %267 = vst [vmem:[%s9565_s6 + $0x44] sm:$0xf] %v266_v17  ;;  %v304_v36 = vld [vmem:[%s9561_s5 + $0x240] sm:$0xf]  ;;  %v306_v37 = vld [vmem:[%s9561_s5 + $0x250] sm:$0xf] }
  0x26   : > { %269 = vst [vmem:[%s9565_s6 + $0x48] sm:$0xf] %v268_v18  ;;  %v308_v38 = vld [vmem:[%s9561_s5 + $0x260] sm:$0xf]  ;;  %v310_v39 = vld [vmem:[%s9561_s5 + $0x270] sm:$0xf] }
  0x27   : > { %271 = vst [vmem:[%s9565_s6 + $0x4c] sm:$0xf] %v270_v19  ;;  %v312_v40 = vld [vmem:[%s9561_s5 + $0x280] sm:$0xf]  ;;  %v314_v41 = vld [vmem:[%s9561_s5 + $0x290] sm:$0xf] }
  0x28   : > { %273 = vst [vmem:[%s9565_s6 + $0x50] sm:$0xf] %v272_v20  ;;  %v316_v42 = vld [vmem:[%s9561_s5 + $0x2a0] sm:$0xf]  ;;  %v318_v43 = vld [vmem:[%s9561_s5 + $0x2b0] sm:$0xf] }
  0x29   : > { %275 = vst [vmem:[%s9565_s6 + $0x54] sm:$0xf] %v274_v21  ;;  %v320_v44 = vld [vmem:[%s9561_s5 + $0x2c0] sm:$0xf]  ;;  %v322_v45 = vld [vmem:[%s9561_s5 + $0x2d0] sm:$0xf] }
  0x2a   : > { %277 = vst [vmem:[%s9565_s6 + $0x58] sm:$0xf] %v276_v22  ;;  %v324_v46 = vld [vmem:[%s9561_s5 + $0x2e0] sm:$0xf]  ;;  %v326_v47 = vld [vmem:[%s9561_s5 + $0x2f0] sm:$0xf] }
  0x2b   : > { %279 = vst [vmem:[%s9565_s6 + $0x5c] sm:$0xf] %v278_v23  ;;  %v328_v48 = vld [vmem:[%s9561_s5 + $0x300] sm:$0xf]  ;;  %v330_v49 = vld [vmem:[%s9561_s5 + $0x310] sm:$0xf] }
  0x2c   : > { %281 = vst [vmem:[%s9565_s6 + $0x60] sm:$0xf] %v280_v24  ;;  %v332_v50 = vld [vmem:[%s9561_s5 + $0x320] sm:$0xf]  ;;  %v334_v51 = vld [vmem:[%s9561_s5 + $0x330] sm:$0xf] }
  0x2d   : > { %283 = vst [vmem:[%s9565_s6 + $0x64] sm:$0xf] %v282_v25  ;;  %v336_v52 = vld [vmem:[%s9561_s5 + $0x340] sm:$0xf]  ;;  %v338_v53 = vld [vmem:[%s9561_s5 + $0x350] sm:$0xf] }
  0x2e   : > { %285 = vst [vmem:[%s9565_s6 + $0x68] sm:$0xf] %v284_v26  ;;  %v340_v54 = vld [vmem:[%s9561_s5 + $0x360] sm:$0xf]  ;;  %v342_v55 = vld [vmem:[%s9561_s5 + $0x370] sm:$0xf] }
  0x2f   : > { %287 = vst [vmem:[%s9565_s6 + $0x6c] sm:$0xf] %v286_v27  ;;  %v344_v56 = vld [vmem:[%s9561_s5 + $0x380] sm:$0xf]  ;;  %v346_v57 = vld [vmem:[%s9561_s5 + $0x390] sm:$0xf] }
  0x30   : > { %289 = vst [vmem:[%s9565_s6 + $0x70] sm:$0xf] %v288_v28  ;;  %v348_v58 = vld [vmem:[%s9561_s5 + $0x3a0] sm:$0xf]  ;;  %v350_v59 = vld [vmem:[%s9561_s5 + $0x3b0] sm:$0xf] }
  0x31   : > { %291 = vst [vmem:[%s9565_s6 + $0x74] sm:$0xf] %v290_v29  ;;  %v352_v60 = vld [vmem:[%s9561_s5 + $0x3c0] sm:$0xf]  ;;  %v354_v61 = vld [vmem:[%s9561_s5 + $0x3d0] sm:$0xf] }
  0x32   : > { %293 = vst [vmem:[%s9565_s6 + $0x78] sm:$0xf] %v292_v30  ;;  %v356_v62 = vld [vmem:[%s9561_s5 + $0x3e0] sm:$0xf]  ;;  %v358_v63 = vld [vmem:[%s9561_s5 + $0x3f0] sm:$0xf] }
  0x33   : > { %295 = vst [vmem:[%s9565_s6 + $0x7c] sm:$0xf] %v294_v31  ;;  %v360_v0 = vld [vmem:[%s9561_s5 + $0x400] sm:$0xf]  ;;  %v362_v1 = vld [vmem:[%s9561_s5 + $0x410] sm:$0xf] }
  0x34   : > { %297 = vst [vmem:[%s9565_s6 + $0x80] sm:$0xf] %v296_v32  ;;  %v364_v2 = vld [vmem:[%s9561_s5 + $0x420] sm:$0xf]  ;;  %v366_v3 = vld [vmem:[%s9561_s5 + $0x430] sm:$0xf] }
  0x35   : > { %299 = vst [vmem:[%s9565_s6 + $0x84] sm:$0xf] %v298_v33  ;;  %v368_v4 = vld [vmem:[%s9561_s5 + $0x440] sm:$0xf]  ;;  %v370_v5 = vld [vmem:[%s9561_s5 + $0x450] sm:$0xf] }
  0x36   : > { %301 = vst [vmem:[%s9565_s6 + $0x88] sm:$0xf] %v300_v34  ;;  %v372_v6 = vld [vmem:[%s9561_s5 + $0x460] sm:$0xf]  ;;  %v374_v7 = vld [vmem:[%s9561_s5 + $0x470] sm:$0xf] }
  0x37   : > { %303 = vst [vmem:[%s9565_s6 + $0x8c] sm:$0xf] %v302_v35  ;;  %v376_v8 = vld [vmem:[%s9561_s5 + $0x480] sm:$0xf]  ;;  %v378_v9 = vld [vmem:[%s9561_s5 + $0x490] sm:$0xf] }
  0x38   : > { %305 = vst [vmem:[%s9565_s6 + $0x90] sm:$0xf] %v304_v36  ;;  %v380_v10 = vld [vmem:[%s9561_s5 + $0x4a0] sm:$0xf]  ;;  %v382_v11 = vld [vmem:[%s9561_s5 + $0x4b0] sm:$0xf] }
  0x39   : > { %307 = vst [vmem:[%s9565_s6 + $0x94] sm:$0xf] %v306_v37  ;;  %v384_v12 = vld [vmem:[%s9561_s5 + $0x4c0] sm:$0xf]  ;;  %v386_v13 = vld [vmem:[%s9561_s5 + $0x4d0] sm:$0xf] }
  0x3a   : > { %309 = vst [vmem:[%s9565_s6 + $0x98] sm:$0xf] %v308_v38  ;;  %v388_v14 = vld [vmem:[%s9561_s5 + $0x4e0] sm:$0xf]  ;;  %v390_v15 = vld [vmem:[%s9561_s5 + $0x4f0] sm:$0xf] }
  0x3b   : > { %311 = vst [vmem:[%s9565_s6 + $0x9c] sm:$0xf] %v310_v39  ;;  %v392_v16 = vld [vmem:[%s9561_s5 + $0x500] sm:$0xf]  ;;  %v394_v17 = vld [vmem:[%s9561_s5 + $0x510] sm:$0xf] }
  0x3c   : > { %313 = vst [vmem:[%s9565_s6 + $0xa0] sm:$0xf] %v312_v40  ;;  %v396_v18 = vld [vmem:[%s9561_s5 + $0x520] sm:$0xf]  ;;  %v398_v19 = vld [vmem:[%s9561_s5 + $0x530] sm:$0xf] }
  0x3d   : > { %315 = vst [vmem:[%s9565_s6 + $0xa4] sm:$0xf] %v314_v41  ;;  %v400_v20 = vld [vmem:[%s9561_s5 + $0x540] sm:$0xf]  ;;  %v402_v21 = vld [vmem:[%s9561_s5 + $0x550] sm:$0xf] }
  0x3e   : > { %317 = vst [vmem:[%s9565_s6 + $0xa8] sm:$0xf] %v316_v42  ;;  %v404_v22 = vld [vmem:[%s9561_s5 + $0x560] sm:$0xf]  ;;  %v406_v23 = vld [vmem:[%s9561_s5 + $0x570] sm:$0xf] }
  0x3f   : > { %319 = vst [vmem:[%s9565_s6 + $0xac] sm:$0xf] %v318_v43  ;;  %v408_v24 = vld [vmem:[%s9561_s5 + $0x580] sm:$0xf]  ;;  %v410_v25 = vld [vmem:[%s9561_s5 + $0x590] sm:$0xf] }
  0x40   : > { %321 = vst [vmem:[%s9565_s6 + $0xb0] sm:$0xf] %v320_v44  ;;  %v412_v26 = vld [vmem:[%s9561_s5 + $0x5a0] sm:$0xf]  ;;  %v414_v27 = vld [vmem:[%s9561_s5 + $0x5b0] sm:$0xf] }
  0x41   : > { %323 = vst [vmem:[%s9565_s6 + $0xb4] sm:$0xf] %v322_v45  ;;  %v416_v28 = vld [vmem:[%s9561_s5 + $0x5c0] sm:$0xf]  ;;  %v418_v29 = vld [vmem:[%s9561_s5 + $0x5d0] sm:$0xf] }
  0x42   : > { %325 = vst [vmem:[%s9565_s6 + $0xb8] sm:$0xf] %v324_v46  ;;  %v420_v30 = vld [vmem:[%s9561_s5 + $0x5e0] sm:$0xf]  ;;  %v422_v31 = vld [vmem:[%s9561_s5 + $0x5f0] sm:$0xf] }
  0x43   : > { %327 = vst [vmem:[%s9565_s6 + $0xbc] sm:$0xf] %v326_v47  ;;  %v424_v32 = vld [vmem:[%s9561_s5 + $0x600] sm:$0xf]  ;;  %v426_v33 = vld [vmem:[%s9561_s5 + $0x610] sm:$0xf] }
  0x44   : > { %329 = vst [vmem:[%s9565_s6 + $0xc0] sm:$0xf] %v328_v48  ;;  %v428_v34 = vld [vmem:[%s9561_s5 + $0x620] sm:$0xf]  ;;  %v430_v35 = vld [vmem:[%s9561_s5 + $0x630] sm:$0xf] }
  0x45   : > { %331 = vst [vmem:[%s9565_s6 + $0xc4] sm:$0xf] %v330_v49  ;;  %v432_v36 = vld [vmem:[%s9561_s5 + $0x640] sm:$0xf]  ;;  %v434_v37 = vld [vmem:[%s9561_s5 + $0x650] sm:$0xf] }
  0x46   : > { %333 = vst [vmem:[%s9565_s6 + $0xc8] sm:$0xf] %v332_v50  ;;  %v436_v38 = vld [vmem:[%s9561_s5 + $0x660] sm:$0xf]  ;;  %v438_v39 = vld [vmem:[%s9561_s5 + $0x670] sm:$0xf] }
  0x47   : > { %335 = vst [vmem:[%s9565_s6 + $0xcc] sm:$0xf] %v334_v51  ;;  %v440_v40 = vld [vmem:[%s9561_s5 + $0x680] sm:$0xf]  ;;  %v442_v41 = vld [vmem:[%s9561_s5 + $0x690] sm:$0xf] }
  0x48   : > { %337 = vst [vmem:[%s9565_s6 + $0xd0] sm:$0xf] %v336_v52  ;;  %v444_v42 = vld [vmem:[%s9561_s5 + $0x6a0] sm:$0xf]  ;;  %v446_v43 = vld [vmem:[%s9561_s5 + $0x6b0] sm:$0xf] }
  0x49   : > { %339 = vst [vmem:[%s9565_s6 + $0xd4] sm:$0xf] %v338_v53  ;;  %v448_v44 = vld [vmem:[%s9561_s5 + $0x6c0] sm:$0xf]  ;;  %v450_v45 = vld [vmem:[%s9561_s5 + $0x6d0] sm:$0xf] }
  0x4a   : > { %341 = vst [vmem:[%s9565_s6 + $0xd8] sm:$0xf] %v340_v54  ;;  %v452_v46 = vld [vmem:[%s9561_s5 + $0x6e0] sm:$0xf]  ;;  %v454_v47 = vld [vmem:[%s9561_s5 + $0x6f0] sm:$0xf] }
  0x4b   : > { %343 = vst [vmem:[%s9565_s6 + $0xdc] sm:$0xf] %v342_v55  ;;  %v456_v48 = vld [vmem:[%s9561_s5 + $0x700] sm:$0xf]  ;;  %v458_v49 = vld [vmem:[%s9561_s5 + $0x710] sm:$0xf] }
  0x4c   : > { %345 = vst [vmem:[%s9565_s6 + $0xe0] sm:$0xf] %v344_v56  ;;  %v460_v50 = vld [vmem:[%s9561_s5 + $0x720] sm:$0xf]  ;;  %v462_v51 = vld [vmem:[%s9561_s5 + $0x730] sm:$0xf] }
  0x4d   : > { %347 = vst [vmem:[%s9565_s6 + $0xe4] sm:$0xf] %v346_v57  ;;  %v464_v52 = vld [vmem:[%s9561_s5 + $0x740] sm:$0xf]  ;;  %v466_v53 = vld [vmem:[%s9561_s5 + $0x750] sm:$0xf] }
  0x4e   : > { %349 = vst [vmem:[%s9565_s6 + $0xe8] sm:$0xf] %v348_v58  ;;  %v468_v54 = vld [vmem:[%s9561_s5 + $0x760] sm:$0xf]  ;;  %v470_v55 = vld [vmem:[%s9561_s5 + $0x770] sm:$0xf] }
  0x4f   : > { %351 = vst [vmem:[%s9565_s6 + $0xec] sm:$0xf] %v350_v59  ;;  %v472_v56 = vld [vmem:[%s9561_s5 + $0x780] sm:$0xf]  ;;  %v474_v57 = vld [vmem:[%s9561_s5 + $0x790] sm:$0xf] }
  0x50   : > { %353 = vst [vmem:[%s9565_s6 + $0xf0] sm:$0xf] %v352_v60  ;;  %v476_v58 = vld [vmem:[%s9561_s5 + $0x7a0] sm:$0xf]  ;;  %v478_v59 = vld [vmem:[%s9561_s5 + $0x7b0] sm:$0xf] }
  0x51   : > { %355 = vst [vmem:[%s9565_s6 + $0xf4] sm:$0xf] %v354_v61  ;;  %v480_v60 = vld [vmem:[%s9561_s5 + $0x7c0] sm:$0xf]  ;;  %v482_v61 = vld [vmem:[%s9561_s5 + $0x7d0] sm:$0xf] }
  0x52   : > { %357 = vst [vmem:[%s9565_s6 + $0xf8] sm:$0xf] %v356_v62  ;;  %v484_v62 = vld [vmem:[%s9561_s5 + $0x7e0] sm:$0xf] }
  0x53   : > { %359 = vst [vmem:[%s9565_s6 + $0xfc] sm:$0xf] %v358_v63  ;;  %v486_v63 = vld [vmem:[%s9561_s5 + $0x7f0] sm:$0xf] }
  0x54   : > { %361 = vst [vmem:[%s9565_s6 + $0x100] sm:$0xf] %v360_v0  ;;  %v488_v0 = vld [vmem:[%s9561_s5 + $0x800] sm:$0xf] }
  0x55   : > { %363 = vst [vmem:[%s9565_s6 + $0x104] sm:$0xf] %v362_v1  ;;  %v490_v1 = vld [vmem:[%s9561_s5 + $0x810] sm:$0xf] }
  0x56   : > { %365 = vst [vmem:[%s9565_s6 + $0x108] sm:$0xf] %v364_v2  ;;  %v492_v2 = vld [vmem:[%s9561_s5 + $0x820] sm:$0xf] }
  0x57   : > { %367 = vst [vmem:[%s9565_s6 + $0x10c] sm:$0xf] %v366_v3  ;;  %v494_v3 = vld [vmem:[%s9561_s5 + $0x830] sm:$0xf] }
  0x58   : > { %369 = vst [vmem:[%s9565_s6 + $0x110] sm:$0xf] %v368_v4  ;;  %v496_v4 = vld [vmem:[%s9561_s5 + $0x840] sm:$0xf] }
  0x59   : > { %371 = vst [vmem:[%s9565_s6 + $0x114] sm:$0xf] %v370_v5  ;;  %v498_v5 = vld [vmem:[%s9561_s5 + $0x850] sm:$0xf] }
  0x5a   : > { %373 = vst [vmem:[%s9565_s6 + $0x118] sm:$0xf] %v372_v6  ;;  %v500_v6 = vld [vmem:[%s9561_s5 + $0x860] sm:$0xf] }
  0x5b   : > { %375 = vst [vmem:[%s9565_s6 + $0x11c] sm:$0xf] %v374_v7  ;;  %v502_v7 = vld [vmem:[%s9561_s5 + $0x870] sm:$0xf] }
  0x5c   : > { %377 = vst [vmem:[%s9565_s6 + $0x120] sm:$0xf] %v376_v8  ;;  %v504_v8 = vld [vmem:[%s9561_s5 + $0x880] sm:$0xf] }
  0x5d   : > { %379 = vst [vmem:[%s9565_s6 + $0x124] sm:$0xf] %v378_v9  ;;  %v506_v9 = vld [vmem:[%s9561_s5 + $0x890] sm:$0xf] }
  0x5e   : > { %381 = vst [vmem:[%s9565_s6 + $0x128] sm:$0xf] %v380_v10  ;;  %v508_v10 = vld [vmem:[%s9561_s5 + $0x8a0] sm:$0xf] }
  0x5f   : > { %383 = vst [vmem:[%s9565_s6 + $0x12c] sm:$0xf] %v382_v11  ;;  %v510_v11 = vld [vmem:[%s9561_s5 + $0x8b0] sm:$0xf] }
  0x60   : > { %385 = vst [vmem:[%s9565_s6 + $0x130] sm:$0xf] %v384_v12  ;;  %v512_v12 = vld [vmem:[%s9561_s5 + $0x8c0] sm:$0xf] }
  0x61   : > { %387 = vst [vmem:[%s9565_s6 + $0x134] sm:$0xf] %v386_v13  ;;  %v514_v13 = vld [vmem:[%s9561_s5 + $0x8d0] sm:$0xf] }
  0x62   : > { %389 = vst [vmem:[%s9565_s6 + $0x138] sm:$0xf] %v388_v14  ;;  %v516_v14 = vld [vmem:[%s9561_s5 + $0x8e0] sm:$0xf] }
  0x63   : > { %391 = vst [vmem:[%s9565_s6 + $0x13c] sm:$0xf] %v390_v15  ;;  %v518_v15 = vld [vmem:[%s9561_s5 + $0x8f0] sm:$0xf] }
  0x64   : > { %393 = vst [vmem:[%s9565_s6 + $0x140] sm:$0xf] %v392_v16  ;;  %v520_v16 = vld [vmem:[%s9561_s5 + $0x900] sm:$0xf] }
  0x65   : > { %395 = vst [vmem:[%s9565_s6 + $0x144] sm:$0xf] %v394_v17  ;;  %v522_v17 = vld [vmem:[%s9561_s5 + $0x910] sm:$0xf] }
  0x66   : > { %397 = vst [vmem:[%s9565_s6 + $0x148] sm:$0xf] %v396_v18  ;;  %v524_v18 = vld [vmem:[%s9561_s5 + $0x920] sm:$0xf] }
  0x67   : > { %399 = vst [vmem:[%s9565_s6 + $0x14c] sm:$0xf] %v398_v19  ;;  %v526_v19 = vld [vmem:[%s9561_s5 + $0x930] sm:$0xf] }
  0x68   : > { %401 = vst [vmem:[%s9565_s6 + $0x150] sm:$0xf] %v400_v20  ;;  %v528_v20 = vld [vmem:[%s9561_s5 + $0x940] sm:$0xf] }
  0x69   : > { %403 = vst [vmem:[%s9565_s6 + $0x154] sm:$0xf] %v402_v21  ;;  %v530_v21 = vld [vmem:[%s9561_s5 + $0x950] sm:$0xf] }
  0x6a   : > { %405 = vst [vmem:[%s9565_s6 + $0x158] sm:$0xf] %v404_v22  ;;  %v532_v22 = vld [vmem:[%s9561_s5 + $0x960] sm:$0xf] }
  0x6b   : > { %407 = vst [vmem:[%s9565_s6 + $0x15c] sm:$0xf] %v406_v23  ;;  %v534_v23 = vld [vmem:[%s9561_s5 + $0x970] sm:$0xf] }
  0x6c   : > { %409 = vst [vmem:[%s9565_s6 + $0x160] sm:$0xf] %v408_v24  ;;  %v536_v24 = vld [vmem:[%s9561_s5 + $0x980] sm:$0xf] }
  0x6d   : > { %411 = vst [vmem:[%s9565_s6 + $0x164] sm:$0xf] %v410_v25  ;;  %v538_v25 = vld [vmem:[%s9561_s5 + $0x990] sm:$0xf] }
  0x6e   : > { %413 = vst [vmem:[%s9565_s6 + $0x168] sm:$0xf] %v412_v26  ;;  %v540_v26 = vld [vmem:[%s9561_s5 + $0x9a0] sm:$0xf] }
  0x6f   : > { %415 = vst [vmem:[%s9565_s6 + $0x16c] sm:$0xf] %v414_v27  ;;  %v542_v27 = vld [vmem:[%s9561_s5 + $0x9b0] sm:$0xf] }
  0x70   : > { %417 = vst [vmem:[%s9565_s6 + $0x170] sm:$0xf] %v416_v28  ;;  %v544_v28 = vld [vmem:[%s9561_s5 + $0x9c0] sm:$0xf] }
  0x71   : > { %419 = vst [vmem:[%s9565_s6 + $0x174] sm:$0xf] %v418_v29  ;;  %v546_v29 = vld [vmem:[%s9561_s5 + $0x9d0] sm:$0xf] }
  0x72   : > { %421 = vst [vmem:[%s9565_s6 + $0x178] sm:$0xf] %v420_v30  ;;  %v548_v30 = vld [vmem:[%s9561_s5 + $0x9e0] sm:$0xf] }
  0x73   : > { %423 = vst [vmem:[%s9565_s6 + $0x17c] sm:$0xf] %v422_v31  ;;  %v550_v31 = vld [vmem:[%s9561_s5 + $0x9f0] sm:$0xf] }
  0x74   : > { %425 = vst [vmem:[%s9565_s6 + $0x180] sm:$0xf] %v424_v32  ;;  %v552_v32 = vld [vmem:[%s9561_s5 + $0xa00] sm:$0xf] }
  0x75   : > { %427 = vst [vmem:[%s9565_s6 + $0x184] sm:$0xf] %v426_v33  ;;  %v554_v33 = vld [vmem:[%s9561_s5 + $0xa10] sm:$0xf] }
  0x76   : > { %429 = vst [vmem:[%s9565_s6 + $0x188] sm:$0xf] %v428_v34  ;;  %v556_v34 = vld [vmem:[%s9561_s5 + $0xa20] sm:$0xf] }
  0x77   : > { %431 = vst [vmem:[%s9565_s6 + $0x18c] sm:$0xf] %v430_v35  ;;  %v558_v35 = vld [vmem:[%s9561_s5 + $0xa30] sm:$0xf] }
  0x78   : > { %433 = vst [vmem:[%s9565_s6 + $0x190] sm:$0xf] %v432_v36  ;;  %v560_v36 = vld [vmem:[%s9561_s5 + $0xa40] sm:$0xf] }
  0x79   : > { %435 = vst [vmem:[%s9565_s6 + $0x194] sm:$0xf] %v434_v37  ;;  %v562_v37 = vld [vmem:[%s9561_s5 + $0xa50] sm:$0xf] }
  0x7a   : > { %437 = vst [vmem:[%s9565_s6 + $0x198] sm:$0xf] %v436_v38  ;;  %v564_v38 = vld [vmem:[%s9561_s5 + $0xa60] sm:$0xf] }
  0x7b   : > { %439 = vst [vmem:[%s9565_s6 + $0x19c] sm:$0xf] %v438_v39  ;;  %v566_v39 = vld [vmem:[%s9561_s5 + $0xa70] sm:$0xf] }
  0x7c   : > { %441 = vst [vmem:[%s9565_s6 + $0x1a0] sm:$0xf] %v440_v40  ;;  %v568_v40 = vld [vmem:[%s9561_s5 + $0xa80] sm:$0xf] }
  0x7d   : > { %443 = vst [vmem:[%s9565_s6 + $0x1a4] sm:$0xf] %v442_v41  ;;  %v570_v41 = vld [vmem:[%s9561_s5 + $0xa90] sm:$0xf] }
  0x7e   : > { %445 = vst [vmem:[%s9565_s6 + $0x1a8] sm:$0xf] %v444_v42  ;;  %v572_v42 = vld [vmem:[%s9561_s5 + $0xaa0] sm:$0xf] }
  0x7f   : > { %447 = vst [vmem:[%s9565_s6 + $0x1ac] sm:$0xf] %v446_v43  ;;  %v574_v43 = vld [vmem:[%s9561_s5 + $0xab0] sm:$0xf] }
  0x80   : > { %449 = vst [vmem:[%s9565_s6 + $0x1b0] sm:$0xf] %v448_v44  ;;  %v576_v44 = vld [vmem:[%s9561_s5 + $0xac0] sm:$0xf] }
  0x81   : > { %451 = vst [vmem:[%s9565_s6 + $0x1b4] sm:$0xf] %v450_v45  ;;  %v578_v45 = vld [vmem:[%s9561_s5 + $0xad0] sm:$0xf] }
  0x82   : > { %453 = vst [vmem:[%s9565_s6 + $0x1b8] sm:$0xf] %v452_v46  ;;  %v580_v46 = vld [vmem:[%s9561_s5 + $0xae0] sm:$0xf] }
  0x83   : > { %455 = vst [vmem:[%s9565_s6 + $0x1bc] sm:$0xf] %v454_v47  ;;  %v582_v47 = vld [vmem:[%s9561_s5 + $0xaf0] sm:$0xf] }
  0x84   : > { %457 = vst [vmem:[%s9565_s6 + $0x1c0] sm:$0xf] %v456_v48  ;;  %v584_v48 = vld [vmem:[%s9561_s5 + $0xb00] sm:$0xf] }
  0x85   : > { %459 = vst [vmem:[%s9565_s6 + $0x1c4] sm:$0xf] %v458_v49  ;;  %v586_v49 = vld [vmem:[%s9561_s5 + $0xb10] sm:$0xf] }
  0x86   : > { %461 = vst [vmem:[%s9565_s6 + $0x1c8] sm:$0xf] %v460_v50  ;;  %v588_v50 = vld [vmem:[%s9561_s5 + $0xb20] sm:$0xf] }
  0x87   : > { %463 = vst [vmem:[%s9565_s6 + $0x1cc] sm:$0xf] %v462_v51  ;;  %v590_v51 = vld [vmem:[%s9561_s5 + $0xb30] sm:$0xf] }
  0x88   : > { %465 = vst [vmem:[%s9565_s6 + $0x1d0] sm:$0xf] %v464_v52  ;;  %v592_v52 = vld [vmem:[%s9561_s5 + $0xb40] sm:$0xf] }
  0x89   : > { %467 = vst [vmem:[%s9565_s6 + $0x1d4] sm:$0xf] %v466_v53  ;;  %v594_v53 = vld [vmem:[%s9561_s5 + $0xb50] sm:$0xf] }
  0x8a   : > { %469 = vst [vmem:[%s9565_s6 + $0x1d8] sm:$0xf] %v468_v54  ;;  %v596_v54 = vld [vmem:[%s9561_s5 + $0xb60] sm:$0xf] }
  0x8b   : > { %471 = vst [vmem:[%s9565_s6 + $0x1dc] sm:$0xf] %v470_v55  ;;  %v598_v55 = vld [vmem:[%s9561_s5 + $0xb70] sm:$0xf] }
  0x8c   : > { %473 = vst [vmem:[%s9565_s6 + $0x1e0] sm:$0xf] %v472_v56  ;;  %v600_v56 = vld [vmem:[%s9561_s5 + $0xb80] sm:$0xf] }
  0x8d   : > { %475 = vst [vmem:[%s9565_s6 + $0x1e4] sm:$0xf] %v474_v57  ;;  %v602_v57 = vld [vmem:[%s9561_s5 + $0xb90] sm:$0xf] }
  0x8e   : > { %477 = vst [vmem:[%s9565_s6 + $0x1e8] sm:$0xf] %v476_v58  ;;  %v604_v58 = vld [vmem:[%s9561_s5 + $0xba0] sm:$0xf] }
  0x8f   : > { %479 = vst [vmem:[%s9565_s6 + $0x1ec] sm:$0xf] %v478_v59  ;;  %v606_v59 = vld [vmem:[%s9561_s5 + $0xbb0] sm:$0xf] }
  0x90   : > { %481 = vst [vmem:[%s9565_s6 + $0x1f0] sm:$0xf] %v480_v60  ;;  %v608_v60 = vld [vmem:[%s9561_s5 + $0xbc0] sm:$0xf] }
  0x91   : > { %483 = vst [vmem:[%s9565_s6 + $0x1f4] sm:$0xf] %v482_v61  ;;  %v610_v61 = vld [vmem:[%s9561_s5 + $0xbd0] sm:$0xf] }
  0x92   : > { %485 = vst [vmem:[%s9565_s6 + $0x1f8] sm:$0xf] %v484_v62  ;;  %v612_v62 = vld [vmem:[%s9561_s5 + $0xbe0] sm:$0xf] }
  0x93   : > { %487 = vst [vmem:[%s9565_s6 + $0x1fc] sm:$0xf] %v486_v63  ;;  %v614_v63 = vld [vmem:[%s9561_s5 + $0xbf0] sm:$0xf] }
  0x94   : > { %489 = vst [vmem:[%s9565_s6 + $0x200] sm:$0xf] %v488_v0  ;;  %v616_v0 = vld [vmem:[%s9561_s5 + $0xc00] sm:$0xf] }
  0x95   : > { %491 = vst [vmem:[%s9565_s6 + $0x204] sm:$0xf] %v490_v1  ;;  %v618_v1 = vld [vmem:[%s9561_s5 + $0xc10] sm:$0xf] }
  0x96   : > { %493 = vst [vmem:[%s9565_s6 + $0x208] sm:$0xf] %v492_v2  ;;  %v620_v2 = vld [vmem:[%s9561_s5 + $0xc20] sm:$0xf] }
  0x97   : > { %495 = vst [vmem:[%s9565_s6 + $0x20c] sm:$0xf] %v494_v3  ;;  %v622_v3 = vld [vmem:[%s9561_s5 + $0xc30] sm:$0xf] }
  0x98   : > { %497 = vst [vmem:[%s9565_s6 + $0x210] sm:$0xf] %v496_v4  ;;  %v624_v4 = vld [vmem:[%s9561_s5 + $0xc40] sm:$0xf] }
  0x99   : > { %499 = vst [vmem:[%s9565_s6 + $0x214] sm:$0xf] %v498_v5  ;;  %v626_v5 = vld [vmem:[%s9561_s5 + $0xc50] sm:$0xf] }
  0x9a   : > { %501 = vst [vmem:[%s9565_s6 + $0x218] sm:$0xf] %v500_v6  ;;  %v628_v6 = vld [vmem:[%s9561_s5 + $0xc60] sm:$0xf] }
  0x9b   : > { %503 = vst [vmem:[%s9565_s6 + $0x21c] sm:$0xf] %v502_v7  ;;  %v630_v7 = vld [vmem:[%s9561_s5 + $0xc70] sm:$0xf] }
  0x9c   : > { %505 = vst [vmem:[%s9565_s6 + $0x220] sm:$0xf] %v504_v8  ;;  %v632_v8 = vld [vmem:[%s9561_s5 + $0xc80] sm:$0xf] }
  0x9d   : > { %507 = vst [vmem:[%s9565_s6 + $0x224] sm:$0xf] %v506_v9  ;;  %v634_v9 = vld [vmem:[%s9561_s5 + $0xc90] sm:$0xf] }
  0x9e   : > { %509 = vst [vmem:[%s9565_s6 + $0x228] sm:$0xf] %v508_v10  ;;  %v636_v10 = vld [vmem:[%s9561_s5 + $0xca0] sm:$0xf] }
  0x9f   : > { %511 = vst [vmem:[%s9565_s6 + $0x22c] sm:$0xf] %v510_v11  ;;  %v638_v11 = vld [vmem:[%s9561_s5 + $0xcb0] sm:$0xf] }
  0xa0   : > { %513 = vst [vmem:[%s9565_s6 + $0x230] sm:$0xf] %v512_v12  ;;  %v640_v12 = vld [vmem:[%s9561_s5 + $0xcc0] sm:$0xf] }
  0xa1   : > { %515 = vst [vmem:[%s9565_s6 + $0x234] sm:$0xf] %v514_v13  ;;  %v642_v13 = vld [vmem:[%s9561_s5 + $0xcd0] sm:$0xf] }
  0xa2   : > { %517 = vst [vmem:[%s9565_s6 + $0x238] sm:$0xf] %v516_v14  ;;  %v644_v14 = vld [vmem:[%s9561_s5 + $0xce0] sm:$0xf] }
  0xa3   : > { %519 = vst [vmem:[%s9565_s6 + $0x23c] sm:$0xf] %v518_v15  ;;  %v646_v15 = vld [vmem:[%s9561_s5 + $0xcf0] sm:$0xf] }
  0xa4   : > { %521 = vst [vmem:[%s9565_s6 + $0x240] sm:$0xf] %v520_v16  ;;  %v648_v16 = vld [vmem:[%s9561_s5 + $0xd00] sm:$0xf] }
  0xa5   : > { %523 = vst [vmem:[%s9565_s6 + $0x244] sm:$0xf] %v522_v17  ;;  %v650_v17 = vld [vmem:[%s9561_s5 + $0xd10] sm:$0xf] }
  0xa6   : > { %525 = vst [vmem:[%s9565_s6 + $0x248] sm:$0xf] %v524_v18  ;;  %v652_v18 = vld [vmem:[%s9561_s5 + $0xd20] sm:$0xf] }
  0xa7   : > { %527 = vst [vmem:[%s9565_s6 + $0x24c] sm:$0xf] %v526_v19  ;;  %v654_v19 = vld [vmem:[%s9561_s5 + $0xd30] sm:$0xf] }
  0xa8   : > { %529 = vst [vmem:[%s9565_s6 + $0x250] sm:$0xf] %v528_v20  ;;  %v656_v20 = vld [vmem:[%s9561_s5 + $0xd40] sm:$0xf] }
  0xa9   : > { %531 = vst [vmem:[%s9565_s6 + $0x254] sm:$0xf] %v530_v21  ;;  %v658_v21 = vld [vmem:[%s9561_s5 + $0xd50] sm:$0xf] }
  0xaa   : > { %533 = vst [vmem:[%s9565_s6 + $0x258] sm:$0xf] %v532_v22  ;;  %v660_v22 = vld [vmem:[%s9561_s5 + $0xd60] sm:$0xf] }
  0xab   : > { %535 = vst [vmem:[%s9565_s6 + $0x25c] sm:$0xf] %v534_v23  ;;  %v662_v23 = vld [vmem:[%s9561_s5 + $0xd70] sm:$0xf] }
  0xac   : > { %537 = vst [vmem:[%s9565_s6 + $0x260] sm:$0xf] %v536_v24  ;;  %v664_v24 = vld [vmem:[%s9561_s5 + $0xd80] sm:$0xf] }
  0xad   : > { %539 = vst [vmem:[%s9565_s6 + $0x264] sm:$0xf] %v538_v25  ;;  %v666_v25 = vld [vmem:[%s9561_s5 + $0xd90] sm:$0xf] }
  0xae   : > { %541 = vst [vmem:[%s9565_s6 + $0x268] sm:$0xf] %v540_v26  ;;  %v668_v26 = vld [vmem:[%s9561_s5 + $0xda0] sm:$0xf] }
  0xaf   : > { %543 = vst [vmem:[%s9565_s6 + $0x26c] sm:$0xf] %v542_v27  ;;  %v670_v27 = vld [vmem:[%s9561_s5 + $0xdb0] sm:$0xf] }
  0xb0   : > { %545 = vst [vmem:[%s9565_s6 + $0x270] sm:$0xf] %v544_v28  ;;  %v672_v28 = vld [vmem:[%s9561_s5 + $0xdc0] sm:$0xf] }
  0xb1   : > { %547 = vst [vmem:[%s9565_s6 + $0x274] sm:$0xf] %v546_v29  ;;  %v674_v29 = vld [vmem:[%s9561_s5 + $0xdd0] sm:$0xf] }
  0xb2   : > { %549 = vst [vmem:[%s9565_s6 + $0x278] sm:$0xf] %v548_v30  ;;  %v676_v30 = vld [vmem:[%s9561_s5 + $0xde0] sm:$0xf] }
  0xb3   : > { %551 = vst [vmem:[%s9565_s6 + $0x27c] sm:$0xf] %v550_v31  ;;  %v678_v31 = vld [vmem:[%s9561_s5 + $0xdf0] sm:$0xf] }
  0xb4   : > { %553 = vst [vmem:[%s9565_s6 + $0x280] sm:$0xf] %v552_v32  ;;  %v680_v32 = vld [vmem:[%s9561_s5 + $0xe00] sm:$0xf] }
  0xb5   : > { %555 = vst [vmem:[%s9565_s6 + $0x284] sm:$0xf] %v554_v33  ;;  %v682_v33 = vld [vmem:[%s9561_s5 + $0xe10] sm:$0xf] }
  0xb6   : > { %557 = vst [vmem:[%s9565_s6 + $0x288] sm:$0xf] %v556_v34  ;;  %v684_v34 = vld [vmem:[%s9561_s5 + $0xe20] sm:$0xf] }
  0xb7   : > { %559 = vst [vmem:[%s9565_s6 + $0x28c] sm:$0xf] %v558_v35  ;;  %v686_v35 = vld [vmem:[%s9561_s5 + $0xe30] sm:$0xf] }
  0xb8   : > { %561 = vst [vmem:[%s9565_s6 + $0x290] sm:$0xf] %v560_v36  ;;  %v688_v36 = vld [vmem:[%s9561_s5 + $0xe40] sm:$0xf] }
  0xb9   : > { %563 = vst [vmem:[%s9565_s6 + $0x294] sm:$0xf] %v562_v37  ;;  %v690_v37 = vld [vmem:[%s9561_s5 + $0xe50] sm:$0xf] }
  0xba   : > { %565 = vst [vmem:[%s9565_s6 + $0x298] sm:$0xf] %v564_v38  ;;  %v692_v38 = vld [vmem:[%s9561_s5 + $0xe60] sm:$0xf] }
  0xbb   : > { %567 = vst [vmem:[%s9565_s6 + $0x29c] sm:$0xf] %v566_v39  ;;  %v694_v39 = vld [vmem:[%s9561_s5 + $0xe70] sm:$0xf] }
  0xbc   : > { %569 = vst [vmem:[%s9565_s6 + $0x2a0] sm:$0xf] %v568_v40  ;;  %v696_v40 = vld [vmem:[%s9561_s5 + $0xe80] sm:$0xf] }
  0xbd   : > { %571 = vst [vmem:[%s9565_s6 + $0x2a4] sm:$0xf] %v570_v41  ;;  %v698_v41 = vld [vmem:[%s9561_s5 + $0xe90] sm:$0xf] }
  0xbe   : > { %573 = vst [vmem:[%s9565_s6 + $0x2a8] sm:$0xf] %v572_v42  ;;  %v700_v42 = vld [vmem:[%s9561_s5 + $0xea0] sm:$0xf] }
  0xbf   : > { %575 = vst [vmem:[%s9565_s6 + $0x2ac] sm:$0xf] %v574_v43  ;;  %v702_v43 = vld [vmem:[%s9561_s5 + $0xeb0] sm:$0xf] }
  0xc0   : > { %577 = vst [vmem:[%s9565_s6 + $0x2b0] sm:$0xf] %v576_v44  ;;  %v704_v44 = vld [vmem:[%s9561_s5 + $0xec0] sm:$0xf] }
  0xc1   : > { %579 = vst [vmem:[%s9565_s6 + $0x2b4] sm:$0xf] %v578_v45  ;;  %v706_v45 = vld [vmem:[%s9561_s5 + $0xed0] sm:$0xf] }
  0xc2   : > { %581 = vst [vmem:[%s9565_s6 + $0x2b8] sm:$0xf] %v580_v46  ;;  %v708_v46 = vld [vmem:[%s9561_s5 + $0xee0] sm:$0xf] }
  0xc3   : > { %583 = vst [vmem:[%s9565_s6 + $0x2bc] sm:$0xf] %v582_v47  ;;  %v710_v47 = vld [vmem:[%s9561_s5 + $0xef0] sm:$0xf] }
  0xc4   : > { %585 = vst [vmem:[%s9565_s6 + $0x2c0] sm:$0xf] %v584_v48  ;;  %v712_v48 = vld [vmem:[%s9561_s5 + $0xf00] sm:$0xf] }
  0xc5   : > { %587 = vst [vmem:[%s9565_s6 + $0x2c4] sm:$0xf] %v586_v49  ;;  %v714_v49 = vld [vmem:[%s9561_s5 + $0xf10] sm:$0xf] }
  0xc6   : > { %589 = vst [vmem:[%s9565_s6 + $0x2c8] sm:$0xf] %v588_v50  ;;  %v716_v50 = vld [vmem:[%s9561_s5 + $0xf20] sm:$0xf] }
  0xc7   : > { %591 = vst [vmem:[%s9565_s6 + $0x2cc] sm:$0xf] %v590_v51  ;;  %v718_v51 = vld [vmem:[%s9561_s5 + $0xf30] sm:$0xf] }
  0xc8   : > { %593 = vst [vmem:[%s9565_s6 + $0x2d0] sm:$0xf] %v592_v52  ;;  %v720_v52 = vld [vmem:[%s9561_s5 + $0xf40] sm:$0xf] }
  0xc9   : > { %595 = vst [vmem:[%s9565_s6 + $0x2d4] sm:$0xf] %v594_v53  ;;  %v722_v53 = vld [vmem:[%s9561_s5 + $0xf50] sm:$0xf] }
  0xca   : > { %597 = vst [vmem:[%s9565_s6 + $0x2d8] sm:$0xf] %v596_v54  ;;  %v724_v54 = vld [vmem:[%s9561_s5 + $0xf60] sm:$0xf] }
  0xcb   : > { %599 = vst [vmem:[%s9565_s6 + $0x2dc] sm:$0xf] %v598_v55  ;;  %v726_v55 = vld [vmem:[%s9561_s5 + $0xf70] sm:$0xf] }
  0xcc   : > { %601 = vst [vmem:[%s9565_s6 + $0x2e0] sm:$0xf] %v600_v56  ;;  %v728_v56 = vld [vmem:[%s9561_s5 + $0xf80] sm:$0xf] }
  0xcd   : > { %603 = vst [vmem:[%s9565_s6 + $0x2e4] sm:$0xf] %v602_v57  ;;  %v730_v57 = vld [vmem:[%s9561_s5 + $0xf90] sm:$0xf] }
  0xce   : > { %605 = vst [vmem:[%s9565_s6 + $0x2e8] sm:$0xf] %v604_v58  ;;  %v732_v58 = vld [vmem:[%s9561_s5 + $0xfa0] sm:$0xf] }
  0xcf   : > { %607 = vst [vmem:[%s9565_s6 + $0x2ec] sm:$0xf] %v606_v59  ;;  %v734_v59 = vld [vmem:[%s9561_s5 + $0xfb0] sm:$0xf] }
  0xd0   : > { %609 = vst [vmem:[%s9565_s6 + $0x2f0] sm:$0xf] %v608_v60  ;;  %v736_v60 = vld [vmem:[%s9561_s5 + $0xfc0] sm:$0xf] }
  0xd1   : > { %611 = vst [vmem:[%s9565_s6 + $0x2f4] sm:$0xf] %v610_v61  ;;  %v738_v61 = vld [vmem:[%s9561_s5 + $0xfd0] sm:$0xf] }
  0xd2   : > { %613 = vst [vmem:[%s9565_s6 + $0x2f8] sm:$0xf] %v612_v62  ;;  %v740_v62 = vld [vmem:[%s9561_s5 + $0xfe0] sm:$0xf] }
  0xd3   : > { %615 = vst [vmem:[%s9565_s6 + $0x2fc] sm:$0xf] %v614_v63  ;;  %v742_v63 = vld [vmem:[%s9561_s5 + $0xff0] sm:$0xf] }
  0xd4   : > { %617 = vst [vmem:[%s9565_s6 + $0x300] sm:$0xf] %v616_v0  ;;  %v744_v0 = vld [vmem:[%s9561_s5 + $0x1000] sm:$0xf] }
  0xd5   : > { %619 = vst [vmem:[%s9565_s6 + $0x304] sm:$0xf] %v618_v1  ;;  %v746_v1 = vld [vmem:[%s9561_s5 + $0x1010] sm:$0xf] }
  0xd6   : > { %621 = vst [vmem:[%s9565_s6 + $0x308] sm:$0xf] %v620_v2  ;;  %v748_v2 = vld [vmem:[%s9561_s5 + $0x1020] sm:$0xf] }
  0xd7   : > { %623 = vst [vmem:[%s9565_s6 + $0x30c] sm:$0xf] %v622_v3  ;;  %v750_v3 = vld [vmem:[%s9561_s5 + $0x1030] sm:$0xf] }
  0xd8   : > { %625 = vst [vmem:[%s9565_s6 + $0x310] sm:$0xf] %v624_v4  ;;  %v752_v4 = vld [vmem:[%s9561_s5 + $0x1040] sm:$0xf] }
  0xd9   : > { %627 = vst [vmem:[%s9565_s6 + $0x314] sm:$0xf] %v626_v5  ;;  %v754_v5 = vld [vmem:[%s9561_s5 + $0x1050] sm:$0xf] }
  0xda   : > { %629 = vst [vmem:[%s9565_s6 + $0x318] sm:$0xf] %v628_v6  ;;  %v756_v6 = vld [vmem:[%s9561_s5 + $0x1060] sm:$0xf] }
  0xdb   : > { %631 = vst [vmem:[%s9565_s6 + $0x31c] sm:$0xf] %v630_v7  ;;  %v758_v7 = vld [vmem:[%s9561_s5 + $0x1070] sm:$0xf] }
  0xdc   : > { %633 = vst [vmem:[%s9565_s6 + $0x320] sm:$0xf] %v632_v8  ;;  %v760_v8 = vld [vmem:[%s9561_s5 + $0x1080] sm:$0xf] }
  0xdd   : > { %635 = vst [vmem:[%s9565_s6 + $0x324] sm:$0xf] %v634_v9  ;;  %v762_v9 = vld [vmem:[%s9561_s5 + $0x1090] sm:$0xf] }
  0xde   : > { %637 = vst [vmem:[%s9565_s6 + $0x328] sm:$0xf] %v636_v10  ;;  %v764_v10 = vld [vmem:[%s9561_s5 + $0x10a0] sm:$0xf] }
  0xdf   : > { %639 = vst [vmem:[%s9565_s6 + $0x32c] sm:$0xf] %v638_v11  ;;  %v766_v11 = vld [vmem:[%s9561_s5 + $0x10b0] sm:$0xf] }
  0xe0   : > { %641 = vst [vmem:[%s9565_s6 + $0x330] sm:$0xf] %v640_v12  ;;  %v768_v12 = vld [vmem:[%s9561_s5 + $0x10c0] sm:$0xf] }
  0xe1   : > { %643 = vst [vmem:[%s9565_s6 + $0x334] sm:$0xf] %v642_v13  ;;  %v770_v13 = vld [vmem:[%s9561_s5 + $0x10d0] sm:$0xf] }
  0xe2   : > { %645 = vst [vmem:[%s9565_s6 + $0x338] sm:$0xf] %v644_v14  ;;  %v772_v14 = vld [vmem:[%s9561_s5 + $0x10e0] sm:$0xf] }
  0xe3   : > { %647 = vst [vmem:[%s9565_s6 + $0x33c] sm:$0xf] %v646_v15  ;;  %v774_v15 = vld [vmem:[%s9561_s5 + $0x10f0] sm:$0xf] }
  0xe4   : > { %649 = vst [vmem:[%s9565_s6 + $0x340] sm:$0xf] %v648_v16  ;;  %v776_v16 = vld [vmem:[%s9561_s5 + $0x1100] sm:$0xf] }
  0xe5   : > { %651 = vst [vmem:[%s9565_s6 + $0x344] sm:$0xf] %v650_v17  ;;  %v778_v17 = vld [vmem:[%s9561_s5 + $0x1110] sm:$0xf] }
  0xe6   : > { %653 = vst [vmem:[%s9565_s6 + $0x348] sm:$0xf] %v652_v18  ;;  %v780_v18 = vld [vmem:[%s9561_s5 + $0x1120] sm:$0xf] }
  0xe7   : > { %655 = vst [vmem:[%s9565_s6 + $0x34c] sm:$0xf] %v654_v19  ;;  %v782_v19 = vld [vmem:[%s9561_s5 + $0x1130] sm:$0xf] }
  0xe8   : > { %657 = vst [vmem:[%s9565_s6 + $0x350] sm:$0xf] %v656_v20  ;;  %v784_v20 = vld [vmem:[%s9561_s5 + $0x1140] sm:$0xf] }
  0xe9   : > { %659 = vst [vmem:[%s9565_s6 + $0x354] sm:$0xf] %v658_v21  ;;  %v786_v21 = vld [vmem:[%s9561_s5 + $0x1150] sm:$0xf] }
  0xea   : > { %661 = vst [vmem:[%s9565_s6 + $0x358] sm:$0xf] %v660_v22  ;;  %v788_v22 = vld [vmem:[%s9561_s5 + $0x1160] sm:$0xf] }
  0xeb   : > { %663 = vst [vmem:[%s9565_s6 + $0x35c] sm:$0xf] %v662_v23  ;;  %v790_v23 = vld [vmem:[%s9561_s5 + $0x1170] sm:$0xf] }
  0xec   : > { %665 = vst [vmem:[%s9565_s6 + $0x360] sm:$0xf] %v664_v24  ;;  %v792_v24 = vld [vmem:[%s9561_s5 + $0x1180] sm:$0xf] }
  0xed   : > { %667 = vst [vmem:[%s9565_s6 + $0x364] sm:$0xf] %v666_v25  ;;  %v794_v25 = vld [vmem:[%s9561_s5 + $0x1190] sm:$0xf] }
  0xee   : > { %669 = vst [vmem:[%s9565_s6 + $0x368] sm:$0xf] %v668_v26  ;;  %v796_v26 = vld [vmem:[%s9561_s5 + $0x11a0] sm:$0xf] }
  0xef   : > { %671 = vst [vmem:[%s9565_s6 + $0x36c] sm:$0xf] %v670_v27  ;;  %v798_v27 = vld [vmem:[%s9561_s5 + $0x11b0] sm:$0xf] }
  0xf0   : > { %673 = vst [vmem:[%s9565_s6 + $0x370] sm:$0xf] %v672_v28  ;;  %v800_v28 = vld [vmem:[%s9561_s5 + $0x11c0] sm:$0xf] }
  0xf1   : > { %675 = vst [vmem:[%s9565_s6 + $0x374] sm:$0xf] %v674_v29  ;;  %v802_v29 = vld [vmem:[%s9561_s5 + $0x11d0] sm:$0xf] }
  0xf2   : > { %677 = vst [vmem:[%s9565_s6 + $0x378] sm:$0xf] %v676_v30  ;;  %v804_v30 = vld [vmem:[%s9561_s5 + $0x11e0] sm:$0xf] }
  0xf3   : > { %679 = vst [vmem:[%s9565_s6 + $0x37c] sm:$0xf] %v678_v31  ;;  %v806_v31 = vld [vmem:[%s9561_s5 + $0x11f0] sm:$0xf] }
  0xf4   : > { %681 = vst [vmem:[%s9565_s6 + $0x380] sm:$0xf] %v680_v32  ;;  %v808_v32 = vld [vmem:[%s9561_s5 + $0x1200] sm:$0xf] }
  0xf5   : > { %683 = vst [vmem:[%s9565_s6 + $0x384] sm:$0xf] %v682_v33  ;;  %v810_v33 = vld [vmem:[%s9561_s5 + $0x1210] sm:$0xf] }
  0xf6   : > { %685 = vst [vmem:[%s9565_s6 + $0x388] sm:$0xf] %v684_v34  ;;  %v812_v34 = vld [vmem:[%s9561_s5 + $0x1220] sm:$0xf] }
  0xf7   : > { %687 = vst [vmem:[%s9565_s6 + $0x38c] sm:$0xf] %v686_v35  ;;  %v814_v35 = vld [vmem:[%s9561_s5 + $0x1230] sm:$0xf] }
  0xf8   : > { %689 = vst [vmem:[%s9565_s6 + $0x390] sm:$0xf] %v688_v36  ;;  %v816_v36 = vld [vmem:[%s9561_s5 + $0x1240] sm:$0xf] }
  0xf9   : > { %691 = vst [vmem:[%s9565_s6 + $0x394] sm:$0xf] %v690_v37  ;;  %v818_v37 = vld [vmem:[%s9561_s5 + $0x1250] sm:$0xf] }
  0xfa   : > { %693 = vst [vmem:[%s9565_s6 + $0x398] sm:$0xf] %v692_v38  ;;  %v820_v38 = vld [vmem:[%s9561_s5 + $0x1260] sm:$0xf] }
  0xfb   : > { %695 = vst [vmem:[%s9565_s6 + $0x39c] sm:$0xf] %v694_v39  ;;  %v822_v39 = vld [vmem:[%s9561_s5 + $0x1270] sm:$0xf] }
  0xfc   : > { %697 = vst [vmem:[%s9565_s6 + $0x3a0] sm:$0xf] %v696_v40  ;;  %v824_v40 = vld [vmem:[%s9561_s5 + $0x1280] sm:$0xf] }
  0xfd   : > { %699 = vst [vmem:[%s9565_s6 + $0x3a4] sm:$0xf] %v698_v41  ;;  %v826_v41 = vld [vmem:[%s9561_s5 + $0x1290] sm:$0xf] }
  0xfe   : > { %701 = vst [vmem:[%s9565_s6 + $0x3a8] sm:$0xf] %v700_v42  ;;  %v828_v42 = vld [vmem:[%s9561_s5 + $0x12a0] sm:$0xf] }
  0xff   : > { %703 = vst [vmem:[%s9565_s6 + $0x3ac] sm:$0xf] %v702_v43  ;;  %v830_v43 = vld [vmem:[%s9561_s5 + $0x12b0] sm:$0xf] }
 0x100   : > { %705 = vst [vmem:[%s9565_s6 + $0x3b0] sm:$0xf] %v704_v44  ;;  %v832_v44 = vld [vmem:[%s9561_s5 + $0x12c0] sm:$0xf] }
 0x101   : > { %707 = vst [vmem:[%s9565_s6 + $0x3b4] sm:$0xf] %v706_v45  ;;  %v834_v45 = vld [vmem:[%s9561_s5 + $0x12d0] sm:$0xf] }
 0x102   : > { %709 = vst [vmem:[%s9565_s6 + $0x3b8] sm:$0xf] %v708_v46  ;;  %v836_v46 = vld [vmem:[%s9561_s5 + $0x12e0] sm:$0xf] }
 0x103   : > { %711 = vst [vmem:[%s9565_s6 + $0x3bc] sm:$0xf] %v710_v47  ;;  %v838_v47 = vld [vmem:[%s9561_s5 + $0x12f0] sm:$0xf] }
 0x104   : > { %713 = vst [vmem:[%s9565_s6 + $0x3c0] sm:$0xf] %v712_v48  ;;  %v840_v48 = vld [vmem:[%s9561_s5 + $0x1300] sm:$0xf] }
 0x105   : > { %715 = vst [vmem:[%s9565_s6 + $0x3c4] sm:$0xf] %v714_v49  ;;  %v842_v49 = vld [vmem:[%s9561_s5 + $0x1310] sm:$0xf] }
 0x106   : > { %717 = vst [vmem:[%s9565_s6 + $0x3c8] sm:$0xf] %v716_v50  ;;  %v844_v50 = vld [vmem:[%s9561_s5 + $0x1320] sm:$0xf] }
 0x107   : > { %719 = vst [vmem:[%s9565_s6 + $0x3cc] sm:$0xf] %v718_v51  ;;  %v846_v51 = vld [vmem:[%s9561_s5 + $0x1330] sm:$0xf] }
 0x108   : > { %721 = vst [vmem:[%s9565_s6 + $0x3d0] sm:$0xf] %v720_v52  ;;  %v848_v52 = vld [vmem:[%s9561_s5 + $0x1340] sm:$0xf] }
 0x109   : > { %723 = vst [vmem:[%s9565_s6 + $0x3d4] sm:$0xf] %v722_v53  ;;  %v850_v53 = vld [vmem:[%s9561_s5 + $0x1350] sm:$0xf] }
 0x10a   : > { %725 = vst [vmem:[%s9565_s6 + $0x3d8] sm:$0xf] %v724_v54  ;;  %v852_v54 = vld [vmem:[%s9561_s5 + $0x1360] sm:$0xf] }
 0x10b   : > { %727 = vst [vmem:[%s9565_s6 + $0x3dc] sm:$0xf] %v726_v55  ;;  %v854_v55 = vld [vmem:[%s9561_s5 + $0x1370] sm:$0xf] }
 0x10c   : > { %729 = vst [vmem:[%s9565_s6 + $0x3e0] sm:$0xf] %v728_v56  ;;  %v856_v56 = vld [vmem:[%s9561_s5 + $0x1380] sm:$0xf] }
 0x10d   : > { %731 = vst [vmem:[%s9565_s6 + $0x3e4] sm:$0xf] %v730_v57  ;;  %v858_v57 = vld [vmem:[%s9561_s5 + $0x1390] sm:$0xf] }
 0x10e   : > { %733 = vst [vmem:[%s9565_s6 + $0x3e8] sm:$0xf] %v732_v58  ;;  %v860_v58 = vld [vmem:[%s9561_s5 + $0x13a0] sm:$0xf] }
 0x10f   : > { %735 = vst [vmem:[%s9565_s6 + $0x3ec] sm:$0xf] %v734_v59  ;;  %v862_v59 = vld [vmem:[%s9561_s5 + $0x13b0] sm:$0xf] }
 0x110   : > { %737 = vst [vmem:[%s9565_s6 + $0x3f0] sm:$0xf] %v736_v60  ;;  %v864_v60 = vld [vmem:[%s9561_s5 + $0x13c0] sm:$0xf] }
 0x111   : > { %739 = vst [vmem:[%s9565_s6 + $0x3f4] sm:$0xf] %v738_v61  ;;  %v866_v61 = vld [vmem:[%s9561_s5 + $0x13d0] sm:$0xf] }
 0x112   : > { %741 = vst [vmem:[%s9565_s6 + $0x3f8] sm:$0xf] %v740_v62  ;;  %v868_v62 = vld [vmem:[%s9561_s5 + $0x13e0] sm:$0xf] }
 0x113   : > { %743 = vst [vmem:[%s9565_s6 + $0x3fc] sm:$0xf] %v742_v63  ;;  %v870_v63 = vld [vmem:[%s9561_s5 + $0x13f0] sm:$0xf] }
 0x114   : > { %745 = vst [vmem:[%s9565_s6 + $0x400] sm:$0xf] %v744_v0  ;;  %v872_v0 = vld [vmem:[%s9561_s5 + $0x1400] sm:$0xf] }
 0x115   : > { %747 = vst [vmem:[%s9565_s6 + $0x404] sm:$0xf] %v746_v1  ;;  %v874_v1 = vld [vmem:[%s9561_s5 + $0x1410] sm:$0xf] }
 0x116   : > { %749 = vst [vmem:[%s9565_s6 + $0x408] sm:$0xf] %v748_v2  ;;  %v876_v2 = vld [vmem:[%s9561_s5 + $0x1420] sm:$0xf] }
 0x117   : > { %751 = vst [vmem:[%s9565_s6 + $0x40c] sm:$0xf] %v750_v3  ;;  %v878_v3 = vld [vmem:[%s9561_s5 + $0x1430] sm:$0xf] }
 0x118   : > { %753 = vst [vmem:[%s9565_s6 + $0x410] sm:$0xf] %v752_v4  ;;  %v880_v4 = vld [vmem:[%s9561_s5 + $0x1440] sm:$0xf] }
 0x119   : > { %755 = vst [vmem:[%s9565_s6 + $0x414] sm:$0xf] %v754_v5  ;;  %v882_v5 = vld [vmem:[%s9561_s5 + $0x1450] sm:$0xf] }
 0x11a   : > { %757 = vst [vmem:[%s9565_s6 + $0x418] sm:$0xf] %v756_v6  ;;  %v884_v6 = vld [vmem:[%s9561_s5 + $0x1460] sm:$0xf] }
 0x11b   : > { %759 = vst [vmem:[%s9565_s6 + $0x41c] sm:$0xf] %v758_v7  ;;  %v886_v7 = vld [vmem:[%s9561_s5 + $0x1470] sm:$0xf] }
 0x11c   : > { %761 = vst [vmem:[%s9565_s6 + $0x420] sm:$0xf] %v760_v8  ;;  %v888_v8 = vld [vmem:[%s9561_s5 + $0x1480] sm:$0xf] }
 0x11d   : > { %763 = vst [vmem:[%s9565_s6 + $0x424] sm:$0xf] %v762_v9  ;;  %v890_v9 = vld [vmem:[%s9561_s5 + $0x1490] sm:$0xf] }
 0x11e   : > { %765 = vst [vmem:[%s9565_s6 + $0x428] sm:$0xf] %v764_v10  ;;  %v892_v10 = vld [vmem:[%s9561_s5 + $0x14a0] sm:$0xf] }
 0x11f   : > { %767 = vst [vmem:[%s9565_s6 + $0x42c] sm:$0xf] %v766_v11  ;;  %v894_v11 = vld [vmem:[%s9561_s5 + $0x14b0] sm:$0xf] }
 0x120   : > { %769 = vst [vmem:[%s9565_s6 + $0x430] sm:$0xf] %v768_v12  ;;  %v896_v12 = vld [vmem:[%s9561_s5 + $0x14c0] sm:$0xf] }
 0x121   : > { %771 = vst [vmem:[%s9565_s6 + $0x434] sm:$0xf] %v770_v13  ;;  %v898_v13 = vld [vmem:[%s9561_s5 + $0x14d0] sm:$0xf] }
 0x122   : > { %773 = vst [vmem:[%s9565_s6 + $0x438] sm:$0xf] %v772_v14  ;;  %v900_v14 = vld [vmem:[%s9561_s5 + $0x14e0] sm:$0xf] }
 0x123   : > { %775 = vst [vmem:[%s9565_s6 + $0x43c] sm:$0xf] %v774_v15  ;;  %v902_v15 = vld [vmem:[%s9561_s5 + $0x14f0] sm:$0xf] }
 0x124   : > { %777 = vst [vmem:[%s9565_s6 + $0x440] sm:$0xf] %v776_v16  ;;  %v904_v16 = vld [vmem:[%s9561_s5 + $0x1500] sm:$0xf] }
 0x125   : > { %779 = vst [vmem:[%s9565_s6 + $0x444] sm:$0xf] %v778_v17  ;;  %v906_v17 = vld [vmem:[%s9561_s5 + $0x1510] sm:$0xf] }
 0x126   : > { %781 = vst [vmem:[%s9565_s6 + $0x448] sm:$0xf] %v780_v18  ;;  %v908_v18 = vld [vmem:[%s9561_s5 + $0x1520] sm:$0xf] }
 0x127   : > { %783 = vst [vmem:[%s9565_s6 + $0x44c] sm:$0xf] %v782_v19  ;;  %v910_v19 = vld [vmem:[%s9561_s5 + $0x1530] sm:$0xf] }
 0x128   : > { %785 = vst [vmem:[%s9565_s6 + $0x450] sm:$0xf] %v784_v20  ;;  %v912_v20 = vld [vmem:[%s9561_s5 + $0x1540] sm:$0xf] }
 0x129   : > { %787 = vst [vmem:[%s9565_s6 + $0x454] sm:$0xf] %v786_v21  ;;  %v914_v21 = vld [vmem:[%s9561_s5 + $0x1550] sm:$0xf] }
 0x12a   : > { %789 = vst [vmem:[%s9565_s6 + $0x458] sm:$0xf] %v788_v22  ;;  %v916_v22 = vld [vmem:[%s9561_s5 + $0x1560] sm:$0xf] }
 0x12b   : > { %791 = vst [vmem:[%s9565_s6 + $0x45c] sm:$0xf] %v790_v23  ;;  %v918_v23 = vld [vmem:[%s9561_s5 + $0x1570] sm:$0xf] }
 0x12c   : > { %793 = vst [vmem:[%s9565_s6 + $0x460] sm:$0xf] %v792_v24  ;;  %v920_v24 = vld [vmem:[%s9561_s5 + $0x1580] sm:$0xf] }
 0x12d   : > { %795 = vst [vmem:[%s9565_s6 + $0x464] sm:$0xf] %v794_v25  ;;  %v922_v25 = vld [vmem:[%s9561_s5 + $0x1590] sm:$0xf] }
 0x12e   : > { %797 = vst [vmem:[%s9565_s6 + $0x468] sm:$0xf] %v796_v26  ;;  %v924_v26 = vld [vmem:[%s9561_s5 + $0x15a0] sm:$0xf] }
 0x12f   : > { %799 = vst [vmem:[%s9565_s6 + $0x46c] sm:$0xf] %v798_v27  ;;  %v926_v27 = vld [vmem:[%s9561_s5 + $0x15b0] sm:$0xf] }
 0x130   : > { %801 = vst [vmem:[%s9565_s6 + $0x470] sm:$0xf] %v800_v28  ;;  %v928_v28 = vld [vmem:[%s9561_s5 + $0x15c0] sm:$0xf] }
 0x131   : > { %803 = vst [vmem:[%s9565_s6 + $0x474] sm:$0xf] %v802_v29  ;;  %v930_v29 = vld [vmem:[%s9561_s5 + $0x15d0] sm:$0xf] }
 0x132   : > { %805 = vst [vmem:[%s9565_s6 + $0x478] sm:$0xf] %v804_v30  ;;  %v932_v30 = vld [vmem:[%s9561_s5 + $0x15e0] sm:$0xf] }
 0x133   : > { %807 = vst [vmem:[%s9565_s6 + $0x47c] sm:$0xf] %v806_v31  ;;  %v934_v31 = vld [vmem:[%s9561_s5 + $0x15f0] sm:$0xf] }
 0x134   : > { %809 = vst [vmem:[%s9565_s6 + $0x480] sm:$0xf] %v808_v32  ;;  %v936_v32 = vld [vmem:[%s9561_s5 + $0x1600] sm:$0xf] }
 0x135   : > { %811 = vst [vmem:[%s9565_s6 + $0x484] sm:$0xf] %v810_v33  ;;  %v938_v33 = vld [vmem:[%s9561_s5 + $0x1610] sm:$0xf] }
 0x136   : > { %813 = vst [vmem:[%s9565_s6 + $0x488] sm:$0xf] %v812_v34  ;;  %v940_v34 = vld [vmem:[%s9561_s5 + $0x1620] sm:$0xf] }
 0x137   : > { %815 = vst [vmem:[%s9565_s6 + $0x48c] sm:$0xf] %v814_v35  ;;  %v942_v35 = vld [vmem:[%s9561_s5 + $0x1630] sm:$0xf] }
 0x138   : > { %817 = vst [vmem:[%s9565_s6 + $0x490] sm:$0xf] %v816_v36  ;;  %v944_v36 = vld [vmem:[%s9561_s5 + $0x1640] sm:$0xf] }
 0x139   : > { %819 = vst [vmem:[%s9565_s6 + $0x494] sm:$0xf] %v818_v37  ;;  %v946_v37 = vld [vmem:[%s9561_s5 + $0x1650] sm:$0xf] }
 0x13a   : > { %821 = vst [vmem:[%s9565_s6 + $0x498] sm:$0xf] %v820_v38  ;;  %v948_v38 = vld [vmem:[%s9561_s5 + $0x1660] sm:$0xf] }
 0x13b   : > { %823 = vst [vmem:[%s9565_s6 + $0x49c] sm:$0xf] %v822_v39  ;;  %v950_v39 = vld [vmem:[%s9561_s5 + $0x1670] sm:$0xf] }
 0x13c   : > { %825 = vst [vmem:[%s9565_s6 + $0x4a0] sm:$0xf] %v824_v40  ;;  %v952_v40 = vld [vmem:[%s9561_s5 + $0x1680] sm:$0xf] }
 0x13d   : > { %827 = vst [vmem:[%s9565_s6 + $0x4a4] sm:$0xf] %v826_v41  ;;  %v954_v41 = vld [vmem:[%s9561_s5 + $0x1690] sm:$0xf] }
 0x13e   : > { %829 = vst [vmem:[%s9565_s6 + $0x4a8] sm:$0xf] %v828_v42  ;;  %v956_v42 = vld [vmem:[%s9561_s5 + $0x16a0] sm:$0xf] }
 0x13f   : > { %831 = vst [vmem:[%s9565_s6 + $0x4ac] sm:$0xf] %v830_v43  ;;  %v958_v43 = vld [vmem:[%s9561_s5 + $0x16b0] sm:$0xf] }
 0x140   : > { %833 = vst [vmem:[%s9565_s6 + $0x4b0] sm:$0xf] %v832_v44  ;;  %v960_v44 = vld [vmem:[%s9561_s5 + $0x16c0] sm:$0xf] }
 0x141   : > { %835 = vst [vmem:[%s9565_s6 + $0x4b4] sm:$0xf] %v834_v45  ;;  %v962_v45 = vld [vmem:[%s9561_s5 + $0x16d0] sm:$0xf] }
 0x142   : > { %837 = vst [vmem:[%s9565_s6 + $0x4b8] sm:$0xf] %v836_v46  ;;  %v964_v46 = vld [vmem:[%s9561_s5 + $0x16e0] sm:$0xf] }
 0x143   : > { %839 = vst [vmem:[%s9565_s6 + $0x4bc] sm:$0xf] %v838_v47  ;;  %v966_v47 = vld [vmem:[%s9561_s5 + $0x16f0] sm:$0xf] }
 0x144   : > { %841 = vst [vmem:[%s9565_s6 + $0x4c0] sm:$0xf] %v840_v48  ;;  %v968_v48 = vld [vmem:[%s9561_s5 + $0x1700] sm:$0xf] }
 0x145   : > { %843 = vst [vmem:[%s9565_s6 + $0x4c4] sm:$0xf] %v842_v49  ;;  %v970_v49 = vld [vmem:[%s9561_s5 + $0x1710] sm:$0xf] }
 0x146   : > { %845 = vst [vmem:[%s9565_s6 + $0x4c8] sm:$0xf] %v844_v50  ;;  %v972_v50 = vld [vmem:[%s9561_s5 + $0x1720] sm:$0xf] }
 0x147   : > { %847 = vst [vmem:[%s9565_s6 + $0x4cc] sm:$0xf] %v846_v51  ;;  %v974_v51 = vld [vmem:[%s9561_s5 + $0x1730] sm:$0xf] }
 0x148   : > { %849 = vst [vmem:[%s9565_s6 + $0x4d0] sm:$0xf] %v848_v52  ;;  %v976_v52 = vld [vmem:[%s9561_s5 + $0x1740] sm:$0xf] }
 0x149   : > { %851 = vst [vmem:[%s9565_s6 + $0x4d4] sm:$0xf] %v850_v53  ;;  %v978_v53 = vld [vmem:[%s9561_s5 + $0x1750] sm:$0xf] }
 0x14a   : > { %853 = vst [vmem:[%s9565_s6 + $0x4d8] sm:$0xf] %v852_v54  ;;  %v980_v54 = vld [vmem:[%s9561_s5 + $0x1760] sm:$0xf] }
 0x14b   : > { %855 = vst [vmem:[%s9565_s6 + $0x4dc] sm:$0xf] %v854_v55  ;;  %v982_v55 = vld [vmem:[%s9561_s5 + $0x1770] sm:$0xf] }
 0x14c   : > { %857 = vst [vmem:[%s9565_s6 + $0x4e0] sm:$0xf] %v856_v56  ;;  %v984_v56 = vld [vmem:[%s9561_s5 + $0x1780] sm:$0xf] }
 0x14d   : > { %859 = vst [vmem:[%s9565_s6 + $0x4e4] sm:$0xf] %v858_v57  ;;  %v986_v57 = vld [vmem:[%s9561_s5 + $0x1790] sm:$0xf] }
 0x14e   : > { %861 = vst [vmem:[%s9565_s6 + $0x4e8] sm:$0xf] %v860_v58  ;;  %v988_v58 = vld [vmem:[%s9561_s5 + $0x17a0] sm:$0xf] }
 0x14f   : > { %863 = vst [vmem:[%s9565_s6 + $0x4ec] sm:$0xf] %v862_v59  ;;  %v990_v59 = vld [vmem:[%s9561_s5 + $0x17b0] sm:$0xf] }
 0x150   : > { %865 = vst [vmem:[%s9565_s6 + $0x4f0] sm:$0xf] %v864_v60  ;;  %v992_v60 = vld [vmem:[%s9561_s5 + $0x17c0] sm:$0xf] }
 0x151   : > { %867 = vst [vmem:[%s9565_s6 + $0x4f4] sm:$0xf] %v866_v61  ;;  %v994_v61 = vld [vmem:[%s9561_s5 + $0x17d0] sm:$0xf] }
 0x152   : > { %869 = vst [vmem:[%s9565_s6 + $0x4f8] sm:$0xf] %v868_v62  ;;  %v996_v62 = vld [vmem:[%s9561_s5 + $0x17e0] sm:$0xf] }
 0x153   : > { %871 = vst [vmem:[%s9565_s6 + $0x4fc] sm:$0xf] %v870_v63  ;;  %v998_v63 = vld [vmem:[%s9561_s5 + $0x17f0] sm:$0xf] }
 0x154   : > { %873 = vst [vmem:[%s9565_s6 + $0x500] sm:$0xf] %v872_v0  ;;  %v1000_v0 = vld [vmem:[%s9561_s5 + $0x1800] sm:$0xf] }
 0x155   : > { %875 = vst [vmem:[%s9565_s6 + $0x504] sm:$0xf] %v874_v1  ;;  %v1002_v1 = vld [vmem:[%s9561_s5 + $0x1810] sm:$0xf] }
 0x156   : > { %877 = vst [vmem:[%s9565_s6 + $0x508] sm:$0xf] %v876_v2  ;;  %v1004_v2 = vld [vmem:[%s9561_s5 + $0x1820] sm:$0xf] }
 0x157   : > { %879 = vst [vmem:[%s9565_s6 + $0x50c] sm:$0xf] %v878_v3  ;;  %v1006_v3 = vld [vmem:[%s9561_s5 + $0x1830] sm:$0xf] }
 0x158   : > { %881 = vst [vmem:[%s9565_s6 + $0x510] sm:$0xf] %v880_v4  ;;  %v1008_v4 = vld [vmem:[%s9561_s5 + $0x1840] sm:$0xf] }
 0x159   : > { %883 = vst [vmem:[%s9565_s6 + $0x514] sm:$0xf] %v882_v5  ;;  %v1010_v5 = vld [vmem:[%s9561_s5 + $0x1850] sm:$0xf] }
 0x15a   : > { %885 = vst [vmem:[%s9565_s6 + $0x518] sm:$0xf] %v884_v6  ;;  %v1012_v6 = vld [vmem:[%s9561_s5 + $0x1860] sm:$0xf] }
 0x15b   : > { %887 = vst [vmem:[%s9565_s6 + $0x51c] sm:$0xf] %v886_v7  ;;  %v1014_v7 = vld [vmem:[%s9561_s5 + $0x1870] sm:$0xf] }
 0x15c   : > { %889 = vst [vmem:[%s9565_s6 + $0x520] sm:$0xf] %v888_v8  ;;  %v1016_v8 = vld [vmem:[%s9561_s5 + $0x1880] sm:$0xf] }
 0x15d   : > { %891 = vst [vmem:[%s9565_s6 + $0x524] sm:$0xf] %v890_v9  ;;  %v1018_v9 = vld [vmem:[%s9561_s5 + $0x1890] sm:$0xf] }
 0x15e   : > { %893 = vst [vmem:[%s9565_s6 + $0x528] sm:$0xf] %v892_v10  ;;  %v1020_v10 = vld [vmem:[%s9561_s5 + $0x18a0] sm:$0xf] }
 0x15f   : > { %895 = vst [vmem:[%s9565_s6 + $0x52c] sm:$0xf] %v894_v11  ;;  %v1022_v11 = vld [vmem:[%s9561_s5 + $0x18b0] sm:$0xf] }
 0x160   : > { %897 = vst [vmem:[%s9565_s6 + $0x530] sm:$0xf] %v896_v12  ;;  %v1024_v12 = vld [vmem:[%s9561_s5 + $0x18c0] sm:$0xf] }
 0x161   : > { %899 = vst [vmem:[%s9565_s6 + $0x534] sm:$0xf] %v898_v13  ;;  %v1026_v13 = vld [vmem:[%s9561_s5 + $0x18d0] sm:$0xf] }
 0x162   : > { %901 = vst [vmem:[%s9565_s6 + $0x538] sm:$0xf] %v900_v14  ;;  %v1028_v14 = vld [vmem:[%s9561_s5 + $0x18e0] sm:$0xf] }
 0x163   : > { %903 = vst [vmem:[%s9565_s6 + $0x53c] sm:$0xf] %v902_v15  ;;  %v1030_v15 = vld [vmem:[%s9561_s5 + $0x18f0] sm:$0xf] }
 0x164   : > { %905 = vst [vmem:[%s9565_s6 + $0x540] sm:$0xf] %v904_v16  ;;  %v1032_v16 = vld [vmem:[%s9561_s5 + $0x1900] sm:$0xf] }
 0x165   : > { %907 = vst [vmem:[%s9565_s6 + $0x544] sm:$0xf] %v906_v17  ;;  %v1034_v17 = vld [vmem:[%s9561_s5 + $0x1910] sm:$0xf] }
 0x166   : > { %909 = vst [vmem:[%s9565_s6 + $0x548] sm:$0xf] %v908_v18  ;;  %v1036_v18 = vld [vmem:[%s9561_s5 + $0x1920] sm:$0xf] }
 0x167   : > { %911 = vst [vmem:[%s9565_s6 + $0x54c] sm:$0xf] %v910_v19  ;;  %v1038_v19 = vld [vmem:[%s9561_s5 + $0x1930] sm:$0xf] }
 0x168   : > { %913 = vst [vmem:[%s9565_s6 + $0x550] sm:$0xf] %v912_v20  ;;  %v1040_v20 = vld [vmem:[%s9561_s5 + $0x1940] sm:$0xf] }
 0x169   : > { %915 = vst [vmem:[%s9565_s6 + $0x554] sm:$0xf] %v914_v21  ;;  %v1042_v21 = vld [vmem:[%s9561_s5 + $0x1950] sm:$0xf] }
 0x16a   : > { %917 = vst [vmem:[%s9565_s6 + $0x558] sm:$0xf] %v916_v22  ;;  %v1044_v22 = vld [vmem:[%s9561_s5 + $0x1960] sm:$0xf] }
 0x16b   : > { %919 = vst [vmem:[%s9565_s6 + $0x55c] sm:$0xf] %v918_v23  ;;  %v1046_v23 = vld [vmem:[%s9561_s5 + $0x1970] sm:$0xf] }
 0x16c   : > { %921 = vst [vmem:[%s9565_s6 + $0x560] sm:$0xf] %v920_v24  ;;  %v1048_v24 = vld [vmem:[%s9561_s5 + $0x1980] sm:$0xf] }
 0x16d   : > { %923 = vst [vmem:[%s9565_s6 + $0x564] sm:$0xf] %v922_v25  ;;  %v1050_v25 = vld [vmem:[%s9561_s5 + $0x1990] sm:$0xf] }
 0x16e   : > { %925 = vst [vmem:[%s9565_s6 + $0x568] sm:$0xf] %v924_v26  ;;  %v1052_v26 = vld [vmem:[%s9561_s5 + $0x19a0] sm:$0xf] }
 0x16f   : > { %927 = vst [vmem:[%s9565_s6 + $0x56c] sm:$0xf] %v926_v27  ;;  %v1054_v27 = vld [vmem:[%s9561_s5 + $0x19b0] sm:$0xf] }
 0x170   : > { %929 = vst [vmem:[%s9565_s6 + $0x570] sm:$0xf] %v928_v28  ;;  %v1056_v28 = vld [vmem:[%s9561_s5 + $0x19c0] sm:$0xf] }
 0x171   : > { %931 = vst [vmem:[%s9565_s6 + $0x574] sm:$0xf] %v930_v29  ;;  %v1058_v29 = vld [vmem:[%s9561_s5 + $0x19d0] sm:$0xf] }
 0x172   : > { %933 = vst [vmem:[%s9565_s6 + $0x578] sm:$0xf] %v932_v30  ;;  %v1060_v30 = vld [vmem:[%s9561_s5 + $0x19e0] sm:$0xf] }
 0x173   : > { %935 = vst [vmem:[%s9565_s6 + $0x57c] sm:$0xf] %v934_v31  ;;  %v1062_v31 = vld [vmem:[%s9561_s5 + $0x19f0] sm:$0xf] }
 0x174   : > { %937 = vst [vmem:[%s9565_s6 + $0x580] sm:$0xf] %v936_v32  ;;  %v1064_v32 = vld [vmem:[%s9561_s5 + $0x1a00] sm:$0xf] }
 0x175   : > { %939 = vst [vmem:[%s9565_s6 + $0x584] sm:$0xf] %v938_v33  ;;  %v1066_v33 = vld [vmem:[%s9561_s5 + $0x1a10] sm:$0xf] }
 0x176   : > { %941 = vst [vmem:[%s9565_s6 + $0x588] sm:$0xf] %v940_v34  ;;  %v1068_v34 = vld [vmem:[%s9561_s5 + $0x1a20] sm:$0xf] }
 0x177   : > { %943 = vst [vmem:[%s9565_s6 + $0x58c] sm:$0xf] %v942_v35  ;;  %v1070_v35 = vld [vmem:[%s9561_s5 + $0x1a30] sm:$0xf] }
 0x178   : > { %945 = vst [vmem:[%s9565_s6 + $0x590] sm:$0xf] %v944_v36  ;;  %v1072_v36 = vld [vmem:[%s9561_s5 + $0x1a40] sm:$0xf] }
 0x179   : > { %947 = vst [vmem:[%s9565_s6 + $0x594] sm:$0xf] %v946_v37  ;;  %v1074_v37 = vld [vmem:[%s9561_s5 + $0x1a50] sm:$0xf] }
 0x17a   : > { %949 = vst [vmem:[%s9565_s6 + $0x598] sm:$0xf] %v948_v38  ;;  %v1076_v38 = vld [vmem:[%s9561_s5 + $0x1a60] sm:$0xf] }
 0x17b   : > { %951 = vst [vmem:[%s9565_s6 + $0x59c] sm:$0xf] %v950_v39  ;;  %v1078_v39 = vld [vmem:[%s9561_s5 + $0x1a70] sm:$0xf] }
 0x17c   : > { %953 = vst [vmem:[%s9565_s6 + $0x5a0] sm:$0xf] %v952_v40  ;;  %v1080_v40 = vld [vmem:[%s9561_s5 + $0x1a80] sm:$0xf] }
 0x17d   : > { %955 = vst [vmem:[%s9565_s6 + $0x5a4] sm:$0xf] %v954_v41  ;;  %v1082_v41 = vld [vmem:[%s9561_s5 + $0x1a90] sm:$0xf] }
 0x17e   : > { %957 = vst [vmem:[%s9565_s6 + $0x5a8] sm:$0xf] %v956_v42  ;;  %v1084_v42 = vld [vmem:[%s9561_s5 + $0x1aa0] sm:$0xf] }
 0x17f   : > { %959 = vst [vmem:[%s9565_s6 + $0x5ac] sm:$0xf] %v958_v43  ;;  %v1086_v43 = vld [vmem:[%s9561_s5 + $0x1ab0] sm:$0xf] }
 0x180   : > { %961 = vst [vmem:[%s9565_s6 + $0x5b0] sm:$0xf] %v960_v44  ;;  %v1088_v44 = vld [vmem:[%s9561_s5 + $0x1ac0] sm:$0xf] }
 0x181   : > { %963 = vst [vmem:[%s9565_s6 + $0x5b4] sm:$0xf] %v962_v45  ;;  %v1090_v45 = vld [vmem:[%s9561_s5 + $0x1ad0] sm:$0xf] }
 0x182   : > { %965 = vst [vmem:[%s9565_s6 + $0x5b8] sm:$0xf] %v964_v46  ;;  %v1092_v46 = vld [vmem:[%s9561_s5 + $0x1ae0] sm:$0xf] }
 0x183   : > { %967 = vst [vmem:[%s9565_s6 + $0x5bc] sm:$0xf] %v966_v47  ;;  %v1094_v47 = vld [vmem:[%s9561_s5 + $0x1af0] sm:$0xf] }
 0x184   : > { %969 = vst [vmem:[%s9565_s6 + $0x5c0] sm:$0xf] %v968_v48  ;;  %v1096_v48 = vld [vmem:[%s9561_s5 + $0x1b00] sm:$0xf] }
 0x185   : > { %971 = vst [vmem:[%s9565_s6 + $0x5c4] sm:$0xf] %v970_v49  ;;  %v1098_v49 = vld [vmem:[%s9561_s5 + $0x1b10] sm:$0xf] }
 0x186   : > { %973 = vst [vmem:[%s9565_s6 + $0x5c8] sm:$0xf] %v972_v50  ;;  %v1100_v50 = vld [vmem:[%s9561_s5 + $0x1b20] sm:$0xf] }
 0x187   : > { %975 = vst [vmem:[%s9565_s6 + $0x5cc] sm:$0xf] %v974_v51  ;;  %v1102_v51 = vld [vmem:[%s9561_s5 + $0x1b30] sm:$0xf] }
 0x188   : > { %977 = vst [vmem:[%s9565_s6 + $0x5d0] sm:$0xf] %v976_v52  ;;  %v1104_v52 = vld [vmem:[%s9561_s5 + $0x1b40] sm:$0xf] }
 0x189   : > { %979 = vst [vmem:[%s9565_s6 + $0x5d4] sm:$0xf] %v978_v53  ;;  %v1106_v53 = vld [vmem:[%s9561_s5 + $0x1b50] sm:$0xf] }
 0x18a   : > { %981 = vst [vmem:[%s9565_s6 + $0x5d8] sm:$0xf] %v980_v54  ;;  %v1108_v54 = vld [vmem:[%s9561_s5 + $0x1b60] sm:$0xf] }
 0x18b   : > { %983 = vst [vmem:[%s9565_s6 + $0x5dc] sm:$0xf] %v982_v55  ;;  %v1110_v55 = vld [vmem:[%s9561_s5 + $0x1b70] sm:$0xf] }
 0x18c   : > { %985 = vst [vmem:[%s9565_s6 + $0x5e0] sm:$0xf] %v984_v56  ;;  %v1112_v56 = vld [vmem:[%s9561_s5 + $0x1b80] sm:$0xf] }
 0x18d   : > { %987 = vst [vmem:[%s9565_s6 + $0x5e4] sm:$0xf] %v986_v57  ;;  %v1114_v57 = vld [vmem:[%s9561_s5 + $0x1b90] sm:$0xf] }
 0x18e   : > { %989 = vst [vmem:[%s9565_s6 + $0x5e8] sm:$0xf] %v988_v58  ;;  %v1116_v58 = vld [vmem:[%s9561_s5 + $0x1ba0] sm:$0xf] }
 0x18f   : > { %991 = vst [vmem:[%s9565_s6 + $0x5ec] sm:$0xf] %v990_v59  ;;  %v1118_v59 = vld [vmem:[%s9561_s5 + $0x1bb0] sm:$0xf] }
 0x190   : > { %993 = vst [vmem:[%s9565_s6 + $0x5f0] sm:$0xf] %v992_v60  ;;  %v1120_v60 = vld [vmem:[%s9561_s5 + $0x1bc0] sm:$0xf] }
 0x191   : > { %995 = vst [vmem:[%s9565_s6 + $0x5f4] sm:$0xf] %v994_v61  ;;  %v1122_v61 = vld [vmem:[%s9561_s5 + $0x1bd0] sm:$0xf] }
 0x192   : > { %997 = vst [vmem:[%s9565_s6 + $0x5f8] sm:$0xf] %v996_v62  ;;  %v1124_v62 = vld [vmem:[%s9561_s5 + $0x1be0] sm:$0xf] }
 0x193   : > { %999 = vst [vmem:[%s9565_s6 + $0x5fc] sm:$0xf] %v998_v63  ;;  %v1126_v63 = vld [vmem:[%s9561_s5 + $0x1bf0] sm:$0xf] }
 0x194   : > { %1001 = vst [vmem:[%s9565_s6 + $0x600] sm:$0xf] %v1000_v0  ;;  %v1128_v0 = vld [vmem:[%s9561_s5 + $0x1c00] sm:$0xf] }
 0x195   : > { %1003 = vst [vmem:[%s9565_s6 + $0x604] sm:$0xf] %v1002_v1  ;;  %v1130_v1 = vld [vmem:[%s9561_s5 + $0x1c10] sm:$0xf] }
 0x196   : > { %1005 = vst [vmem:[%s9565_s6 + $0x608] sm:$0xf] %v1004_v2  ;;  %v1132_v2 = vld [vmem:[%s9561_s5 + $0x1c20] sm:$0xf] }
 0x197   : > { %1007 = vst [vmem:[%s9565_s6 + $0x60c] sm:$0xf] %v1006_v3  ;;  %v1134_v3 = vld [vmem:[%s9561_s5 + $0x1c30] sm:$0xf] }
 0x198   : > { %1009 = vst [vmem:[%s9565_s6 + $0x610] sm:$0xf] %v1008_v4  ;;  %v1136_v4 = vld [vmem:[%s9561_s5 + $0x1c40] sm:$0xf] }
 0x199   : > { %1011 = vst [vmem:[%s9565_s6 + $0x614] sm:$0xf] %v1010_v5  ;;  %v1138_v5 = vld [vmem:[%s9561_s5 + $0x1c50] sm:$0xf] }
 0x19a   : > { %1013 = vst [vmem:[%s9565_s6 + $0x618] sm:$0xf] %v1012_v6  ;;  %v1140_v6 = vld [vmem:[%s9561_s5 + $0x1c60] sm:$0xf] }
 0x19b   : > { %1015 = vst [vmem:[%s9565_s6 + $0x61c] sm:$0xf] %v1014_v7  ;;  %v1142_v7 = vld [vmem:[%s9561_s5 + $0x1c70] sm:$0xf] }
 0x19c   : > { %1017 = vst [vmem:[%s9565_s6 + $0x620] sm:$0xf] %v1016_v8  ;;  %v1144_v8 = vld [vmem:[%s9561_s5 + $0x1c80] sm:$0xf] }
 0x19d   : > { %1019 = vst [vmem:[%s9565_s6 + $0x624] sm:$0xf] %v1018_v9  ;;  %v1146_v9 = vld [vmem:[%s9561_s5 + $0x1c90] sm:$0xf] }
 0x19e   : > { %1021 = vst [vmem:[%s9565_s6 + $0x628] sm:$0xf] %v1020_v10  ;;  %v1148_v10 = vld [vmem:[%s9561_s5 + $0x1ca0] sm:$0xf] }
 0x19f   : > { %1023 = vst [vmem:[%s9565_s6 + $0x62c] sm:$0xf] %v1022_v11  ;;  %v1150_v11 = vld [vmem:[%s9561_s5 + $0x1cb0] sm:$0xf] }
 0x1a0   : > { %1025 = vst [vmem:[%s9565_s6 + $0x630] sm:$0xf] %v1024_v12  ;;  %v1152_v12 = vld [vmem:[%s9561_s5 + $0x1cc0] sm:$0xf] }
 0x1a1   : > { %1027 = vst [vmem:[%s9565_s6 + $0x634] sm:$0xf] %v1026_v13  ;;  %v1154_v13 = vld [vmem:[%s9561_s5 + $0x1cd0] sm:$0xf] }
 0x1a2   : > { %1029 = vst [vmem:[%s9565_s6 + $0x638] sm:$0xf] %v1028_v14  ;;  %v1156_v14 = vld [vmem:[%s9561_s5 + $0x1ce0] sm:$0xf] }
 0x1a3   : > { %1031 = vst [vmem:[%s9565_s6 + $0x63c] sm:$0xf] %v1030_v15  ;;  %v1158_v15 = vld [vmem:[%s9561_s5 + $0x1cf0] sm:$0xf] }
 0x1a4   : > { %1033 = vst [vmem:[%s9565_s6 + $0x640] sm:$0xf] %v1032_v16  ;;  %v1160_v16 = vld [vmem:[%s9561_s5 + $0x1d00] sm:$0xf] }
 0x1a5   : > { %1035 = vst [vmem:[%s9565_s6 + $0x644] sm:$0xf] %v1034_v17  ;;  %v1162_v17 = vld [vmem:[%s9561_s5 + $0x1d10] sm:$0xf] }
 0x1a6   : > { %1037 = vst [vmem:[%s9565_s6 + $0x648] sm:$0xf] %v1036_v18  ;;  %v1164_v18 = vld [vmem:[%s9561_s5 + $0x1d20] sm:$0xf] }
 0x1a7   : > { %1039 = vst [vmem:[%s9565_s6 + $0x64c] sm:$0xf] %v1038_v19  ;;  %v1166_v19 = vld [vmem:[%s9561_s5 + $0x1d30] sm:$0xf] }
 0x1a8   : > { %1041 = vst [vmem:[%s9565_s6 + $0x650] sm:$0xf] %v1040_v20  ;;  %v1168_v20 = vld [vmem:[%s9561_s5 + $0x1d40] sm:$0xf] }
 0x1a9   : > { %1043 = vst [vmem:[%s9565_s6 + $0x654] sm:$0xf] %v1042_v21  ;;  %v1170_v21 = vld [vmem:[%s9561_s5 + $0x1d50] sm:$0xf] }
 0x1aa   : > { %1045 = vst [vmem:[%s9565_s6 + $0x658] sm:$0xf] %v1044_v22  ;;  %v1172_v22 = vld [vmem:[%s9561_s5 + $0x1d60] sm:$0xf] }
 0x1ab   : > { %1047 = vst [vmem:[%s9565_s6 + $0x65c] sm:$0xf] %v1046_v23  ;;  %v1174_v23 = vld [vmem:[%s9561_s5 + $0x1d70] sm:$0xf] }
 0x1ac   : > { %1049 = vst [vmem:[%s9565_s6 + $0x660] sm:$0xf] %v1048_v24  ;;  %v1176_v24 = vld [vmem:[%s9561_s5 + $0x1d80] sm:$0xf] }
 0x1ad   : > { %1051 = vst [vmem:[%s9565_s6 + $0x664] sm:$0xf] %v1050_v25  ;;  %v1178_v25 = vld [vmem:[%s9561_s5 + $0x1d90] sm:$0xf] }
 0x1ae   : > { %1053 = vst [vmem:[%s9565_s6 + $0x668] sm:$0xf] %v1052_v26  ;;  %v1180_v26 = vld [vmem:[%s9561_s5 + $0x1da0] sm:$0xf] }
 0x1af   : > { %1055 = vst [vmem:[%s9565_s6 + $0x66c] sm:$0xf] %v1054_v27  ;;  %v1182_v27 = vld [vmem:[%s9561_s5 + $0x1db0] sm:$0xf] }
 0x1b0   : > { %1057 = vst [vmem:[%s9565_s6 + $0x670] sm:$0xf] %v1056_v28  ;;  %v1184_v28 = vld [vmem:[%s9561_s5 + $0x1dc0] sm:$0xf] }
 0x1b1   : > { %1059 = vst [vmem:[%s9565_s6 + $0x674] sm:$0xf] %v1058_v29  ;;  %v1186_v29 = vld [vmem:[%s9561_s5 + $0x1dd0] sm:$0xf] }
 0x1b2   : > { %1061 = vst [vmem:[%s9565_s6 + $0x678] sm:$0xf] %v1060_v30  ;;  %v1188_v30 = vld [vmem:[%s9561_s5 + $0x1de0] sm:$0xf] }
 0x1b3   : > { %1063 = vst [vmem:[%s9565_s6 + $0x67c] sm:$0xf] %v1062_v31  ;;  %v1190_v31 = vld [vmem:[%s9561_s5 + $0x1df0] sm:$0xf] }
 0x1b4   : > { %1065 = vst [vmem:[%s9565_s6 + $0x680] sm:$0xf] %v1064_v32  ;;  %v1192_v32 = vld [vmem:[%s9561_s5 + $0x1e00] sm:$0xf] }
 0x1b5   : > { %1067 = vst [vmem:[%s9565_s6 + $0x684] sm:$0xf] %v1066_v33  ;;  %v1194_v33 = vld [vmem:[%s9561_s5 + $0x1e10] sm:$0xf] }
 0x1b6   : > { %1069 = vst [vmem:[%s9565_s6 + $0x688] sm:$0xf] %v1068_v34  ;;  %v1196_v34 = vld [vmem:[%s9561_s5 + $0x1e20] sm:$0xf] }
 0x1b7   : > { %1071 = vst [vmem:[%s9565_s6 + $0x68c] sm:$0xf] %v1070_v35  ;;  %v1198_v35 = vld [vmem:[%s9561_s5 + $0x1e30] sm:$0xf] }
 0x1b8   : > { %1073 = vst [vmem:[%s9565_s6 + $0x690] sm:$0xf] %v1072_v36  ;;  %v1200_v36 = vld [vmem:[%s9561_s5 + $0x1e40] sm:$0xf] }
 0x1b9   : > { %1075 = vst [vmem:[%s9565_s6 + $0x694] sm:$0xf] %v1074_v37  ;;  %v1202_v37 = vld [vmem:[%s9561_s5 + $0x1e50] sm:$0xf] }
 0x1ba   : > { %1077 = vst [vmem:[%s9565_s6 + $0x698] sm:$0xf] %v1076_v38  ;;  %v1204_v38 = vld [vmem:[%s9561_s5 + $0x1e60] sm:$0xf] }
 0x1bb   : > { %1079 = vst [vmem:[%s9565_s6 + $0x69c] sm:$0xf] %v1078_v39  ;;  %v1206_v39 = vld [vmem:[%s9561_s5 + $0x1e70] sm:$0xf] }
 0x1bc   : > { %1081 = vst [vmem:[%s9565_s6 + $0x6a0] sm:$0xf] %v1080_v40  ;;  %v1208_v40 = vld [vmem:[%s9561_s5 + $0x1e80] sm:$0xf] }
 0x1bd   : > { %1083 = vst [vmem:[%s9565_s6 + $0x6a4] sm:$0xf] %v1082_v41  ;;  %v1210_v41 = vld [vmem:[%s9561_s5 + $0x1e90] sm:$0xf] }
 0x1be   : > { %1085 = vst [vmem:[%s9565_s6 + $0x6a8] sm:$0xf] %v1084_v42  ;;  %v1212_v42 = vld [vmem:[%s9561_s5 + $0x1ea0] sm:$0xf] }
 0x1bf   : > { %1087 = vst [vmem:[%s9565_s6 + $0x6ac] sm:$0xf] %v1086_v43  ;;  %v1214_v43 = vld [vmem:[%s9561_s5 + $0x1eb0] sm:$0xf] }
 0x1c0   : > { %1089 = vst [vmem:[%s9565_s6 + $0x6b0] sm:$0xf] %v1088_v44  ;;  %v1216_v44 = vld [vmem:[%s9561_s5 + $0x1ec0] sm:$0xf] }
 0x1c1   : > { %1091 = vst [vmem:[%s9565_s6 + $0x6b4] sm:$0xf] %v1090_v45  ;;  %v1218_v45 = vld [vmem:[%s9561_s5 + $0x1ed0] sm:$0xf] }
 0x1c2   : > { %1093 = vst [vmem:[%s9565_s6 + $0x6b8] sm:$0xf] %v1092_v46  ;;  %v1220_v46 = vld [vmem:[%s9561_s5 + $0x1ee0] sm:$0xf] }
 0x1c3   : > { %1095 = vst [vmem:[%s9565_s6 + $0x6bc] sm:$0xf] %v1094_v47  ;;  %v1222_v47 = vld [vmem:[%s9561_s5 + $0x1ef0] sm:$0xf] }
 0x1c4   : > { %1097 = vst [vmem:[%s9565_s6 + $0x6c0] sm:$0xf] %v1096_v48  ;;  %v1224_v48 = vld [vmem:[%s9561_s5 + $0x1f00] sm:$0xf] }
 0x1c5   : > { %1099 = vst [vmem:[%s9565_s6 + $0x6c4] sm:$0xf] %v1098_v49  ;;  %v1226_v49 = vld [vmem:[%s9561_s5 + $0x1f10] sm:$0xf] }
 0x1c6   : > { %1101 = vst [vmem:[%s9565_s6 + $0x6c8] sm:$0xf] %v1100_v50  ;;  %v1228_v50 = vld [vmem:[%s9561_s5 + $0x1f20] sm:$0xf] }
 0x1c7   : > { %1103 = vst [vmem:[%s9565_s6 + $0x6cc] sm:$0xf] %v1102_v51  ;;  %v1230_v51 = vld [vmem:[%s9561_s5 + $0x1f30] sm:$0xf] }
 0x1c8   : > { %1105 = vst [vmem:[%s9565_s6 + $0x6d0] sm:$0xf] %v1104_v52  ;;  %v1232_v52 = vld [vmem:[%s9561_s5 + $0x1f40] sm:$0xf] }
 0x1c9   : > { %1107 = vst [vmem:[%s9565_s6 + $0x6d4] sm:$0xf] %v1106_v53  ;;  %v1234_v53 = vld [vmem:[%s9561_s5 + $0x1f50] sm:$0xf] }
 0x1ca   : > { %1109 = vst [vmem:[%s9565_s6 + $0x6d8] sm:$0xf] %v1108_v54  ;;  %v1236_v54 = vld [vmem:[%s9561_s5 + $0x1f60] sm:$0xf] }
 0x1cb   : > { %1111 = vst [vmem:[%s9565_s6 + $0x6dc] sm:$0xf] %v1110_v55  ;;  %v1238_v55 = vld [vmem:[%s9561_s5 + $0x1f70] sm:$0xf] }
 0x1cc   : > { %1113 = vst [vmem:[%s9565_s6 + $0x6e0] sm:$0xf] %v1112_v56  ;;  %v1240_v56 = vld [vmem:[%s9561_s5 + $0x1f80] sm:$0xf] }
 0x1cd   : > { %1115 = vst [vmem:[%s9565_s6 + $0x6e4] sm:$0xf] %v1114_v57  ;;  %v1242_v57 = vld [vmem:[%s9561_s5 + $0x1f90] sm:$0xf] }
 0x1ce   : > { %1117 = vst [vmem:[%s9565_s6 + $0x6e8] sm:$0xf] %v1116_v58  ;;  %v1244_v58 = vld [vmem:[%s9561_s5 + $0x1fa0] sm:$0xf] }
 0x1cf   : > { %1119 = vst [vmem:[%s9565_s6 + $0x6ec] sm:$0xf] %v1118_v59  ;;  %v1246_v59 = vld [vmem:[%s9561_s5 + $0x1fb0] sm:$0xf] }
 0x1d0   : > { %1121 = vst [vmem:[%s9565_s6 + $0x6f0] sm:$0xf] %v1120_v60  ;;  %v1248_v60 = vld [vmem:[%s9561_s5 + $0x1fc0] sm:$0xf] }
 0x1d1   : > { %1123 = vst [vmem:[%s9565_s6 + $0x6f4] sm:$0xf] %v1122_v61  ;;  %v1250_v61 = vld [vmem:[%s9561_s5 + $0x1fd0] sm:$0xf] }
 0x1d2   : > { %1125 = vst [vmem:[%s9565_s6 + $0x6f8] sm:$0xf] %v1124_v62  ;;  %v1252_v62 = vld [vmem:[%s9561_s5 + $0x1fe0] sm:$0xf] }
 0x1d3   : > { %1127 = vst [vmem:[%s9565_s6 + $0x6fc] sm:$0xf] %v1126_v63  ;;  %v1254_v63 = vld [vmem:[%s9561_s5 + $0x1ff0] sm:$0xf] }
 0x1d4   : > { %1129 = vst [vmem:[%s9565_s6 + $0x700] sm:$0xf] %v1128_v0 }
 0x1d5   : > { %1131 = vst [vmem:[%s9565_s6 + $0x704] sm:$0xf] %v1130_v1 }
 0x1d6   : > { %1133 = vst [vmem:[%s9565_s6 + $0x708] sm:$0xf] %v1132_v2 }
 0x1d7   : > { %1135 = vst [vmem:[%s9565_s6 + $0x70c] sm:$0xf] %v1134_v3 }
 0x1d8   : > { %1137 = vst [vmem:[%s9565_s6 + $0x710] sm:$0xf] %v1136_v4 }
 0x1d9   : > { %1139 = vst [vmem:[%s9565_s6 + $0x714] sm:$0xf] %v1138_v5 }
 0x1da   : > { %1141 = vst [vmem:[%s9565_s6 + $0x718] sm:$0xf] %v1140_v6 }
 0x1db   : > { %1143 = vst [vmem:[%s9565_s6 + $0x71c] sm:$0xf] %v1142_v7 }
 0x1dc   : > { %1145 = vst [vmem:[%s9565_s6 + $0x720] sm:$0xf] %v1144_v8 }
 0x1dd   : > { %1147 = vst [vmem:[%s9565_s6 + $0x724] sm:$0xf] %v1146_v9 }
 0x1de   : > { %1149 = vst [vmem:[%s9565_s6 + $0x728] sm:$0xf] %v1148_v10 }
 0x1df   : > { %1151 = vst [vmem:[%s9565_s6 + $0x72c] sm:$0xf] %v1150_v11 }
 0x1e0   : > { %1153 = vst [vmem:[%s9565_s6 + $0x730] sm:$0xf] %v1152_v12 }
 0x1e1   : > { %1155 = vst [vmem:[%s9565_s6 + $0x734] sm:$0xf] %v1154_v13 }
 0x1e2   : > { %1157 = vst [vmem:[%s9565_s6 + $0x738] sm:$0xf] %v1156_v14 }
 0x1e3   : > { %1159 = vst [vmem:[%s9565_s6 + $0x73c] sm:$0xf] %v1158_v15 }
 0x1e4   : > { %1161 = vst [vmem:[%s9565_s6 + $0x740] sm:$0xf] %v1160_v16 }
 0x1e5   : > { %1163 = vst [vmem:[%s9565_s6 + $0x744] sm:$0xf] %v1162_v17 }
 0x1e6   : > { %1165 = vst [vmem:[%s9565_s6 + $0x748] sm:$0xf] %v1164_v18 }
 0x1e7   : > { %1167 = vst [vmem:[%s9565_s6 + $0x74c] sm:$0xf] %v1166_v19 }
 0x1e8   : > { %1169 = vst [vmem:[%s9565_s6 + $0x750] sm:$0xf] %v1168_v20 }
 0x1e9   : > { %1171 = vst [vmem:[%s9565_s6 + $0x754] sm:$0xf] %v1170_v21 }
 0x1ea   : > { %1173 = vst [vmem:[%s9565_s6 + $0x758] sm:$0xf] %v1172_v22 }
 0x1eb   : > { %1175 = vst [vmem:[%s9565_s6 + $0x75c] sm:$0xf] %v1174_v23 }
 0x1ec   : > { %1177 = vst [vmem:[%s9565_s6 + $0x760] sm:$0xf] %v1176_v24 }
 0x1ed   : > { %1179 = vst [vmem:[%s9565_s6 + $0x764] sm:$0xf] %v1178_v25 }
 0x1ee   : > { %1181 = vst [vmem:[%s9565_s6 + $0x768] sm:$0xf] %v1180_v26 }
 0x1ef   : > { %1183 = vst [vmem:[%s9565_s6 + $0x76c] sm:$0xf] %v1182_v27 }
 0x1f0   : > { %1185 = vst [vmem:[%s9565_s6 + $0x770] sm:$0xf] %v1184_v28 }
 0x1f1   : > { %1187 = vst [vmem:[%s9565_s6 + $0x774] sm:$0xf] %v1186_v29 }
 0x1f2   : > { %1189 = vst [vmem:[%s9565_s6 + $0x778] sm:$0xf] %v1188_v30 }
 0x1f3   : > { %1191 = vst [vmem:[%s9565_s6 + $0x77c] sm:$0xf] %v1190_v31 }
 0x1f4   : > { %1193 = vst [vmem:[%s9565_s6 + $0x780] sm:$0xf] %v1192_v32 }
 0x1f5   : > { %1195 = vst [vmem:[%s9565_s6 + $0x784] sm:$0xf] %v1194_v33 }
 0x1f6   : > { %1197 = vst [vmem:[%s9565_s6 + $0x788] sm:$0xf] %v1196_v34 }
 0x1f7   : > { %1199 = vst [vmem:[%s9565_s6 + $0x78c] sm:$0xf] %v1198_v35 }
 0x1f8   : > { %1201 = vst [vmem:[%s9565_s6 + $0x790] sm:$0xf] %v1200_v36 }
 0x1f9   : > { %1203 = vst [vmem:[%s9565_s6 + $0x794] sm:$0xf] %v1202_v37 }
 0x1fa   : > { %1205 = vst [vmem:[%s9565_s6 + $0x798] sm:$0xf] %v1204_v38 }
 0x1fb   : > { %1207 = vst [vmem:[%s9565_s6 + $0x79c] sm:$0xf] %v1206_v39 }
 0x1fc   : > { %1209 = vst [vmem:[%s9565_s6 + $0x7a0] sm:$0xf] %v1208_v40 }
 0x1fd   : > { %1211 = vst [vmem:[%s9565_s6 + $0x7a4] sm:$0xf] %v1210_v41 }
 0x1fe   : > { %1213 = vst [vmem:[%s9565_s6 + $0x7a8] sm:$0xf] %v1212_v42 }
 0x1ff   : > { %1215 = vst [vmem:[%s9565_s6 + $0x7ac] sm:$0xf] %v1214_v43 }
 0x200   : > { %1217 = vst [vmem:[%s9565_s6 + $0x7b0] sm:$0xf] %v1216_v44 }
 0x201   : > { %1219 = vst [vmem:[%s9565_s6 + $0x7b4] sm:$0xf] %v1218_v45 }
 0x202   : > { %1221 = vst [vmem:[%s9565_s6 + $0x7b8] sm:$0xf] %v1220_v46 }
 0x203   : > { %1223 = vst [vmem:[%s9565_s6 + $0x7bc] sm:$0xf] %v1222_v47 }
 0x204   : > { %1225 = vst [vmem:[%s9565_s6 + $0x7c0] sm:$0xf] %v1224_v48 }
 0x205   : > { %1227 = vst [vmem:[%s9565_s6 + $0x7c4] sm:$0xf] %v1226_v49 }
 0x206   : > { %1229 = vst [vmem:[%s9565_s6 + $0x7c8] sm:$0xf] %v1228_v50 }
 0x207   : > { %1231 = vst [vmem:[%s9565_s6 + $0x7cc] sm:$0xf] %v1230_v51 }
 0x208   : > { %1233 = vst [vmem:[%s9565_s6 + $0x7d0] sm:$0xf] %v1232_v52 }
 0x209   : > { %1235 = vst [vmem:[%s9565_s6 + $0x7d4] sm:$0xf] %v1234_v53 }
 0x20a   : > { %1237 = vst [vmem:[%s9565_s6 + $0x7d8] sm:$0xf] %v1236_v54 }
 0x20b   : > { %1239 = vst [vmem:[%s9565_s6 + $0x7dc] sm:$0xf] %v1238_v55 }
 0x20c   : > { %1241 = vst [vmem:[%s9565_s6 + $0x7e0] sm:$0xf] %v1240_v56 }
 0x20d   : > { %1243 = vst [vmem:[%s9565_s6 + $0x7e4] sm:$0xf] %v1242_v57 }
 0x20e   : > { %1245 = vst [vmem:[%s9565_s6 + $0x7e8] sm:$0xf] %v1244_v58 }
 0x20f   : > { %1247 = vst [vmem:[%s9565_s6 + $0x7ec] sm:$0xf] %v1246_v59 }
 0x210   : > { %1249 = vst [vmem:[%s9565_s6 + $0x7f0] sm:$0xf] %v1248_v60 }
 0x211   : > { %1251 = vst [vmem:[%s9565_s6 + $0x7f4] sm:$0xf] %v1250_v61 }
 0x212   : > { %1253 = vst [vmem:[%s9565_s6 + $0x7f8] sm:$0xf] %v1252_v62 }
 0x213   : > { %1255 = vst [vmem:[%s9565_s6 + $0x7fc] sm:$0xf] %v1254_v63 }
 0x214 PF: > { %p7801_p8 = scmp.ge.s32.totalorder %s9486_s19, 1  ;;  %p4376_p9 = scmp.lt.s32.totalorder %s9486_s19, 5 }
 0x216   : > { %p4377_p10 = pnand %p7801_p8, %p4376_p9 }
 0x217   : > { %s4383_s7 = sand.u32 (!%p4377_p10), 1, %s9470_s15   ;;  %p4447_p11 = scmp.lt.s32.totalorder (!%p4377_p10), %s9478_s17, 3 }
 0x218   : > { %4380 = sbr.rel (%p4377_p10) target bundleno = 976 (0x3d0), region = 76  ;;  %s7802_s8 = sshll.u32 (!%p4377_p10), %s4383_s7, 11 }
 0x219   : > { %s10594_s9 = scalar_lea.vmem (!%p4377_p10), [#allocation3], %s7802_s8  ;;  %s7803_s6 = sshll.u32 (!%p4377_p10), %s4383_s7, 5 }
 0x21a   : > { %s11265_s8 = scalar_lea.vmem (!%p4377_p10), [#allocation4], %s7803_s6 }
 0x21d   : > { %v9159_v0 = vld [vmem:[%s10594_s9 + $0x38] sm:$0xff]  ;;  %v9158_v4 = vld [vmem:[%s10594_s9 + $0x30] sm:$0xff]  ;;  %v9157_v8 = vld [vmem:[%s10594_s9 + $0x28] sm:$0xff]  ;;  %s4448_s15 = scalar_select %p4447_p11, %s9478_s17, 3 }
 0x21e   : > { %v9167_v1 = vld [vmem:[%s10594_s9 + $0x78] sm:$0xff]  ;;  %6903 = vmatpush.bf16.msra.mxu0 %v9159_v0  ;;  %v9166_v5 = vld [vmem:[%s10594_s9 + $0x70] sm:$0xff]  ;;  %v9165_v9 = vld [vmem:[%s10594_s9 + $0x68] sm:$0xff]  ;;  %s9085_s14 = sshll.u32 (%p9548_p6), %s9478_s17, 3 }
 0x21f   : > { %v9175_v2 = vld [vmem:[%s10594_s9 + $0xb8] sm:$0xff]  ;;  %6922 = vmatpush.bf16.msra.mxu1 %v9167_v1  ;;  %v9174_v6 = vld [vmem:[%s10594_s9 + $0xb0] sm:$0xff]  ;;  %v9173_v10 = vld [vmem:[%s10594_s9 + $0xa8] sm:$0xff]  ;;  %s4451_s11 = scalar_lea.vmem %s11307_s3, %s4448_s15  ;;  %s4458_s13 = scalar_lea.vmem %s11308_s4, %s4448_s15 }
 0x220   : > { %v9183_v3 = vld [vmem:[%s10594_s9 + $0xf8] sm:$0xff]  ;;  %6941 = vmatpush.bf16.msra.mxu2 %v9175_v2  ;;  %v9182_v7 = vld [vmem:[%s10594_s9 + $0xf0] sm:$0xff]  ;;  %v9181_v11 = vld [vmem:[%s10594_s9 + $0xe8] sm:$0xff]  ;;  %s7579_s23 = scalar_lea.vmem (%p9548_p6), %s11306_s2, %s9085_s14 }
 0x221   : > { %6960 = vmatpush.bf16.msra.mxu3 %v9183_v3  ;;  %v9156_v12 = vld [vmem:[%s10594_s9 + $0x20] sm:$0xff]  ;;  %v9155_v16 = vld [vmem:[%s10594_s9 + $0x18] sm:$0xff]  ;;  %v9154_v20 = vld [vmem:[%s10594_s9 + $0x10] sm:$0xff] }
 0x222   : > { %6904 = vmatpush.bf16.msra.mxu0 %v9158_v4  ;;  %v9164_v13 = vld [vmem:[%s10594_s9 + $0x60] sm:$0xff]  ;;  %v9163_v17 = vld [vmem:[%s10594_s9 + $0x58] sm:$0xff]  ;;  %v9162_v21 = vld [vmem:[%s10594_s9 + $0x50] sm:$0xff] }
 0x223   : > { %6923 = vmatpush.bf16.msra.mxu1 %v9166_v5  ;;  %v9172_v14 = vld [vmem:[%s10594_s9 + $0xa0] sm:$0xff]  ;;  %v9171_v18 = vld [vmem:[%s10594_s9 + $0x98] sm:$0xff]  ;;  %v9170_v22 = vld [vmem:[%s10594_s9 + $0x90] sm:$0xff] }
 0x224   : > { %6942 = vmatpush.bf16.msra.mxu2 %v9174_v6  ;;  %v9180_v15 = vld [vmem:[%s10594_s9 + $0xe0] sm:$0xff]  ;;  %v9179_v19 = vld [vmem:[%s10594_s9 + $0xd8] sm:$0xff]  ;;  %v9178_v23 = vld [vmem:[%s10594_s9 + $0xd0] sm:$0xff] }
 0x225   : > { %6961 = vmatpush.bf16.msra.mxu3 %v9182_v7  ;;  %v9153_v24 = vld [vmem:[%s10594_s9 + $0x8] sm:$0xff]  ;;  %v9152_v28 = vld [vmem:[%s10594_s9] sm:$0xff]  ;;  %v9207_v40 = vld [vmem:[%s10594_s9 + $0x1b8] sm:$0xff] }
 0x226   : > { %6905 = vmatpush.bf16.msra.mxu0 %v9157_v8  ;;  %v9161_v25 = vld [vmem:[%s10594_s9 + $0x48] sm:$0xff]  ;;  %v7806_v29 = vld [vmem:[%s11304_s0] sm:$0xf]  ;;  %v9088_v34 = vld [vmem:[%s11304_s0 + $0x4] sm:$0xf] }
 0x227   : > { %6924 = vmatpush.bf16.msra.mxu1 %v9165_v9  ;;  %v9169_v26 = vld [vmem:[%s10594_s9 + $0x88] sm:$0xff]  ;;  %v9104_v30 = vld [vmem:[%s11304_s0 + $0x7c] sm:$0xf0]  ;;  %v7808_v35 = vld [vmem:[%s11304_s0 + $0x80] sm:$0xf0] }
 0x228   : > { %6943 = vmatpush.bf16.msra.mxu2 %v9173_v10  ;;  %v9177_v27 = vld [vmem:[%s10594_s9 + $0xc8] sm:$0xff]  ;;  %v9160_v31 = vld [vmem:[%s10594_s9 + $0x40] sm:$0xff]  ;;  %v9191_v41 = vld [vmem:[%s10594_s9 + $0x138] sm:$0xff]  ;;  %v7807_v42 = vor.u32 %v9104_v30, %v7806_v29  ;;  %v7811_v43 = vor.u32 %v9088_v34, %v7808_v35 }
 0x229   : > { %6962 = vmatpush.bf16.msra.mxu3 %v9181_v11  ;;  %v9168_v32 = vld [vmem:[%s10594_s9 + $0x80] sm:$0xff]  ;;  %v7814_v36 = vld [vmem:[%s11304_s0 + $0x8] sm:$0xf]  ;;  %v9089_v38 = vld [vmem:[%s11304_s0 + $0xc] sm:$0xf] }
 0x22a   : > { %6906 = vmatpush.bf16.msra.mxu0 %v9156_v12  ;;  %v9176_v33 = vld [vmem:[%s10594_s9 + $0xc0] sm:$0xff]  ;;  %v9105_v37 = vld [vmem:[%s11304_s0 + $0x84] sm:$0xf0]  ;;  %v7816_v39 = vld [vmem:[%s11304_s0 + $0x88] sm:$0xf0] }
 0x22b   : > { %6925 = vmatpush.bf16.msra.mxu1 %v9164_v13  ;;  %v7815_v44 = vor.u32 %v9105_v37, %v7814_v36  ;;  %v7819_v45 = vor.u32 %v9089_v38, %v7816_v39  ;;  %v9199_v46 = vld [vmem:[%s10594_s9 + $0x178] sm:$0xff]  ;;  %v9206_v48 = vld [vmem:[%s10594_s9 + $0x1b0] sm:$0xff]  ;;  %v9205_v52 = vld [vmem:[%s10594_s9 + $0x1a8] sm:$0xff] }
 0x22c   : > { %6944 = vmatpush.bf16.msra.mxu2 %v9172_v14  ;;  %v9215_v47 = vld [vmem:[%s10594_s9 + $0x1f8] sm:$0xff]  ;;  %v9190_v49 = vld [vmem:[%s10594_s9 + $0x130] sm:$0xff]  ;;  %v9189_v53 = vld [vmem:[%s10594_s9 + $0x128] sm:$0xff] }
 0x22d   : > { %6963 = vmatpush.bf16.msra.mxu3 %v9180_v15  ;;  %v9198_v50 = vld [vmem:[%s10594_s9 + $0x170] sm:$0xff]  ;;  %v9197_v54 = vld [vmem:[%s10594_s9 + $0x168] sm:$0xff]  ;;  %v9204_v56 = vld [vmem:[%s10594_s9 + $0x1a0] sm:$0xff] }
 0x22e   : > { %6907 = vmatpush.bf16.msra.mxu0 %v9155_v16  ;;  %v9214_v51 = vld [vmem:[%s10594_s9 + $0x1f0] sm:$0xff]  ;;  %v9213_v55 = vld [vmem:[%s10594_s9 + $0x1e8] sm:$0xff]  ;;  %v9188_v57 = vld [vmem:[%s10594_s9 + $0x120] sm:$0xff] }
 0x22f   : > { %6926 = vmatpush.bf16.msra.mxu1 %v9163_v17  ;;  %v9196_v58 = vld [vmem:[%s10594_s9 + $0x160] sm:$0xff]  ;;  %v7942_v0 = vld [vmem:[%s11304_s0 + $0x108] sm:$0xf]  ;;  %v9121_v2 = vld [vmem:[%s11304_s0 + $0x10c] sm:$0xf] }
 0x230   : > { %6945 = vmatpush.bf16.msra.mxu2 %v9171_v18  ;;  %v9212_v59 = vld [vmem:[%s10594_s9 + $0x1e0] sm:$0xff]  ;;  %v9137_v1 = vld [vmem:[%s11304_s0 + $0x184] sm:$0xf0]  ;;  %v7944_v3 = vld [vmem:[%s11304_s0 + $0x188] sm:$0xf0] }
 0x231   : > { %6964 = vmatpush.bf16.msra.mxu3 %v9179_v19  ;;  %v7934_v60 = vld [vmem:[%s11304_s0 + $0x100] sm:$0xf]  ;;  %v9120_v62 = vld [vmem:[%s11304_s0 + $0x104] sm:$0xf]  ;;  %v9203_v4 = vld [vmem:[%s10594_s9 + $0x198] sm:$0xff]  ;;  %v7943_v8 = vor.u32 %v9137_v1, %v7942_v0  ;;  %v7947_v9 = vor.u32 %v9121_v2, %v7944_v3 }
 0x232   : > { %6908 = vmatpush.bf16.msra.mxu0 %v9154_v20  ;;  %v9136_v61 = vld [vmem:[%s11304_s0 + $0x17c] sm:$0xf0]  ;;  %v7936_v63 = vld [vmem:[%s11304_s0 + $0x180] sm:$0xf0]  ;;  %v9187_v5 = vld [vmem:[%s10594_s9 + $0x118] sm:$0xff] }
 0x233   : > { %6927 = vmatpush.bf16.msra.mxu1 %v9162_v21  ;;  %v7935_v6 = vor.u32 %v9136_v61, %v7934_v60  ;;  %v7939_v7 = vor.u32 %v9120_v62, %v7936_v63  ;;  %v9195_v10 = vld [vmem:[%s10594_s9 + $0x158] sm:$0xff]  ;;  %v9202_v12 = vld [vmem:[%s10594_s9 + $0x190] sm:$0xff]  ;;  %v9201_v16 = vld [vmem:[%s10594_s9 + $0x188] sm:$0xff] }
 0x234   : > { %6946 = vmatpush.bf16.msra.mxu2 %v9170_v22  ;;  %v9211_v11 = vld [vmem:[%s10594_s9 + $0x1d8] sm:$0xff]  ;;  %v9186_v13 = vld [vmem:[%s10594_s9 + $0x110] sm:$0xff]  ;;  %v9185_v17 = vld [vmem:[%s10594_s9 + $0x108] sm:$0xff] }
 0x235   : > { %6965 = vmatpush.bf16.msra.mxu3 %v9178_v23  ;;  %v9194_v14 = vld [vmem:[%s10594_s9 + $0x150] sm:$0xff]  ;;  %v9193_v18 = vld [vmem:[%s10594_s9 + $0x148] sm:$0xff]  ;;  %v9200_v20 = vld [vmem:[%s10594_s9 + $0x180] sm:$0xff] }
 0x236   : > { %6909 = vmatpush.bf16.msra.mxu0 %v9153_v24  ;;  %v9210_v15 = vld [vmem:[%s10594_s9 + $0x1d0] sm:$0xff]  ;;  %v9209_v19 = vld [vmem:[%s10594_s9 + $0x1c8] sm:$0xff]  ;;  %v9184_v21 = vld [vmem:[%s10594_s9 + $0x100] sm:$0xff] }
 0x237   : > { %6928 = vmatpush.bf16.msra.mxu1 %v9161_v25  ;;  %v9192_v22 = vld [vmem:[%s10594_s9 + $0x140] sm:$0xff]  ;;  %v7822_v24 = vld [vmem:[%s11304_s0 + $0x10] sm:$0xf]  ;;  %v9239_v25 = vld [vmem:[%s10594_s9 + $0x2b8] sm:$0xff] }
 0x238   : > { %6947 = vmatpush.bf16.msra.mxu2 %v9169_v26  ;;  %v9208_v23 = vld [vmem:[%s10594_s9 + $0x1c0] sm:$0xff]  ;;  %v9223_v26 = vld [vmem:[%s10594_s9 + $0x238] sm:$0xff]  ;;  %v7824_v29 = vld [vmem:[%s11304_s0 + $0x90] sm:$0xf0] }
 0x239   : > { %6966 = vmatpush.bf16.msra.mxu3 %v9177_v27  ;;  %v9106_v27 = vld [vmem:[%s11304_s0 + $0x8c] sm:$0xf0]  ;;  %v7830_v30 = vld [vmem:[%s11304_s0 + $0x18] sm:$0xf]  ;;  %v7960_v61 = vld [vmem:[%s11304_s0 + $0x198] sm:$0xf0] }
 0x23a   : > { %6910 = vmatpush.bf16.msra.mxu0 %v9152_v28  ;;  %v9090_v28 = vld [vmem:[%s11304_s0 + $0x14] sm:$0xf]  ;;  %v9231_v34 = vld [vmem:[%s10594_s9 + $0x278] sm:$0xff]  ;;  %v7823_v36 = vor.u32 %v9106_v27, %v7822_v24  ;;  %v7840_v24 = vld [vmem:[%s11304_s0 + $0xa0] sm:$0xf0] }
 0x23b   : > { %6929 = vmatpush.bf16.msra.mxu1 %v9160_v31  ;;  %v9107_v31 = vld [vmem:[%s11304_s0 + $0x94] sm:$0xf0]  ;;  %v9238_v37 = vld [vmem:[%s10594_s9 + $0x2b0] sm:$0xff]  ;;  %v7827_v38 = vor.u32 %v9090_v28, %v7824_v29  ;;  %v9093_v27 = vld [vmem:[%s11304_s0 + $0x2c] sm:$0xf] }
 0x23c   : > { %6948 = vmatpush.bf16.msra.mxu2 %v9168_v32  ;;  %v9091_v32 = vld [vmem:[%s11304_s0 + $0x1c] sm:$0xf]  ;;  %v7831_v39 = vor.u32 %v9107_v31, %v7830_v30  ;;  %v9234_v1 = vld [vmem:[%s10594_s9 + $0x290] sm:$0xff]  ;;  %v7848_v28 = vld [vmem:[%s11304_s0 + $0xa8] sm:$0xf0] }
 0x23d   : > { %6967 = vmatpush.bf16.msra.mxu3 %v9176_v33  ;;  %6911 = vmatmul.bf16.vlgmr.msra.gmra.mxu0 %v7807_v42  ;;  %v7832_v33 = vld [vmem:[%s11304_s0 + $0x98] sm:$0xf0]  ;;  %v9230_v42 = vld [vmem:[%s10594_s9 + $0x270] sm:$0xff] }
 0x23e   : > { %6979 = vmatpush.bf16.msrb.mxu0 %v9191_v41  ;;  %6930 = vmatmul.bf16.vlgmr.msra.gmra.mxu1 %v7811_v43  ;;  %v9247_v35 = vld [vmem:[%s10594_s9 + $0x2f8] sm:$0xff]  ;;  %v9222_v41 = vld [vmem:[%s10594_s9 + $0x230] sm:$0xff] }
 0x23f   : > { %6949 = vmatmul.bf16.vlgmr.msra.gmra.mxu2 %v7815_v44  ;;  %6998 = vmatpush.bf16.msrb.mxu1 %v9199_v46  ;;  %v9246_v43 = vld [vmem:[%s10594_s9 + $0x2f0] sm:$0xff]  ;;  %v9237_v44 = vld [vmem:[%s10594_s9 + $0x2a8] sm:$0xff]  ;;  %v9219_v60 = vld [vmem:[%s10594_s9 + $0x218] sm:$0xff] }
 0x240   : > { %7017 = vmatpush.bf16.msrb.mxu2 %v9207_v40  ;;  %6968 = vmatmul.bf16.vlgmr.msra.gmra.mxu3 %v7819_v45  ;;  %v7835_v40 = vor.u32 %v9091_v32, %v7832_v33  ;;  %v9221_v45 = vld [vmem:[%s10594_s9 + $0x228] sm:$0xff]  ;;  %v9227_v62 = vld [vmem:[%s10594_s9 + $0x258] sm:$0xff]  ;;  %v9262_v30 = vld [vmem:[%s10594_s9 + $0x370] sm:$0xff]  ;;  %v7851_v33 = vor.u32 %v9093_v27, %v7848_v28 }
 0x241   : > { %7036 = vmatpush.bf16.msrb.mxu3 %v9215_v47  ;;  %v9229_v46 = vld [vmem:[%s10594_s9 + $0x268] sm:$0xff]  ;;  %v9243_v63 = vld [vmem:[%s10594_s9 + $0x2d8] sm:$0xff] }
 0x242   : > { %6980 = vmatpush.bf16.msrb.mxu0 %v9190_v49  ;;  %v9245_v47 = vld [vmem:[%s10594_s9 + $0x2e8] sm:$0xff]  ;;  %v9220_v49 = vld [vmem:[%s10594_s9 + $0x220] sm:$0xff] }
 0x243   : > { %6999 = vmatpush.bf16.msrb.mxu1 %v9198_v50  ;;  %v9228_v50 = vld [vmem:[%s10594_s9 + $0x260] sm:$0xff]  ;;  %v9301_v28 = vld [vmem:[%s10594_s9 + $0x4a8] sm:$0xff] }
 0x244   : > { %7018 = vmatpush.bf16.msrb.mxu2 %v9206_v48  ;;  %v9236_v48 = vld [vmem:[%s10594_s9 + $0x2a0] sm:$0xff] }
 0x245   : > { %7037 = vmatpush.bf16.msrb.mxu3 %v9214_v51  ;;  %v9244_v51 = vld [vmem:[%s10594_s9 + $0x2e0] sm:$0xff] }
 0x246   : > { %6981 = vmatpush.bf16.msrb.mxu0 %v9189_v53  ;;  %v9138_v53 = vld [vmem:[%s11304_s0 + $0x18c] sm:$0xf0] }
 0x247   : > { %7000 = vmatpush.bf16.msrb.mxu1 %v9197_v54  ;;  %v9235_v54 = vld [vmem:[%s10594_s9 + $0x298] sm:$0xff] }
 0x248   : > { %7019 = vmatpush.bf16.msrb.mxu2 %v9205_v52  ;;  %v7950_v52 = vld [vmem:[%s11304_s0 + $0x110] sm:$0xf] }
 0x249   : > { %7038 = vmatpush.bf16.msrb.mxu3 %v9213_v55  ;;  %v9122_v55 = vld [vmem:[%s11304_s0 + $0x114] sm:$0xf]  ;;  %v7951_v0 = vor.u32 %v9138_v53, %v7950_v52  ;;  %v9125_v52 = vld [vmem:[%s11304_s0 + $0x12c] sm:$0xf]  ;;  %v9251_v53 = vld [vmem:[%s10594_s9 + $0x318] sm:$0xff] }
 0x24a   : > { %6982 = vmatpush.bf16.msrb.mxu0 %v9188_v57  ;;  %v7958_v57 = vld [vmem:[%s11304_s0 + $0x118] sm:$0xf] }
 0x24b   : > { %7001 = vmatpush.bf16.msrb.mxu1 %v9196_v58  ;;  %v9139_v58 = vld [vmem:[%s11304_s0 + $0x194] sm:$0xf0] }
 0x24c   : > { %7020 = vmatpush.bf16.msrb.mxu2 %v9204_v56  ;;  %v7952_v56 = vld [vmem:[%s11304_s0 + $0x190] sm:$0xf0]  ;;  %v7959_v3 = vor.u32 %v9139_v58, %v7958_v57 }
 0x24d   : > { %7039 = vmatpush.bf16.msrb.mxu3 %v9212_v59  ;;  %6916 = vmatmul.bf16.gmra.mxu0 %v7935_v6  ;;  %v9123_v59 = vld [vmem:[%s11304_s0 + $0x11c] sm:$0xf]  ;;  %v7955_v2 = vor.u32 %v9122_v55, %v7952_v56  ;;  %v9226_v6 = vld [vmem:[%s10594_s9 + $0x250] sm:$0xff] }
 0x24e   : > { %6983 = vmatpush.bf16.msrb.mxu0 %v9187_v5  ;;  %6935 = vmatmul.bf16.gmra.mxu1 %v7939_v7  ;;  %v9218_v5 = vld [vmem:[%s10594_s9 + $0x210] sm:$0xff]  ;;  %v9275_v55 = vld [vmem:[%s10594_s9 + $0x3d8] sm:$0xff] }
 0x24f   : > { %6954 = vmatmul.bf16.gmra.mxu2 %v7943_v8  ;;  %7002 = vmatpush.bf16.msrb.mxu1 %v9195_v10  ;;  %v9242_v7 = vld [vmem:[%s10594_s9 + $0x2d0] sm:$0xff]  ;;  %v9233_v8 = vld [vmem:[%s10594_s9 + $0x288] sm:$0xff] }
 0x250   : > { %7021 = vmatpush.bf16.msrb.mxu2 %v9203_v4  ;;  %6973 = vmatmul.bf16.gmra.mxu3 %v7947_v9  ;;  %v7963_v4 = vor.u32 %v9123_v59, %v7960_v61  ;;  %v9217_v9 = vld [vmem:[%s10594_s9 + $0x208] sm:$0xff]  ;;  %v9266_v56 = vld [vmem:[%s10594_s9 + $0x390] sm:$0xff] }
 0x251   : > { %7040 = vmatpush.bf16.msrb.mxu3 %v9211_v11  ;;  %v9225_v10 = vld [vmem:[%s10594_s9 + $0x248] sm:$0xff]  ;;  %v9258_v58 = vld [vmem:[%s10594_s9 + $0x350] sm:$0xff] }
 0x252   : > { %6984 = vmatpush.bf16.msrb.mxu0 %v9186_v13  ;;  %v9241_v11 = vld [vmem:[%s10594_s9 + $0x2c8] sm:$0xff]  ;;  %v9271_v13 = vld [vmem:[%s10594_s9 + $0x3b8] sm:$0xff] }
 0x253   : > { %7003 = vmatpush.bf16.msrb.mxu1 %v9194_v14  ;;  %v9216_v14 = vld [vmem:[%s10594_s9 + $0x200] sm:$0xff] }
 0x254   : > { %7022 = vmatpush.bf16.msrb.mxu2 %v9202_v12  ;;  %v9232_v12 = vld [vmem:[%s10594_s9 + $0x280] sm:$0xff] }
 0x255   : > { %7041 = vmatpush.bf16.msrb.mxu3 %v9210_v15  ;;  %v9224_v15 = vld [vmem:[%s10594_s9 + $0x240] sm:$0xff] }
 0x256   : > { %6985 = vmatpush.bf16.msrb.mxu0 %v9185_v17  ;;  %v7838_v17 = vld [vmem:[%s11304_s0 + $0x20] sm:$0xf] }
 0x257   : > { %7004 = vmatpush.bf16.msrb.mxu1 %v9193_v18  ;;  %v9108_v18 = vld [vmem:[%s11304_s0 + $0x9c] sm:$0xf0] }
 0x258   : > { %7023 = vmatpush.bf16.msrb.mxu2 %v9201_v16  ;;  %v9240_v16 = vld [vmem:[%s10594_s9 + $0x2c0] sm:$0xff]  ;;  %v7839_v29 = vor.u32 %v9108_v18, %v7838_v17  ;;  %v7856_v17 = vld [vmem:[%s11304_s0 + $0xb0] sm:$0xf0]  ;;  %v7862_v18 = vld [vmem:[%s11304_s0 + $0x38] sm:$0xf] }
 0x259   : > { %7042 = vmatpush.bf16.msrb.mxu3 %v9209_v19  ;;  %v9255_v19 = vld [vmem:[%s10594_s9 + $0x338] sm:$0xff] }
 0x25a   : > { %6986 = vmatpush.bf16.msrb.mxu0 %v9184_v21  ;;  %v9092_v21 = vld [vmem:[%s11304_s0 + $0x24] sm:$0xf] }
 0x25b   : > { %7005 = vmatpush.bf16.msrb.mxu1 %v9192_v22  ;;  %v9279_v22 = vld [vmem:[%s10594_s9 + $0x3f8] sm:$0xff]  ;;  %v7843_v31 = vor.u32 %v9092_v21, %v7840_v24  ;;  %v9310_v24 = vld [vmem:[%s10594_s9 + $0x4f0] sm:$0xff] }
 0x25c   : > { %7024 = vmatpush.bf16.msrb.mxu2 %v9200_v20  ;;  %v9263_v20 = vld [vmem:[%s10594_s9 + $0x378] sm:$0xff] }
 0x25d   : > { %7043 = vmatpush.bf16.msrb.mxu3 %v9208_v23  ;;  %6987 = vmatmul.bf16.vlgmr.msrb.gmra.mxu0 %v7823_v36  ;;  %v9270_v23 = vld [vmem:[%s10594_s9 + $0x3b0] sm:$0xff]  ;;  %v9269_v36 = vld [vmem:[%s10594_s9 + $0x3a8] sm:$0xff]  ;;  %v7864_v21 = vld [vmem:[%s11304_s0 + $0xb8] sm:$0xf0] }
 0x25e   : > { %7055 = vmatpush.bf16.msra.mxu0 %v9223_v26  ;;  %7006 = vmatmul.bf16.vlgmr.msrb.gmra.mxu1 %v7827_v38  ;;  %v9109_v26 = vld [vmem:[%s11304_s0 + $0xa4] sm:$0xf0] }
 0x25f   : > { %7074 = vmatpush.bf16.msra.mxu1 %v9231_v34  ;;  %7025 = vmatmul.bf16.vlgmr.msrb.gmra.mxu2 %v7831_v39  ;;  %v9254_v34 = vld [vmem:[%s10594_s9 + $0x330] sm:$0xff]  ;;  %v9253_v38 = vld [vmem:[%s10594_s9 + $0x328] sm:$0xff] }
 0x260   : > { %7093 = vmatpush.bf16.msra.mxu2 %v9239_v25  ;;  %7044 = vmatmul.bf16.vlgmr.msrb.gmra.mxu3 %v7835_v40  ;;  %v7846_v25 = vld [vmem:[%s11304_s0 + $0x28] sm:$0xf]  ;;  %v9268_v40 = vld [vmem:[%s10594_s9 + $0x3a0] sm:$0xff] }
 0x261   : > { %7112 = vmatpush.bf16.msra.mxu3 %v9247_v35  ;;  %v7847_v32 = vor.u32 %v9109_v26, %v7846_v25  ;;  %v9278_v35 = vld [vmem:[%s10594_s9 + $0x3f0] sm:$0xff]  ;;  %v9277_v39 = vld [vmem:[%s10594_s9 + $0x3e8] sm:$0xff] }
 0x262   : > { %7056 = vmatpush.bf16.msra.mxu0 %v9222_v41  ;;  %v9260_v41 = vld [vmem:[%s10594_s9 + $0x360] sm:$0xff] }
 0x263   : > { %7075 = vmatpush.bf16.msra.mxu1 %v9230_v42  ;;  %v9252_v42 = vld [vmem:[%s10594_s9 + $0x320] sm:$0xff] }
 0x264   : > { %7094 = vmatpush.bf16.msra.mxu2 %v9238_v37  ;;  %v9261_v37 = vld [vmem:[%s10594_s9 + $0x368] sm:$0xff] }
 0x265   : > { %7113 = vmatpush.bf16.msra.mxu3 %v9246_v43  ;;  %v9276_v43 = vld [vmem:[%s10594_s9 + $0x3e0] sm:$0xff] }
 0x266   : > { %7057 = vmatpush.bf16.msra.mxu0 %v9221_v45  ;;  %v7966_v45 = vld [vmem:[%s11304_s0 + $0x120] sm:$0xf] }
 0x267   : > { %7076 = vmatpush.bf16.msra.mxu1 %v9229_v46  ;;  %v9140_v46 = vld [vmem:[%s11304_s0 + $0x19c] sm:$0xf0] }
 0x268   : > { %7095 = vmatpush.bf16.msra.mxu2 %v9237_v44  ;;  %v9267_v44 = vld [vmem:[%s10594_s9 + $0x398] sm:$0xff]  ;;  %v7967_v57 = vor.u32 %v9140_v46, %v7966_v45 }
 0x269   : > { %7114 = vmatpush.bf16.msra.mxu3 %v9245_v47  ;;  %v9259_v47 = vld [vmem:[%s10594_s9 + $0x358] sm:$0xff] }
 0x26a   : > { %7058 = vmatpush.bf16.msra.mxu0 %v9220_v49  ;;  %v7968_v49 = vld [vmem:[%s11304_s0 + $0x1a0] sm:$0xf0]  ;;  %v9143_v45 = vld [vmem:[%s11304_s0 + $0x1b4] sm:$0xf0]  ;;  %v9127_v46 = vld [vmem:[%s11304_s0 + $0x13c] sm:$0xf] }
 0x26b   : > { %7077 = vmatpush.bf16.msra.mxu1 %v9228_v50  ;;  %v7974_v50 = vld [vmem:[%s11304_s0 + $0x128] sm:$0xf] }
 0x26c   : > { %7096 = vmatpush.bf16.msra.mxu2 %v9236_v48  ;;  %v9124_v48 = vld [vmem:[%s11304_s0 + $0x124] sm:$0xf] }
 0x26d   : > { %7115 = vmatpush.bf16.msra.mxu3 %v9244_v51  ;;  %6992 = vmatmul.bf16.gmra.mxu0 %v7951_v0  ;;  %v9141_v51 = vld [vmem:[%s11304_s0 + $0x1a4] sm:$0xf0]  ;;  %v7971_v59 = vor.u32 %v9124_v48, %v7968_v49  ;;  %v7992_v48 = vld [vmem:[%s11304_s0 + $0x1b8] sm:$0xf0]  ;;  %v9282_v49 = vld [vmem:[%s10594_s9 + $0x410] sm:$0xff] }
 0x26e   : > { %7059 = vmatpush.bf16.msra.mxu0 %v9219_v60  ;;  %7011 = vmatmul.bf16.gmra.mxu1 %v7955_v2  ;;  %v7975_v60 = vor.u32 %v9141_v51, %v7974_v50  ;;  %v9265_v0 = vld [vmem:[%s10594_s9 + $0x388] sm:$0xff]  ;;  %v9290_v50 = vld [vmem:[%s10594_s9 + $0x450] sm:$0xff] }
 0x26f   : > { %7078 = vmatpush.bf16.msra.mxu1 %v9227_v62  ;;  %7030 = vmatmul.bf16.gmra.mxu2 %v7959_v3  ;;  %v9250_v62 = vld [vmem:[%s10594_s9 + $0x310] sm:$0xff]  ;;  %v9249_v2 = vld [vmem:[%s10594_s9 + $0x308] sm:$0xff] }
 0x270   : > { %7097 = vmatpush.bf16.msra.mxu2 %v9235_v54  ;;  %7049 = vmatmul.bf16.gmra.mxu3 %v7963_v4  ;;  %v7976_v54 = vld [vmem:[%s11304_s0 + $0x1a8] sm:$0xf0]  ;;  %v9264_v4 = vld [vmem:[%s10594_s9 + $0x380] sm:$0xff] }
 0x271   : > { %7116 = vmatpush.bf16.msra.mxu3 %v9243_v63  ;;  %v7979_v61 = vor.u32 %v9125_v52, %v7976_v54  ;;  %v9274_v63 = vld [vmem:[%s10594_s9 + $0x3d0] sm:$0xff]  ;;  %v9273_v3 = vld [vmem:[%s10594_s9 + $0x3c8] sm:$0xff] }
 0x272   : > { %7060 = vmatpush.bf16.msra.mxu0 %v9218_v5  ;;  %v9256_v5 = vld [vmem:[%s10594_s9 + $0x340] sm:$0xff]  ;;  %v9306_v52 = vld [vmem:[%s10594_s9 + $0x4d0] sm:$0xff] }
 0x273   : > { %7079 = vmatpush.bf16.msra.mxu1 %v9226_v6  ;;  %v9303_v6 = vld [vmem:[%s10594_s9 + $0x4b8] sm:$0xff] }
 0x274   : > { %7098 = vmatpush.bf16.msra.mxu2 %v9234_v1  ;;  %v9257_v1 = vld [vmem:[%s10594_s9 + $0x348] sm:$0xff] }
 0x275   : > { %7117 = vmatpush.bf16.msra.mxu3 %v9242_v7  ;;  %v9295_v7 = vld [vmem:[%s10594_s9 + $0x478] sm:$0xff] }
 0x276   : > { %7061 = vmatpush.bf16.msra.mxu0 %v9217_v9  ;;  %v9272_v9 = vld [vmem:[%s10594_s9 + $0x3c0] sm:$0xff] }
 0x277   : > { %7080 = vmatpush.bf16.msra.mxu1 %v9225_v10  ;;  %v9287_v10 = vld [vmem:[%s10594_s9 + $0x438] sm:$0xff] }
 0x278   : > { %7099 = vmatpush.bf16.msra.mxu2 %v9233_v8  ;;  %v9248_v8 = vld [vmem:[%s10594_s9 + $0x300] sm:$0xff] }
 0x279   : > { %7118 = vmatpush.bf16.msra.mxu3 %v9241_v11  ;;  %v7854_v11 = vld [vmem:[%s11304_s0 + $0x30] sm:$0xf] }
 0x27a   : > { %7062 = vmatpush.bf16.msra.mxu0 %v9216_v14  ;;  %v9110_v14 = vld [vmem:[%s11304_s0 + $0xac] sm:$0xf0] }
 0x27b   : > { %7081 = vmatpush.bf16.msra.mxu1 %v9224_v15  ;;  %v9094_v15 = vld [vmem:[%s11304_s0 + $0x34] sm:$0xf] }
 0x27c   : > { %7100 = vmatpush.bf16.msra.mxu2 %v9232_v12  ;;  %v9311_v12 = vld [vmem:[%s10594_s9 + $0x4f8] sm:$0xff]  ;;  %v7859_v25 = vor.u32 %v9094_v15, %v7856_v17  ;;  %v7880_v15 = vld [vmem:[%s11304_s0 + $0xc8] sm:$0xf0] }
 0x27d   : > { %7119 = vmatpush.bf16.msra.mxu3 %v9240_v16  ;;  %7063 = vmatmul.bf16.vlgmr.msra.gmra.mxu0 %v7839_v29  ;;  %v9294_v16 = vld [vmem:[%s10594_s9 + $0x470] sm:$0xff]  ;;  %v9285_v29 = vld [vmem:[%s10594_s9 + $0x428] sm:$0xff] }
 0x27e   : > { %7131 = vmatpush.bf16.msrb.mxu0 %v9255_v19  ;;  %7082 = vmatmul.bf16.vlgmr.msra.gmra.mxu1 %v7843_v31  ;;  %v9111_v19 = vld [vmem:[%s11304_s0 + $0xb4] sm:$0xf0]  ;;  %v9309_v31 = vld [vmem:[%s10594_s9 + $0x4e8] sm:$0xff] }
 0x27f   : > { %7150 = vmatpush.bf16.msrb.mxu1 %v9263_v20  ;;  %7101 = vmatmul.bf16.vlgmr.msra.gmra.mxu2 %v7847_v32  ;;  %v9095_v20 = vld [vmem:[%s11304_s0 + $0x3c] sm:$0xf]  ;;  %v7863_v26 = vor.u32 %v9111_v19, %v7862_v18  ;;  %v9300_v32 = vld [vmem:[%s10594_s9 + $0x4a0] sm:$0xff]  ;;  %v9333_v17 = vld [vmem:[%s10594_s9 + $0x5a8] sm:$0xff] }
 0x280   : > { %7169 = vmatpush.bf16.msrb.mxu2 %v9271_v13  ;;  %7120 = vmatmul.bf16.vlgmr.msra.gmra.mxu3 %v7851_v33  ;;  %v9302_v13 = vld [vmem:[%s10594_s9 + $0x4b0] sm:$0xff]  ;;  %v7867_v27 = vor.u32 %v9095_v20, %v7864_v21  ;;  %v9284_v33 = vld [vmem:[%s10594_s9 + $0x420] sm:$0xff] }
 0x281   : > { %7188 = vmatpush.bf16.msrb.mxu3 %v9279_v22  ;;  %v9286_v22 = vld [vmem:[%s10594_s9 + $0x430] sm:$0xff] }
 0x282   : > { %7132 = vmatpush.bf16.msrb.mxu0 %v9254_v34  ;;  %v9292_v34 = vld [vmem:[%s10594_s9 + $0x460] sm:$0xff] }
 0x283   : > { %7151 = vmatpush.bf16.msrb.mxu1 %v9262_v30  ;;  %v9293_v30 = vld [vmem:[%s10594_s9 + $0x468] sm:$0xff] }
 0x284   : > { %7170 = vmatpush.bf16.msrb.mxu2 %v9270_v23  ;;  %v7855_v23 = vor.u32 %v9110_v14, %v7854_v11  ;;  %v7878_v11 = vld [vmem:[%s11304_s0 + $0x48] sm:$0xf]  ;;  %v9097_v14 = vld [vmem:[%s11304_s0 + $0x4c] sm:$0xf] }
 0x285   : > { %7189 = vmatpush.bf16.msrb.mxu3 %v9278_v35  ;;  %v9308_v35 = vld [vmem:[%s10594_s9 + $0x4e0] sm:$0xff] }
 0x286   : > { %7133 = vmatpush.bf16.msrb.mxu0 %v9253_v38  ;;  %v9291_v38 = vld [vmem:[%s10594_s9 + $0x458] sm:$0xff] }
 0x287   : > { %7152 = vmatpush.bf16.msrb.mxu1 %v9261_v37  ;;  %v9283_v37 = vld [vmem:[%s10594_s9 + $0x418] sm:$0xff] }
 0x288   : > { %7171 = vmatpush.bf16.msrb.mxu2 %v9269_v36  ;;  %v9299_v36 = vld [vmem:[%s10594_s9 + $0x498] sm:$0xff] }
 0x289   : > { %7190 = vmatpush.bf16.msrb.mxu3 %v9277_v39  ;;  %v7982_v39 = vld [vmem:[%s11304_s0 + $0x130] sm:$0xf] }
 0x28a   : > { %7134 = vmatpush.bf16.msrb.mxu0 %v9252_v42  ;;  %v9126_v42 = vld [vmem:[%s11304_s0 + $0x134] sm:$0xf] }
 0x28b   : > { %7153 = vmatpush.bf16.msrb.mxu1 %v9260_v41  ;;  %v9307_v41 = vld [vmem:[%s10594_s9 + $0x4d8] sm:$0xff] }
 0x28c   : > { %7172 = vmatpush.bf16.msrb.mxu2 %v9268_v40  ;;  %v9142_v40 = vld [vmem:[%s11304_s0 + $0x1ac] sm:$0xf0] }
 0x28d   : > { %7191 = vmatpush.bf16.msrb.mxu3 %v9276_v43  ;;  %7068 = vmatmul.bf16.gmra.mxu0 %v7967_v57  ;;  %v7984_v43 = vld [vmem:[%s11304_s0 + $0x1b0] sm:$0xf0]  ;;  %v7983_v51 = vor.u32 %v9142_v40, %v7982_v39  ;;  %v9281_v57 = vld [vmem:[%s10594_s9 + $0x408] sm:$0xff]  ;;  %v9323_v40 = vld [vmem:[%s10594_s9 + $0x558] sm:$0xff] }
 0x28e   : > { %7135 = vmatpush.bf16.msrb.mxu0 %v9251_v53  ;;  %7087 = vmatmul.bf16.gmra.mxu1 %v7971_v59  ;;  %v7987_v53 = vor.u32 %v9126_v42, %v7984_v43  ;;  %v9305_v59 = vld [vmem:[%s10594_s9 + $0x4c8] sm:$0xff]  ;;  %v7998_v42 = vld [vmem:[%s11304_s0 + $0x140] sm:$0xf] }
 0x28f   : > { %7154 = vmatpush.bf16.msrb.mxu1 %v9259_v47  ;;  %7106 = vmatmul.bf16.gmra.mxu2 %v7975_v60  ;;  %v9298_v47 = vld [vmem:[%s10594_s9 + $0x490] sm:$0xff]  ;;  %v9296_v60 = vld [vmem:[%s10594_s9 + $0x480] sm:$0xff] }
 0x290   : > { %7173 = vmatpush.bf16.msrb.mxu2 %v9267_v44  ;;  %7125 = vmatmul.bf16.gmra.mxu3 %v7979_v61  ;;  %v7990_v44 = vld [vmem:[%s11304_s0 + $0x138] sm:$0xf]  ;;  %v9280_v61 = vld [vmem:[%s10594_s9 + $0x400] sm:$0xff] }
 0x291   : > { %7192 = vmatpush.bf16.msrb.mxu3 %v9275_v55  ;;  %v7991_v54 = vor.u32 %v9143_v45, %v7990_v44  ;;  %v7995_v55 = vor.u32 %v9127_v46, %v7992_v48  ;;  %v9144_v43 = vld [vmem:[%s11304_s0 + $0x1bc] sm:$0xf0]  ;;  %v9330_v44 = vld [vmem:[%s10594_s9 + $0x590] sm:$0xff]  ;;  %v9128_v45 = vld [vmem:[%s11304_s0 + $0x144] sm:$0xf] }
 0x292   : > { %7136 = vmatpush.bf16.msrb.mxu0 %v9250_v62  ;;  %v9288_v62 = vld [vmem:[%s10594_s9 + $0x440] sm:$0xff]  ;;  %v9145_v48 = vld [vmem:[%s11304_s0 + $0x1c4] sm:$0xf0] }
 0x293   : > { %7155 = vmatpush.bf16.msrb.mxu1 %v9258_v58  ;;  %v9289_v58 = vld [vmem:[%s10594_s9 + $0x448] sm:$0xff]  ;;  %v8000_v46 = vld [vmem:[%s11304_s0 + $0x1c0] sm:$0xf0] }
 0x294   : > { %7174 = vmatpush.bf16.msrb.mxu2 %v9266_v56  ;;  %v9297_v56 = vld [vmem:[%s10594_s9 + $0x488] sm:$0xff] }
 0x295   : > { %7193 = vmatpush.bf16.msrb.mxu3 %v9274_v63  ;;  %v9304_v63 = vld [vmem:[%s10594_s9 + $0x4c0] sm:$0xff] }
 0x296   : > { %7137 = vmatpush.bf16.msrb.mxu0 %v9249_v2  ;;  %v9327_v2 = vld [vmem:[%s10594_s9 + $0x578] sm:$0xff] }
 0x297   : > { %7156 = vmatpush.bf16.msrb.mxu1 %v9257_v1  ;;  %v9319_v1 = vld [vmem:[%s10594_s9 + $0x538] sm:$0xff] }
 0x298   : > { %7175 = vmatpush.bf16.msrb.mxu2 %v9265_v0  ;;  %v9335_v0 = vld [vmem:[%s10594_s9 + $0x5b8] sm:$0xff] }
 0x299   : > { %7194 = vmatpush.bf16.msrb.mxu3 %v9273_v3  ;;  %v9343_v3 = vld [vmem:[%s10594_s9 + $0x5f8] sm:$0xff] }
 0x29a   : > { %7138 = vmatpush.bf16.msrb.mxu0 %v9248_v8  ;;  %v7872_v8 = vld [vmem:[%s11304_s0 + $0xc0] sm:$0xf0] }
 0x29b   : > { %7157 = vmatpush.bf16.msrb.mxu1 %v9256_v5  ;;  %v9112_v5 = vld [vmem:[%s11304_s0 + $0xbc] sm:$0xf0] }
 0x29c   : > { %7176 = vmatpush.bf16.msrb.mxu2 %v9264_v4  ;;  %v7870_v4 = vld [vmem:[%s11304_s0 + $0x40] sm:$0xf] }
 0x29d   : > { %7195 = vmatpush.bf16.msrb.mxu3 %v9272_v9  ;;  %7139 = vmatmul.bf16.vlgmr.msrb.gmra.mxu0 %v7855_v23  ;;  %v9318_v9 = vld [vmem:[%s10594_s9 + $0x530] sm:$0xff]  ;;  %v7883_v23 = vor.u32 %v9097_v14, %v7880_v15 }
 0x29e   : > { %7207 = vmatpush.bf16.msra.mxu0 %v9287_v10  ;;  %7158 = vmatmul.bf16.vlgmr.msrb.gmra.mxu1 %v7859_v25  ;;  %v9326_v10 = vld [vmem:[%s10594_s9 + $0x570] sm:$0xff]  ;;  %v9325_v25 = vld [vmem:[%s10594_s9 + $0x568] sm:$0xff] }
 0x29f   : > { %7226 = vmatpush.bf16.msra.mxu1 %v9295_v7  ;;  %7177 = vmatmul.bf16.vlgmr.msrb.gmra.mxu2 %v7863_v26  ;;  %v9334_v7 = vld [vmem:[%s10594_s9 + $0x5b0] sm:$0xff]  ;;  %v9341_v26 = vld [vmem:[%s10594_s9 + $0x5e8] sm:$0xff] }
 0x2a0   : > { %7245 = vmatpush.bf16.msra.mxu2 %v9303_v6  ;;  %7196 = vmatmul.bf16.vlgmr.msrb.gmra.mxu3 %v7867_v27  ;;  %v9096_v6 = vld [vmem:[%s11304_s0 + $0x44] sm:$0xf] }
 0x2a1   : > { %7264 = vmatpush.bf16.msra.mxu3 %v9311_v12  ;;  %v9113_v12 = vld [vmem:[%s11304_s0 + $0xc4] sm:$0xf0]  ;;  %v7875_v20 = vor.u32 %v9096_v6, %v7872_v8  ;;  %v9332_v27 = vld [vmem:[%s10594_s9 + $0x5a0] sm:$0xff]  ;;  %v9367_v6 = vld [vmem:[%s10594_s9 + $0x6b8] sm:$0xff] }
 0x2a2   : > { %7208 = vmatpush.bf16.msra.mxu0 %v9286_v22  ;;  %v7879_v21 = vor.u32 %v9113_v12, %v7878_v11  ;;  %v9320_v8 = vld [vmem:[%s10594_s9 + $0x540] sm:$0xff]  ;;  %v9351_v12 = vld [vmem:[%s10594_s9 + $0x638] sm:$0xff] }
 0x2a3   : > { %7227 = vmatpush.bf16.msra.mxu1 %v9294_v16  ;;  %v7871_v16 = vor.u32 %v9112_v5, %v7870_v4  ;;  %v9337_v4 = vld [vmem:[%s10594_s9 + $0x5c8] sm:$0xff]  ;;  %v9328_v5 = vld [vmem:[%s10594_s9 + $0x580] sm:$0xff] }
 0x2a4   : > { %7246 = vmatpush.bf16.msra.mxu2 %v9302_v13  ;;  %v9342_v13 = vld [vmem:[%s10594_s9 + $0x5f0] sm:$0xff] }
 0x2a5   : > { %7265 = vmatpush.bf16.msra.mxu3 %v9310_v24  ;;  %v9317_v24 = vld [vmem:[%s10594_s9 + $0x528] sm:$0xff] }
 0x2a6   : > { %7209 = vmatpush.bf16.msra.mxu0 %v9285_v29  ;;  %v9324_v29 = vld [vmem:[%s10594_s9 + $0x560] sm:$0xff] }
 0x2a7   : > { %7228 = vmatpush.bf16.msra.mxu1 %v9293_v30  ;;  %v9340_v30 = vld [vmem:[%s10594_s9 + $0x5e0] sm:$0xff] }
 0x2a8   : > { %7247 = vmatpush.bf16.msra.mxu2 %v9301_v28  ;;  %v9316_v28 = vld [vmem:[%s10594_s9 + $0x520] sm:$0xff] }
 0x2a9   : > { %7266 = vmatpush.bf16.msra.mxu3 %v9309_v31 }
 0x2aa   : > { %7210 = vmatpush.bf16.msra.mxu0 %v9284_v33  ;;  %v9331_v33 = vld [vmem:[%s10594_s9 + $0x598] sm:$0xff] }
 0x2ab   : > { %7229 = vmatpush.bf16.msra.mxu1 %v9292_v34 }
 0x2ac   : > { %7248 = vmatpush.bf16.msra.mxu2 %v9300_v32 }
 0x2ad   : > { %7267 = vmatpush.bf16.msra.mxu3 %v9308_v35  ;;  %7144 = vmatmul.bf16.gmra.mxu0 %v7983_v51  ;;  %v8008_v51 = vld [vmem:[%s11304_s0 + $0x1c8] sm:$0xf0] }
 0x2ae   : > { %7211 = vmatpush.bf16.msra.mxu0 %v9283_v37  ;;  %7163 = vmatmul.bf16.gmra.mxu1 %v7987_v53  ;;  %v9338_v53 = vld [vmem:[%s10594_s9 + $0x5d0] sm:$0xff] }
 0x2af   : > { %7230 = vmatpush.bf16.msra.mxu1 %v9291_v38  ;;  %7182 = vmatmul.bf16.gmra.mxu2 %v7991_v54  ;;  %v9315_v38 = vld [vmem:[%s10594_s9 + $0x518] sm:$0xff] }
 0x2b0   : > { %7249 = vmatpush.bf16.msra.mxu2 %v9299_v36  ;;  %7201 = vmatmul.bf16.gmra.mxu3 %v7995_v55 }
 0x2b1   : > { %7268 = vmatpush.bf16.msra.mxu3 %v9307_v41  ;;  %v9339_v41 = vld [vmem:[%s10594_s9 + $0x5d8] sm:$0xff] }
 0x2b2   : > { %7212 = vmatpush.bf16.msra.mxu0 %v9282_v49  ;;  %v9129_v49 = vld [vmem:[%s11304_s0 + $0x14c] sm:$0xf] }
 0x2b3   : > { %7231 = vmatpush.bf16.msra.mxu1 %v9290_v50  ;;  %v9314_v50 = vld [vmem:[%s10594_s9 + $0x510] sm:$0xff] }
 0x2b4   : > { %7250 = vmatpush.bf16.msra.mxu2 %v9298_v47  ;;  %v8006_v47 = vld [vmem:[%s11304_s0 + $0x148] sm:$0xf] }
 0x2b5   : > { %7269 = vmatpush.bf16.msra.mxu3 %v9306_v52  ;;  %v9322_v52 = vld [vmem:[%s10594_s9 + $0x550] sm:$0xff] }
 0x2b6   : > { %7213 = vmatpush.bf16.msra.mxu0 %v9281_v57  ;;  %v9329_v57 = vld [vmem:[%s10594_s9 + $0x588] sm:$0xff] }
 0x2b7   : > { %7232 = vmatpush.bf16.msra.mxu1 %v9289_v58 }
 0x2b8   : > { %7251 = vmatpush.bf16.msra.mxu2 %v9297_v56  ;;  %v7999_v56 = vor.u32 %v9144_v43, %v7998_v42 }
 0x2b9   : > { %7270 = vmatpush.bf16.msra.mxu3 %v9305_v59 }
 0x2ba   : > { %7214 = vmatpush.bf16.msra.mxu0 %v9280_v61  ;;  %v6912_v18 = vpop.f32.mrf.mxu0  ;;  %v8003_v61 = vor.u32 %v9128_v45, %v8000_v46  ;;  %v9349_v45 = vld [vmem:[%s10594_s9 + $0x628] sm:$0xff] }
 0x2bb   : > { %7233 = vmatpush.bf16.msra.mxu1 %v9288_v62  ;;  %v6931_v19 = vpop.f32.mrf.mxu1  ;;  %v8007_v62 = vor.u32 %v9145_v48, %v8006_v47  ;;  %v9373_v47 = vld [vmem:[%s10594_s9 + $0x6e8] sm:$0xff]  ;;  %v9364_v48 = vld [vmem:[%s10594_s9 + $0x6a0] sm:$0xff] }
 0x2bc   : > { %7252 = vmatpush.bf16.msra.mxu2 %v9296_v60  ;;  %v6932_v22 = vadd.f32 %v6931_v19, %v6912_v18  ;;  %v9366_v18 = vld [vmem:[%s10594_s9 + $0x6b0] sm:$0xff] }
 0x2bd   : > { %7271 = vmatpush.bf16.msra.mxu3 %v9304_v63  ;;  %7215 = vmatmul.bf16.vlgmr.msra.gmra.mxu0 %v7871_v16 }
 0x2be   : > { %7283 = vmatpush.bf16.msrb.mxu0 %v9319_v1  ;;  %7234 = vmatmul.bf16.vlgmr.msra.gmra.mxu1 %v7875_v20  ;;  %v9313_v1 = vld [vmem:[%s10594_s9 + $0x508] sm:$0xff] }
 0x2bf   : > { %7302 = vmatpush.bf16.msrb.mxu1 %v9327_v2  ;;  %7253 = vmatmul.bf16.vlgmr.msra.gmra.mxu2 %v7879_v21  ;;  %v7886_v21 = vld [vmem:[%s11304_s0 + $0x50] sm:$0xf] }
 0x2c0   : > { %7321 = vmatpush.bf16.msrb.mxu2 %v9335_v0  ;;  %7272 = vmatmul.bf16.vlgmr.msra.gmra.mxu3 %v7883_v23  ;;  %v8011_v0 = vor.u32 %v9129_v49, %v8008_v51  ;;  %v9350_v23 = vld [vmem:[%s10594_s9 + $0x630] sm:$0xff]  ;;  %v9372_v51 = vld [vmem:[%s10594_s9 + $0x6e0] sm:$0xff] }
 0x2c1   : > { %7340 = vmatpush.bf16.msrb.mxu3 %v9343_v3  ;;  %v9321_v3 = vld [vmem:[%s10594_s9 + $0x548] sm:$0xff] }
 0x2c2   : > { %7284 = vmatpush.bf16.msrb.mxu0 %v9318_v9  ;;  %v6950_v31 = vpop.f32.mrf.mxu2  ;;  %v6914_v35 = vpop.f32.mrf.mxu0  ;;  %v9336_v9 = vld [vmem:[%s10594_s9 + $0x5c0] sm:$0xff] }
 0x2c3   : > { %7303 = vmatpush.bf16.msrb.mxu1 %v9326_v10  ;;  %v6969_v32 = vpop.f32.mrf.mxu3  ;;  %v6951_v34 = vadd.f32 %v6950_v31, %v6932_v22  ;;  %v6933_v36 = vpop.f32.mrf.mxu1  ;;  %v9114_v22 = vld [vmem:[%s11304_s0 + $0xcc] sm:$0xf0]  ;;  %v9099_v31 = vld [vmem:[%s11304_s0 + $0x5c] sm:$0xf] }
 0x2c4   : > { %7322 = vmatpush.bf16.msrb.mxu2 %v9334_v7  ;;  %v6934_v37 = vadd.f32 %v6933_v36, %v6914_v35  ;;  %v9312_v7 = vld [vmem:[%s10594_s9 + $0x500] sm:$0xff]  ;;  %v7887_v35 = vor.u32 %v9114_v22, %v7886_v21  ;;  %v9357_v36 = vld [vmem:[%s10594_s9 + $0x668] sm:$0xff] }
 0x2c5   : > { %7341 = vmatpush.bf16.msrb.mxu3 %v9342_v13  ;;  %v10990_v39 = vadd.f32 %v6969_v32, %v6951_v34  ;;  %v9359_v13 = vld [vmem:[%s10594_s9 + $0x678] sm:$0xff] }
 0x2c6   : > { %7285 = vmatpush.bf16.msrb.mxu0 %v9317_v24  ;;  %v9358_v24 = vld [vmem:[%s10594_s9 + $0x670] sm:$0xff]  ;;  %v7896_v32 = vld [vmem:[%s11304_s0 + $0xd8] sm:$0xf0] }
 0x2c7   : > { %7304 = vmatpush.bf16.msrb.mxu1 %v9325_v25  ;;  %v9098_v25 = vld [vmem:[%s11304_s0 + $0x54] sm:$0xf] }
 0x2c8   : > { %7323 = vmatpush.bf16.msrb.mxu2 %v9333_v17  ;;  %v9375_v17 = vld [vmem:[%s10594_s9 + $0x6f8] sm:$0xff] }
 0x2c9   : > { %7342 = vmatpush.bf16.msrb.mxu3 %v9341_v26  ;;  %v9374_v26 = vld [vmem:[%s10594_s9 + $0x6f0] sm:$0xff] }
 0x2ca   : > { %7286 = vmatpush.bf16.msrb.mxu0 %v9316_v28  ;;  %v6952_v54 = vpop.f32.mrf.mxu2  ;;  %v6917_v59 = vpop.f32.mrf.mxu0  ;;  %v7888_v28 = vld [vmem:[%s11304_s0 + $0xd0] sm:$0xf0] }
 0x2cb   : > { %7305 = vmatpush.bf16.msrb.mxu1 %v9324_v29  ;;  %v6971_v55 = vpop.f32.mrf.mxu3  ;;  %v6953_v58 = vadd.f32 %v6952_v54, %v6934_v37  ;;  %v6936_v60 = vpop.f32.mrf.mxu1  ;;  %v7894_v29 = vld [vmem:[%s11304_s0 + $0x58] sm:$0xf] }
 0x2cc   : > { %7324 = vmatpush.bf16.msrb.mxu2 %v9332_v27  ;;  %v6937_v63 = vadd.f32 %v6936_v60, %v6917_v59  ;;  %v9365_v27 = vld [vmem:[%s10594_s9 + $0x6a8] sm:$0xff]  ;;  %v9355_v54 = vld [vmem:[%s10594_s9 + $0x658] sm:$0xff] }
 0x2cd   : > { %7343 = vmatpush.bf16.msrb.mxu3 %v9340_v30  ;;  %v11024_v2 = vadd.f32 %v6971_v55, %v6953_v58  ;;  %7220 = vmatmul.bf16.gmra.mxu0 %v7999_v56  ;;  %v9115_v30 = vld [vmem:[%s11304_s0 + $0xd4] sm:$0xf0] }
 0x2ce   : > { %7287 = vmatpush.bf16.msrb.mxu0 %v9315_v38  ;;  %7239 = vmatmul.bf16.gmra.mxu1 %v8003_v61  ;;  %v9347_v60 = vld [vmem:[%s10594_s9 + $0x618] sm:$0xff] }
 0x2cf   : > { %7306 = vmatpush.bf16.msrb.mxu1 %v9323_v40  ;;  %7258 = vmatmul.bf16.gmra.mxu2 %v8007_v62  ;;  %v7891_v40 = vor.u32 %v9098_v25, %v7888_v28  ;;  %v9371_v62 = vld [vmem:[%s10594_s9 + $0x6d8] sm:$0xff]  ;;  %v9345_v25 = vld [vmem:[%s10594_s9 + $0x608] sm:$0xff]  ;;  %v9360_v28 = vld [vmem:[%s10594_s9 + $0x680] sm:$0xff] }
 0x2d0   : > { %7325 = vmatpush.bf16.msrb.mxu2 %v9331_v33  ;;  %7277 = vmatmul.bf16.gmra.mxu3 %v8011_v0 }
 0x2d1   : > { %7344 = vmatpush.bf16.msrb.mxu3 %v9339_v41  ;;  %v7895_v41 = vor.u32 %v9115_v30, %v7894_v29  ;;  %v9352_v30 = vld [vmem:[%s10594_s9 + $0x640] sm:$0xff] }
 0x2d2   : > { %7288 = vmatpush.bf16.msrb.mxu0 %v9314_v50  ;;  %v6955_v10 = vpop.f32.mrf.mxu2  ;;  %v6919_v15 = vpop.f32.mrf.mxu0  ;;  %v9356_v50 = vld [vmem:[%s10594_s9 + $0x660] sm:$0xff] }
 0x2d3   : > { %7307 = vmatpush.bf16.msrb.mxu1 %v9322_v52  ;;  %v6974_v11 = vpop.f32.mrf.mxu3  ;;  %v6956_v14 = vadd.f32 %v6955_v10, %v6937_v63  ;;  %v6938_v16 = vpop.f32.mrf.mxu1  ;;  %v9363_v52 = vld [vmem:[%s10594_s9 + $0x698] sm:$0xff]  ;;  %v9362_v63 = vld [vmem:[%s10594_s9 + $0x690] sm:$0xff] }
 0x2d4   : > { %7326 = vmatpush.bf16.msrb.mxu2 %v9330_v44  ;;  %v6939_v19 = vadd.f32 %v6938_v16, %v6919_v15  ;;  %v7899_v44 = vor.u32 %v9099_v31, %v7896_v32  ;;  %v8024_v10 = vld [vmem:[%s11304_s0 + $0x1d8] sm:$0xf0]  ;;  %v9353_v15 = vld [vmem:[%s10594_s9 + $0x648] sm:$0xff]  ;;  %v9344_v32 = vld [vmem:[%s10594_s9 + $0x600] sm:$0xff] }
 0x2d5   : > { %7345 = vmatpush.bf16.msrb.mxu3 %v9338_v53  ;;  %v11037_v20 = vadd.f32 %v6974_v11, %v6956_v14  ;;  %v9370_v11 = vld [vmem:[%s10594_s9 + $0x6d0] sm:$0xff]  ;;  %v9391_v31 = vld [vmem:[%s10594_s9 + $0x778] sm:$0xff] }
 0x2d6   : > { %7289 = vmatpush.bf16.msrb.mxu0 %v9313_v1  ;;  %v8014_v1 = vld [vmem:[%s11304_s0 + $0x150] sm:$0xf] }
 0x2d7   : > { %7308 = vmatpush.bf16.msrb.mxu1 %v9321_v3  ;;  %v9354_v3 = vld [vmem:[%s10594_s9 + $0x650] sm:$0xff] }
 0x2d8   : > { %7327 = vmatpush.bf16.msrb.mxu2 %v9329_v57 }
 0x2d9   : > { %7346 = vmatpush.bf16.msrb.mxu3 %v9337_v4  ;;  %v9130_v4 = vld [vmem:[%s11304_s0 + $0x154] sm:$0xf] }
 0x2da   : > { %7290 = vmatpush.bf16.msrb.mxu0 %v9312_v7  ;;  %v6957_v33 = vpop.f32.mrf.mxu2  ;;  %v6988_v38 = vpop.f32.mrf.mxu0  ;;  %v9147_v7 = vld [vmem:[%s11304_s0 + $0x1d4] sm:$0xf0] }
 0x2db   : > { %7309 = vmatpush.bf16.msrb.mxu1 %v9320_v8  ;;  %v6976_v34 = vpop.f32.mrf.mxu3  ;;  %v6958_v37 = vadd.f32 %v6957_v33, %v6939_v19  ;;  %v6989_v42 = vadd.f32 %v6988_v38, %v10990_v39  ;;  %v7007_v43 = vpop.f32.mrf.mxu1  ;;  %v9348_v39 = vld [vmem:[%s10594_s9 + $0x620] sm:$0xff]  ;;  %v9131_v8 = vld [vmem:[%s11304_s0 + $0x15c] sm:$0xf] }
 0x2dc   : > { %7328 = vmatpush.bf16.msrb.mxu2 %v9328_v5  ;;  %v8016_v5 = vld [vmem:[%s11304_s0 + $0x1d0] sm:$0xf0]  ;;  %v9368_v33 = vld [vmem:[%s10594_s9 + $0x6c0] sm:$0xff] }
 0x2dd   : > { %7347 = vmatpush.bf16.msrb.mxu3 %v9336_v9  ;;  %v11070_v46 = vadd.f32 %v6976_v34, %v6958_v37  ;;  %v7008_v49 = vadd.f32 %v7007_v43, %v6989_v42  ;;  %7291 = vmatmul.bf16.vlgmr.msrb.gmra.mxu0 %v7887_v35  ;;  %v9346_v9 = vld [vmem:[%s10594_s9 + $0x610] sm:$0xff]  ;;  %v8019_v19 = vor.u32 %v9130_v4, %v8016_v5  ;;  %v9383_v34 = vld [vmem:[%s10594_s9 + $0x738] sm:$0xff] }
 0x2de   : > { %7359 = vmatpush.bf16.msra.mxu0 %v9351_v12  ;;  %7310 = vmatmul.bf16.vlgmr.msrb.gmra.mxu1 %v7891_v40  ;;  %v9361_v12 = vld [vmem:[%s10594_s9 + $0x688] sm:$0xff]  ;;  %v9398_v37 = vld [vmem:[%s10594_s9 + $0x7b0] sm:$0xff] }
 0x2df   : > { %7378 = vmatpush.bf16.msra.mxu1 %v9359_v13  ;;  %7329 = vmatmul.bf16.vlgmr.msrb.gmra.mxu2 %v7895_v41  ;;  %v9390_v42 = vld [vmem:[%s10594_s9 + $0x770] sm:$0xff] }
 0x2e0   : > { %7397 = vmatpush.bf16.msra.mxu2 %v9367_v6  ;;  %7348 = vmatmul.bf16.vlgmr.msrb.gmra.mxu3 %v7899_v44  ;;  %v8022_v6 = vld [vmem:[%s11304_s0 + $0x158] sm:$0xf] }
 0x2e1   : > { %7416 = vmatpush.bf16.msra.mxu3 %v9375_v17  ;;  %v8023_v21 = vor.u32 %v9147_v7, %v8022_v6  ;;  %v9396_v7 = vld [vmem:[%s10594_s9 + $0x7a0] sm:$0xff] }
 0x2e2   : > { %7360 = vmatpush.bf16.msra.mxu0 %v9350_v23  ;;  %v7026_v53 = vpop.f32.mrf.mxu2  ;;  %v6990_v57 = vpop.f32.mrf.mxu0 }
 0x2e3   : > { %7379 = vmatpush.bf16.msra.mxu1 %v9358_v24  ;;  %v7027_v55 = vadd.f32 %v7026_v53, %v7008_v49  ;;  %v7045_v56 = vpop.f32.mrf.mxu3  ;;  %v6991_v58 = vadd.f32 %v6990_v57, %v11024_v2  ;;  %v7009_v59 = vpop.f32.mrf.mxu1  ;;  %v9146_v2 = vld [vmem:[%s11304_s0 + $0x1cc] sm:$0xf0]  ;;  %v8027_v24 = vor.u32 %v9131_v8, %v8024_v10  ;;  %v7902_v49 = vld [vmem:[%s11304_s0 + $0x60] sm:$0xf]  ;;  %v7904_v53 = vld [vmem:[%s11304_s0 + $0xe0] sm:$0xf0] }
 0x2e4   : > { %7398 = vmatpush.bf16.msra.mxu2 %v9366_v18  ;;  %v8015_v14 = vor.u32 %v9146_v2, %v8014_v1  ;;  %v7912_v57 = vld [vmem:[%s11304_s0 + $0xe8] sm:$0xf0]  ;;  %v9388_v10 = vld [vmem:[%s10594_s9 + $0x760] sm:$0xff] }
 0x2e5   : > { %7417 = vmatpush.bf16.msra.mxu3 %v9374_v26  ;;  %v11081_v61 = vadd.f32 %v7045_v56, %v7027_v55  ;;  %v7010_v0 = vadd.f32 %v7009_v59, %v6991_v58  ;;  %v9117_v55 = vld [vmem:[%s11304_s0 + $0xe4] sm:$0xf0]  ;;  %v9101_v56 = vld [vmem:[%s11304_s0 + $0x6c] sm:$0xf] }
 0x2e6   : > { %7361 = vmatpush.bf16.msra.mxu0 %v9349_v45  ;;  %v9381_v58 = vld [vmem:[%s10594_s9 + $0x728] sm:$0xff]  ;;  %v7915_v6 = vor.u32 %v9101_v56, %v7912_v57  ;;  %v9400_v56 = vld [vmem:[%s10594_s9 + $0x7c0] sm:$0xff] }
 0x2e7   : > { %7380 = vmatpush.bf16.msra.mxu1 %v9357_v36  ;;  %v9407_v36 = vld [vmem:[%s10594_s9 + $0x7f8] sm:$0xff] }
 0x2e8   : > { %7399 = vmatpush.bf16.msra.mxu2 %v9365_v27  ;;  %v9369_v27 = vld [vmem:[%s10594_s9 + $0x6c8] sm:$0xff] }
 0x2e9   : > { %7418 = vmatpush.bf16.msra.mxu3 %v9373_v47  ;;  %v9382_v47 = vld [vmem:[%s10594_s9 + $0x730] sm:$0xff] }
 0x2ea   : > { %7362 = vmatpush.bf16.msra.mxu0 %v9348_v39  ;;  %v7028_v13 = vpop.f32.mrf.mxu2  ;;  %v6993_v18 = vpop.f32.mrf.mxu0  ;;  %v9397_v39 = vld [vmem:[%s10594_s9 + $0x7a8] sm:$0xff] }
 0x2eb   : > { %7381 = vmatpush.bf16.msra.mxu1 %v9356_v50  ;;  %v7029_v16 = vadd.f32 %v7028_v13, %v7010_v0  ;;  %v7047_v17 = vpop.f32.mrf.mxu3  ;;  %v6994_v22 = vadd.f32 %v6993_v18, %v11037_v20  ;;  %v7012_v23 = vpop.f32.mrf.mxu1  ;;  %v9399_v20 = vld [vmem:[%s10594_s9 + $0x7b8] sm:$0xff]  ;;  %v9406_v50 = vld [vmem:[%s10594_s9 + $0x7f0] sm:$0xff] }
 0x2ec   : > { %7400 = vmatpush.bf16.msra.mxu2 %v9364_v48  ;;  %v9379_v13 = vld [vmem:[%s10594_s9 + $0x718] sm:$0xff] }
 0x2ed   : > { %7419 = vmatpush.bf16.msra.mxu3 %v9372_v51  ;;  %v11116_v26 = vadd.f32 %v7047_v17, %v7029_v16  ;;  %v7013_v29 = vadd.f32 %v7012_v23, %v6994_v22  ;;  %7296 = vmatmul.bf16.gmra.mxu0 %v8015_v14  ;;  %v9100_v51 = vld [vmem:[%s11304_s0 + $0x64] sm:$0xf]  ;;  %v9387_v14 = vld [vmem:[%s10594_s9 + $0x758] sm:$0xff]  ;;  %v9394_v23 = vld [vmem:[%s10594_s9 + $0x790] sm:$0xff] }
 0x2ee   : > { %7363 = vmatpush.bf16.msra.mxu0 %v9347_v60  ;;  %7315 = vmatmul.bf16.gmra.mxu1 %v8019_v19  ;;  %v7907_v2 = vor.u32 %v9100_v51, %v7904_v53  ;;  %v9403_v16 = vld [vmem:[%s10594_s9 + $0x7d8] sm:$0xff]  ;;  %v9392_v51 = vld [vmem:[%s10594_s9 + $0x780] sm:$0xff] }
 0x2ef   : > { %7382 = vmatpush.bf16.msra.mxu1 %v9355_v54  ;;  %7334 = vmatmul.bf16.gmra.mxu2 %v8023_v21  ;;  %v7910_v54 = vld [vmem:[%s11304_s0 + $0x68] sm:$0xf]  ;;  %v9376_v53 = vld [vmem:[%s10594_s9 + $0x700] sm:$0xff] }
 0x2f0   : > { %7401 = vmatpush.bf16.msra.mxu2 %v9363_v52  ;;  %7353 = vmatmul.bf16.gmra.mxu3 %v8027_v24  ;;  %v9389_v52 = vld [vmem:[%s10594_s9 + $0x768] sm:$0xff] }
 0x2f1   : > { %7420 = vmatpush.bf16.msra.mxu3 %v9371_v62  ;;  %v9405_v62 = vld [vmem:[%s10594_s9 + $0x7e8] sm:$0xff] }
 0x2f2   : > { %7364 = vmatpush.bf16.msra.mxu0 %v9346_v9  ;;  %v7031_v35 = vpop.f32.mrf.mxu2  ;;  %v6995_v41 = vpop.f32.mrf.mxu0  ;;  %v9380_v9 = vld [vmem:[%s10594_s9 + $0x720] sm:$0xff] }
 0x2f3   : > { %7383 = vmatpush.bf16.msra.mxu1 %v9354_v3  ;;  %v7032_v38 = vadd.f32 %v7031_v35, %v7013_v29  ;;  %v7050_v40 = vpop.f32.mrf.mxu3  ;;  %v6996_v43 = vadd.f32 %v6995_v41, %v11070_v46  ;;  %v7014_v44 = vpop.f32.mrf.mxu1  ;;  %v9116_v46 = vld [vmem:[%s11304_s0 + $0xdc] sm:$0xf0]  ;;  %v7911_v3 = vor.u32 %v9117_v55, %v7910_v54  ;;  %v9393_v35 = vld [vmem:[%s10594_s9 + $0x788] sm:$0xff] }
 0x2f4   : > { %7402 = vmatpush.bf16.msra.mxu2 %v9362_v63  ;;  %v7903_v60 = vor.u32 %v9116_v46, %v7902_v49  ;;  %v8030_v29 = vld [vmem:[%s11304_s0 + $0x160] sm:$0xf] }
 0x2f5   : > { %7421 = vmatpush.bf16.msra.mxu3 %v9370_v11  ;;  %v11130_v45 = vadd.f32 %v7050_v40, %v7032_v38  ;;  %v7015_v48 = vadd.f32 %v7014_v44, %v6996_v43  ;;  %v9385_v38 = vld [vmem:[%s10594_s9 + $0x748] sm:$0xff]  ;;  %v9384_v54 = vld [vmem:[%s10594_s9 + $0x740] sm:$0xff] }
 0x2f6   : > { %7365 = vmatpush.bf16.msra.mxu0 %v9345_v25  ;;  %v9378_v25 = vld [vmem:[%s10594_s9 + $0x710] sm:$0xff] }
 0x2f7   : > { %7384 = vmatpush.bf16.msra.mxu1 %v9353_v15 }
 0x2f8   : > { %7403 = vmatpush.bf16.msra.mxu2 %v9361_v12  ;;  %v9404_v12 = vld [vmem:[%s10594_s9 + $0x7e0] sm:$0xff] }
 0x2f9   : > { %7422 = vmatpush.bf16.msra.mxu3 %v9369_v27  ;;  %v9386_v27 = vld [vmem:[%s10594_s9 + $0x750] sm:$0xff] }
 0x2fa   : > { %7366 = vmatpush.bf16.msra.mxu0 %v9344_v32  ;;  %v7033_v59 = vpop.f32.mrf.mxu2  ;;  %v7064_v1 = vpop.f32.mrf.mxu0  ;;  %v8038_v32 = vld [vmem:[%s11304_s0 + $0x168] sm:$0xf] }
 0x2fb   : > { %7385 = vmatpush.bf16.msra.mxu1 %v9352_v30  ;;  %v7034_v63 = vadd.f32 %v7033_v59, %v7015_v48  ;;  %v7052_v0 = vpop.f32.mrf.mxu3  ;;  %v7065_v4 = vadd.f32 %v7064_v1, %v11081_v61  ;;  %v7083_v5 = vpop.f32.mrf.mxu1  ;;  %v9395_v61 = vld [vmem:[%s10594_s9 + $0x798] sm:$0xff]  ;;  %v9402_v30 = vld [vmem:[%s10594_s9 + $0x7d0] sm:$0xff] }
 0x2fc   : > { %7404 = vmatpush.bf16.msra.mxu2 %v9360_v28  ;;  %v7918_v1 = vld [vmem:[%s11304_s0 + $0x70] sm:$0xf] }
 0x2fd   : > { %7423 = vmatpush.bf16.msra.mxu3 %v9368_v33  ;;  %v11164_v8 = vadd.f32 %v7052_v0, %v7034_v63  ;;  %v7084_v11 = vadd.f32 %v7083_v5, %v7065_v4  ;;  %7367 = vmatmul.bf16.vlgmr.msra.gmra.mxu0 %v7903_v60  ;;  %v9149_v33 = vld [vmem:[%s11304_s0 + $0x1e4] sm:$0xf0]  ;;  %v7920_v4 = vld [vmem:[%s11304_s0 + $0xf0] sm:$0xf0]  ;;  %v7926_v5 = vld [vmem:[%s11304_s0 + $0x78] sm:$0xf] }
 0x2fe   : > { %7435 = vmatpush.bf16.msrb.mxu0 %v9383_v34  ;;  %7386 = vmatmul.bf16.vlgmr.msra.gmra.mxu1 %v7907_v2  ;;  %v9133_v34 = vld [vmem:[%s11304_s0 + $0x16c] sm:$0xf]  ;;  %v8039_v49 = vor.u32 %v9149_v33, %v8038_v32  ;;  %v9118_v2 = vld [vmem:[%s11304_s0 + $0xec] sm:$0xf0]  ;;  %v8054_v32 = vld [vmem:[%s11304_s0 + $0x178] sm:$0xf] }
 0x2ff   : > { %7454 = vmatpush.bf16.msrb.mxu1 %v9391_v31  ;;  %7405 = vmatmul.bf16.vlgmr.msra.gmra.mxu2 %v7911_v3  ;;  %v8032_v31 = vld [vmem:[%s11304_s0 + $0x1e0] sm:$0xf0]  ;;  %v9102_v3 = vld [vmem:[%s11304_s0 + $0x74] sm:$0xf]  ;;  %v9151_v33 = vld [vmem:[%s11304_s0 + $0x1f4] sm:$0xf0] }
 0x300   : > { %7473 = vmatpush.bf16.msrb.mxu2 %v9399_v20  ;;  %7424 = vmatmul.bf16.vlgmr.msra.gmra.mxu3 %v7915_v6  ;;  %v9132_v20 = vld [vmem:[%s11304_s0 + $0x164] sm:$0xf]  ;;  %v9119_v6 = vld [vmem:[%s11304_s0 + $0xf4] sm:$0xf0] }
 0x301   : > { %7492 = vmatpush.bf16.msrb.mxu3 %v9407_v36  ;;  %v8040_v36 = vld [vmem:[%s11304_s0 + $0x1e8] sm:$0xf0]  ;;  %v8035_v48 = vor.u32 %v9132_v20, %v8032_v31  ;;  %v9134_v20 = vld [vmem:[%s11304_s0 + $0x174] sm:$0xf] }
 0x302   : > { %7436 = vmatpush.bf16.msrb.mxu0 %v9382_v47  ;;  %v7102_v15 = vpop.f32.mrf.mxu2  ;;  %v7066_v19 = vpop.f32.mrf.mxu0  ;;  %v8043_v46 = vor.u32 %v9133_v34, %v8040_v36  ;;  %v8048_v31 = vld [vmem:[%s11304_s0 + $0x1f0] sm:$0xf0]  ;;  %v9135_v34 = vld [vmem:[%s11304_s0 + $0x17c] sm:$0xf] }
 0x303   : > { %7455 = vmatpush.bf16.msrb.mxu1 %v9390_v42  ;;  %v7103_v17 = vadd.f32 %v7102_v15, %v7084_v11  ;;  %v7121_v18 = vpop.f32.mrf.mxu3  ;;  %v7067_v21 = vadd.f32 %v7066_v19, %v11116_v26  ;;  %v7085_v22 = vpop.f32.mrf.mxu1  ;;  %v9148_v26 = vld [vmem:[%s11304_s0 + $0x1dc] sm:$0xf0]  ;;  %v9401_v42 = vld [vmem:[%s10594_s9 + $0x7c8] sm:$0xff] }
 0x304   : > { %7474 = vmatpush.bf16.msrb.mxu2 %v9398_v37  ;;  %v9377_v37 = vld [vmem:[%s10594_s9 + $0x708] sm:$0xff]  ;;  %v8031_v41 = vor.u32 %v9148_v26, %v8030_v29 }
 0x305   : > { %7493 = vmatpush.bf16.msrb.mxu3 %v9406_v50  ;;  %v11175_v24 = vadd.f32 %v7121_v18, %v7103_v17  ;;  %v7086_v28 = vadd.f32 %v7085_v22, %v7067_v21 }
 0x306   : > { %7437 = vmatpush.bf16.msrb.mxu0 %v9381_v58 }
 0x307   : > { %7456 = vmatpush.bf16.msrb.mxu1 %v9389_v52 }
 0x308   : > { %7475 = vmatpush.bf16.msrb.mxu2 %v9397_v39 }
 0x309   : > { %7494 = vmatpush.bf16.msrb.mxu3 %v9405_v62 }
 0x30a   : > { %7438 = vmatpush.bf16.msrb.mxu0 %v9380_v9  ;;  %v7104_v40 = vpop.f32.mrf.mxu2  ;;  %v7069_v47 = vpop.f32.mrf.mxu0 }
 0x30b   : > { %7457 = vmatpush.bf16.msrb.mxu1 %v9388_v10  ;;  %v7105_v43 = vadd.f32 %v7104_v40, %v7086_v28  ;;  %v7123_v44 = vpop.f32.mrf.mxu3  ;;  %v7070_v50 = vadd.f32 %v7069_v47, %v11130_v45  ;;  %v7088_v39 = vpop.f32.mrf.mxu1  ;;  %v7919_v10 = vor.u32 %v9118_v2, %v7918_v1 }
 0x30c   : > { %7476 = vmatpush.bf16.msrb.mxu2 %v9396_v7  ;;  %v9103_v7 = vld [vmem:[%s11304_s0 + $0x7c] sm:$0xf] }
 0x30d   : > { %7495 = vmatpush.bf16.msrb.mxu3 %v9404_v12  ;;  %v7124_v52 = vadd.f32 %v7123_v44, %v7105_v43  ;;  %v7089_v55 = vadd.f32 %v7088_v39, %v7070_v50  ;;  %7372 = vmatmul.bf16.gmra.mxu0 %v8031_v41  ;;  %v8055_v43 = vor.u32 %v9151_v33, %v8054_v32 }
 0x30e   : > { %7439 = vmatpush.bf16.msrb.mxu0 %v9379_v13  ;;  %7391 = vmatmul.bf16.gmra.mxu1 %v8035_v48  ;;  %v7923_v13 = vor.u32 %v9102_v3, %v7920_v4 }
 0x30f   : > { %7458 = vmatpush.bf16.msrb.mxu1 %v9387_v14  ;;  %7410 = vmatmul.bf16.gmra.mxu2 %v8039_v49  ;;  %v7927_v14 = vor.u32 %v9119_v6, %v7926_v5 }
 0x310   : > { %7477 = vmatpush.bf16.msrb.mxu2 %v9395_v61  ;;  %7429 = vmatmul.bf16.gmra.mxu3 %v8043_v46 }
 0x311   : > { %7496 = vmatpush.bf16.msrb.mxu3 %v9403_v16 }
 0x312   : > { %7440 = vmatpush.bf16.msrb.mxu0 %v9378_v25  ;;  %v7107_v45 = vpop.f32.mrf.mxu2  ;;  %v7071_v59 = vpop.f32.mrf.mxu0 }
 0x313   : > { %7459 = vmatpush.bf16.msrb.mxu1 %v9386_v27  ;;  %v7108_v57 = vadd.f32 %v7107_v45, %v7089_v55  ;;  %v7126_v58 = vpop.f32.mrf.mxu3  ;;  %v7072_v60 = vadd.f32 %v7071_v59, %v11164_v8  ;;  %v7090_v62 = vpop.f32.mrf.mxu1  ;;  %v7928_v8 = vld [vmem:[%s11304_s0 + $0xf8] sm:$0xf0] }
 0x314   : > { %7478 = vmatpush.bf16.msrb.mxu2 %v9394_v23  ;;  %v7931_v17 = vor.u32 %v9103_v7, %v7928_v8 }
 0x315   : > { %7497 = vmatpush.bf16.msrb.mxu3 %v9402_v30  ;;  %v7127_v63 = vadd.f32 %v7126_v58, %v7108_v57  ;;  %v7091_v0 = vadd.f32 %v7090_v62, %v7072_v60  ;;  %v9150_v30 = vld [vmem:[%s11304_s0 + $0x1ec] sm:$0xf0] }
 0x316   : > { %7441 = vmatpush.bf16.msrb.mxu0 %v9377_v37 }
 0x317   : > { %7460 = vmatpush.bf16.msrb.mxu1 %v9385_v38 }
 0x318   : > { %7479 = vmatpush.bf16.msrb.mxu2 %v9393_v35  ;;  %v8056_v35 = vld [vmem:[%s11304_s0 + $0x1f8] sm:$0xf0] }
 0x319   : > { %7498 = vmatpush.bf16.msrb.mxu3 %v9401_v42  ;;  %v8051_v42 = vor.u32 %v9134_v20, %v8048_v31  ;;  %v8059_v48 = vor.u32 %v9135_v34, %v8056_v35 }
 0x31a   : > { %7442 = vmatpush.bf16.msrb.mxu0 %v9376_v53  ;;  %v7109_v9 = vpop.f32.mrf.mxu2  ;;  %v7140_v61 = vpop.f32.mrf.mxu0 }
 0x31b   : > { %7461 = vmatpush.bf16.msrb.mxu1 %v9384_v54  ;;  %v7110_v11 = vadd.f32 %v7109_v9, %v7091_v0  ;;  %v7128_v12 = vpop.f32.mrf.mxu3  ;;  %v7141_v15 = vadd.f32 %v7140_v61, %v11175_v24  ;;  %v7159_v16 = vpop.f32.mrf.mxu1  ;;  %v8046_v24 = vld [vmem:[%s11304_s0 + $0x170] sm:$0xf] }
 0x31c   : > { %7480 = vmatpush.bf16.msrb.mxu2 %v9392_v51  ;;  %v8047_v37 = vor.u32 %v9150_v30, %v8046_v24 }
 0x31d   : > { %7499 = vmatpush.bf16.msrb.mxu3 %v9400_v56  ;;  %v7129_v18 = vadd.f32 %v7128_v12, %v7110_v11  ;;  %v7160_v19 = vadd.f32 %v7159_v16, %v7141_v15  ;;  %7443 = vmatmul.bf16.vlgmr.msrb.gmra.mxu0 %v7919_v10 }
 0x31e   : > { %7462 = vmatmul.bf16.vlgmr.msrb.gmra.mxu1 %v7923_v13 }
 0x31f   : > { %7481 = vmatmul.bf16.vlgmr.msrb.gmra.mxu2 %v7927_v14 }
 0x320   : > { %7500 = vmatmul.bf16.vlgmr.msrb.gmra.mxu3 %v7931_v17 }
 0x322   : > { %v7178_v21 = vpop.f32.mrf.mxu2  ;;  %v7142_v25 = vpop.f32.mrf.mxu0 }
 0x323   : > { %v7179_v22 = vadd.f32 %v7178_v21, %v7160_v19  ;;  %v7197_v23 = vpop.f32.mrf.mxu3  ;;  %v7143_v27 = vadd.f32 %v7142_v25, %v7124_v52  ;;  %v7161_v28 = vpop.f32.mrf.mxu1 }
 0x325   : > { %v7198_v29 = vadd.f32 %v7197_v23, %v7179_v22  ;;  %v7162_v26 = vadd.f32 %v7161_v28, %v7143_v27 }
 0x32a   : > { %v7180_v36 = vpop.f32.mrf.mxu2  ;;  %v7145_v41 = vpop.f32.mrf.mxu0 }
 0x32b   : > { %v7181_v38 = vadd.f32 %v7180_v36, %v7162_v26  ;;  %v7199_v40 = vpop.f32.mrf.mxu3  ;;  %v7146_v44 = vadd.f32 %v7145_v41, %v7127_v63  ;;  %v7164_v47 = vpop.f32.mrf.mxu1 }
 0x32d   : > { %v7200_v49 = vadd.f32 %v7199_v40, %v7181_v38  ;;  %v7165_v50 = vadd.f32 %v7164_v47, %v7146_v44  ;;  %7448 = vmatmul.bf16.gmra.mxu0 %v8047_v37 }
 0x32e   : > { %7467 = vmatmul.bf16.gmra.mxu1 %v8051_v42 }
 0x32f   : > { %7486 = vmatmul.bf16.gmra.mxu2 %v8055_v43 }
 0x330   : > { %7505 = vmatmul.bf16.gmra.mxu3 %v8059_v48 }
 0x332   : > { %v7183_v39 = vpop.f32.mrf.mxu2  ;;  %v7147_v52 = vpop.f32.mrf.mxu0 }
 0x333   : > { %v7184_v46 = vadd.f32 %v7183_v39, %v7165_v50  ;;  %v7202_v51 = vpop.f32.mrf.mxu3  ;;  %v7148_v53 = vadd.f32 %v7147_v52, %v7129_v18  ;;  %v7166_v54 = vpop.f32.mrf.mxu1 }
 0x335   : > { %v7203_v55 = vadd.f32 %v7202_v51, %v7184_v46  ;;  %v7167_v56 = vadd.f32 %v7166_v54, %v7148_v53 }
 0x33a   : > { %v7185_v45 = vpop.f32.mrf.mxu2  ;;  %v7216_v59 = vpop.f32.mrf.mxu0 }
 0x33b   : > { %v7186_v57 = vadd.f32 %v7185_v45, %v7167_v56  ;;  %v7204_v58 = vpop.f32.mrf.mxu3  ;;  %v7217_v60 = vadd.f32 %v7216_v59, %v7198_v29  ;;  %v7235_v62 = vpop.f32.mrf.mxu1 }
 0x33d   : > { %v7205_v63 = vadd.f32 %v7204_v58, %v7186_v57  ;;  %v7236_v0 = vadd.f32 %v7235_v62, %v7217_v60 }
 0x342   : > { %v7254_v1 = vpop.f32.mrf.mxu2  ;;  %v7218_v4 = vpop.f32.mrf.mxu0 }
 0x343   : > { %v7255_v2 = vadd.f32 %v7254_v1, %v7236_v0  ;;  %v7273_v3 = vpop.f32.mrf.mxu3  ;;  %v7219_v5 = vadd.f32 %v7218_v4, %v7200_v49  ;;  %v7237_v6 = vpop.f32.mrf.mxu1 }
 0x345   : > { %v7274_v7 = vadd.f32 %v7273_v3, %v7255_v2  ;;  %v7238_v8 = vadd.f32 %v7237_v6, %v7219_v5 }
 0x34a   : > { %v7256_v9 = vpop.f32.mrf.mxu2  ;;  %v7221_v12 = vpop.f32.mrf.mxu0 }
 0x34b   : > { %v7257_v10 = vadd.f32 %v7256_v9, %v7238_v8  ;;  %v7275_v11 = vpop.f32.mrf.mxu3  ;;  %v7222_v61 = vadd.f32 %v7221_v12, %v7203_v55  ;;  %v7240_v13 = vpop.f32.mrf.mxu1 }
 0x34d   : > { %v7276_v14 = vadd.f32 %v7275_v11, %v7257_v10  ;;  %v7241_v15 = vadd.f32 %v7240_v13, %v7222_v61 }
 0x352   : > { %v7259_v16 = vpop.f32.mrf.mxu2  ;;  %v7223_v19 = vpop.f32.mrf.mxu0 }
 0x353   : > { %v7260_v17 = vadd.f32 %v7259_v16, %v7241_v15  ;;  %v7278_v18 = vpop.f32.mrf.mxu3  ;;  %v7224_v21 = vadd.f32 %v7223_v19, %v7205_v63  ;;  %v7242_v22 = vpop.f32.mrf.mxu1 }
 0x355   : > { %v7279_v23 = vadd.f32 %v7278_v18, %v7260_v17  ;;  %v7243_v25 = vadd.f32 %v7242_v22, %v7224_v21 }
 0x35a   : > { %v7261_v27 = vpop.f32.mrf.mxu2  ;;  %v7292_v26 = vpop.f32.mrf.mxu0 }
 0x35b   : > { %v7262_v28 = vadd.f32 %v7261_v27, %v7243_v25  ;;  %v7280_v29 = vpop.f32.mrf.mxu3  ;;  %v7311_v24 = vpop.f32.mrf.mxu1  ;;  %v7293_v51 = vadd.f32 %v7292_v26, %v7274_v7 }
 0x35d   : > { %v7281_v30 = vadd.f32 %v7280_v29, %v7262_v28  ;;  %v7312_v52 = vadd.f32 %v7311_v24, %v7293_v51 }
 0x362   : > { %v7330_v20 = vpop.f32.mrf.mxu2  ;;  %v7294_v32 = vpop.f32.mrf.mxu0 }
 0x363   : > { %v7349_v31 = vpop.f32.mrf.mxu3  ;;  %v7313_v33 = vpop.f32.mrf.mxu1  ;;  %v7331_v54 = vadd.f32 %v7330_v20, %v7312_v52  ;;  %v7295_v57 = vadd.f32 %v7294_v32, %v7276_v14 }
 0x365   : > { %v7350_v58 = vadd.f32 %v7349_v31, %v7331_v54  ;;  %v7314_v59 = vadd.f32 %v7313_v33, %v7295_v57 }
 0x36a   : > { %v7332_v34 = vpop.f32.mrf.mxu2  ;;  %v7297_v36 = vpop.f32.mrf.mxu0 }
 0x36b   : > { %v7351_v35 = vpop.f32.mrf.mxu3  ;;  %v7316_v37 = vpop.f32.mrf.mxu1  ;;  %v7333_v63 = vadd.f32 %v7332_v34, %v7314_v59  ;;  %v7298_v3 = vadd.f32 %v7297_v36, %v7279_v23 }
 0x36d   : > { %v7352_v5 = vadd.f32 %v7351_v35, %v7333_v63  ;;  %v7317_v7 = vadd.f32 %v7316_v37, %v7298_v3 }
 0x372   : > { %v7335_v38 = vpop.f32.mrf.mxu2  ;;  %v7299_v41 = vpop.f32.mrf.mxu0 }
 0x373   : > { %v7354_v40 = vpop.f32.mrf.mxu3  ;;  %v7318_v42 = vpop.f32.mrf.mxu1  ;;  %v7336_v10 = vadd.f32 %v7335_v38, %v7317_v7  ;;  %v7300_v14 = vadd.f32 %v7299_v41, %v7281_v30 }
 0x375   : > { %v7355_v17 = vadd.f32 %v7354_v40, %v7336_v10  ;;  %v7319_v19 = vadd.f32 %v7318_v42, %v7300_v14 }
 0x37a   : > { %v7337_v43 = vpop.f32.mrf.mxu2  ;;  %v7368_v47 = vpop.f32.mrf.mxu0 }
 0x37b   : > { %v7356_v44 = vpop.f32.mrf.mxu3  ;;  %v7387_v48 = vpop.f32.mrf.mxu1  ;;  %v7369_v60 = vadd.f32 %v7368_v47, %v7350_v58  ;;  %v7338_v25 = vadd.f32 %v7337_v43, %v7319_v19 }
 0x37d   : > { %v7388_v4 = vadd.f32 %v7387_v48, %v7369_v60  ;;  %v7357_v30 = vadd.f32 %v7356_v44, %v7338_v25 }
 0x382   : > { %v7406_v49 = vpop.f32.mrf.mxu2  ;;  %v7370_v39 = vpop.f32.mrf.mxu0 }
 0x383   : > { %v7425_v50 = vpop.f32.mrf.mxu3  ;;  %v7389_v46 = vpop.f32.mrf.mxu1  ;;  %v7407_v6 = vadd.f32 %v7406_v49, %v7388_v4  ;;  %v7371_v8 = vadd.f32 %v7370_v39, %v7352_v5 }
 0x385   : > { %v7426_v11 = vadd.f32 %v7425_v50, %v7407_v6  ;;  %v7390_v15 = vadd.f32 %v7389_v46, %v7371_v8 }
 0x38a   : > { %v7408_v53 = vpop.f32.mrf.mxu2  ;;  %v7373_v56 = vpop.f32.mrf.mxu0 }
 0x38b   : > { %v7427_v55 = vpop.f32.mrf.mxu3  ;;  %v7392_v45 = vpop.f32.mrf.mxu1  ;;  %v7409_v18 = vadd.f32 %v7408_v53, %v7390_v15  ;;  %v7374_v21 = vadd.f32 %v7373_v56, %v7355_v17 }
 0x38d   : > { %v7428_v27 = vadd.f32 %v7427_v55, %v7409_v18  ;;  %v7393_v20 = vadd.f32 %v7392_v45, %v7374_v21 }
 0x392   : > { %v7411_v62 = vpop.f32.mrf.mxu2  ;;  %v7375_v1 = vpop.f32.mrf.mxu0 }
 0x393   : > { %v7430_v0 = vpop.f32.mrf.mxu3  ;;  %v7394_v2 = vpop.f32.mrf.mxu1  ;;  %v7412_v33 = vadd.f32 %v7411_v62, %v7393_v20  ;;  %v7376_v34 = vadd.f32 %v7375_v1, %v7357_v30 }
 0x395   : > { %v7431_v37 = vadd.f32 %v7430_v0, %v7412_v33  ;;  %v7395_v42 = vadd.f32 %v7394_v2, %v7376_v34 }
 0x39a   : > { %v7413_v9 = vpop.f32.mrf.mxu2  ;;  %v7444_v61 = vpop.f32.mrf.mxu0 }
 0x39b   : > { %v7432_v12 = vpop.f32.mrf.mxu3  ;;  %v7463_v13 = vpop.f32.mrf.mxu1  ;;  %v7445_v16 = vadd.f32 %v7444_v61, %v7426_v11  ;;  %v7414_v49 = vadd.f32 %v7413_v9, %v7395_v42 }
 0x39d   : > { %v7464_v22 = vadd.f32 %v7463_v13, %v7445_v16  ;;  %v7433_v53 = vadd.f32 %v7432_v12, %v7414_v49 }
 0x3a2   : > { %v7482_v23 = vpop.f32.mrf.mxu2  ;;  %v7446_v26 = vpop.f32.mrf.mxu0 }
 0x3a3   : > { %v7483_v28 = vadd.f32 %v7482_v23, %v7464_v22  ;;  %v7501_v29 = vpop.f32.mrf.mxu3  ;;  %v7465_v24 = vpop.f32.mrf.mxu1  ;;  %v7447_v32 = vadd.f32 %v7446_v26, %v7428_v27 }
 0x3a5   : > { %v7502_v31 = vadd.f32 %v7501_v29, %v7483_v28  ;;  %v7466_v35 = vadd.f32 %v7465_v24, %v7447_v32 }
 0x3a7   : > { %7526 = vst [vmem:[%s11265_s8] sm:$0xff] %v7502_v31  ;;  %v7540_v44 = vmul.f32 %v7502_v31, %v7502_v31 }
 0x3aa   : > { %v7484_v36 = vpop.f32.mrf.mxu2  ;;  %v7449_v41 = vpop.f32.mrf.mxu0 }
 0x3ab   : > { %v7485_v38 = vadd.f32 %v7484_v36, %v7466_v35  ;;  %v7503_v40 = vpop.f32.mrf.mxu3  ;;  %v7450_v47 = vadd.f32 %v7449_v41, %v7431_v37  ;;  %v7468_v48 = vpop.f32.mrf.mxu1 }
 0x3ad   : > { %v7504_v43 = vadd.f32 %v7503_v40, %v7485_v38  ;;  %v7469_v51 = vadd.f32 %v7468_v48, %v7450_v47 }
 0x3ae   : > { %v7614_v18 = vld [vmem:[%s11265_s8] sm:$0xff] (%p9548_p6) }
 0x3af   : > { %7527 = vst [vmem:[%s11265_s8 + $0x8] sm:$0xff] %v7504_v43  ;;  %v7530_v50 = vadd.f32 %v7504_v43, %v7502_v31  ;;  %v7541_v39 = vmul.f32 %v7504_v43, %v7504_v43 }
 0x3b0   : > { %7615 = vst [vmem:[%s7579_s23] sm:$0xff] (%p9548_p6), %v7614_v18 }
 0x3b1   : > { %v7544_v46 = vadd.f32 %v7541_v39, %v7540_v44 }
 0x3b2   : > { %v7487_v52 = vpop.f32.mrf.mxu2  ;;  %v7451_v56 = vpop.f32.mrf.mxu0 }
 0x3b3   : > { %v7488_v54 = vadd.f32 %v7487_v52, %v7469_v51  ;;  %v7506_v55 = vpop.f32.mrf.mxu3  ;;  %v7452_v57 = vadd.f32 %v7451_v56, %v7433_v53  ;;  %v7470_v60 = vpop.f32.mrf.mxu1 }
 0x3b5   : > { %v7507_v45 = vadd.f32 %v7506_v55, %v7488_v54  ;;  %v7471_v63 = vadd.f32 %v7470_v60, %v7452_v57 }
 0x3b6   : > { %v7616_v19 = vld [vmem:[%s11265_s8 + $0x8] sm:$0xff] (%p9548_p6) }
 0x3b7   : > { %7528 = vst [vmem:[%s11265_s8 + $0x10] sm:$0xff] %v7507_v45  ;;  %v7531_v58 = vadd.f32 %v7530_v50, %v7507_v45  ;;  %v7542_v59 = vmul.f32 %v7507_v45, %v7507_v45 }
 0x3b8   : > { %7617 = vst [vmem:[%s7579_s23 + $0x20] sm:$0xff] (%p9548_p6), %v7616_v19 }
 0x3b9   : > { %v7545_v62 = vadd.f32 %v7544_v46, %v7542_v59 }
 0x3ba   : > { %v7489_v0 = vpop.f32.mrf.mxu2 }
 0x3bb   : > { %v7490_v1 = vadd.f32 %v7489_v0, %v7471_v63  ;;  %v7508_v2 = vpop.f32.mrf.mxu3 }
 0x3bd   : > { %v7509_v3 = vadd.f32 %v7508_v2, %v7490_v1 }
 0x3be   : > { %v7618_v21 = vld [vmem:[%s11265_s8 + $0x10] sm:$0xff] (%p9548_p6) }
 0x3bf   : > { %7529 = vst [vmem:[%s11265_s8 + $0x18] sm:$0xff] %v7509_v3  ;;  %v7532_v4 = vadd.f32 %v7531_v58, %v7509_v3  ;;  %v7543_v5 = vmul.f32 %v7509_v3, %v7509_v3 }
 0x3c0   : > { %7619 = vst [vmem:[%s7579_s23 + $0x40] sm:$0xff] (%p9548_p6), %v7618_v21 }
 0x3c1   : > { %v7533_v6 = vrot.slane %v7532_v4, 4  ;;  %v7546_v7 = vadd.f32 %v7545_v62, %v7543_v5 }
 0x3c3   : > { %v7534_v8 = vadd.f32 %v7533_v6, %v7532_v4  ;;  %v7547_v9 = vrot.slane %v7546_v7, 4 }
 0x3c5   : > { %v7535_v10 = vrot.slane %v7534_v8, 2  ;;  %v7548_v11 = vadd.f32 %v7547_v9, %v7546_v7 }
 0x3c6   : > { %v7620_v22 = vld [vmem:[%s11265_s8 + $0x18] sm:$0xff] (%p9548_p6) }
 0x3c7   : > { %v7536_v12 = vadd.f32 %v7535_v10, %v7534_v8  ;;  %v7549_v61 = vrot.slane %v7548_v11, 2  ;;  %7621 = vst [vmem:[%s7579_s23 + $0x60] sm:$0xff] (%p9548_p6), %v7620_v22 }
 0x3c9   : > { %v7537_v13 = vrot.slane %v7536_v12, 1  ;;  %v7550_v14 = vadd.f32 %v7549_v61, %v7548_v11 }
 0x3cb   : > { %v7538_v15 = vadd.f32 %v7537_v13, %v7536_v12  ;;  %v7551_v16 = vrot.slane %v7550_v14, 1  ;;  %7574 = sbr.rel (!%p9548_p6) target bundleno = 976 (0x3d0), region = 92 }
 0x3cd   : > { %7539 = vst [vmem:[%s4451_s11] sm:$0x1] %v7538_v15  ;;  %v7552_v17 = vadd.f32 %v7551_v16, %v7550_v14 }
 0x3cf   : > { %7553 = vst [vmem:[%s4458_s13] sm:$0x1] %v7552_v17 }
 0x3d0 PF: > { %s15_s19 = sadd.s32 1, %s9486_s19   ;;  %s11310_s15 = smov %s9474_s16 }
 0x3d1   : > { %p12_p12 = scmp.ge.s32.totalorder %s15_s19, 6   ;;  %s11311_s16 = smov %s9553_s25 }
 0x3d2   : > { %s11312_s17 = smov %s9482_s18  ;;  %s11313_s18 = smov %s11315_s20 }
 0x3d3   :  { %14 = sbr.rel (!%p12_p12) target bundleno = 3 (0x3), region = 192 }

// kernel: discriminator_forward.15
= control target key start
LH: loop header
LB: loop body
LE: loop exit
PB: predicated region body
PF: predicated region fallthrough
CT: control target
= control target key end

     0   :  { %vm379_vm0 = vcmask 1041408   ;;  %vm381_vm1 = vcmask 1045508   ;;  %vm383_vm2 = vcmask 1043456   ;;  %vm775_vm7 = vcmask 1024   ;;  %s1236_s0 = inlined_call_operand.vmem [shape: bf16[2,8192], index: 0, kind: input, shape index: {}]   ;;  %s1237_s1 = inlined_call_operand.vmem [shape: bf16[1,8192], index: 1, kind: input, shape index: {}]   ;;  %s1238_s2 = inlined_call_operand.vmem [shape: f32[2,1], index: 2, kind: output, shape index: {}]  }
   0x1   :  { %v803_v0 = vld [vmem:[%s1236_s0] sm:$0xff]  ;;  %v808_v1 = vld [vmem:[%s1236_s0 + $0x8] sm:$0xff]  ;;  %v813_v2 = vld [vmem:[%s1236_s0 + $0x30] sm:$0xff] }
   0x2   :  { %v818_v3 = vld [vmem:[%s1236_s0 + $0x38] sm:$0xff]  ;;  %v35_v4 = vld [vmem:[%s1237_s1] sm:$0xff]  ;;  %v36_v5 = vld [vmem:[%s1237_s1 + $0x8] sm:$0xff] }
   0x3   :  { %v37_v10 = vld [vmem:[%s1237_s1 + $0x10] sm:$0xff]  ;;  %v38_v11 = vld [vmem:[%s1237_s1 + $0x18] sm:$0xff]  ;;  %v39_v16 = vld [vmem:[%s1237_s1 + $0x20] sm:$0xff]  ;;  %v852_v20 = vunpack.c.l.bf16 %v35_v4  ;;  %v854_v21 = vunpack.c.h.bf16 %v35_v4  ;;  %v856_v22 = vunpack.c.l.bf16 %v36_v5  ;;  %v858_v23 = vunpack.c.h.bf16 %v36_v5 }
   0x4   :  { %v40_v17 = vld [vmem:[%s1237_s1 + $0x28] sm:$0xff]  ;;  %v41_v18 = vld [vmem:[%s1237_s1 + $0x30] sm:$0xff]  ;;  %v42_v19 = vld [vmem:[%s1237_s1 + $0x38] sm:$0xff]  ;;  %v860_v24 = vunpack.c.l.bf16 %v37_v10  ;;  %v862_v25 = vunpack.c.h.bf16 %v37_v10  ;;  %v864_v26 = vunpack.c.l.bf16 %v38_v11  ;;  %v866_v27 = vunpack.c.h.bf16 %v38_v11 }
   0x5   :  { %v868_v28 = vunpack.c.l.bf16 %v39_v16  ;;  %v870_v29 = vunpack.c.h.bf16 %v39_v16  ;;  %v872_v30 = vunpack.c.l.bf16 %v40_v17  ;;  %v874_v31 = vunpack.c.h.bf16 %v40_v17 }
   0x6   :  { %v876_v32 = vunpack.c.l.bf16 %v41_v18  ;;  %v878_v33 = vunpack.c.h.bf16 %v41_v18  ;;  %v880_v34 = vunpack.c.l.bf16 %v42_v19  ;;  %v882_v35 = vunpack.c.h.bf16 %v42_v19 }
   0x7   :  { %v75_v36 = vperm.slane %v852_v20, 0  ;;  %v76_v37 = vperm.slane %v852_v20, 2  ;;  %v77_v38 = vperm.slane %v852_v20, 4  ;;  %v78_v39 = vperm.slane %v852_v20, 6 }
   0x8   :  { %v79_v40 = vperm.slane %v854_v21, 0  ;;  %v80_v41 = vperm.slane %v854_v21, 2  ;;  %v81_v42 = vperm.slane %v854_v21, 4  ;;  %v82_v43 = vperm.slane %v854_v21, 6 }
   0x9   :  { %v83_v44 = vperm.slane %v856_v22, 0  ;;  %v84_v45 = vperm.slane %v856_v22, 2  ;;  %v85_v46 = vperm.slane %v856_v22, 4  ;;  %v86_v47 = vperm.slane %v856_v22, 6 }
   0xa   :  { %v87_v48 = vperm.slane %v858_v23, 0  ;;  %v88_v49 = vperm.slane %v858_v23, 2  ;;  %v89_v50 = vperm.slane %v858_v23, 4  ;;  %v90_v51 = vperm.slane %v858_v23, 6 }
   0xb   :  { %v123_v21 = vperm.slane %v876_v32, 0  ;;  %v124_v22 = vperm.slane %v876_v32, 2  ;;  %v125_v23 = vperm.slane %v876_v32, 4  ;;  %v126_v10 = vperm.slane %v876_v32, 6 }
   0xc   :  { %v127_v11 = vperm.slane %v878_v33, 0  ;;  %v128_v16 = vperm.slane %v878_v33, 2  ;;  %v129_v17 = vperm.slane %v878_v33, 4  ;;  %v130_v18 = vperm.slane %v878_v33, 6 }
   0xd   :  { %v131_v19 = vperm.slane %v880_v34, 0  ;;  %v132_v20 = vperm.slane %v880_v34, 2  ;;  %v133_v5 = vperm.slane %v880_v34, 4  ;;  %v134_v9 = vperm.slane %v880_v34, 6 }
   0xe   :  { %v135_v8 = vperm.slane %v882_v35, 0  ;;  %v136_v32 = vperm.slane %v882_v35, 2  ;;  %v137_v4 = vperm.slane %v882_v35, 4  ;;  %v138_v63 = vperm.slane %v882_v35, 6 }
   0xf   :  { %v203_v62 = vperm.slane %v75_v36, 0  ;;  %v204_v61 = vperm.slane %v76_v37, 0  ;;  %v205_v60 = vperm.slane %v77_v38, 0  ;;  %v206_v33 = vperm.slane %v78_v39, 0 }
  0x10   :  { %v207_v56 = vperm.slane %v79_v40, 0  ;;  %v208_v52 = vperm.slane %v80_v41, 0  ;;  %v209_v15 = vperm.slane %v81_v42, 0  ;;  %v210_v14 = vperm.slane %v82_v43, 0 }
  0x11   :  { %v947_v13 = vperm.slane %v83_v44, 0  ;;  %v949_v12 = vperm.slane %v84_v45, 0  ;;  %v951_v34 = vperm.slane %v85_v46, 0  ;;  %v953_v59 = vperm.slane %v86_v47, 0 }
  0x12   :  { %v955_v58 = vperm.slane %v87_v48, 0  ;;  %v957_v57 = vperm.slane %v88_v49, 0  ;;  %v959_v35 = vperm.slane %v89_v50, 0  ;;  %v961_v36 = vperm.slane %v90_v51, 0 }
  0x13   :  { %v251_v37 = vperm.slane %v123_v21, 0  ;;  %v252_v38 = vperm.slane %v124_v22, 0  ;;  %v253_v39 = vperm.slane %v125_v23, 0  ;;  %v254_v40 = vperm.slane %v126_v10, 0 }
  0x14   :  { %v255_v41 = vperm.slane %v127_v11, 0  ;;  %v256_v42 = vperm.slane %v128_v16, 0  ;;  %v257_v43 = vperm.slane %v129_v17, 0  ;;  %v258_v44 = vperm.slane %v130_v18, 0 }
  0x15   :  { %v259_v45 = vperm.slane %v131_v19, 0  ;;  %v260_v46 = vperm.slane %v132_v20, 0  ;;  %v261_v47 = vperm.slane %v133_v5, 0  ;;  %v262_v55 = vperm.slane %v134_v9, 0 }
  0x16   :  { %v263_v48 = vperm.slane %v135_v8, 0  ;;  %v264_v7 = vperm.slane %v136_v32, 0  ;;  %v265_v49 = vperm.slane %v137_v4, 0  ;;  %v266_v54 = vperm.slane %v138_v63, 0 }
  0x17   :  { %v331_v50 = vrot.slane %v204_v61, 6  ;;  %v332_v53 = vrot.slane %v205_v60, 4  ;;  %v333_v51 = vrot.slane %v206_v33, 2  ;;  %v334_v6 = vrot.slane %v208_v52, 6 }
  0x18   :  { %v335_v21 = vrot.slane %v209_v15, 4  ;;  %v336_v22 = vrot.slane %v210_v14, 2  ;;  %v337_v10 = vrot.slane %v949_v12, 6  ;;  %v338_v11 = vrot.slane %v951_v34, 4 }
  0x19   :  { %v339_v16 = vrot.slane %v953_v59, 2  ;;  %v367_v5 = vrot.slane %v252_v38, 6  ;;  %v368_v9 = vrot.slane %v253_v39, 4  ;;  %v369_v8 = vrot.slane %v254_v40, 2 }
  0x1a   :  { %v370_v17 = vrot.slane %v256_v42, 6  ;;  %v371_v4 = vrot.slane %v257_v43, 4  ;;  %v372_v63 = vrot.slane %v258_v44, 2  ;;  %v373_v61 = vrot.slane %v260_v46, 6 }
  0x1b   :  { %v380_v60 = vsel %vm379_vm0, %v203_v62, %v331_v50  ;;  %v382_v15 = vsel %vm381_vm1, %v332_v53, %v333_v51  ;;  %v374_v14 = vrot.slane %v261_v47, 4  ;;  %v375_v12 = vrot.slane %v262_v55, 2 }
  0x1c   :  { %v385_v52 = vsel %vm379_vm0, %v207_v56, %v334_v6  ;;  %v386_v18 = vsel %vm381_vm1, %v335_v21, %v336_v22  ;;  %v340_v59 = vrot.slane %v957_v57, 6  ;;  %v376_v19 = vrot.slane %v264_v7, 6 }
  0x1d   :  { %v377_v20 = vrot.slane %v265_v49, 4  ;;  %v378_v23 = vrot.slane %v266_v54, 2  ;;  %v341_v32 = vrot.slane %v959_v35, 4  ;;  %v342_v33 = vrot.slane %v961_v36, 2 }
  0x1e   :  { %v384_v62 = vsel %vm383_vm2, %v380_v60, %v382_v15  ;;  %v418_v53 = vsel %vm379_vm0, %v251_v37, %v367_v5  ;;  %v387_v34 = vsel %vm383_vm2, %v385_v52, %v386_v18  ;;  %v419_v55 = vsel %vm381_vm1, %v368_v9, %v369_v8 }
  0x1f   :  { %v421_v6 = vsel %vm379_vm0, %v255_v41, %v370_v17  ;;  %v422_v56 = vsel %vm381_vm1, %v371_v4, %v372_v63  ;;  %v420_v7 = vsel %vm383_vm2, %v418_v53, %v419_v55  ;;  %v424_v57 = vsel %vm379_vm0, %v259_v45, %v373_v61 }
  0x20   :  { %v423_v54 = vsel %vm383_vm2, %v421_v6, %v422_v56  ;;  %v425_v35 = vsel %vm381_vm1, %v374_v14, %v375_v12  ;;  %v427_v37 = vsel %vm379_vm0, %v263_v48, %v376_v19  ;;  %v428_v38 = vsel %vm381_vm1, %v377_v20, %v378_v23  ;;  %v13_v6 = vld [vmem:[%s1236_s0 + $0x10] sm:$0xff] }
  0x21   :  { %v426_v36 = vsel %vm383_vm2, %v424_v57, %v425_v35  ;;  %v1239_v39 = vunpack.c.l.bf16 %v803_v0  ;;  %v1240_v41 = vperm.slane %v860_v24, 2  ;;  %v1241_v43 = vperm.slane %v860_v24, 4 }
  0x22   :  { %v429_v46 = vsel %vm383_vm2, %v427_v37, %v428_v38  ;;  %v1242_v45 = vunpack.c.h.bf16 %v803_v0  ;;  %v1243_v49 = vperm.slane %v860_v24, 6  ;;  %v1244_v48 = vperm.slane %v862_v25, 2 }
  0x23   :  { %v446_v40 = vmul.f32 %v384_v62, %v1239_v39  ;;  %v220_v42 = vperm.slane %v1240_v41, 0  ;;  %v221_v44 = vperm.slane %v1241_v43, 0  ;;  %v1245_v21 = vperm.slane %v862_v25, 4 }
  0x24   :  { %v447_v47 = vmul.f32 %v387_v34, %v1242_v45  ;;  %v222_v50 = vperm.slane %v1243_v49, 0  ;;  %v224_v51 = vperm.slane %v1244_v48, 0  ;;  %v1246_v5 = vperm.slane %v862_v25, 6 }
  0x25   :  { %v225_v22 = vperm.slane %v1245_v21, 0  ;;  %478 = vst [vmem:[#allocation1] ss:$4 sm:$0xff] %v446_v40  ;;  %v388_v8 = vsel %vm379_vm0, %v947_v13, %v337_v10  ;;  %v389_v17 = vsel %vm381_vm1, %v338_v11, %v339_v16  ;;  %v391_v0 = vsel %vm379_vm0, %v955_v58, %v340_v59 }
  0x26   :  { %v226_v9 = vperm.slane %v1246_v5, 0  ;;  %v392_v4 = vsel %vm381_vm1, %v341_v32, %v342_v33  ;;  %480 = vst [vmem:[#allocation1 + $0x20] ss:$4 sm:$0xff] %v447_v47  ;;  %v1247_v63 = vunpack.c.l.bf16 %v813_v2  ;;  %v1248_v60 = vunpack.c.h.bf16 %v813_v2 }
  0x27   :  { %v1249_v14 = vunpack.c.l.bf16 %v818_v3  ;;  %v1250_v13 = vunpack.c.h.bf16 %v818_v3  ;;  %v122_v58 = vperm.slane %v874_v31, 6  ;;  %v1251_v11 = vperm.slane %v860_v24, 0 }
  0x28   :  { %v1011_v61 = vmul.f32 %v420_v7, %v1247_v63  ;;  %v1015_v15 = vmul.f32 %v423_v54, %v1248_v60  ;;  %v1252_v52 = vperm.slane %v862_v25, 0  ;;  %v1253_v2 = vperm.slane %v864_v26, 0 }
  0x29   :  { %v1019_v12 = vmul.f32 %v426_v36, %v1249_v14  ;;  %v1023_v10 = vmul.f32 %v429_v46, %v1250_v13  ;;  %v219_v16 = vperm.slane %v1251_v11, 0  ;;  %v1254_v19 = vperm.slane %v864_v26, 2 }
  0x2a   :  { %v223_v18 = vperm.slane %v1252_v52, 0  ;;  %v1032_v59 = vperm.slane %v1253_v2, 0  ;;  %v1255_v3 = vperm.slane %v864_v26, 4  ;;  %v1256_v32 = vperm.slane %v864_v26, 6 }
  0x2b   :  { %v1036_v20 = vperm.slane %v1254_v19, 0  ;;  %v390_v24 = vsel %vm383_vm2, %v388_v8, %v389_v17  ;;  %v1257_v25 = vperm.slane %v866_v27, 0  ;;  %v343_v53 = vrot.slane %v220_v42, 6 }
  0x2c   :  { %v1040_v23 = vperm.slane %v1255_v3, 0  ;;  %v1044_v33 = vperm.slane %v1256_v32, 0  ;;  %v344_v34 = vrot.slane %v221_v44, 4  ;;  %v393_v55 = vsel %vm383_vm2, %v391_v0, %v392_v4  ;;  %v481_v36 = vld.sshfl [vmem:[#allocation1] sm:$0xff pattern:$0x73625140] }
  0x2d   :  { %v1049_v62 = vperm.slane %v1257_v25, 0  ;;  %v345_v56 = vrot.slane %v222_v50, 2  ;;  %v346_v7 = vrot.slane %v224_v51, 6  ;;  %v347_v54 = vrot.slane %v225_v22, 4 }
  0x2e   :  { %v348_v26 = vrot.slane %v226_v9, 2  ;;  %v1258_v57 = vunpack.c.l.bf16 %v808_v1  ;;  %v482_v37 = vld.sshfl [vmem:[#allocation1 + $0x8] sm:$0xff pattern:$0x73625140]  ;;  %v1259_v38 = vunpack.c.h.bf16 %v808_v1  ;;  %v23_v44 = vunpack.c.l.bf16 %v13_v6 }
  0x2f   :  { %v483_v40 = vld.sshfl [vmem:[#allocation1 + $0x10] sm:$0xff pattern:$0x73625140]  ;;  %v484_v41 = vld.sshfl [vmem:[#allocation1 + $0x18] sm:$0xff pattern:$0x73625140]  ;;  %v24_v46 = vunpack.c.h.bf16 %v13_v6  ;;  %v394_v5 = vsel %vm379_vm0, %v219_v16, %v343_v53  ;;  %v395_v9 = vsel %vm381_vm1, %v344_v34, %v345_v56  ;;  %v397_v4 = vsel %vm379_vm0, %v223_v18, %v346_v7 }
  0x30   :  { %v448_v35 = vmul.f32 %v390_v24, %v1258_v57  ;;  %v449_v39 = vmul.f32 %v393_v55, %v1259_v38  ;;  %v485_v42 = vld.sshfl [vmem:[#allocation1 + $0x20] sm:$0xff pattern:$0x73625140]  ;;  %v486_v43 = vld.sshfl [vmem:[#allocation1 + $0x28] sm:$0xff pattern:$0x73625140]  ;;  %v398_v63 = vsel %vm381_vm1, %v347_v54, %v348_v26  ;;  %v396_v32 = vsel %vm383_vm2, %v394_v5, %v395_v9 }
  0x31   :  { %v487_v45 = vld.sshfl [vmem:[#allocation1 + $0x30] sm:$0xff pattern:$0x73625140]  ;;  %v488_v47 = vld.sshfl [vmem:[#allocation1 + $0x38] sm:$0xff pattern:$0x73625140]  ;;  %v399_v34 = vsel %vm383_vm2, %v397_v4, %v398_v63  ;;  %v450_v54 = vmul.f32 %v396_v32, %v23_v44 }
  0x32   :  { %v1260_v49 = vperm.slane %v866_v27, 2  ;;  %489 = vst [vmem:[#allocation1] ss:$4 sm:$0xff] %v448_v35  ;;  %v623_v48 = vsel %vm379_vm0, %v481_v36, 0.0  ;;  %v624_v51 = vsel %vm379_vm0, %v482_v37, 0.0  ;;  %v626_v21 = vsel %vm379_vm0, %v483_v40, 0.0 }
  0x33   :  { %v1261_v1 = vperm.slane %v866_v27, 4  ;;  %490 = vst [vmem:[#allocation1 + $0x20] ss:$4 sm:$0xff] %v449_v39  ;;  %v625_v8 = vadd.f32 %v624_v51, %v623_v48  ;;  %v1262_v17 = vperm.slane %v866_v27, 6  ;;  %v628_v60 = vsel %vm379_vm0, %v484_v41, 0.0 }
  0x34   :  { %v232_v50 = vperm.slane %v1260_v49, 0  ;;  %v1263_v14 = vperm.slane %v868_v28, 0  ;;  %v1264_v11 = vperm.slane %v868_v28, 2  ;;  %v1265_v52 = vperm.slane %v868_v28, 4 }
  0x35   :  { %v233_v22 = vperm.slane %v1261_v1, 0  ;;  %v234_v0 = vperm.slane %v1262_v17, 0  ;;  %v627_v27 = vadd.f32 %v626_v21, %v625_v8  ;;  %v1266_v19 = vperm.slane %v868_v28, 6 }
  0x36   :  { %v1075_v13 = vperm.slane %v1263_v14, 0  ;;  %v1079_v16 = vperm.slane %v1264_v11, 0  ;;  %v1083_v2 = vperm.slane %v1265_v52, 0  ;;  %v349_v3 = vrot.slane %v1036_v20, 6  ;;  %v14_v20 = vld [vmem:[%s1236_s0 + $0x18] sm:$0xff] }
  0x37   :  { %v1087_v18 = vperm.slane %v1266_v19, 0  ;;  %v630_v24 = vsel %vm379_vm0, %v485_v42, 0.0  ;;  %v350_v25 = vrot.slane %v1040_v23, 4  ;;  %v351_v53 = vrot.slane %v1044_v33, 2 }
  0x38   :  { %v629_v55 = vadd.f32 %v628_v60, %v627_v27  ;;  %v352_v6 = vrot.slane %v232_v50, 6  ;;  %v353_v56 = vrot.slane %v233_v22, 4  ;;  %v354_v7 = vrot.slane %v234_v0, 2 }
  0x39   :  { %v632_v28 = vsel %vm379_vm0, %v486_v43, 0.0  ;;  %v491_v26 = vld.sshfl [vmem:[#allocation1] sm:$0xff pattern:$0x73625140]  ;;  %v634_v35 = vsel %vm379_vm0, %v487_v45, 0.0  ;;  %v636_v23 = vsel %vm379_vm0, %v488_v47, 0.0  ;;  %v451_v33 = vmul.f32 %v399_v34, %v24_v46 }
  0x3a   :  { %v631_v57 = vadd.f32 %v630_v24, %v629_v55  ;;  %v492_v36 = vld.sshfl [vmem:[#allocation1 + $0x8] sm:$0xff pattern:$0x73625140]  ;;  %v493_v37 = vld.sshfl [vmem:[#allocation1 + $0x10] sm:$0xff pattern:$0x73625140]  ;;  %v25_v43 = vunpack.c.l.bf16 %v14_v20  ;;  %v26_v49 = vunpack.c.h.bf16 %v14_v20  ;;  %v400_v46 = vsel %vm379_vm0, %v1032_v59, %v349_v3 }
  0x3b   :  { %v494_v38 = vld.sshfl [vmem:[#allocation1 + $0x18] sm:$0xff pattern:$0x73625140]  ;;  %v495_v39 = vld.sshfl [vmem:[#allocation1 + $0x20] sm:$0xff pattern:$0x73625140]  ;;  %v401_v21 = vsel %vm381_vm1, %v350_v25, %v351_v53  ;;  %v403_v9 = vsel %vm379_vm0, %v1049_v62, %v352_v6  ;;  %v404_v8 = vsel %vm381_vm1, %v353_v56, %v354_v7 }
  0x3c   :  { %v633_v40 = vadd.f32 %v632_v28, %v631_v57  ;;  %v496_v41 = vld.sshfl [vmem:[#allocation1 + $0x28] sm:$0xff pattern:$0x73625140]  ;;  %v497_v42 = vld.sshfl [vmem:[#allocation1 + $0x30] sm:$0xff pattern:$0x73625140]  ;;  %v405_v25 = vsel %vm383_vm2, %v403_v9, %v404_v8 }
  0x3d   :  { %v1267_v50 = vperm.slane %v870_v29, 0  ;;  %v1103_v44 = vld.sshfl [vmem:[#allocation1 + $0x38] sm:$0xff pattern:$0x73625140]  ;;  %499 = vst [vmem:[#allocation1] ss:$4 sm:$0xff] %v450_v54 }
  0x3e   :  { %v635_v51 = vadd.f32 %v634_v35, %v633_v40  ;;  %v1268_v45 = vperm.slane %v870_v29, 2  ;;  %500 = vst [vmem:[#allocation1 + $0x20] ss:$4 sm:$0xff] %v451_v33  ;;  %v638_v1 = vsel %vm379_vm0, %v491_v26, 0.0  ;;  %v1269_v22 = vperm.slane %v870_v29, 4 }
  0x3f   :  { %v239_v48 = vperm.slane %v1267_v50, 0  ;;  %v1270_v0 = vperm.slane %v870_v29, 6  ;;  %v1271_v63 = vperm.slane %v872_v30, 2  ;;  %v1272_v60 = vperm.slane %v872_v30, 4 }
  0x40   :  { %v240_v47 = vperm.slane %v1268_v45, 0  ;;  %v241_v5 = vperm.slane %v1269_v22, 0  ;;  %v637_v17 = vadd.f32 %v636_v23, %v635_v51  ;;  %v640_v11 = vsel %vm379_vm0, %v492_v36, 0.0  ;;  %v15_v23 = vld [vmem:[%s1236_s0 + $0x20] sm:$0xff] }
  0x41   :  { %v242_v4 = vperm.slane %v1270_v0, 0  ;;  %v1120_v59 = vperm.slane %v1271_v63, 0  ;;  %v1124_v14 = vperm.slane %v1272_v60, 0  ;;  %v1273_v52 = vperm.slane %v872_v30, 6 }
  0x42   :  { %v1274_v62 = vperm.slane %v874_v31, 2  ;;  %v402_v29 = vsel %vm383_vm2, %v400_v46, %v401_v21  ;;  %v639_v3 = vadd.f32 %v638_v1, %v637_v17  ;;  %v355_v32 = vrot.slane %v1079_v16, 6 }
  0x43   :  { %v1129_v27 = vperm.slane %v1273_v52, 0  ;;  %v356_v24 = vrot.slane %v1083_v2, 4  ;;  %v642_v53 = vsel %vm379_vm0, %v493_v37, 0.0  ;;  %v357_v34 = vrot.slane %v1087_v18, 2 }
  0x44   :  { %v1133_v19 = vperm.slane %v1274_v62, 0  ;;  %v358_v55 = vrot.slane %v240_v47, 6  ;;  %v359_v6 = vrot.slane %v241_v5, 4  ;;  %v641_v56 = vadd.f32 %v640_v11, %v639_v3  ;;  %v501_v57 = vld.sshfl [vmem:[#allocation1] sm:$0xff pattern:$0x73625140] }
  0x45   :  { %v360_v7 = vrot.slane %v242_v4, 2  ;;  %v452_v28 = vmul.f32 %v402_v29, %v25_v43  ;;  %v644_v20 = vsel %vm379_vm0, %v494_v38, 0.0  ;;  %v646_v54 = vsel %vm379_vm0, %v495_v39, 0.0  ;;  %v502_v16 = vld.sshfl [vmem:[#allocation1 + $0x8] sm:$0xff pattern:$0x73625140] }
  0x46   :  { %v453_v26 = vmul.f32 %v405_v25, %v26_v49  ;;  %v503_v35 = vld.sshfl [vmem:[#allocation1 + $0x10] sm:$0xff pattern:$0x73625140]  ;;  %v643_v2 = vadd.f32 %v642_v53, %v641_v56  ;;  %v504_v33 = vld.sshfl [vmem:[#allocation1 + $0x18] sm:$0xff pattern:$0x73625140]  ;;  %v406_v50 = vsel %vm379_vm0, %v1075_v13, %v355_v32  ;;  %v407_v51 = vsel %vm381_vm1, %v356_v24, %v357_v34 }
  0x47   :  { %v505_v18 = vld.sshfl [vmem:[#allocation1 + $0x20] sm:$0xff pattern:$0x73625140]  ;;  %v506_v36 = vld.sshfl [vmem:[#allocation1 + $0x28] sm:$0xff pattern:$0x73625140]  ;;  %v409_v46 = vsel %vm379_vm0, %v239_v48, %v358_v55  ;;  %v410_v21 = vsel %vm381_vm1, %v359_v6, %v360_v7  ;;  %v28_v22 = vunpack.c.h.bf16 %v15_v23  ;;  %v408_v4 = vsel %vm383_vm2, %v406_v50, %v407_v51 }
  0x48   :  { %v1146_v37 = vld.sshfl [vmem:[#allocation1 + $0x30] sm:$0xff pattern:$0x73625140]  ;;  %v645_v40 = vadd.f32 %v644_v20, %v643_v2  ;;  %v508_v43 = vld.sshfl [vmem:[#allocation1 + $0x38] sm:$0xff pattern:$0x73625140]  ;;  %v411_v63 = vsel %vm383_vm2, %v409_v46, %v410_v21 }
  0x49   :  { %509 = vst [vmem:[#allocation1] ss:$4 sm:$0xff] %v452_v28  ;;  %v648_v38 = vsel %vm379_vm0, %v496_v41, 0.0  ;;  %v1275_v39 = vperm.slane %v874_v31, 4  ;;  %v250_v47 = vperm.slane %v122_v58, 0  ;;  %v650_v1 = vsel %vm379_vm0, %v497_v42, 0.0 }
  0x4a   :  { %510 = vst [vmem:[#allocation1 + $0x20] ss:$4 sm:$0xff] %v453_v26  ;;  %v647_v45 = vadd.f32 %v646_v54, %v645_v40  ;;  %v27_v41 = vunpack.c.l.bf16 %v15_v23  ;;  %v1276_v5 = vperm.slane %v872_v30, 0  ;;  %v1277_v13 = vperm.slane %v874_v31, 0 }
  0x4b   :  { %v249_v49 = vperm.slane %v1275_v39, 0  ;;  %v361_v0 = vrot.slane %v1120_v59, 6  ;;  %v652_v58 = vsel %vm379_vm0, %v1103_v44, 0.0  ;;  %v362_v48 = vrot.slane %v1124_v14, 4 }
  0x4c   :  { %v243_v9 = vperm.slane %v1276_v5, 0  ;;  %v649_v8 = vadd.f32 %v648_v38, %v647_v45  ;;  %v247_v17 = vperm.slane %v1277_v13, 0  ;;  %v363_v42 = vrot.slane %v1129_v27, 2 }
  0x4d   :  { %v364_v30 = vrot.slane %v1133_v19, 6  ;;  %v365_v11 = vrot.slane %v249_v49, 4  ;;  %v366_v52 = vrot.slane %v250_v47, 2  ;;  %v654_v31 = vsel %vm379_vm0, %v501_v57, 0.0  ;;  %v16_v19 = vld [vmem:[%s1236_s0 + $0x28] sm:$0xff] }
  0x4e   :  { %v651_v60 = vadd.f32 %v650_v1, %v649_v8  ;;  %v454_v62 = vmul.f32 %v408_v4, %v27_v41  ;;  %v656_v29 = vsel %vm379_vm0, %v502_v16, 0.0  ;;  %v658_v3 = vsel %vm379_vm0, %v503_v35, 0.0 }
  0x4f   :  { %v455_v44 = vmul.f32 %v411_v63, %v28_v22  ;;  %v412_v7 = vsel %vm379_vm0, %v243_v9, %v361_v0  ;;  %v413_v28 = vsel %vm381_vm1, %v362_v48, %v363_v42  ;;  %v660_v20 = vsel %vm379_vm0, %v504_v33, 0.0 }
  0x50   :  { %v653_v59 = vadd.f32 %v652_v58, %v651_v60  ;;  %v511_v32 = vld.sshfl [vmem:[#allocation1] sm:$0xff pattern:$0x73625140]  ;;  %v512_v14 = vld.sshfl [vmem:[#allocation1 + $0x8] sm:$0xff pattern:$0x73625140]  ;;  %v415_v54 = vsel %vm379_vm0, %v247_v17, %v364_v30  ;;  %v416_v26 = vsel %vm381_vm1, %v365_v11, %v366_v52  ;;  %v29_v16 = vunpack.c.l.bf16 %v16_v19 }
  0x51   :  { %v513_v24 = vld.sshfl [vmem:[#allocation1 + $0x10] sm:$0xff pattern:$0x73625140]  ;;  %v514_v27 = vld.sshfl [vmem:[#allocation1 + $0x18] sm:$0xff pattern:$0x73625140]  ;;  %v30_v2 = vunpack.c.h.bf16 %v16_v19  ;;  %v414_v23 = vsel %vm383_vm2, %v412_v7, %v413_v28  ;;  %v417_v38 = vsel %vm383_vm2, %v415_v54, %v416_v26 }
  0x52   :  { %v515_v25 = vld.sshfl [vmem:[#allocation1 + $0x20] sm:$0xff pattern:$0x73625140]  ;;  %v655_v53 = vadd.f32 %v654_v31, %v653_v59  ;;  %v516_v34 = vld.sshfl [vmem:[#allocation1 + $0x28] sm:$0xff pattern:$0x73625140]  ;;  %v456_v50 = vmul.f32 %v414_v23, %v29_v16 }
  0x53   :  { %v517_v55 = vld.sshfl [vmem:[#allocation1 + $0x30] sm:$0xff pattern:$0x73625140]  ;;  %v518_v6 = vld.sshfl [vmem:[#allocation1 + $0x38] sm:$0xff pattern:$0x73625140]  ;;  %v457_v45 = vmul.f32 %v417_v38, %v30_v2 }
  0x54   :  { %519 = vst [vmem:[#allocation1] ss:$4 sm:$0xff] %v454_v62  ;;  %v657_v56 = vadd.f32 %v656_v29, %v655_v53  ;;  %v662_v35 = vsel %vm379_vm0, %v505_v18, 0.0  ;;  %v664_v39 = vsel %vm379_vm0, %v506_v36, 0.0  ;;  %v666_v33 = vsel %vm379_vm0, %v1146_v37, 0.0 }
  0x55   :  { %520 = vst [vmem:[#allocation1 + $0x20] ss:$4 sm:$0xff] %v455_v44  ;;  %v668_v51 = vsel %vm379_vm0, %v508_v43, 0.0  ;;  %v670_v36 = vsel %vm379_vm0, %v511_v32, 0.0  ;;  %v672_v37 = vsel %vm379_vm0, %v512_v14, 0.0  ;;  %v674_v43 = vsel %vm379_vm0, %v513_v24, 0.0 }
  0x56   :  { %v659_v57 = vadd.f32 %v658_v3, %v657_v56  ;;  %v676_v4 = vsel %vm379_vm0, %v514_v27, 0.0  ;;  %v678_v48 = vsel %vm379_vm0, %v515_v25, 0.0  ;;  %v680_v42 = vsel %vm379_vm0, %v516_v34, 0.0 }
  0x57   :  { %v682_v44 = vsel %vm379_vm0, %v517_v55, 0.0  ;;  %v684_v14 = vsel %vm379_vm0, %v518_v6, 0.0 }
  0x58   :  { %v661_v40 = vadd.f32 %v660_v20, %v659_v57 }
  0x5a   :  { %v663_v49 = vadd.f32 %v662_v35, %v661_v40 }
  0x5b   :  { %v521_v47 = vld.sshfl [vmem:[#allocation1] sm:$0xff pattern:$0x73625140]  ;;  %v522_v46 = vld.sshfl [vmem:[#allocation1 + $0x8] sm:$0xff pattern:$0x73625140] }
  0x5c   :  { %v523_v21 = vld.sshfl [vmem:[#allocation1 + $0x10] sm:$0xff pattern:$0x73625140]  ;;  %v665_v18 = vadd.f32 %v664_v39, %v663_v49  ;;  %v524_v1 = vld.sshfl [vmem:[#allocation1 + $0x18] sm:$0xff pattern:$0x73625140] }
  0x5d   :  { %v525_v41 = vld.sshfl [vmem:[#allocation1 + $0x20] sm:$0xff pattern:$0x73625140]  ;;  %v526_v22 = vld.sshfl [vmem:[#allocation1 + $0x28] sm:$0xff pattern:$0x73625140] }
  0x5e   :  { %v527_v5 = vld.sshfl [vmem:[#allocation1 + $0x30] sm:$0xff pattern:$0x73625140]  ;;  %v667_v9 = vadd.f32 %v666_v33, %v665_v18  ;;  %v528_v8 = vld.sshfl [vmem:[#allocation1 + $0x38] sm:$0xff pattern:$0x73625140] }
  0x5f   :  { %529 = vst [vmem:[#allocation1] ss:$4 sm:$0xff] %v456_v50  ;;  %v686_v27 = vsel %vm379_vm0, %v521_v47, 0.0  ;;  %v688_v53 = vsel %vm379_vm0, %v522_v46, 0.0  ;;  %v690_v34 = vsel %vm379_vm0, %v523_v21, 0.0  ;;  %v692_v6 = vsel %vm379_vm0, %v524_v1, 0.0 }
  0x60   :  { %530 = vst [vmem:[#allocation1 + $0x20] ss:$4 sm:$0xff] %v457_v45  ;;  %v669_v13 = vadd.f32 %v668_v51, %v667_v9  ;;  %v694_v16 = vsel %vm379_vm0, %v525_v41, 0.0  ;;  %v696_v2 = vsel %vm379_vm0, %v526_v22, 0.0  ;;  %v698_v40 = vsel %vm379_vm0, %v527_v5, 0.0 }
  0x61   :  { %v700_v39 = vsel %vm379_vm0, %v528_v8, 0.0 }
  0x62   :  { %v671_v17 = vadd.f32 %v670_v36, %v669_v13 }
  0x64   :  { %v673_v0 = vadd.f32 %v672_v37, %v671_v17 }
  0x66   :  { %v675_v58 = vadd.f32 %v674_v43, %v673_v0  ;;  %v531_v63 = vld.sshfl [vmem:[#allocation1] sm:$0xff pattern:$0x73625140]  ;;  %v532_v60 = vld.sshfl [vmem:[#allocation1 + $0x8] sm:$0xff pattern:$0x73625140] }
  0x67   :  { %v533_v30 = vld.sshfl [vmem:[#allocation1 + $0x10] sm:$0xff pattern:$0x73625140]  ;;  %v534_v11 = vld.sshfl [vmem:[#allocation1 + $0x18] sm:$0xff pattern:$0x73625140] }
  0x68   :  { %v535_v52 = vld.sshfl [vmem:[#allocation1 + $0x20] sm:$0xff pattern:$0x73625140]  ;;  %v677_v31 = vadd.f32 %v676_v4, %v675_v58  ;;  %v536_v62 = vld.sshfl [vmem:[#allocation1 + $0x28] sm:$0xff pattern:$0x73625140] }
  0x69   :  { %v537_v59 = vld.sshfl [vmem:[#allocation1 + $0x30] sm:$0xff pattern:$0x73625140]  ;;  %v538_v29 = vld.sshfl [vmem:[#allocation1 + $0x38] sm:$0xff pattern:$0x73625140] }
  0x6a   :  { %539 = vst [vmem:[#allocation1] ss:$4 sm:$0xff] %v1011_v61  ;;  %v679_v3 = vadd.f32 %v678_v48, %v677_v31  ;;  %v702_v50 = vsel %vm379_vm0, %v531_v63, 0.0  ;;  %v704_v33 = vsel %vm379_vm0, %v532_v60, 0.0  ;;  %v708_v47 = vsel %vm379_vm0, %v534_v11, 0.0 }
  0x6b   :  { %540 = vst [vmem:[#allocation1 + $0x20] ss:$4 sm:$0xff] %v1015_v15  ;;  %v710_v21 = vsel %vm379_vm0, %v535_v52, 0.0  ;;  %v712_v1 = vsel %vm379_vm0, %v536_v62, 0.0  ;;  %v714_v22 = vsel %vm379_vm0, %v537_v59, 0.0  ;;  %v716_v9 = vsel %vm379_vm0, %v538_v29, 0.0 }
  0x6c   :  { %v681_v32 = vadd.f32 %v680_v42, %v679_v3 }
  0x6e   :  { %v683_v24 = vadd.f32 %v682_v44, %v681_v32 }
  0x70   :  { %v685_v25 = vadd.f32 %v684_v14, %v683_v24 }
  0x71   :  { %v541_v19 = vld.sshfl [vmem:[#allocation1] sm:$0xff pattern:$0x73625140]  ;;  %v542_v56 = vld.sshfl [vmem:[#allocation1 + $0x8] sm:$0xff pattern:$0x73625140] }
  0x72   :  { %v543_v7 = vld.sshfl [vmem:[#allocation1 + $0x10] sm:$0xff pattern:$0x73625140]  ;;  %v687_v61 = vadd.f32 %v686_v27, %v685_v25  ;;  %v544_v28 = vld.sshfl [vmem:[#allocation1 + $0x18] sm:$0xff pattern:$0x73625140] }
  0x73   :  { %v545_v20 = vld.sshfl [vmem:[#allocation1 + $0x20] sm:$0xff pattern:$0x73625140]  ;;  %v546_v15 = vld.sshfl [vmem:[#allocation1 + $0x28] sm:$0xff pattern:$0x73625140] }
  0x74   :  { %v547_v54 = vld.sshfl [vmem:[#allocation1 + $0x30] sm:$0xff pattern:$0x73625140]  ;;  %v689_v55 = vadd.f32 %v688_v53, %v687_v61  ;;  %v548_v26 = vld.sshfl [vmem:[#allocation1 + $0x38] sm:$0xff pattern:$0x73625140] }
  0x75   :  { %549 = vst [vmem:[#allocation1] ss:$4 sm:$0xff] %v1019_v12  ;;  %v718_v36 = vsel %vm379_vm0, %v541_v19, 0.0  ;;  %v720_v37 = vsel %vm379_vm0, %v542_v56, 0.0  ;;  %v722_v43 = vsel %vm379_vm0, %v543_v7, 0.0  ;;  %v724_v4 = vsel %vm379_vm0, %v544_v28, 0.0 }
  0x76   :  { %550 = vst [vmem:[#allocation1 + $0x20] ss:$4 sm:$0xff] %v1023_v10  ;;  %v691_v57 = vadd.f32 %v690_v34, %v689_v55  ;;  %v706_v10 = vsel %vm379_vm0, %v533_v30, 0.0  ;;  %v726_v48 = vsel %vm379_vm0, %v545_v20, 0.0  ;;  %v728_v63 = vsel %vm379_vm0, %v546_v15, 0.0 }
  0x77   :  { %v730_v30 = vsel %vm379_vm0, %v547_v54, 0.0  ;;  %v732_v31 = vsel %vm379_vm0, %v548_v26, 0.0 }
  0x78   :  { %v693_v35 = vadd.f32 %v692_v6, %v691_v57 }
  0x7a   :  { %v695_v23 = vadd.f32 %v694_v16, %v693_v35 }
  0x7c   :  { %v697_v38 = vadd.f32 %v696_v2, %v695_v23  ;;  %v551_v11 = vld.sshfl [vmem:[#allocation1] sm:$0xff pattern:$0x73625140]  ;;  %v552_v62 = vld.sshfl [vmem:[#allocation1 + $0x8] sm:$0xff pattern:$0x73625140] }
  0x7d   :  { %v734_v29 = vsel %vm379_vm0, %v551_v11, 0.0  ;;  %v553_v3 = vld.sshfl [vmem:[#allocation1 + $0x10] sm:$0xff pattern:$0x73625140]  ;;  %v736_v32 = vsel %vm379_vm0, %v552_v62, 0.0 }
  0x7e   :  { %v699_v49 = vadd.f32 %v698_v40, %v697_v38  ;;  %v554_v14 = vld.sshfl [vmem:[#allocation1 + $0x18] sm:$0xff pattern:$0x73625140]  ;;  %v738_v27 = vsel %vm379_vm0, %v553_v3, 0.0 }
  0x7f   :  { %v555_v25 = vld.sshfl [vmem:[#allocation1 + $0x20] sm:$0xff pattern:$0x73625140]  ;;  %v740_v34 = vsel %vm379_vm0, %v554_v14, 0.0 }
  0x80   :  { %v701_v12 = vadd.f32 %v700_v39, %v699_v49  ;;  %v556_v19 = vld.sshfl [vmem:[#allocation1 + $0x28] sm:$0xff pattern:$0x73625140]  ;;  %v742_v7 = vsel %vm379_vm0, %v555_v25, 0.0 }
  0x81   :  { %v557_v61 = vld.sshfl [vmem:[#allocation1 + $0x30] sm:$0xff pattern:$0x73625140]  ;;  %v744_v20 = vsel %vm379_vm0, %v556_v19, 0.0 }
  0x82   :  { %v703_v51 = vadd.f32 %v702_v50, %v701_v12  ;;  %v558_v15 = vld.sshfl [vmem:[#allocation1 + $0x38] sm:$0xff pattern:$0x73625140]  ;;  %v746_v55 = vsel %vm379_vm0, %v557_v61, 0.0 }
  0x83   :  { %v748_v6 = vsel %vm379_vm0, %v558_v15, 0.0 }
  0x84   :  { %v705_v45 = vadd.f32 %v704_v33, %v703_v51 }
  0x86   :  { %v707_v46 = vadd.f32 %v706_v10, %v705_v45 }
  0x88   :  { %v709_v18 = vadd.f32 %v708_v47, %v707_v46 }
  0x8a   :  { %v711_v41 = vadd.f32 %v710_v21, %v709_v18 }
  0x8c   :  { %v713_v5 = vadd.f32 %v712_v1, %v711_v41 }
  0x8e   :  { %v715_v8 = vadd.f32 %v714_v22, %v713_v5 }
  0x90   :  { %v717_v13 = vadd.f32 %v716_v9, %v715_v8 }
  0x92   :  { %v719_v17 = vadd.f32 %v718_v36, %v717_v13 }
  0x94   :  { %v721_v0 = vadd.f32 %v720_v37, %v719_v17 }
  0x96   :  { %v723_v58 = vadd.f32 %v722_v43, %v721_v0 }
  0x98   :  { %v725_v42 = vadd.f32 %v724_v4, %v723_v58 }
  0x9a   :  { %v727_v60 = vadd.f32 %v726_v48, %v725_v42 }
  0x9c   :  { %v729_v52 = vadd.f32 %v728_v63, %v727_v60 }
  0x9e   :  { %v731_v59 = vadd.f32 %v730_v30, %v729_v52 }
  0xa0   :  { %v733_v44 = vadd.f32 %v732_v31, %v731_v59 }
  0xa2   :  { %v735_v24 = vadd.f32 %v734_v29, %v733_v44 }
  0xa4   :  { %v737_v53 = vadd.f32 %v736_v32, %v735_v24 }
  0xa6   :  { %v739_v56 = vadd.f32 %v738_v27, %v737_v53 }
  0xa8   :  { %v741_v28 = vadd.f32 %v740_v34, %v739_v56 }
  0xaa   :  { %v743_v54 = vadd.f32 %v742_v7, %v741_v28 }
  0xac   :  { %v745_v26 = vadd.f32 %v744_v20, %v743_v54 }
  0xae   :  { %v747_v57 = vadd.f32 %v746_v55, %v745_v26 }
  0xb0   :  { %v749_v16 = vadd.f32 %v748_v6, %v747_v57 }
  0xb2   :  { %750 = vadd.xlane.f32.xlu0 %v749_v16 }
 0x125   :  { %v751_v35 = vpop.xlane.xlu0 %750 }
 0x126   :  { %v752_v2 = vand.u32 2147483647, %v751_v35  ;;  %vm756_vm8 = vcmp.ge.f32.partialorder %v751_v35, 0.0 }
 0x128   :  { %v753_v23 = vsub.f32 0.0, %v752_v2 }
 0x12a   :  { %v754_v40 = vmul.f32 1.442695, %v753_v23 }
 0x12c   :  { %781 = vpow2.f32 %v754_v40 }
 0x132   :  { %v782_v38 = vpop.eup %781 }
 0x133   :  { %v757_v39 = vadd.f32 1.0, %v782_v38 }
 0x135   :  { %783 = vrcp.f32 %v757_v39  ;;  %v769_v33 = vand.u32 2147483648, %v757_v39  ;;  %v767_v10 = vand.u32 2147483647, %v757_v39  ;;  %vm763_vm4 = vweird.f32 %v757_v39 }
 0x137   :  { %v770_v47 = vor.u32 1.1754944e-38, %v769_v33  ;;  %vm768_vm6 = vcmp.eq.f32.partialorder %v767_v10, 8.507059e+37 }
 0x13b   :  { %v784_v49 = vpop.eup %783 }
 0x13c   :  { %v759_v50 = vmul.f32 %v784_v49, %v757_v39  ;;  %vm764_vm3 = vweird.f32 %v784_v49 }
 0x13d   :  { %vm765_vm5 = vmor %vm763_vm4, %vm764_vm3 }
 0x13e   :  { %v760_v12 = vsub.f32 1.0, %v759_v50 }
 0x140   :  { %v761_v51 = vmul.f32 %v784_v49, %v760_v12 }
 0x142   :  { %v762_v45 = vadd.f32 %v784_v49, %v761_v51 }
 0x144   :  { %v766_v46 = vsel %vm765_vm5, %v784_v49, %v762_v45 }
 0x145   :  { %v771_v21 = vsel %vm768_vm6, %v770_v47, %v766_v46 }
 0x146   :  { %v773_v18 = vmul.f32 %v782_v38, %v771_v21 }
 0x148   :  { %v774_v1 = vsel %vm756_vm8, %v771_v21, %v773_v18 }
 0x149   :  { %776 = vst.msk [vmem:[%s1238_s2] sm:$0x3] %vm775_vm7, %v774_v1 }

</bundles_post_ra>
